<compile_context>
chip_gen: v7x
topology: tpu7x:2x2x1
jax: 0.10.0
libtpu: 0.0.40
codegen_flags: <defaults>
</compile_context>

<pallas_src>
import jax
import jax.numpy as jnp
from jax import lax
from jax.experimental import pallas as pl
from jax.experimental.pallas import tpu as pltpu


GB = 128          # per-gate lane block (vreg-aligned gate slices)
GP = 3 * GB       # stacked gate width per direction [r|z|n]
HP = 128          # lane-padded hidden width


def bigru_kernel(x_ref,                       # (T*B, E)   time-major flattened embedded seq
                 wi_ref, bi_ref,              # (E, 2*GP), (1, 2*GP)   [fwd gates | bwd gates]
                 wh_ref, bh_ref,              # (HP, 2*GP), (1, 2*GP)  [wh_f | wh_b], rows H:HP = 0
                 wfc_f_ref, wfc_b_ref, bfc_ref,   # (HP, C), (HP, C), (1, C)  split/padded FC head
                 label_ref,                   # (B, C) one-hot labels
                 probs_ref, ht_ref, logits_ref, ce_ref,   # outputs
                 xi_scr):                     # (T*B, 2*GP) hoisted fused input projections
    B = label_ref.shape[0]
    T = x_ref.shape[0] // B
    H = ht_ref.shape[1] // 2
    GP2 = wi_ref.shape[1]          # 2*GP
    gp = GP2 // 2
    gb = gp // 3
    hp = wh_ref.shape[0]

    # ---- Hoisted fused input projection: one big matmul for BOTH directions. ----
    xi_scr[...] = (jnp.dot(x_ref[...], wi_ref[...], preferred_element_type=jnp.float32)
                   + bi_ref[...])

    wh = wh_ref[...]               # (HP, 2*GP)
    bh = bh_ref[...]               # (1, 2*GP)

    def gru_update(xi, gh, h):
        # PyTorch GRU cell, gate order [r, z, n], each gate in its own 128-lane block:
        #   r = sigmoid(W_ir x + b_ir + W_hr h + b_hr)
        #   z = sigmoid(W_iz x + b_iz + W_hz h + b_hz)
        #   n = tanh  (W_in x + b_in + r * (W_hn h + b_hn))
        #   h' = (1 - z) * n + z * h
        # Computed on full 128-lane blocks; padded lanes stay exactly 0.
        r = jax.nn.sigmoid(xi[:, 0:gb] + gh[:, 0:gb])
        z = jax.nn.sigmoid(xi[:, gb:2 * gb] + gh[:, gb:2 * gb])
        n = jnp.tanh(xi[:, 2 * gb:3 * gb] + r * gh[:, 2 * gb:3 * gb])
        return (1.0 - z) * n + z * h

    def step(t, h):
        # h: (2B, HP) — rows 0:B fwd state, rows B:2B bwd state, lanes H:HP == 0.
        row_f = pl.multiple_of(t * B, B)
        row_b = pl.multiple_of((T - 1 - t) * B, B)
        # One fused hidden matmul per step (single MXU push->pop round trip).
        # Cross fwd/bwd output blocks are computed-and-discarded — cheaper than a
        # second serial matmul on the recurrence critical path.
        gh = jnp.dot(h, wh, preferred_element_type=jnp.float32) + bh        # (2B, 2*GP)
        xi_f = xi_scr[pl.ds(row_f, B), :][:, 0:gp]                          # whole-vreg lane slice
        xi_b = xi_scr[pl.ds(row_b, B), :][:, gp:GP2]
        hf = gru_update(xi_f, gh[0:B, 0:gp], h[0:B, :])
        hb = gru_update(xi_b, gh[B:2 * B, gp:GP2], h[B:2 * B, :])
        return jnp.concatenate([hf, hb], axis=0)                            # sublane-aligned concat

    h0 = jnp.zeros((2 * B, hp), jnp.float32)
    # Full unroll only at small T (concrete offsets, max LLO visibility); cap at larger
    # T to bound instruction memory and vreg live ranges.
    unroll = True if T <= 32 else 8
    h = lax.fori_loop(0, T, step, h0, unroll=unroll)

    hf = h[0:B, :]
    hb = h[B:2 * B, :]

    # ht = [h_fwd | h_bwd] — two slab stores (one-time, outside the recurrence).
    ht_ref[:, 0:H] = hf[:, 0:H]
    ht_ref[:, H:2 * H] = hb[:, 0:H]

    # logits = ht @ W_fc + b_fc, with W_fc split into padded fwd/bwd halves.
    logits = (jnp.dot(hf, wfc_f_ref[...], preferred_element_type=jnp.float32)
              + jnp.dot(hb, wfc_b_ref[...], preferred_element_type=jnp.float32)
              + bfc_ref[...])
    logits_ref[...] = logits

    # probs = softmax(logits, dim=1); reciprocal on the EUP slot.
    m = jnp.max(logits, axis=1, keepdims=True)
    e = jnp.exp(logits - m)
    s = jnp.sum(e, axis=1, keepdims=True)
    probs_ref[...] = e * pl.reciprocal(s, approx=True)

    # ce = sum(label * (logsumexp(logits) - logits)) == sum(-log(softmax(logits)) * label)
    lse = m + jnp.log(s)
    ce_ref[0, 0] = jnp.sum(label_ref[...] * (lse - logits))


def bilstm_forward(seq_ids, label, params):
    """Returns (probs, ht, logits, ce_loss) — the 'test' outputs plus the 'ind_pre' CE loss."""
    emb = params["embedding"]                                # (V, E)
    # TODO(synk): at large vocab/T/B, fuse this gather into the kernel via scalar prefetch.
    x = jnp.take(emb, seq_ids, axis=0).astype(jnp.float32)   # (B, T, E) embedding lookup (glue)
    B, T, E = x.shape
    x = jnp.transpose(x, (1, 0, 2)).reshape(T * B, E)        # time-major, flattened for one matmul

    H = params["wh_f"].shape[1]
    C = params["wfc"].shape[1]
    assert H <= HP and B % 8 == 0

    def pack_wi(w3):
        """(3, E, H) gate order [r,z,n] -> (E, GP): gate g at lanes [g*GB, g*GB+H), rest 0."""
        out = jnp.zeros((E, GP), jnp.float32)
        for g in range(3):
            out = out.at[:, g * GB:g * GB + H].set(w3[g])
        return out

    def pack_wh(w3):
        """(3, H, H) -> (HP, GP): per-gate 128-lane blocks, rows H:HP zero."""
        out = jnp.zeros((HP, GP), jnp.float32)
        for g in range(3):
            out = out.at[0:H, g * GB:g * GB + H].set(w3[g])
        return out

    def pack_b(b3):
        """(3, 1, H) -> (1, GP)."""
        out = jnp.zeros((1, GP), jnp.float32)
        for g in range(3):
            out = out.at[:, g * GB:g * GB + H].set(b3[g])
        return out

    # Fused input-projection weights/biases: [fwd | bwd] along lanes.
    wi = jnp.concatenate([pack_wi(params["wi_f"]), pack_wi(params["wi_b"])], axis=1)   # (E, 2*GP)
    bi = jnp.concatenate([pack_b(params["bi_f"]), pack_b(params["bi_b"])], axis=1)     # (1, 2*GP)
    # Fused hidden weights: one (HP, 2*GP) RHS shared by the stacked (2B, HP) carry.
    wh = jnp.concatenate([pack_wh(params["wh_f"]), pack_wh(params["wh_b"])], axis=1)   # (HP, 2*GP)
    bh = jnp.concatenate([pack_b(params["bh_f"]), pack_b(params["bh_b"])], axis=1)     # (1, 2*GP)
    # FC head lifted onto the padded hidden layout (rows H:HP zero).
    wfc_f = jnp.pad(params["wfc"][:H], ((0, HP - H), (0, 0)))                           # (HP, C)
    wfc_b = jnp.pad(params["wfc"][H:], ((0, HP - H), (0, 0)))                           # (HP, C)

    vmem = pl.BlockSpec(memory_space=pltpu.MemorySpace.VMEM)
    smem = pl.BlockSpec(memory_space=pltpu.MemorySpace.SMEM)

    out_shape = (
        jax.ShapeDtypeStruct((B, C), jnp.float32),        # probs
        jax.ShapeDtypeStruct((B, 2 * H), jnp.float32),    # ht
        jax.ShapeDtypeStruct((B, C), jnp.float32),        # logits
        jax.ShapeDtypeStruct((1, 1), jnp.float32),        # ce_loss
    )

    return pl.pallas_call(
        bigru_kernel,
        out_shape=out_shape,
        in_specs=[vmem] * 9,
        out_specs=(vmem, vmem, vmem, smem),
        scratch_shapes=[
            pltpu.VMEM((T * B, 2 * GP), jnp.float32),     # fused hoisted input projections
        ],
        compiler_params=pltpu.CompilerParams(vmem_limit_bytes=32 * 1024 * 1024),
    )(x, wi, bi, wh, bh, wfc_f, wfc_b, params["bfc"], label.astype(jnp.float32))


def reference_forward(seq_ids, label, params):
    """Pure-JAX reference matching the PyTorch forward (eval-mode dropout)."""
    x = jnp.take(params["embedding"], seq_ids, axis=0).astype(jnp.float32)  # (B, T, E)
    x = jnp.transpose(x, (1, 0, 2))                                          # (T, B, E)
    T, B, _ = x.shape
    H = params["wh_f"].shape[1]

    def cell(x_t, h, wi, wh, bi, bh):
        r = jax.nn.sigmoid(x_t @ wi[0] + bi[0] + h @ wh[0] + bh[0])
        z = jax.nn.sigmoid(x_t @ wi[1] + bi[1] + h @ wh[1] + bh[1])
        n = jnp.tanh(x_t @ wi[2] + bi[2] + r * (h @ wh[2] + bh[2]))
        return (1.0 - z) * n + z * h

    hf = jnp.zeros((B, H), jnp.float32)
    for t in range(T):
        hf = cell(x[t], hf, params["wi_f"], params["wh_f"], params["bi_f"], params["bh_f"])
    hb = jnp.zeros((B, H), jnp.float32)
    for t in range(T - 1, -1, -1):
        hb = cell(x[t], hb, params["wi_b"], params["wh_b"], params["bi_b"], params["bh_b"])

    ht = jnp.concatenate([hf, hb], axis=1)
    logits = ht @ params["wfc"] + params["bfc"]
    probs = jax.nn.softmax(logits, axis=1)
    ce = jnp.sum(-jnp.log(probs) * label.astype(jnp.float32))
    return probs, ht, logits, ce


def init_params(key, vocab, embed_dim, hidden_dim, n_class):
    ks = jax.random.split(key, 12)
    std = 1.0 / jnp.sqrt(jnp.float32(hidden_dim))

    def u(k, shape):
        return jax.random.uniform(k, shape, jnp.float32, minval=-std, maxval=std)

    return {
        "embedding": 0.1 * jax.random.normal(ks[0], (vocab, embed_dim), jnp.float32),
        # forward GRU (gate order r, z, n)
        "wi_f": u(ks[1], (3, embed_dim, hidden_dim)),
        "wh_f": u(ks[2], (3, hidden_dim, hidden_dim)),
        "bi_f": u(ks[3], (3, 1, hidden_dim)),
        "bh_f": u(ks[4], (3, 1, hidden_dim)),
        # backward GRU
        "wi_b": u(ks[5], (3, embed_dim, hidden_dim)),
        "wh_b": u(ks[6], (3, hidden_dim, hidden_dim)),
        "bi_b": u(ks[7], (3, 1, hidden_dim)),
        "bh_b": u(ks[8], (3, 1, hidden_dim)),
        # fc: Linear(2H -> n_class)
        "wfc": u(ks[9], (2 * hidden_dim, n_class)),
        "bfc": u(ks[10], (1, n_class)),
    }


if __name__ == "__main__":
    VOCAB, EMBED_DIM = 50, 32
    BATCH, SEQ_LEN = 8, 16
    HIDDEN_DIM, N_CLASS = 32, 8      # HIDDEN_DIM, n_class_seen; NUM_LAYERS = 1

    key = jax.random.PRNGKey(0)
    k_param, k_seq, k_lab = jax.random.split(key, 3)

    params = init_params(k_param, VOCAB, EMBED_DIM, HIDDEN_DIM, N_CLASS)
    seq = jax.random.randint(k_seq, (BATCH, SEQ_LEN), 0, VOCAB, dtype=jnp.int32)
    label = jax.nn.one_hot(
        jax.random.randint(k_lab, (BATCH,), 0, N_CLASS), N_CLASS, dtype=jnp.float32)

    probs, ht, logits, ce = jax.block_until_ready(bilstm_forward(seq, label, params))

    # correctness check vs pure-JAX reference
    probs_r, ht_r, logits_r, ce_r = reference_forward(seq, label, params)
    assert jnp.allclose(probs, probs_r, atol=2e-3, rtol=2e-3)
    assert jnp.allclose(ht, ht_r, atol=2e-3, rtol=2e-3)
    assert jnp.allclose(logits, logits_r, atol=2e-3, rtol=2e-3)
    assert jnp.allclose(ce[0, 0], ce_r, atol=2e-2, rtol=2e-3)

    print("KERNEL_OK")
</pallas_src>

<mosaic_0001>
module attributes {stable_mosaic.version = 11 : i64} {
  func.func @bigru_kernel(%arg0: memref<128x32xf32, #tpu.memory_space<vmem>>, %arg1: memref<32x768xf32, #tpu.memory_space<vmem>>, %arg2: memref<1x768xf32, #tpu.memory_space<vmem>>, %arg3: memref<128x768xf32, #tpu.memory_space<vmem>>, %arg4: memref<1x768xf32, #tpu.memory_space<vmem>>, %arg5: memref<128x8xf32, #tpu.memory_space<vmem>>, %arg6: memref<128x8xf32, #tpu.memory_space<vmem>>, %arg7: memref<1x8xf32, #tpu.memory_space<vmem>>, %arg8: memref<8x8xf32, #tpu.memory_space<vmem>>, %arg9: memref<8x8xf32, #tpu.memory_space<vmem>>, %arg10: memref<8x64xf32, #tpu.memory_space<vmem>>, %arg11: memref<8x8xf32, #tpu.memory_space<vmem>>, %arg12: memref<1x1xf32, #tpu.memory_space<smem>>, %arg13: memref<128x768xf32, #tpu.memory_space<vmem>>) attributes {dimension_semantics = [], scalar_prefetch = 0 : i64, scratch_operands = 1 : i64, tpu.core_type = #tpu.core_type<tc>} {
    %c0 = arith.constant 0 : index
    %c0_0 = arith.constant 0 : index
    %0 = vector.load %arg0[%c0, %c0_0] : memref<128x32xf32, #tpu.memory_space<vmem>>, vector<128x32xf32>
    %c0_1 = arith.constant 0 : index
    %c0_2 = arith.constant 0 : index
    %1 = vector.load %arg1[%c0_1, %c0_2] : memref<32x768xf32, #tpu.memory_space<vmem>>, vector<32x768xf32>
    %cst = arith.constant dense<0.000000e+00> : vector<128x768xf32>
    %2 = tpu.matmul %0, %1, %cst {dimension_numbers = #tpu.dot_dimension_numbers<[1], [0], [0], [1], [0, 0, 1, 1], [], []>} : vector<128x32xf32>, vector<32x768xf32>, vector<128x768xf32> -> vector<128x768xf32>
    %c0_3 = arith.constant 0 : index
    %c0_4 = arith.constant 0 : index
    %3 = vector.load %arg2[%c0_3, %c0_4] : memref<1x768xf32, #tpu.memory_space<vmem>>, vector<1x768xf32>
    %4 = vector.broadcast %3 : vector<1x768xf32> to vector<128x768xf32>
    %5 = arith.addf %2, %4 : vector<128x768xf32>
    %c0_5 = arith.constant 0 : index
    %c0_6 = arith.constant 0 : index
    %6 = vector.load %arg13[%c0_5, %c0_6] : memref<128x768xf32, #tpu.memory_space<vmem>>, vector<128x768xf32>
    tpu.vector_store %arg13[%c0_5, %c0_6], %5 {strides = array<i32>} : memref<128x768xf32, #tpu.memory_space<vmem>>, vector<128x768xf32>,
    %c0_7 = arith.constant 0 : index
    %c0_8 = arith.constant 0 : index
    %7 = vector.load %arg3[%c0_7, %c0_8] : memref<128x768xf32, #tpu.memory_space<vmem>>, vector<128x768xf32>
    %c0_9 = arith.constant 0 : index
    %c0_10 = arith.constant 0 : index
    %8 = vector.load %arg4[%c0_9, %c0_10] : memref<1x768xf32, #tpu.memory_space<vmem>>, vector<1x768xf32>
    %cst_11 = arith.constant 0.000000e+00 : f32
    %9 = vector.broadcast %cst_11 : f32 to vector<16x128xf32>
    %c0_i32 = arith.constant 0 : i32
    %c8_i32 = arith.constant 8 : i32
    %10 = arith.muli %c0_i32, %c8_i32 : i32
    %11 = tpu.assume_multiple %10, 8 : i32
    %c15_i32 = arith.constant 15 : i32
    %12 = arith.subi %c15_i32, %c0_i32 : i32
    %c8_i32_12 = arith.constant 8 : i32
    %13 = arith.muli %12, %c8_i32_12 : i32
    %14 = tpu.assume_multiple %13, 8 : i32
    %cst_13 = arith.constant dense<0.000000e+00> : vector<16x768xf32>
    %15 = tpu.matmul %9, %7, %cst_13 {dimension_numbers = #tpu.dot_dimension_numbers<[1], [0], [0], [1], [0, 0, 1, 1], [], []>} : vector<16x128xf32>, vector<128x768xf32>, vector<16x768xf32> -> vector<16x768xf32>
    %16 = vector.broadcast %8 : vector<1x768xf32> to vector<16x768xf32>
    %17 = arith.addf %15, %16 : vector<16x768xf32>
    %18 = arith.index_cast %11 : i32 to index
    %c0_14 = arith.constant 0 : index
    %19 = vector.load %arg13[%18, %c0_14] : memref<128x768xf32, #tpu.memory_space<vmem>>, vector<8x768xf32>
    %20 = vector.extract_strided_slice %19 {offsets = [0, 0], sizes = [8, 384], strides = [1, 1]} : vector<8x768xf32> to vector<8x384xf32>
    %21 = arith.index_cast %14 : i32 to index
    %c0_15 = arith.constant 0 : index
    %22 = vector.load %arg13[%21, %c0_15] : memref<128x768xf32, #tpu.memory_space<vmem>>, vector<8x768xf32>
    %23 = vector.extract_strided_slice %22 {offsets = [0, 384], sizes = [8, 384], strides = [1, 1]} : vector<8x768xf32> to vector<8x384xf32>
    %24 = vector.extract_strided_slice %17 {offsets = [0, 0], sizes = [8, 384], strides = [1, 1]} : vector<16x768xf32> to vector<8x384xf32>
    %25 = vector.extract_strided_slice %9 {offsets = [0, 0], sizes = [8, 128], strides = [1, 1]} : vector<16x128xf32> to vector<8x128xf32>
    %26 = vector.extract_strided_slice %20 {offsets = [0, 0], sizes = [8, 128], strides = [1, 1]} : vector<8x384xf32> to vector<8x128xf32>
    %27 = vector.extract_strided_slice %24 {offsets = [0, 0], sizes = [8, 128], strides = [1, 1]} : vector<8x384xf32> to vector<8x128xf32>
    %28 = arith.addf %26, %27 : vector<8x128xf32>
    %29 = arith.negf %28 : vector<8x128xf32>
    %30 = math.exp %29 : vector<8x128xf32>
    %cst_16 = arith.constant 1.000000e+00 : f32
    %31 = vector.broadcast %cst_16 : f32 to vector<8x128xf32>
    %32 = arith.addf %31, %30 : vector<8x128xf32>
    %33 = arith.divf %31, %32 : vector<8x128xf32>
    %34 = vector.extract_strided_slice %20 {offsets = [0, 128], sizes = [8, 128], strides = [1, 1]} : vector<8x384xf32> to vector<8x128xf32>
    %35 = vector.extract_strided_slice %24 {offsets = [0, 128], sizes = [8, 128], strides = [1, 1]} : vector<8x384xf32> to vector<8x128xf32>
    %36 = arith.addf %34, %35 : vector<8x128xf32>
    %37 = arith.negf %36 : vector<8x128xf32>
    %38 = math.exp %37 : vector<8x128xf32>
    %cst_17 = arith.constant 1.000000e+00 : f32
    %39 = vector.broadcast %cst_17 : f32 to vector<8x128xf32>
    %40 = arith.addf %39, %38 : vector<8x128xf32>
    %41 = arith.divf %39, %40 : vector<8x128xf32>
    %42 = vector.extract_strided_slice %20 {offsets = [0, 256], sizes = [8, 128], strides = [1, 1]} : vector<8x384xf32> to vector<8x128xf32>
    %43 = vector.extract_strided_slice %24 {offsets = [0, 256], sizes = [8, 128], strides = [1, 1]} : vector<8x384xf32> to vector<8x128xf32>
    %44 = arith.mulf %33, %43 : vector<8x128xf32>
    %45 = arith.addf %42, %44 : vector<8x128xf32>
    %46 = math.tanh %45 : vector<8x128xf32>
    %cst_18 = arith.constant 1.000000e+00 : f32
    %47 = vector.broadcast %cst_18 : f32 to vector<8x128xf32>
    %48 = arith.subf %47, %41 : vector<8x128xf32>
    %49 = arith.mulf %48, %46 : vector<8x128xf32>
    %50 = arith.mulf %41, %25 : vector<8x128xf32>
    %51 = arith.addf %49, %50 : vector<8x128xf32>
    %52 = vector.extract_strided_slice %17 {offsets = [8, 384], sizes = [8, 384], strides = [1, 1]} : vector<16x768xf32> to vector<8x384xf32>
    %53 = vector.extract_strided_slice %9 {offsets = [8, 0], sizes = [8, 128], strides = [1, 1]} : vector<16x128xf32> to vector<8x128xf32>
    %54 = vector.extract_strided_slice %23 {offsets = [0, 0], sizes = [8, 128], strides = [1, 1]} : vector<8x384xf32> to vector<8x128xf32>
    %55 = vector.extract_strided_slice %52 {offsets = [0, 0], sizes = [8, 128], strides = [1, 1]} : vector<8x384xf32> to vector<8x128xf32>
    %56 = arith.addf %54, %55 : vector<8x128xf32>
    %57 = arith.negf %56 : vector<8x128xf32>
    %58 = math.exp %57 : vector<8x128xf32>
    %cst_19 = arith.constant 1.000000e+00 : f32
    %59 = vector.broadcast %cst_19 : f32 to vector<8x128xf32>
    %60 = arith.addf %59, %58 : vector<8x128xf32>
    %61 = arith.divf %59, %60 : vector<8x128xf32>
    %62 = vector.extract_strided_slice %23 {offsets = [0, 128], sizes = [8, 128], strides = [1, 1]} : vector<8x384xf32> to vector<8x128xf32>
    %63 = vector.extract_strided_slice %52 {offsets = [0, 128], sizes = [8, 128], strides = [1, 1]} : vector<8x384xf32> to vector<8x128xf32>
    %64 = arith.addf %62, %63 : vector<8x128xf32>
    %65 = arith.negf %64 : vector<8x128xf32>
    %66 = math.exp %65 : vector<8x128xf32>
    %cst_20 = arith.constant 1.000000e+00 : f32
    %67 = vector.broadcast %cst_20 : f32 to vector<8x128xf32>
    %68 = arith.addf %67, %66 : vector<8x128xf32>
    %69 = arith.divf %67, %68 : vector<8x128xf32>
    %70 = vector.extract_strided_slice %23 {offsets = [0, 256], sizes = [8, 128], strides = [1, 1]} : vector<8x384xf32> to vector<8x128xf32>
    %71 = vector.extract_strided_slice %52 {offsets = [0, 256], sizes = [8, 128], strides = [1, 1]} : vector<8x384xf32> to vector<8x128xf32>
    %72 = arith.mulf %61, %71 : vector<8x128xf32>
    %73 = arith.addf %70, %72 : vector<8x128xf32>
    %74 = math.tanh %73 : vector<8x128xf32>
    %cst_21 = arith.constant 1.000000e+00 : f32
    %75 = vector.broadcast %cst_21 : f32 to vector<8x128xf32>
    %76 = arith.subf %75, %69 : vector<8x128xf32>
    %77 = arith.mulf %76, %74 : vector<8x128xf32>
    %78 = arith.mulf %69, %53 : vector<8x128xf32>
    %79 = arith.addf %77, %78 : vector<8x128xf32>
    %80 = tpu.concatenate %51, %79 in 0 : vector<8x128xf32>, vector<8x128xf32> -> vector<16x128xf32>
    %c1_i32 = arith.constant 1 : i32
    %c8_i32_22 = arith.constant 8 : i32
    %81 = arith.muli %c1_i32, %c8_i32_22 : i32
    %82 = tpu.assume_multiple %81, 8 : i32
    %c15_i32_23 = arith.constant 15 : i32
    %83 = arith.subi %c15_i32_23, %c1_i32 : i32
    %c8_i32_24 = arith.constant 8 : i32
    %84 = arith.muli %83, %c8_i32_24 : i32
    %85 = tpu.assume_multiple %84, 8 : i32
    %cst_25 = arith.constant dense<0.000000e+00> : vector<16x768xf32>
    %86 = tpu.matmul %80, %7, %cst_25 {dimension_numbers = #tpu.dot_dimension_numbers<[1], [0], [0], [1], [0, 0, 1, 1], [], []>} : vector<16x128xf32>, vector<128x768xf32>, vector<16x768xf32> -> vector<16x768xf32>
    %87 = vector.broadcast %8 : vector<1x768xf32> to vector<16x768xf32>
    %88 = arith.addf %86, %87 : vector<16x768xf32>
    %89 = arith.index_cast %82 : i32 to index
    %c0_26 = arith.constant 0 : index
    %90 = vector.load %arg13[%89, %c0_26] : memref<128x768xf32, #tpu.memory_space<vmem>>, vector<8x768xf32>
    %91 = vector.extract_strided_slice %90 {offsets = [0, 0], sizes = [8, 384], strides = [1, 1]} : vector<8x768xf32> to vector<8x384xf32>
    %92 = arith.index_cast %85 : i32 to index
    %c0_27 = arith.constant 0 : index
    %93 = vector.load %arg13[%92, %c0_27] : memref<128x768xf32, #tpu.memory_space<vmem>>, vector<8x768xf32>
    %94 = vector.extract_strided_slice %93 {offsets = [0, 384], sizes = [8, 384], strides = [1, 1]} : vector<8x768xf32> to vector<8x384xf32>
    %95 = vector.extract_strided_slice %88 {offsets = [0, 0], sizes = [8, 384], strides = [1, 1]} : vector<16x768xf32> to vector<8x384xf32>
    %96 = vector.extract_strided_slice %80 {offsets = [0, 0], sizes = [8, 128], strides = [1, 1]} : vector<16x128xf32> to vector<8x128xf32>
    %97 = vector.extract_strided_slice %91 {offsets = [0, 0], sizes = [8, 128], strides = [1, 1]} : vector<8x384xf32> to vector<8x128xf32>
    %98 = vector.extract_strided_slice %95 {offsets = [0, 0], sizes = [8, 128], strides = [1, 1]} : vector<8x384xf32> to vector<8x128xf32>
    %99 = arith.addf %97, %98 : vector<8x128xf32>
    %100 = arith.negf %99 : vector<8x128xf32>
    %101 = math.exp %100 : vector<8x128xf32>
    %cst_28 = arith.constant 1.000000e+00 : f32
    %102 = vector.broadcast %cst_28 : f32 to vector<8x128xf32>
    %103 = arith.addf %102, %101 : vector<8x128xf32>
    %104 = arith.divf %102, %103 : vector<8x128xf32>
    %105 = vector.extract_strided_slice %91 {offsets = [0, 128], sizes = [8, 128], strides = [1, 1]} : vector<8x384xf32> to vector<8x128xf32>
    %106 = vector.extract_strided_slice %95 {offsets = [0, 128], sizes = [8, 128], strides = [1, 1]} : vector<8x384xf32> to vector<8x128xf32>
    %107 = arith.addf %105, %106 : vector<8x128xf32>
    %108 = arith.negf %107 : vector<8x128xf32>
    %109 = math.exp %108 : vector<8x128xf32>
    %cst_29 = arith.constant 1.000000e+00 : f32
    %110 = vector.broadcast %cst_29 : f32 to vector<8x128xf32>
    %111 = arith.addf %110, %109 : vector<8x128xf32>
    %112 = arith.divf %110, %111 : vector<8x128xf32>
    %113 = vector.extract_strided_slice %91 {offsets = [0, 256], sizes = [8, 128], strides = [1, 1]} : vector<8x384xf32> to vector<8x128xf32>
    %114 = vector.extract_strided_slice %95 {offsets = [0, 256], sizes = [8, 128], strides = [1, 1]} : vector<8x384xf32> to vector<8x128xf32>
    %115 = arith.mulf %104, %114 : vector<8x128xf32>
    %116 = arith.addf %113, %115 : vector<8x128xf32>
    %117 = math.tanh %116 : vector<8x128xf32>
    %cst_30 = arith.constant 1.000000e+00 : f32
    %118 = vector.broadcast %cst_30 : f32 to vector<8x128xf32>
    %119 = arith.subf %118, %112 : vector<8x128xf32>
    %120 = arith.mulf %119, %117 : vector<8x128xf32>
    %121 = arith.mulf %112, %96 : vector<8x128xf32>
    %122 = arith.addf %120, %121 : vector<8x128xf32>
    %123 = vector.extract_strided_slice %88 {offsets = [8, 384], sizes = [8, 384], strides = [1, 1]} : vector<16x768xf32> to vector<8x384xf32>
    %124 = vector.extract_strided_slice %80 {offsets = [8, 0], sizes = [8, 128], strides = [1, 1]} : vector<16x128xf32> to vector<8x128xf32>
    %125 = vector.extract_strided_slice %94 {offsets = [0, 0], sizes = [8, 128], strides = [1, 1]} : vector<8x384xf32> to vector<8x128xf32>
    %126 = vector.extract_strided_slice %123 {offsets = [0, 0], sizes = [8, 128], strides = [1, 1]} : vector<8x384xf32> to vector<8x128xf32>
    %127 = arith.addf %125, %126 : vector<8x128xf32>
    %128 = arith.negf %127 : vector<8x128xf32>
    %129 = math.exp %128 : vector<8x128xf32>
    %cst_31 = arith.constant 1.000000e+00 : f32
    %130 = vector.broadcast %cst_31 : f32 to vector<8x128xf32>
    %131 = arith.addf %130, %129 : vector<8x128xf32>
    %132 = arith.divf %130, %131 : vector<8x128xf32>
    %133 = vector.extract_strided_slice %94 {offsets = [0, 128], sizes = [8, 128], strides = [1, 1]} : vector<8x384xf32> to vector<8x128xf32>
    %134 = vector.extract_strided_slice %123 {offsets = [0, 128], sizes = [8, 128], strides = [1, 1]} : vector<8x384xf32> to vector<8x128xf32>
    %135 = arith.addf %133, %134 : vector<8x128xf32>
    %136 = arith.negf %135 : vector<8x128xf32>
    %137 = math.exp %136 : vector<8x128xf32>
    %cst_32 = arith.constant 1.000000e+00 : f32
    %138 = vector.broadcast %cst_32 : f32 to vector<8x128xf32>
    %139 = arith.addf %138, %137 : vector<8x128xf32>
    %140 = arith.divf %138, %139 : vector<8x128xf32>
    %141 = vector.extract_strided_slice %94 {offsets = [0, 256], sizes = [8, 128], strides = [1, 1]} : vector<8x384xf32> to vector<8x128xf32>
    %142 = vector.extract_strided_slice %123 {offsets = [0, 256], sizes = [8, 128], strides = [1, 1]} : vector<8x384xf32> to vector<8x128xf32>
    %143 = arith.mulf %132, %142 : vector<8x128xf32>
    %144 = arith.addf %141, %143 : vector<8x128xf32>
    %145 = math.tanh %144 : vector<8x128xf32>
    %cst_33 = arith.constant 1.000000e+00 : f32
    %146 = vector.broadcast %cst_33 : f32 to vector<8x128xf32>
    %147 = arith.subf %146, %140 : vector<8x128xf32>
    %148 = arith.mulf %147, %145 : vector<8x128xf32>
    %149 = arith.mulf %140, %124 : vector<8x128xf32>
    %150 = arith.addf %148, %149 : vector<8x128xf32>
    %151 = tpu.concatenate %122, %150 in 0 : vector<8x128xf32>, vector<8x128xf32> -> vector<16x128xf32>
    %c2_i32 = arith.constant 2 : i32
    %c8_i32_34 = arith.constant 8 : i32
    %152 = arith.muli %c2_i32, %c8_i32_34 : i32
    %153 = tpu.assume_multiple %152, 8 : i32
    %c15_i32_35 = arith.constant 15 : i32
    %154 = arith.subi %c15_i32_35, %c2_i32 : i32
    %c8_i32_36 = arith.constant 8 : i32
    %155 = arith.muli %154, %c8_i32_36 : i32
    %156 = tpu.assume_multiple %155, 8 : i32
    %cst_37 = arith.constant dense<0.000000e+00> : vector<16x768xf32>
    %157 = tpu.matmul %151, %7, %cst_37 {dimension_numbers = #tpu.dot_dimension_numbers<[1], [0], [0], [1], [0, 0, 1, 1], [], []>} : vector<16x128xf32>, vector<128x768xf32>, vector<16x768xf32> -> vector<16x768xf32>
    %158 = vector.broadcast %8 : vector<1x768xf32> to vector<16x768xf32>
    %159 = arith.addf %157, %158 : vector<16x768xf32>
    %160 = arith.index_cast %153 : i32 to index
    %c0_38 = arith.constant 0 : index
    %161 = vector.load %arg13[%160, %c0_38] : memref<128x768xf32, #tpu.memory_space<vmem>>, vector<8x768xf32>
    %162 = vector.extract_strided_slice %161 {offsets = [0, 0], sizes = [8, 384], strides = [1, 1]} : vector<8x768xf32> to vector<8x384xf32>
    %163 = arith.index_cast %156 : i32 to index
    %c0_39 = arith.constant 0 : index
    %164 = vector.load %arg13[%163, %c0_39] : memref<128x768xf32, #tpu.memory_space<vmem>>, vector<8x768xf32>
    %165 = vector.extract_strided_slice %164 {offsets = [0, 384], sizes = [8, 384], strides = [1, 1]} : vector<8x768xf32> to vector<8x384xf32>
    %166 = vector.extract_strided_slice %159 {offsets = [0, 0], sizes = [8, 384], strides = [1, 1]} : vector<16x768xf32> to vector<8x384xf32>
    %167 = vector.extract_strided_slice %151 {offsets = [0, 0], sizes = [8, 128], strides = [1, 1]} : vector<16x128xf32> to vector<8x128xf32>
    %168 = vector.extract_strided_slice %162 {offsets = [0, 0], sizes = [8, 128], strides = [1, 1]} : vector<8x384xf32> to vector<8x128xf32>
    %169 = vector.extract_strided_slice %166 {offsets = [0, 0], sizes = [8, 128], strides = [1, 1]} : vector<8x384xf32> to vector<8x128xf32>
    %170 = arith.addf %168, %169 : vector<8x128xf32>
    %171 = arith.negf %170 : vector<8x128xf32>
    %172 = math.exp %171 : vector<8x128xf32>
    %cst_40 = arith.constant 1.000000e+00 : f32
    %173 = vector.broadcast %cst_40 : f32 to vector<8x128xf32>
    %174 = arith.addf %173, %172 : vector<8x128xf32>
    %175 = arith.divf %173, %174 : vector<8x128xf32>
    %176 = vector.extract_strided_slice %162 {offsets = [0, 128], sizes = [8, 128], strides = [1, 1]} : vector<8x384xf32> to vector<8x128xf32>
    %177 = vector.extract_strided_slice %166 {offsets = [0, 128], sizes = [8, 128], strides = [1, 1]} : vector<8x384xf32> to vector<8x128xf32>
    %178 = arith.addf %176, %177 : vector<8x128xf32>
    %179 = arith.negf %178 : vector<8x128xf32>
    %180 = math.exp %179 : vector<8x128xf32>
    %cst_41 = arith.constant 1.000000e+00 : f32
    %181 = vector.broadcast %cst_41 : f32 to vector<8x128xf32>
    %182 = arith.addf %181, %180 : vector<8x128xf32>
    %183 = arith.divf %181, %182 : vector<8x128xf32>
    %184 = vector.extract_strided_slice %162 {offsets = [0, 256], sizes = [8, 128], strides = [1, 1]} : vector<8x384xf32> to vector<8x128xf32>
    %185 = vector.extract_strided_slice %166 {offsets = [0, 256], sizes = [8, 128], strides = [1, 1]} : vector<8x384xf32> to vector<8x128xf32>
    %186 = arith.mulf %175, %185 : vector<8x128xf32>
    %187 = arith.addf %184, %186 : vector<8x128xf32>
    %188 = math.tanh %187 : vector<8x128xf32>
    %cst_42 = arith.constant 1.000000e+00 : f32
    %189 = vector.broadcast %cst_42 : f32 to vector<8x128xf32>
    %190 = arith.subf %189, %183 : vector<8x128xf32>
    %191 = arith.mulf %190, %188 : vector<8x128xf32>
    %192 = arith.mulf %183, %167 : vector<8x128xf32>
    %193 = arith.addf %191, %192 : vector<8x128xf32>
    %194 = vector.extract_strided_slice %159 {offsets = [8, 384], sizes = [8, 384], strides = [1, 1]} : vector<16x768xf32> to vector<8x384xf32>
    %195 = vector.extract_strided_slice %151 {offsets = [8, 0], sizes = [8, 128], strides = [1, 1]} : vector<16x128xf32> to vector<8x128xf32>
    %196 = vector.extract_strided_slice %165 {offsets = [0, 0], sizes = [8, 128], strides = [1, 1]} : vector<8x384xf32> to vector<8x128xf32>
    %197 = vector.extract_strided_slice %194 {offsets = [0, 0], sizes = [8, 128], strides = [1, 1]} : vector<8x384xf32> to vector<8x128xf32>
    %198 = arith.addf %196, %197 : vector<8x128xf32>
    %199 = arith.negf %198 : vector<8x128xf32>
    %200 = math.exp %199 : vector<8x128xf32>
    %cst_43 = arith.constant 1.000000e+00 : f32
    %201 = vector.broadcast %cst_43 : f32 to vector<8x128xf32>
    %202 = arith.addf %201, %200 : vector<8x128xf32>
    %203 = arith.divf %201, %202 : vector<8x128xf32>
    %204 = vector.extract_strided_slice %165 {offsets = [0, 128], sizes = [8, 128], strides = [1, 1]} : vector<8x384xf32> to vector<8x128xf32>
    %205 = vector.extract_strided_slice %194 {offsets = [0, 128], sizes = [8, 128], strides = [1, 1]} : vector<8x384xf32> to vector<8x128xf32>
    %206 = arith.addf %204, %205 : vector<8x128xf32>
    %207 = arith.negf %206 : vector<8x128xf32>
    %208 = math.exp %207 : vector<8x128xf32>
    %cst_44 = arith.constant 1.000000e+00 : f32
    %209 = vector.broadcast %cst_44 : f32 to vector<8x128xf32>
    %210 = arith.addf %209, %208 : vector<8x128xf32>
    %211 = arith.divf %209, %210 : vector<8x128xf32>
    %212 = vector.extract_strided_slice %165 {offsets = [0, 256], sizes = [8, 128], strides = [1, 1]} : vector<8x384xf32> to vector<8x128xf32>
    %213 = vector.extract_strided_slice %194 {offsets = [0, 256], sizes = [8, 128], strides = [1, 1]} : vector<8x384xf32> to vector<8x128xf32>
    %214 = arith.mulf %203, %213 : vector<8x128xf32>
    %215 = arith.addf %212, %214 : vector<8x128xf32>
    %216 = math.tanh %215 : vector<8x128xf32>
    %cst_45 = arith.constant 1.000000e+00 : f32
    %217 = vector.broadcast %cst_45 : f32 to vector<8x128xf32>
    %218 = arith.subf %217, %211 : vector<8x128xf32>
    %219 = arith.mulf %218, %216 : vector<8x128xf32>
    %220 = arith.mulf %211, %195 : vector<8x128xf32>
    %221 = arith.addf %219, %220 : vector<8x128xf32>
    %222 = tpu.concatenate %193, %221 in 0 : vector<8x128xf32>, vector<8x128xf32> -> vector<16x128xf32>
    %c3_i32 = arith.constant 3 : i32
    %c8_i32_46 = arith.constant 8 : i32
    %223 = arith.muli %c3_i32, %c8_i32_46 : i32
    %224 = tpu.assume_multiple %223, 8 : i32
    %c15_i32_47 = arith.constant 15 : i32
    %225 = arith.subi %c15_i32_47, %c3_i32 : i32
    %c8_i32_48 = arith.constant 8 : i32
    %226 = arith.muli %225, %c8_i32_48 : i32
    %227 = tpu.assume_multiple %226, 8 : i32
    %cst_49 = arith.constant dense<0.000000e+00> : vector<16x768xf32>
    %228 = tpu.matmul %222, %7, %cst_49 {dimension_numbers = #tpu.dot_dimension_numbers<[1], [0], [0], [1], [0, 0, 1, 1], [], []>} : vector<16x128xf32>, vector<128x768xf32>, vector<16x768xf32> -> vector<16x768xf32>
    %229 = vector.broadcast %8 : vector<1x768xf32> to vector<16x768xf32>
    %230 = arith.addf %228, %229 : vector<16x768xf32>
    %231 = arith.index_cast %224 : i32 to index
    %c0_50 = arith.constant 0 : index
    %232 = vector.load %arg13[%231, %c0_50] : memref<128x768xf32, #tpu.memory_space<vmem>>, vector<8x768xf32>
    %233 = vector.extract_strided_slice %232 {offsets = [0, 0], sizes = [8, 384], strides = [1, 1]} : vector<8x768xf32> to vector<8x384xf32>
    %234 = arith.index_cast %227 : i32 to index
    %c0_51 = arith.constant 0 : index
    %235 = vector.load %arg13[%234, %c0_51] : memref<128x768xf32, #tpu.memory_space<vmem>>, vector<8x768xf32>
    %236 = vector.extract_strided_slice %235 {offsets = [0, 384], sizes = [8, 384], strides = [1, 1]} : vector<8x768xf32> to vector<8x384xf32>
    %237 = vector.extract_strided_slice %230 {offsets = [0, 0], sizes = [8, 384], strides = [1, 1]} : vector<16x768xf32> to vector<8x384xf32>
    %238 = vector.extract_strided_slice %222 {offsets = [0, 0], sizes = [8, 128], strides = [1, 1]} : vector<16x128xf32> to vector<8x128xf32>
    %239 = vector.extract_strided_slice %233 {offsets = [0, 0], sizes = [8, 128], strides = [1, 1]} : vector<8x384xf32> to vector<8x128xf32>
    %240 = vector.extract_strided_slice %237 {offsets = [0, 0], sizes = [8, 128], strides = [1, 1]} : vector<8x384xf32> to vector<8x128xf32>
    %241 = arith.addf %239, %240 : vector<8x128xf32>
    %242 = arith.negf %241 : vector<8x128xf32>
    %243 = math.exp %242 : vector<8x128xf32>
    %cst_52 = arith.constant 1.000000e+00 : f32
    %244 = vector.broadcast %cst_52 : f32 to vector<8x128xf32>
    %245 = arith.addf %244, %243 : vector<8x128xf32>
    %246 = arith.divf %244, %245 : vector<8x128xf32>
    %247 = vector.extract_strided_slice %233 {offsets = [0, 128], sizes = [8, 128], strides = [1, 1]} : vector<8x384xf32> to vector<8x128xf32>
    %248 = vector.extract_strided_slice %237 {offsets = [0, 128], sizes = [8, 128], strides = [1, 1]} : vector<8x384xf32> to vector<8x128xf32>
    %249 = arith.addf %247, %248 : vector<8x128xf32>
    %250 = arith.negf %249 : vector<8x128xf32>
    %251 = math.exp %250 : vector<8x128xf32>
    %cst_53 = arith.constant 1.000000e+00 : f32
    %252 = vector.broadcast %cst_53 : f32 to vector<8x128xf32>
    %253 = arith.addf %252, %251 : vector<8x128xf32>
    %254 = arith.divf %252, %253 : vector<8x128xf32>
    %255 = vector.extract_strided_slice %233 {offsets = [0, 256], sizes = [8, 128], strides = [1, 1]} : vector<8x384xf32> to vector<8x128xf32>
    %256 = vector.extract_strided_slice %237 {offsets = [0, 256], sizes = [8, 128], strides = [1, 1]} : vector<8x384xf32> to vector<8x128xf32>
    %257 = arith.mulf %246, %256 : vector<8x128xf32>
    %258 = arith.addf %255, %257 : vector<8x128xf32>
    %259 = math.tanh %258 : vector<8x128xf32>
    %cst_54 = arith.constant 1.000000e+00 : f32
    %260 = vector.broadcast %cst_54 : f32 to vector<8x128xf32>
    %261 = arith.subf %260, %254 : vector<8x128xf32>
    %262 = arith.mulf %261, %259 : vector<8x128xf32>
    %263 = arith.mulf %254, %238 : vector<8x128xf32>
    %264 = arith.addf %262, %263 : vector<8x128xf32>
    %265 = vector.extract_strided_slice %230 {offsets = [8, 384], sizes = [8, 384], strides = [1, 1]} : vector<16x768xf32> to vector<8x384xf32>
    %266 = vector.extract_strided_slice %222 {offsets = [8, 0], sizes = [8, 128], strides = [1, 1]} : vector<16x128xf32> to vector<8x128xf32>
    %267 = vector.extract_strided_slice %236 {offsets = [0, 0], sizes = [8, 128], strides = [1, 1]} : vector<8x384xf32> to vector<8x128xf32>
    %268 = vector.extract_strided_slice %265 {offsets = [0, 0], sizes = [8, 128], strides = [1, 1]} : vector<8x384xf32> to vector<8x128xf32>
    %269 = arith.addf %267, %268 : vector<8x128xf32>
    %270 = arith.negf %269 : vector<8x128xf32>
    %271 = math.exp %270 : vector<8x128xf32>
    %cst_55 = arith.constant 1.000000e+00 : f32
    %272 = vector.broadcast %cst_55 : f32 to vector<8x128xf32>
    %273 = arith.addf %272, %271 : vector<8x128xf32>
    %274 = arith.divf %272, %273 : vector<8x128xf32>
    %275 = vector.extract_strided_slice %236 {offsets = [0, 128], sizes = [8, 128], strides = [1, 1]} : vector<8x384xf32> to vector<8x128xf32>
    %276 = vector.extract_strided_slice %265 {offsets = [0, 128], sizes = [8, 128], strides = [1, 1]} : vector<8x384xf32> to vector<8x128xf32>
    %277 = arith.addf %275, %276 : vector<8x128xf32>
    %278 = arith.negf %277 : vector<8x128xf32>
    %279 = math.exp %278 : vector<8x128xf32>
    %cst_56 = arith.constant 1.000000e+00 : f32
    %280 = vector.broadcast %cst_56 : f32 to vector<8x128xf32>
    %281 = arith.addf %280, %279 : vector<8x128xf32>
    %282 = arith.divf %280, %281 : vector<8x128xf32>
    %283 = vector.extract_strided_slice %236 {offsets = [0, 256], sizes = [8, 128], strides = [1, 1]} : vector<8x384xf32> to vector<8x128xf32>
    %284 = vector.extract_strided_slice %265 {offsets = [0, 256], sizes = [8, 128], strides = [1, 1]} : vector<8x384xf32> to vector<8x128xf32>
    %285 = arith.mulf %274, %284 : vector<8x128xf32>
    %286 = arith.addf %283, %285 : vector<8x128xf32>
    %287 = math.tanh %286 : vector<8x128xf32>
    %cst_57 = arith.constant 1.000000e+00 : f32
    %288 = vector.broadcast %cst_57 : f32 to vector<8x128xf32>
    %289 = arith.subf %288, %282 : vector<8x128xf32>
    %290 = arith.mulf %289, %287 : vector<8x128xf32>
    %291 = arith.mulf %282, %266 : vector<8x128xf32>
    %292 = arith.addf %290, %291 : vector<8x128xf32>
    %293 = tpu.concatenate %264, %292 in 0 : vector<8x128xf32>, vector<8x128xf32> -> vector<16x128xf32>
    %c4_i32 = arith.constant 4 : i32
    %c8_i32_58 = arith.constant 8 : i32
    %294 = arith.muli %c4_i32, %c8_i32_58 : i32
    %295 = tpu.assume_multiple %294, 8 : i32
    %c15_i32_59 = arith.constant 15 : i32
    %296 = arith.subi %c15_i32_59, %c4_i32 : i32
    %c8_i32_60 = arith.constant 8 : i32
    %297 = arith.muli %296, %c8_i32_60 : i32
    %298 = tpu.assume_multiple %297, 8 : i32
    %cst_61 = arith.constant dense<0.000000e+00> : vector<16x768xf32>
    %299 = tpu.matmul %293, %7, %cst_61 {dimension_numbers = #tpu.dot_dimension_numbers<[1], [0], [0], [1], [0, 0, 1, 1], [], []>} : vector<16x128xf32>, vector<128x768xf32>, vector<16x768xf32> -> vector<16x768xf32>
    %300 = vector.broadcast %8 : vector<1x768xf32> to vector<16x768xf32>
    %301 = arith.addf %299, %300 : vector<16x768xf32>
    %302 = arith.index_cast %295 : i32 to index
    %c0_62 = arith.constant 0 : index
    %303 = vector.load %arg13[%302, %c0_62] : memref<128x768xf32, #tpu.memory_space<vmem>>, vector<8x768xf32>
    %304 = vector.extract_strided_slice %303 {offsets = [0, 0], sizes = [8, 384], strides = [1, 1]} : vector<8x768xf32> to vector<8x384xf32>
    %305 = arith.index_cast %298 : i32 to index
    %c0_63 = arith.constant 0 : index
    %306 = vector.load %arg13[%305, %c0_63] : memref<128x768xf32, #tpu.memory_space<vmem>>, vector<8x768xf32>
    %307 = vector.extract_strided_slice %306 {offsets = [0, 384], sizes = [8, 384], strides = [1, 1]} : vector<8x768xf32> to vector<8x384xf32>
    %308 = vector.extract_strided_slice %301 {offsets = [0, 0], sizes = [8, 384], strides = [1, 1]} : vector<16x768xf32> to vector<8x384xf32>
    %309 = vector.extract_strided_slice %293 {offsets = [0, 0], sizes = [8, 128], strides = [1, 1]} : vector<16x128xf32> to vector<8x128xf32>
    %310 = vector.extract_strided_slice %304 {offsets = [0, 0], sizes = [8, 128], strides = [1, 1]} : vector<8x384xf32> to vector<8x128xf32>
    %311 = vector.extract_strided_slice %308 {offsets = [0, 0], sizes = [8, 128], strides = [1, 1]} : vector<8x384xf32> to vector<8x128xf32>
    %312 = arith.addf %310, %311 : vector<8x128xf32>
    %313 = arith.negf %312 : vector<8x128xf32>
    %314 = math.exp %313 : vector<8x128xf32>
    %cst_64 = arith.constant 1.000000e+00 : f32
    %315 = vector.broadcast %cst_64 : f32 to vector<8x128xf32>
    %316 = arith.addf %315, %314 : vector<8x128xf32>
    %317 = arith.divf %315, %316 : vector<8x128xf32>
    %318 = vector.extract_strided_slice %304 {offsets = [0, 128], sizes = [8, 128], strides = [1, 1]} : vector<8x384xf32> to vector<8x128xf32>
    %319 = vector.extract_strided_slice %308 {offsets = [0, 128], sizes = [8, 128], strides = [1, 1]} : vector<8x384xf32> to vector<8x128xf32>
    %320 = arith.addf %318, %319 : vector<8x128xf32>
    %321 = arith.negf %320 : vector<8x128xf32>
    %322 = math.exp %321 : vector<8x128xf32>
    %cst_65 = arith.constant 1.000000e+00 : f32
    %323 = vector.broadcast %cst_65 : f32 to vector<8x128xf32>
    %324 = arith.addf %323, %322 : vector<8x128xf32>
    %325 = arith.divf %323, %324 : vector<8x128xf32>
    %326 = vector.extract_strided_slice %304 {offsets = [0, 256], sizes = [8, 128], strides = [1, 1]} : vector<8x384xf32> to vector<8x128xf32>
    %327 = vector.extract_strided_slice %308 {offsets = [0, 256], sizes = [8, 128], strides = [1, 1]} : vector<8x384xf32> to vector<8x128xf32>
    %328 = arith.mulf %317, %327 : vector<8x128xf32>
    %329 = arith.addf %326, %328 : vector<8x128xf32>
    %330 = math.tanh %329 : vector<8x128xf32>
    %cst_66 = arith.constant 1.000000e+00 : f32
    %331 = vector.broadcast %cst_66 : f32 to vector<8x128xf32>
    %332 = arith.subf %331, %325 : vector<8x128xf32>
    %333 = arith.mulf %332, %330 : vector<8x128xf32>
    %334 = arith.mulf %325, %309 : vector<8x128xf32>
    %335 = arith.addf %333, %334 : vector<8x128xf32>
    %336 = vector.extract_strided_slice %301 {offsets = [8, 384], sizes = [8, 384], strides = [1, 1]} : vector<16x768xf32> to vector<8x384xf32>
    %337 = vector.extract_strided_slice %293 {offsets = [8, 0], sizes = [8, 128], strides = [1, 1]} : vector<16x128xf32> to vector<8x128xf32>
    %338 = vector.extract_strided_slice %307 {offsets = [0, 0], sizes = [8, 128], strides = [1, 1]} : vector<8x384xf32> to vector<8x128xf32>
    %339 = vector.extract_strided_slice %336 {offsets = [0, 0], sizes = [8, 128], strides = [1, 1]} : vector<8x384xf32> to vector<8x128xf32>
    %340 = arith.addf %338, %339 : vector<8x128xf32>
    %341 = arith.negf %340 : vector<8x128xf32>
    %342 = math.exp %341 : vector<8x128xf32>
    %cst_67 = arith.constant 1.000000e+00 : f32
    %343 = vector.broadcast %cst_67 : f32 to vector<8x128xf32>
    %344 = arith.addf %343, %342 : vector<8x128xf32>
    %345 = arith.divf %343, %344 : vector<8x128xf32>
    %346 = vector.extract_strided_slice %307 {offsets = [0, 128], sizes = [8, 128], strides = [1, 1]} : vector<8x384xf32> to vector<8x128xf32>
    %347 = vector.extract_strided_slice %336 {offsets = [0, 128], sizes = [8, 128], strides = [1, 1]} : vector<8x384xf32> to vector<8x128xf32>
    %348 = arith.addf %346, %347 : vector<8x128xf32>
    %349 = arith.negf %348 : vector<8x128xf32>
    %350 = math.exp %349 : vector<8x128xf32>
    %cst_68 = arith.constant 1.000000e+00 : f32
    %351 = vector.broadcast %cst_68 : f32 to vector<8x128xf32>
    %352 = arith.addf %351, %350 : vector<8x128xf32>
    %353 = arith.divf %351, %352 : vector<8x128xf32>
    %354 = vector.extract_strided_slice %307 {offsets = [0, 256], sizes = [8, 128], strides = [1, 1]} : vector<8x384xf32> to vector<8x128xf32>
    %355 = vector.extract_strided_slice %336 {offsets = [0, 256], sizes = [8, 128], strides = [1, 1]} : vector<8x384xf32> to vector<8x128xf32>
    %356 = arith.mulf %345, %355 : vector<8x128xf32>
    %357 = arith.addf %354, %356 : vector<8x128xf32>
    %358 = math.tanh %357 : vector<8x128xf32>
    %cst_69 = arith.constant 1.000000e+00 : f32
    %359 = vector.broadcast %cst_69 : f32 to vector<8x128xf32>
    %360 = arith.subf %359, %353 : vector<8x128xf32>
    %361 = arith.mulf %360, %358 : vector<8x128xf32>
    %362 = arith.mulf %353, %337 : vector<8x128xf32>
    %363 = arith.addf %361, %362 : vector<8x128xf32>
    %364 = tpu.concatenate %335, %363 in 0 : vector<8x128xf32>, vector<8x128xf32> -> vector<16x128xf32>
    %c5_i32 = arith.constant 5 : i32
    %c8_i32_70 = arith.constant 8 : i32
    %365 = arith.muli %c5_i32, %c8_i32_70 : i32
    %366 = tpu.assume_multiple %365, 8 : i32
    %c15_i32_71 = arith.constant 15 : i32
    %367 = arith.subi %c15_i32_71, %c5_i32 : i32
    %c8_i32_72 = arith.constant 8 : i32
    %368 = arith.muli %367, %c8_i32_72 : i32
    %369 = tpu.assume_multiple %368, 8 : i32
    %cst_73 = arith.constant dense<0.000000e+00> : vector<16x768xf32>
    %370 = tpu.matmul %364, %7, %cst_73 {dimension_numbers = #tpu.dot_dimension_numbers<[1], [0], [0], [1], [0, 0, 1, 1], [], []>} : vector<16x128xf32>, vector<128x768xf32>, vector<16x768xf32> -> vector<16x768xf32>
    %371 = vector.broadcast %8 : vector<1x768xf32> to vector<16x768xf32>
    %372 = arith.addf %370, %371 : vector<16x768xf32>
    %373 = arith.index_cast %366 : i32 to index
    %c0_74 = arith.constant 0 : index
    %374 = vector.load %arg13[%373, %c0_74] : memref<128x768xf32, #tpu.memory_space<vmem>>, vector<8x768xf32>
    %375 = vector.extract_strided_slice %374 {offsets = [0, 0], sizes = [8, 384], strides = [1, 1]} : vector<8x768xf32> to vector<8x384xf32>
    %376 = arith.index_cast %369 : i32 to index
    %c0_75 = arith.constant 0 : index
    %377 = vector.load %arg13[%376, %c0_75] : memref<128x768xf32, #tpu.memory_space<vmem>>, vector<8x768xf32>
    %378 = vector.extract_strided_slice %377 {offsets = [0, 384], sizes = [8, 384], strides = [1, 1]} : vector<8x768xf32> to vector<8x384xf32>
    %379 = vector.extract_strided_slice %372 {offsets = [0, 0], sizes = [8, 384], strides = [1, 1]} : vector<16x768xf32> to vector<8x384xf32>
    %380 = vector.extract_strided_slice %364 {offsets = [0, 0], sizes = [8, 128], strides = [1, 1]} : vector<16x128xf32> to vector<8x128xf32>
    %381 = vector.extract_strided_slice %375 {offsets = [0, 0], sizes = [8, 128], strides = [1, 1]} : vector<8x384xf32> to vector<8x128xf32>
    %382 = vector.extract_strided_slice %379 {offsets = [0, 0], sizes = [8, 128], strides = [1, 1]} : vector<8x384xf32> to vector<8x128xf32>
    %383 = arith.addf %381, %382 : vector<8x128xf32>
    %384 = arith.negf %383 : vector<8x128xf32>
    %385 = math.exp %384 : vector<8x128xf32>
    %cst_76 = arith.constant 1.000000e+00 : f32
    %386 = vector.broadcast %cst_76 : f32 to vector<8x128xf32>
    %387 = arith.addf %386, %385 : vector<8x128xf32>
    %388 = arith.divf %386, %387 : vector<8x128xf32>
    %389 = vector.extract_strided_slice %375 {offsets = [0, 128], sizes = [8, 128], strides = [1, 1]} : vector<8x384xf32> to vector<8x128xf32>
    %390 = vector.extract_strided_slice %379 {offsets = [0, 128], sizes = [8, 128], strides = [1, 1]} : vector<8x384xf32> to vector<8x128xf32>
    %391 = arith.addf %389, %390 : vector<8x128xf32>
    %392 = arith.negf %391 : vector<8x128xf32>
    %393 = math.exp %392 : vector<8x128xf32>
    %cst_77 = arith.constant 1.000000e+00 : f32
    %394 = vector.broadcast %cst_77 : f32 to vector<8x128xf32>
    %395 = arith.addf %394, %393 : vector<8x128xf32>
    %396 = arith.divf %394, %395 : vector<8x128xf32>
    %397 = vector.extract_strided_slice %375 {offsets = [0, 256], sizes = [8, 128], strides = [1, 1]} : vector<8x384xf32> to vector<8x128xf32>
    %398 = vector.extract_strided_slice %379 {offsets = [0, 256], sizes = [8, 128], strides = [1, 1]} : vector<8x384xf32> to vector<8x128xf32>
    %399 = arith.mulf %388, %398 : vector<8x128xf32>
    %400 = arith.addf %397, %399 : vector<8x128xf32>
    %401 = math.tanh %400 : vector<8x128xf32>
    %cst_78 = arith.constant 1.000000e+00 : f32
    %402 = vector.broadcast %cst_78 : f32 to vector<8x128xf32>
    %403 = arith.subf %402, %396 : vector<8x128xf32>
    %404 = arith.mulf %403, %401 : vector<8x128xf32>
    %405 = arith.mulf %396, %380 : vector<8x128xf32>
    %406 = arith.addf %404, %405 : vector<8x128xf32>
    %407 = vector.extract_strided_slice %372 {offsets = [8, 384], sizes = [8, 384], strides = [1, 1]} : vector<16x768xf32> to vector<8x384xf32>
    %408 = vector.extract_strided_slice %364 {offsets = [8, 0], sizes = [8, 128], strides = [1, 1]} : vector<16x128xf32> to vector<8x128xf32>
    %409 = vector.extract_strided_slice %378 {offsets = [0, 0], sizes = [8, 128], strides = [1, 1]} : vector<8x384xf32> to vector<8x128xf32>
    %410 = vector.extract_strided_slice %407 {offsets = [0, 0], sizes = [8, 128], strides = [1, 1]} : vector<8x384xf32> to vector<8x128xf32>
    %411 = arith.addf %409, %410 : vector<8x128xf32>
    %412 = arith.negf %411 : vector<8x128xf32>
    %413 = math.exp %412 : vector<8x128xf32>
    %cst_79 = arith.constant 1.000000e+00 : f32
    %414 = vector.broadcast %cst_79 : f32 to vector<8x128xf32>
    %415 = arith.addf %414, %413 : vector<8x128xf32>
    %416 = arith.divf %414, %415 : vector<8x128xf32>
    %417 = vector.extract_strided_slice %378 {offsets = [0, 128], sizes = [8, 128], strides = [1, 1]} : vector<8x384xf32> to vector<8x128xf32>
    %418 = vector.extract_strided_slice %407 {offsets = [0, 128], sizes = [8, 128], strides = [1, 1]} : vector<8x384xf32> to vector<8x128xf32>
    %419 = arith.addf %417, %418 : vector<8x128xf32>
    %420 = arith.negf %419 : vector<8x128xf32>
    %421 = math.exp %420 : vector<8x128xf32>
    %cst_80 = arith.constant 1.000000e+00 : f32
    %422 = vector.broadcast %cst_80 : f32 to vector<8x128xf32>
    %423 = arith.addf %422, %421 : vector<8x128xf32>
    %424 = arith.divf %422, %423 : vector<8x128xf32>
    %425 = vector.extract_strided_slice %378 {offsets = [0, 256], sizes = [8, 128], strides = [1, 1]} : vector<8x384xf32> to vector<8x128xf32>
    %426 = vector.extract_strided_slice %407 {offsets = [0, 256], sizes = [8, 128], strides = [1, 1]} : vector<8x384xf32> to vector<8x128xf32>
    %427 = arith.mulf %416, %426 : vector<8x128xf32>
    %428 = arith.addf %425, %427 : vector<8x128xf32>
    %429 = math.tanh %428 : vector<8x128xf32>
    %cst_81 = arith.constant 1.000000e+00 : f32
    %430 = vector.broadcast %cst_81 : f32 to vector<8x128xf32>
    %431 = arith.subf %430, %424 : vector<8x128xf32>
    %432 = arith.mulf %431, %429 : vector<8x128xf32>
    %433 = arith.mulf %424, %408 : vector<8x128xf32>
    %434 = arith.addf %432, %433 : vector<8x128xf32>
    %435 = tpu.concatenate %406, %434 in 0 : vector<8x128xf32>, vector<8x128xf32> -> vector<16x128xf32>
    %c6_i32 = arith.constant 6 : i32
    %c8_i32_82 = arith.constant 8 : i32
    %436 = arith.muli %c6_i32, %c8_i32_82 : i32
    %437 = tpu.assume_multiple %436, 8 : i32
    %c15_i32_83 = arith.constant 15 : i32
    %438 = arith.subi %c15_i32_83, %c6_i32 : i32
    %c8_i32_84 = arith.constant 8 : i32
    %439 = arith.muli %438, %c8_i32_84 : i32
    %440 = tpu.assume_multiple %439, 8 : i32
    %cst_85 = arith.constant dense<0.000000e+00> : vector<16x768xf32>
    %441 = tpu.matmul %435, %7, %cst_85 {dimension_numbers = #tpu.dot_dimension_numbers<[1], [0], [0], [1], [0, 0, 1, 1], [], []>} : vector<16x128xf32>, vector<128x768xf32>, vector<16x768xf32> -> vector<16x768xf32>
    %442 = vector.broadcast %8 : vector<1x768xf32> to vector<16x768xf32>
    %443 = arith.addf %441, %442 : vector<16x768xf32>
    %444 = arith.index_cast %437 : i32 to index
    %c0_86 = arith.constant 0 : index
    %445 = vector.load %arg13[%444, %c0_86] : memref<128x768xf32, #tpu.memory_space<vmem>>, vector<8x768xf32>
    %446 = vector.extract_strided_slice %445 {offsets = [0, 0], sizes = [8, 384], strides = [1, 1]} : vector<8x768xf32> to vector<8x384xf32>
    %447 = arith.index_cast %440 : i32 to index
    %c0_87 = arith.constant 0 : index
    %448 = vector.load %arg13[%447, %c0_87] : memref<128x768xf32, #tpu.memory_space<vmem>>, vector<8x768xf32>
    %449 = vector.extract_strided_slice %448 {offsets = [0, 384], sizes = [8, 384], strides = [1, 1]} : vector<8x768xf32> to vector<8x384xf32>
    %450 = vector.extract_strided_slice %443 {offsets = [0, 0], sizes = [8, 384], strides = [1, 1]} : vector<16x768xf32> to vector<8x384xf32>
    %451 = vector.extract_strided_slice %435 {offsets = [0, 0], sizes = [8, 128], strides = [1, 1]} : vector<16x128xf32> to vector<8x128xf32>
    %452 = vector.extract_strided_slice %446 {offsets = [0, 0], sizes = [8, 128], strides = [1, 1]} : vector<8x384xf32> to vector<8x128xf32>
    %453 = vector.extract_strided_slice %450 {offsets = [0, 0], sizes = [8, 128], strides = [1, 1]} : vector<8x384xf32> to vector<8x128xf32>
    %454 = arith.addf %452, %453 : vector<8x128xf32>
    %455 = arith.negf %454 : vector<8x128xf32>
    %456 = math.exp %455 : vector<8x128xf32>
    %cst_88 = arith.constant 1.000000e+00 : f32
    %457 = vector.broadcast %cst_88 : f32 to vector<8x128xf32>
    %458 = arith.addf %457, %456 : vector<8x128xf32>
    %459 = arith.divf %457, %458 : vector<8x128xf32>
    %460 = vector.extract_strided_slice %446 {offsets = [0, 128], sizes = [8, 128], strides = [1, 1]} : vector<8x384xf32> to vector<8x128xf32>
    %461 = vector.extract_strided_slice %450 {offsets = [0, 128], sizes = [8, 128], strides = [1, 1]} : vector<8x384xf32> to vector<8x128xf32>
    %462 = arith.addf %460, %461 : vector<8x128xf32>
    %463 = arith.negf %462 : vector<8x128xf32>
    %464 = math.exp %463 : vector<8x128xf32>
    %cst_89 = arith.constant 1.000000e+00 : f32
    %465 = vector.broadcast %cst_89 : f32 to vector<8x128xf32>
    %466 = arith.addf %465, %464 : vector<8x128xf32>
    %467 = arith.divf %465, %466 : vector<8x128xf32>
    %468 = vector.extract_strided_slice %446 {offsets = [0, 256], sizes = [8, 128], strides = [1, 1]} : vector<8x384xf32> to vector<8x128xf32>
    %469 = vector.extract_strided_slice %450 {offsets = [0, 256], sizes = [8, 128], strides = [1, 1]} : vector<8x384xf32> to vector<8x128xf32>
    %470 = arith.mulf %459, %469 : vector<8x128xf32>
    %471 = arith.addf %468, %470 : vector<8x128xf32>
    %472 = math.tanh %471 : vector<8x128xf32>
    %cst_90 = arith.constant 1.000000e+00 : f32
    %473 = vector.broadcast %cst_90 : f32 to vector<8x128xf32>
    %474 = arith.subf %473, %467 : vector<8x128xf32>
    %475 = arith.mulf %474, %472 : vector<8x128xf32>
    %476 = arith.mulf %467, %451 : vector<8x128xf32>
    %477 = arith.addf %475, %476 : vector<8x128xf32>
    %478 = vector.extract_strided_slice %443 {offsets = [8, 384], sizes = [8, 384], strides = [1, 1]} : vector<16x768xf32> to vector<8x384xf32>
    %479 = vector.extract_strided_slice %435 {offsets = [8, 0], sizes = [8, 128], strides = [1, 1]} : vector<16x128xf32> to vector<8x128xf32>
    %480 = vector.extract_strided_slice %449 {offsets = [0, 0], sizes = [8, 128], strides = [1, 1]} : vector<8x384xf32> to vector<8x128xf32>
    %481 = vector.extract_strided_slice %478 {offsets = [0, 0], sizes = [8, 128], strides = [1, 1]} : vector<8x384xf32> to vector<8x128xf32>
    %482 = arith.addf %480, %481 : vector<8x128xf32>
    %483 = arith.negf %482 : vector<8x128xf32>
    %484 = math.exp %483 : vector<8x128xf32>
    %cst_91 = arith.constant 1.000000e+00 : f32
    %485 = vector.broadcast %cst_91 : f32 to vector<8x128xf32>
    %486 = arith.addf %485, %484 : vector<8x128xf32>
    %487 = arith.divf %485, %486 : vector<8x128xf32>
    %488 = vector.extract_strided_slice %449 {offsets = [0, 128], sizes = [8, 128], strides = [1, 1]} : vector<8x384xf32> to vector<8x128xf32>
    %489 = vector.extract_strided_slice %478 {offsets = [0, 128], sizes = [8, 128], strides = [1, 1]} : vector<8x384xf32> to vector<8x128xf32>
    %490 = arith.addf %488, %489 : vector<8x128xf32>
    %491 = arith.negf %490 : vector<8x128xf32>
    %492 = math.exp %491 : vector<8x128xf32>
    %cst_92 = arith.constant 1.000000e+00 : f32
    %493 = vector.broadcast %cst_92 : f32 to vector<8x128xf32>
    %494 = arith.addf %493, %492 : vector<8x128xf32>
    %495 = arith.divf %493, %494 : vector<8x128xf32>
    %496 = vector.extract_strided_slice %449 {offsets = [0, 256], sizes = [8, 128], strides = [1, 1]} : vector<8x384xf32> to vector<8x128xf32>
    %497 = vector.extract_strided_slice %478 {offsets = [0, 256], sizes = [8, 128], strides = [1, 1]} : vector<8x384xf32> to vector<8x128xf32>
    %498 = arith.mulf %487, %497 : vector<8x128xf32>
    %499 = arith.addf %496, %498 : vector<8x128xf32>
    %500 = math.tanh %499 : vector<8x128xf32>
    %cst_93 = arith.constant 1.000000e+00 : f32
    %501 = vector.broadcast %cst_93 : f32 to vector<8x128xf32>
    %502 = arith.subf %501, %495 : vector<8x128xf32>
    %503 = arith.mulf %502, %500 : vector<8x128xf32>
    %504 = arith.mulf %495, %479 : vector<8x128xf32>
    %505 = arith.addf %503, %504 : vector<8x128xf32>
    %506 = tpu.concatenate %477, %505 in 0 : vector<8x128xf32>, vector<8x128xf32> -> vector<16x128xf32>
    %c7_i32 = arith.constant 7 : i32
    %c8_i32_94 = arith.constant 8 : i32
    %507 = arith.muli %c7_i32, %c8_i32_94 : i32
    %508 = tpu.assume_multiple %507, 8 : i32
    %c15_i32_95 = arith.constant 15 : i32
    %509 = arith.subi %c15_i32_95, %c7_i32 : i32
    %c8_i32_96 = arith.constant 8 : i32
    %510 = arith.muli %509, %c8_i32_96 : i32
    %511 = tpu.assume_multiple %510, 8 : i32
    %cst_97 = arith.constant dense<0.000000e+00> : vector<16x768xf32>
    %512 = tpu.matmul %506, %7, %cst_97 {dimension_numbers = #tpu.dot_dimension_numbers<[1], [0], [0], [1], [0, 0, 1, 1], [], []>} : vector<16x128xf32>, vector<128x768xf32>, vector<16x768xf32> -> vector<16x768xf32>
    %513 = vector.broadcast %8 : vector<1x768xf32> to vector<16x768xf32>
    %514 = arith.addf %512, %513 : vector<16x768xf32>
    %515 = arith.index_cast %508 : i32 to index
    %c0_98 = arith.constant 0 : index
    %516 = vector.load %arg13[%515, %c0_98] : memref<128x768xf32, #tpu.memory_space<vmem>>, vector<8x768xf32>
    %517 = vector.extract_strided_slice %516 {offsets = [0, 0], sizes = [8, 384], strides = [1, 1]} : vector<8x768xf32> to vector<8x384xf32>
    %518 = arith.index_cast %511 : i32 to index
    %c0_99 = arith.constant 0 : index
    %519 = vector.load %arg13[%518, %c0_99] : memref<128x768xf32, #tpu.memory_space<vmem>>, vector<8x768xf32>
    %520 = vector.extract_strided_slice %519 {offsets = [0, 384], sizes = [8, 384], strides = [1, 1]} : vector<8x768xf32> to vector<8x384xf32>
    %521 = vector.extract_strided_slice %514 {offsets = [0, 0], sizes = [8, 384], strides = [1, 1]} : vector<16x768xf32> to vector<8x384xf32>
    %522 = vector.extract_strided_slice %506 {offsets = [0, 0], sizes = [8, 128], strides = [1, 1]} : vector<16x128xf32> to vector<8x128xf32>
    %523 = vector.extract_strided_slice %517 {offsets = [0, 0], sizes = [8, 128], strides = [1, 1]} : vector<8x384xf32> to vector<8x128xf32>
    %524 = vector.extract_strided_slice %521 {offsets = [0, 0], sizes = [8, 128], strides = [1, 1]} : vector<8x384xf32> to vector<8x128xf32>
    %525 = arith.addf %523, %524 : vector<8x128xf32>
    %526 = arith.negf %525 : vector<8x128xf32>
    %527 = math.exp %526 : vector<8x128xf32>
    %cst_100 = arith.constant 1.000000e+00 : f32
    %528 = vector.broadcast %cst_100 : f32 to vector<8x128xf32>
    %529 = arith.addf %528, %527 : vector<8x128xf32>
    %530 = arith.divf %528, %529 : vector<8x128xf32>
    %531 = vector.extract_strided_slice %517 {offsets = [0, 128], sizes = [8, 128], strides = [1, 1]} : vector<8x384xf32> to vector<8x128xf32>
    %532 = vector.extract_strided_slice %521 {offsets = [0, 128], sizes = [8, 128], strides = [1, 1]} : vector<8x384xf32> to vector<8x128xf32>
    %533 = arith.addf %531, %532 : vector<8x128xf32>
    %534 = arith.negf %533 : vector<8x128xf32>
    %535 = math.exp %534 : vector<8x128xf32>
    %cst_101 = arith.constant 1.000000e+00 : f32
    %536 = vector.broadcast %cst_101 : f32 to vector<8x128xf32>
    %537 = arith.addf %536, %535 : vector<8x128xf32>
    %538 = arith.divf %536, %537 : vector<8x128xf32>
    %539 = vector.extract_strided_slice %517 {offsets = [0, 256], sizes = [8, 128], strides = [1, 1]} : vector<8x384xf32> to vector<8x128xf32>
    %540 = vector.extract_strided_slice %521 {offsets = [0, 256], sizes = [8, 128], strides = [1, 1]} : vector<8x384xf32> to vector<8x128xf32>
    %541 = arith.mulf %530, %540 : vector<8x128xf32>
    %542 = arith.addf %539, %541 : vector<8x128xf32>
    %543 = math.tanh %542 : vector<8x128xf32>
    %cst_102 = arith.constant 1.000000e+00 : f32
    %544 = vector.broadcast %cst_102 : f32 to vector<8x128xf32>
    %545 = arith.subf %544, %538 : vector<8x128xf32>
    %546 = arith.mulf %545, %543 : vector<8x128xf32>
    %547 = arith.mulf %538, %522 : vector<8x128xf32>
    %548 = arith.addf %546, %547 : vector<8x128xf32>
    %549 = vector.extract_strided_slice %514 {offsets = [8, 384], sizes = [8, 384], strides = [1, 1]} : vector<16x768xf32> to vector<8x384xf32>
    %550 = vector.extract_strided_slice %506 {offsets = [8, 0], sizes = [8, 128], strides = [1, 1]} : vector<16x128xf32> to vector<8x128xf32>
    %551 = vector.extract_strided_slice %520 {offsets = [0, 0], sizes = [8, 128], strides = [1, 1]} : vector<8x384xf32> to vector<8x128xf32>
    %552 = vector.extract_strided_slice %549 {offsets = [0, 0], sizes = [8, 128], strides = [1, 1]} : vector<8x384xf32> to vector<8x128xf32>
    %553 = arith.addf %551, %552 : vector<8x128xf32>
    %554 = arith.negf %553 : vector<8x128xf32>
    %555 = math.exp %554 : vector<8x128xf32>
    %cst_103 = arith.constant 1.000000e+00 : f32
    %556 = vector.broadcast %cst_103 : f32 to vector<8x128xf32>
    %557 = arith.addf %556, %555 : vector<8x128xf32>
    %558 = arith.divf %556, %557 : vector<8x128xf32>
    %559 = vector.extract_strided_slice %520 {offsets = [0, 128], sizes = [8, 128], strides = [1, 1]} : vector<8x384xf32> to vector<8x128xf32>
    %560 = vector.extract_strided_slice %549 {offsets = [0, 128], sizes = [8, 128], strides = [1, 1]} : vector<8x384xf32> to vector<8x128xf32>
    %561 = arith.addf %559, %560 : vector<8x128xf32>
    %562 = arith.negf %561 : vector<8x128xf32>
    %563 = math.exp %562 : vector<8x128xf32>
    %cst_104 = arith.constant 1.000000e+00 : f32
    %564 = vector.broadcast %cst_104 : f32 to vector<8x128xf32>
    %565 = arith.addf %564, %563 : vector<8x128xf32>
    %566 = arith.divf %564, %565 : vector<8x128xf32>
    %567 = vector.extract_strided_slice %520 {offsets = [0, 256], sizes = [8, 128], strides = [1, 1]} : vector<8x384xf32> to vector<8x128xf32>
    %568 = vector.extract_strided_slice %549 {offsets = [0, 256], sizes = [8, 128], strides = [1, 1]} : vector<8x384xf32> to vector<8x128xf32>
    %569 = arith.mulf %558, %568 : vector<8x128xf32>
    %570 = arith.addf %567, %569 : vector<8x128xf32>
    %571 = math.tanh %570 : vector<8x128xf32>
    %cst_105 = arith.constant 1.000000e+00 : f32
    %572 = vector.broadcast %cst_105 : f32 to vector<8x128xf32>
    %573 = arith.subf %572, %566 : vector<8x128xf32>
    %574 = arith.mulf %573, %571 : vector<8x128xf32>
    %575 = arith.mulf %566, %550 : vector<8x128xf32>
    %576 = arith.addf %574, %575 : vector<8x128xf32>
    %577 = tpu.concatenate %548, %576 in 0 : vector<8x128xf32>, vector<8x128xf32> -> vector<16x128xf32>
    %c8_i32_106 = arith.constant 8 : i32
    %c8_i32_107 = arith.constant 8 : i32
    %578 = arith.muli %c8_i32_106, %c8_i32_107 : i32
    %579 = tpu.assume_multiple %578, 8 : i32
    %c15_i32_108 = arith.constant 15 : i32
    %580 = arith.subi %c15_i32_108, %c8_i32_106 : i32
    %c8_i32_109 = arith.constant 8 : i32
    %581 = arith.muli %580, %c8_i32_109 : i32
    %582 = tpu.assume_multiple %581, 8 : i32
    %cst_110 = arith.constant dense<0.000000e+00> : vector<16x768xf32>
    %583 = tpu.matmul %577, %7, %cst_110 {dimension_numbers = #tpu.dot_dimension_numbers<[1], [0], [0], [1], [0, 0, 1, 1], [], []>} : vector<16x128xf32>, vector<128x768xf32>, vector<16x768xf32> -> vector<16x768xf32>
    %584 = vector.broadcast %8 : vector<1x768xf32> to vector<16x768xf32>
    %585 = arith.addf %583, %584 : vector<16x768xf32>
    %586 = arith.index_cast %579 : i32 to index
    %c0_111 = arith.constant 0 : index
    %587 = vector.load %arg13[%586, %c0_111] : memref<128x768xf32, #tpu.memory_space<vmem>>, vector<8x768xf32>
    %588 = vector.extract_strided_slice %587 {offsets = [0, 0], sizes = [8, 384], strides = [1, 1]} : vector<8x768xf32> to vector<8x384xf32>
    %589 = arith.index_cast %582 : i32 to index
    %c0_112 = arith.constant 0 : index
    %590 = vector.load %arg13[%589, %c0_112] : memref<128x768xf32, #tpu.memory_space<vmem>>, vector<8x768xf32>
    %591 = vector.extract_strided_slice %590 {offsets = [0, 384], sizes = [8, 384], strides = [1, 1]} : vector<8x768xf32> to vector<8x384xf32>
    %592 = vector.extract_strided_slice %585 {offsets = [0, 0], sizes = [8, 384], strides = [1, 1]} : vector<16x768xf32> to vector<8x384xf32>
    %593 = vector.extract_strided_slice %577 {offsets = [0, 0], sizes = [8, 128], strides = [1, 1]} : vector<16x128xf32> to vector<8x128xf32>
    %594 = vector.extract_strided_slice %588 {offsets = [0, 0], sizes = [8, 128], strides = [1, 1]} : vector<8x384xf32> to vector<8x128xf32>
    %595 = vector.extract_strided_slice %592 {offsets = [0, 0], sizes = [8, 128], strides = [1, 1]} : vector<8x384xf32> to vector<8x128xf32>
    %596 = arith.addf %594, %595 : vector<8x128xf32>
    %597 = arith.negf %596 : vector<8x128xf32>
    %598 = math.exp %597 : vector<8x128xf32>
    %cst_113 = arith.constant 1.000000e+00 : f32
    %599 = vector.broadcast %cst_113 : f32 to vector<8x128xf32>
    %600 = arith.addf %599, %598 : vector<8x128xf32>
    %601 = arith.divf %599, %600 : vector<8x128xf32>
    %602 = vector.extract_strided_slice %588 {offsets = [0, 128], sizes = [8, 128], strides = [1, 1]} : vector<8x384xf32> to vector<8x128xf32>
    %603 = vector.extract_strided_slice %592 {offsets = [0, 128], sizes = [8, 128], strides = [1, 1]} : vector<8x384xf32> to vector<8x128xf32>
    %604 = arith.addf %602, %603 : vector<8x128xf32>
    %605 = arith.negf %604 : vector<8x128xf32>
    %606 = math.exp %605 : vector<8x128xf32>
    %cst_114 = arith.constant 1.000000e+00 : f32
    %607 = vector.broadcast %cst_114 : f32 to vector<8x128xf32>
    %608 = arith.addf %607, %606 : vector<8x128xf32>
    %609 = arith.divf %607, %608 : vector<8x128xf32>
    %610 = vector.extract_strided_slice %588 {offsets = [0, 256], sizes = [8, 128], strides = [1, 1]} : vector<8x384xf32> to vector<8x128xf32>
    %611 = vector.extract_strided_slice %592 {offsets = [0, 256], sizes = [8, 128], strides = [1, 1]} : vector<8x384xf32> to vector<8x128xf32>
    %612 = arith.mulf %601, %611 : vector<8x128xf32>
    %613 = arith.addf %610, %612 : vector<8x128xf32>
    %614 = math.tanh %613 : vector<8x128xf32>
    %cst_115 = arith.constant 1.000000e+00 : f32
    %615 = vector.broadcast %cst_115 : f32 to vector<8x128xf32>
    %616 = arith.subf %615, %609 : vector<8x128xf32>
    %617 = arith.mulf %616, %614 : vector<8x128xf32>
    %618 = arith.mulf %609, %593 : vector<8x128xf32>
    %619 = arith.addf %617, %618 : vector<8x128xf32>
    %620 = vector.extract_strided_slice %585 {offsets = [8, 384], sizes = [8, 384], strides = [1, 1]} : vector<16x768xf32> to vector<8x384xf32>
    %621 = vector.extract_strided_slice %577 {offsets = [8, 0], sizes = [8, 128], strides = [1, 1]} : vector<16x128xf32> to vector<8x128xf32>
    %622 = vector.extract_strided_slice %591 {offsets = [0, 0], sizes = [8, 128], strides = [1, 1]} : vector<8x384xf32> to vector<8x128xf32>
    %623 = vector.extract_strided_slice %620 {offsets = [0, 0], sizes = [8, 128], strides = [1, 1]} : vector<8x384xf32> to vector<8x128xf32>
    %624 = arith.addf %622, %623 : vector<8x128xf32>
    %625 = arith.negf %624 : vector<8x128xf32>
    %626 = math.exp %625 : vector<8x128xf32>
    %cst_116 = arith.constant 1.000000e+00 : f32
    %627 = vector.broadcast %cst_116 : f32 to vector<8x128xf32>
    %628 = arith.addf %627, %626 : vector<8x128xf32>
    %629 = arith.divf %627, %628 : vector<8x128xf32>
    %630 = vector.extract_strided_slice %591 {offsets = [0, 128], sizes = [8, 128], strides = [1, 1]} : vector<8x384xf32> to vector<8x128xf32>
    %631 = vector.extract_strided_slice %620 {offsets = [0, 128], sizes = [8, 128], strides = [1, 1]} : vector<8x384xf32> to vector<8x128xf32>
    %632 = arith.addf %630, %631 : vector<8x128xf32>
    %633 = arith.negf %632 : vector<8x128xf32>
    %634 = math.exp %633 : vector<8x128xf32>
    %cst_117 = arith.constant 1.000000e+00 : f32
    %635 = vector.broadcast %cst_117 : f32 to vector<8x128xf32>
    %636 = arith.addf %635, %634 : vector<8x128xf32>
    %637 = arith.divf %635, %636 : vector<8x128xf32>
    %638 = vector.extract_strided_slice %591 {offsets = [0, 256], sizes = [8, 128], strides = [1, 1]} : vector<8x384xf32> to vector<8x128xf32>
    %639 = vector.extract_strided_slice %620 {offsets = [0, 256], sizes = [8, 128], strides = [1, 1]} : vector<8x384xf32> to vector<8x128xf32>
    %640 = arith.mulf %629, %639 : vector<8x128xf32>
    %641 = arith.addf %638, %640 : vector<8x128xf32>
    %642 = math.tanh %641 : vector<8x128xf32>
    %cst_118 = arith.constant 1.000000e+00 : f32
    %643 = vector.broadcast %cst_118 : f32 to vector<8x128xf32>
    %644 = arith.subf %643, %637 : vector<8x128xf32>
    %645 = arith.mulf %644, %642 : vector<8x128xf32>
    %646 = arith.mulf %637, %621 : vector<8x128xf32>
    %647 = arith.addf %645, %646 : vector<8x128xf32>
    %648 = tpu.concatenate %619, %647 in 0 : vector<8x128xf32>, vector<8x128xf32> -> vector<16x128xf32>
    %c9_i32 = arith.constant 9 : i32
    %c8_i32_119 = arith.constant 8 : i32
    %649 = arith.muli %c9_i32, %c8_i32_119 : i32
    %650 = tpu.assume_multiple %649, 8 : i32
    %c15_i32_120 = arith.constant 15 : i32
    %651 = arith.subi %c15_i32_120, %c9_i32 : i32
    %c8_i32_121 = arith.constant 8 : i32
    %652 = arith.muli %651, %c8_i32_121 : i32
    %653 = tpu.assume_multiple %652, 8 : i32
    %cst_122 = arith.constant dense<0.000000e+00> : vector<16x768xf32>
    %654 = tpu.matmul %648, %7, %cst_122 {dimension_numbers = #tpu.dot_dimension_numbers<[1], [0], [0], [1], [0, 0, 1, 1], [], []>} : vector<16x128xf32>, vector<128x768xf32>, vector<16x768xf32> -> vector<16x768xf32>
    %655 = vector.broadcast %8 : vector<1x768xf32> to vector<16x768xf32>
    %656 = arith.addf %654, %655 : vector<16x768xf32>
    %657 = arith.index_cast %650 : i32 to index
    %c0_123 = arith.constant 0 : index
    %658 = vector.load %arg13[%657, %c0_123] : memref<128x768xf32, #tpu.memory_space<vmem>>, vector<8x768xf32>
    %659 = vector.extract_strided_slice %658 {offsets = [0, 0], sizes = [8, 384], strides = [1, 1]} : vector<8x768xf32> to vector<8x384xf32>
    %660 = arith.index_cast %653 : i32 to index
    %c0_124 = arith.constant 0 : index
    %661 = vector.load %arg13[%660, %c0_124] : memref<128x768xf32, #tpu.memory_space<vmem>>, vector<8x768xf32>
    %662 = vector.extract_strided_slice %661 {offsets = [0, 384], sizes = [8, 384], strides = [1, 1]} : vector<8x768xf32> to vector<8x384xf32>
    %663 = vector.extract_strided_slice %656 {offsets = [0, 0], sizes = [8, 384], strides = [1, 1]} : vector<16x768xf32> to vector<8x384xf32>
    %664 = vector.extract_strided_slice %648 {offsets = [0, 0], sizes = [8, 128], strides = [1, 1]} : vector<16x128xf32> to vector<8x128xf32>
    %665 = vector.extract_strided_slice %659 {offsets = [0, 0], sizes = [8, 128], strides = [1, 1]} : vector<8x384xf32> to vector<8x128xf32>
    %666 = vector.extract_strided_slice %663 {offsets = [0, 0], sizes = [8, 128], strides = [1, 1]} : vector<8x384xf32> to vector<8x128xf32>
    %667 = arith.addf %665, %666 : vector<8x128xf32>
    %668 = arith.negf %667 : vector<8x128xf32>
    %669 = math.exp %668 : vector<8x128xf32>
    %cst_125 = arith.constant 1.000000e+00 : f32
    %670 = vector.broadcast %cst_125 : f32 to vector<8x128xf32>
    %671 = arith.addf %670, %669 : vector<8x128xf32>
    %672 = arith.divf %670, %671 : vector<8x128xf32>
    %673 = vector.extract_strided_slice %659 {offsets = [0, 128], sizes = [8, 128], strides = [1, 1]} : vector<8x384xf32> to vector<8x128xf32>
    %674 = vector.extract_strided_slice %663 {offsets = [0, 128], sizes = [8, 128], strides = [1, 1]} : vector<8x384xf32> to vector<8x128xf32>
    %675 = arith.addf %673, %674 : vector<8x128xf32>
    %676 = arith.negf %675 : vector<8x128xf32>
    %677 = math.exp %676 : vector<8x128xf32>
    %cst_126 = arith.constant 1.000000e+00 : f32
    %678 = vector.broadcast %cst_126 : f32 to vector<8x128xf32>
    %679 = arith.addf %678, %677 : vector<8x128xf32>
    %680 = arith.divf %678, %679 : vector<8x128xf32>
    %681 = vector.extract_strided_slice %659 {offsets = [0, 256], sizes = [8, 128], strides = [1, 1]} : vector<8x384xf32> to vector<8x128xf32>
    %682 = vector.extract_strided_slice %663 {offsets = [0, 256], sizes = [8, 128], strides = [1, 1]} : vector<8x384xf32> to vector<8x128xf32>
    %683 = arith.mulf %672, %682 : vector<8x128xf32>
    %684 = arith.addf %681, %683 : vector<8x128xf32>
    %685 = math.tanh %684 : vector<8x128xf32>
    %cst_127 = arith.constant 1.000000e+00 : f32
    %686 = vector.broadcast %cst_127 : f32 to vector<8x128xf32>
    %687 = arith.subf %686, %680 : vector<8x128xf32>
    %688 = arith.mulf %687, %685 : vector<8x128xf32>
    %689 = arith.mulf %680, %664 : vector<8x128xf32>
    %690 = arith.addf %688, %689 : vector<8x128xf32>
    %691 = vector.extract_strided_slice %656 {offsets = [8, 384], sizes = [8, 384], strides = [1, 1]} : vector<16x768xf32> to vector<8x384xf32>
    %692 = vector.extract_strided_slice %648 {offsets = [8, 0], sizes = [8, 128], strides = [1, 1]} : vector<16x128xf32> to vector<8x128xf32>
    %693 = vector.extract_strided_slice %662 {offsets = [0, 0], sizes = [8, 128], strides = [1, 1]} : vector<8x384xf32> to vector<8x128xf32>
    %694 = vector.extract_strided_slice %691 {offsets = [0, 0], sizes = [8, 128], strides = [1, 1]} : vector<8x384xf32> to vector<8x128xf32>
    %695 = arith.addf %693, %694 : vector<8x128xf32>
    %696 = arith.negf %695 : vector<8x128xf32>
    %697 = math.exp %696 : vector<8x128xf32>
    %cst_128 = arith.constant 1.000000e+00 : f32
    %698 = vector.broadcast %cst_128 : f32 to vector<8x128xf32>
    %699 = arith.addf %698, %697 : vector<8x128xf32>
    %700 = arith.divf %698, %699 : vector<8x128xf32>
    %701 = vector.extract_strided_slice %662 {offsets = [0, 128], sizes = [8, 128], strides = [1, 1]} : vector<8x384xf32> to vector<8x128xf32>
    %702 = vector.extract_strided_slice %691 {offsets = [0, 128], sizes = [8, 128], strides = [1, 1]} : vector<8x384xf32> to vector<8x128xf32>
    %703 = arith.addf %701, %702 : vector<8x128xf32>
    %704 = arith.negf %703 : vector<8x128xf32>
    %705 = math.exp %704 : vector<8x128xf32>
    %cst_129 = arith.constant 1.000000e+00 : f32
    %706 = vector.broadcast %cst_129 : f32 to vector<8x128xf32>
    %707 = arith.addf %706, %705 : vector<8x128xf32>
    %708 = arith.divf %706, %707 : vector<8x128xf32>
    %709 = vector.extract_strided_slice %662 {offsets = [0, 256], sizes = [8, 128], strides = [1, 1]} : vector<8x384xf32> to vector<8x128xf32>
    %710 = vector.extract_strided_slice %691 {offsets = [0, 256], sizes = [8, 128], strides = [1, 1]} : vector<8x384xf32> to vector<8x128xf32>
    %711 = arith.mulf %700, %710 : vector<8x128xf32>
    %712 = arith.addf %709, %711 : vector<8x128xf32>
    %713 = math.tanh %712 : vector<8x128xf32>
    %cst_130 = arith.constant 1.000000e+00 : f32
    %714 = vector.broadcast %cst_130 : f32 to vector<8x128xf32>
    %715 = arith.subf %714, %708 : vector<8x128xf32>
    %716 = arith.mulf %715, %713 : vector<8x128xf32>
    %717 = arith.mulf %708, %692 : vector<8x128xf32>
    %718 = arith.addf %716, %717 : vector<8x128xf32>
    %719 = tpu.concatenate %690, %718 in 0 : vector<8x128xf32>, vector<8x128xf32> -> vector<16x128xf32>
    %c10_i32 = arith.constant 10 : i32
    %c8_i32_131 = arith.constant 8 : i32
    %720 = arith.muli %c10_i32, %c8_i32_131 : i32
    %721 = tpu.assume_multiple %720, 8 : i32
    %c15_i32_132 = arith.constant 15 : i32
    %722 = arith.subi %c15_i32_132, %c10_i32 : i32
    %c8_i32_133 = arith.constant 8 : i32
    %723 = arith.muli %722, %c8_i32_133 : i32
    %724 = tpu.assume_multiple %723, 8 : i32
    %cst_134 = arith.constant dense<0.000000e+00> : vector<16x768xf32>
    %725 = tpu.matmul %719, %7, %cst_134 {dimension_numbers = #tpu.dot_dimension_numbers<[1], [0], [0], [1], [0, 0, 1, 1], [], []>} : vector<16x128xf32>, vector<128x768xf32>, vector<16x768xf32> -> vector<16x768xf32>
    %726 = vector.broadcast %8 : vector<1x768xf32> to vector<16x768xf32>
    %727 = arith.addf %725, %726 : vector<16x768xf32>
    %728 = arith.index_cast %721 : i32 to index
    %c0_135 = arith.constant 0 : index
    %729 = vector.load %arg13[%728, %c0_135] : memref<128x768xf32, #tpu.memory_space<vmem>>, vector<8x768xf32>
    %730 = vector.extract_strided_slice %729 {offsets = [0, 0], sizes = [8, 384], strides = [1, 1]} : vector<8x768xf32> to vector<8x384xf32>
    %731 = arith.index_cast %724 : i32 to index
    %c0_136 = arith.constant 0 : index
    %732 = vector.load %arg13[%731, %c0_136] : memref<128x768xf32, #tpu.memory_space<vmem>>, vector<8x768xf32>
    %733 = vector.extract_strided_slice %732 {offsets = [0, 384], sizes = [8, 384], strides = [1, 1]} : vector<8x768xf32> to vector<8x384xf32>
    %734 = vector.extract_strided_slice %727 {offsets = [0, 0], sizes = [8, 384], strides = [1, 1]} : vector<16x768xf32> to vector<8x384xf32>
    %735 = vector.extract_strided_slice %719 {offsets = [0, 0], sizes = [8, 128], strides = [1, 1]} : vector<16x128xf32> to vector<8x128xf32>
    %736 = vector.extract_strided_slice %730 {offsets = [0, 0], sizes = [8, 128], strides = [1, 1]} : vector<8x384xf32> to vector<8x128xf32>
    %737 = vector.extract_strided_slice %734 {offsets = [0, 0], sizes = [8, 128], strides = [1, 1]} : vector<8x384xf32> to vector<8x128xf32>
    %738 = arith.addf %736, %737 : vector<8x128xf32>
    %739 = arith.negf %738 : vector<8x128xf32>
    %740 = math.exp %739 : vector<8x128xf32>
    %cst_137 = arith.constant 1.000000e+00 : f32
    %741 = vector.broadcast %cst_137 : f32 to vector<8x128xf32>
    %742 = arith.addf %741, %740 : vector<8x128xf32>
    %743 = arith.divf %741, %742 : vector<8x128xf32>
    %744 = vector.extract_strided_slice %730 {offsets = [0, 128], sizes = [8, 128], strides = [1, 1]} : vector<8x384xf32> to vector<8x128xf32>
    %745 = vector.extract_strided_slice %734 {offsets = [0, 128], sizes = [8, 128], strides = [1, 1]} : vector<8x384xf32> to vector<8x128xf32>
    %746 = arith.addf %744, %745 : vector<8x128xf32>
    %747 = arith.negf %746 : vector<8x128xf32>
    %748 = math.exp %747 : vector<8x128xf32>
    %cst_138 = arith.constant 1.000000e+00 : f32
    %749 = vector.broadcast %cst_138 : f32 to vector<8x128xf32>
    %750 = arith.addf %749, %748 : vector<8x128xf32>
    %751 = arith.divf %749, %750 : vector<8x128xf32>
    %752 = vector.extract_strided_slice %730 {offsets = [0, 256], sizes = [8, 128], strides = [1, 1]} : vector<8x384xf32> to vector<8x128xf32>
    %753 = vector.extract_strided_slice %734 {offsets = [0, 256], sizes = [8, 128], strides = [1, 1]} : vector<8x384xf32> to vector<8x128xf32>
    %754 = arith.mulf %743, %753 : vector<8x128xf32>
    %755 = arith.addf %752, %754 : vector<8x128xf32>
    %756 = math.tanh %755 : vector<8x128xf32>
    %cst_139 = arith.constant 1.000000e+00 : f32
    %757 = vector.broadcast %cst_139 : f32 to vector<8x128xf32>
    %758 = arith.subf %757, %751 : vector<8x128xf32>
    %759 = arith.mulf %758, %756 : vector<8x128xf32>
    %760 = arith.mulf %751, %735 : vector<8x128xf32>
    %761 = arith.addf %759, %760 : vector<8x128xf32>
    %762 = vector.extract_strided_slice %727 {offsets = [8, 384], sizes = [8, 384], strides = [1, 1]} : vector<16x768xf32> to vector<8x384xf32>
    %763 = vector.extract_strided_slice %719 {offsets = [8, 0], sizes = [8, 128], strides = [1, 1]} : vector<16x128xf32> to vector<8x128xf32>
    %764 = vector.extract_strided_slice %733 {offsets = [0, 0], sizes = [8, 128], strides = [1, 1]} : vector<8x384xf32> to vector<8x128xf32>
    %765 = vector.extract_strided_slice %762 {offsets = [0, 0], sizes = [8, 128], strides = [1, 1]} : vector<8x384xf32> to vector<8x128xf32>
    %766 = arith.addf %764, %765 : vector<8x128xf32>
    %767 = arith.negf %766 : vector<8x128xf32>
    %768 = math.exp %767 : vector<8x128xf32>
    %cst_140 = arith.constant 1.000000e+00 : f32
    %769 = vector.broadcast %cst_140 : f32 to vector<8x128xf32>
    %770 = arith.addf %769, %768 : vector<8x128xf32>
    %771 = arith.divf %769, %770 : vector<8x128xf32>
    %772 = vector.extract_strided_slice %733 {offsets = [0, 128], sizes = [8, 128], strides = [1, 1]} : vector<8x384xf32> to vector<8x128xf32>
    %773 = vector.extract_strided_slice %762 {offsets = [0, 128], sizes = [8, 128], strides = [1, 1]} : vector<8x384xf32> to vector<8x128xf32>
    %774 = arith.addf %772, %773 : vector<8x128xf32>
    %775 = arith.negf %774 : vector<8x128xf32>
    %776 = math.exp %775 : vector<8x128xf32>
    %cst_141 = arith.constant 1.000000e+00 : f32
    %777 = vector.broadcast %cst_141 : f32 to vector<8x128xf32>
    %778 = arith.addf %777, %776 : vector<8x128xf32>
    %779 = arith.divf %777, %778 : vector<8x128xf32>
    %780 = vector.extract_strided_slice %733 {offsets = [0, 256], sizes = [8, 128], strides = [1, 1]} : vector<8x384xf32> to vector<8x128xf32>
    %781 = vector.extract_strided_slice %762 {offsets = [0, 256], sizes = [8, 128], strides = [1, 1]} : vector<8x384xf32> to vector<8x128xf32>
    %782 = arith.mulf %771, %781 : vector<8x128xf32>
    %783 = arith.addf %780, %782 : vector<8x128xf32>
    %784 = math.tanh %783 : vector<8x128xf32>
    %cst_142 = arith.constant 1.000000e+00 : f32
    %785 = vector.broadcast %cst_142 : f32 to vector<8x128xf32>
    %786 = arith.subf %785, %779 : vector<8x128xf32>
    %787 = arith.mulf %786, %784 : vector<8x128xf32>
    %788 = arith.mulf %779, %763 : vector<8x128xf32>
    %789 = arith.addf %787, %788 : vector<8x128xf32>
    %790 = tpu.concatenate %761, %789 in 0 : vector<8x128xf32>, vector<8x128xf32> -> vector<16x128xf32>
    %c11_i32 = arith.constant 11 : i32
    %c8_i32_143 = arith.constant 8 : i32
    %791 = arith.muli %c11_i32, %c8_i32_143 : i32
    %792 = tpu.assume_multiple %791, 8 : i32
    %c15_i32_144 = arith.constant 15 : i32
    %793 = arith.subi %c15_i32_144, %c11_i32 : i32
    %c8_i32_145 = arith.constant 8 : i32
    %794 = arith.muli %793, %c8_i32_145 : i32
    %795 = tpu.assume_multiple %794, 8 : i32
    %cst_146 = arith.constant dense<0.000000e+00> : vector<16x768xf32>
    %796 = tpu.matmul %790, %7, %cst_146 {dimension_numbers = #tpu.dot_dimension_numbers<[1], [0], [0], [1], [0, 0, 1, 1], [], []>} : vector<16x128xf32>, vector<128x768xf32>, vector<16x768xf32> -> vector<16x768xf32>
    %797 = vector.broadcast %8 : vector<1x768xf32> to vector<16x768xf32>
    %798 = arith.addf %796, %797 : vector<16x768xf32>
    %799 = arith.index_cast %792 : i32 to index
    %c0_147 = arith.constant 0 : index
    %800 = vector.load %arg13[%799, %c0_147] : memref<128x768xf32, #tpu.memory_space<vmem>>, vector<8x768xf32>
    %801 = vector.extract_strided_slice %800 {offsets = [0, 0], sizes = [8, 384], strides = [1, 1]} : vector<8x768xf32> to vector<8x384xf32>
    %802 = arith.index_cast %795 : i32 to index
    %c0_148 = arith.constant 0 : index
    %803 = vector.load %arg13[%802, %c0_148] : memref<128x768xf32, #tpu.memory_space<vmem>>, vector<8x768xf32>
    %804 = vector.extract_strided_slice %803 {offsets = [0, 384], sizes = [8, 384], strides = [1, 1]} : vector<8x768xf32> to vector<8x384xf32>
    %805 = vector.extract_strided_slice %798 {offsets = [0, 0], sizes = [8, 384], strides = [1, 1]} : vector<16x768xf32> to vector<8x384xf32>
    %806 = vector.extract_strided_slice %790 {offsets = [0, 0], sizes = [8, 128], strides = [1, 1]} : vector<16x128xf32> to vector<8x128xf32>
    %807 = vector.extract_strided_slice %801 {offsets = [0, 0], sizes = [8, 128], strides = [1, 1]} : vector<8x384xf32> to vector<8x128xf32>
    %808 = vector.extract_strided_slice %805 {offsets = [0, 0], sizes = [8, 128], strides = [1, 1]} : vector<8x384xf32> to vector<8x128xf32>
    %809 = arith.addf %807, %808 : vector<8x128xf32>
    %810 = arith.negf %809 : vector<8x128xf32>
    %811 = math.exp %810 : vector<8x128xf32>
    %cst_149 = arith.constant 1.000000e+00 : f32
    %812 = vector.broadcast %cst_149 : f32 to vector<8x128xf32>
    %813 = arith.addf %812, %811 : vector<8x128xf32>
    %814 = arith.divf %812, %813 : vector<8x128xf32>
    %815 = vector.extract_strided_slice %801 {offsets = [0, 128], sizes = [8, 128], strides = [1, 1]} : vector<8x384xf32> to vector<8x128xf32>
    %816 = vector.extract_strided_slice %805 {offsets = [0, 128], sizes = [8, 128], strides = [1, 1]} : vector<8x384xf32> to vector<8x128xf32>
    %817 = arith.addf %815, %816 : vector<8x128xf32>
    %818 = arith.negf %817 : vector<8x128xf32>
    %819 = math.exp %818 : vector<8x128xf32>
    %cst_150 = arith.constant 1.000000e+00 : f32
    %820 = vector.broadcast %cst_150 : f32 to vector<8x128xf32>
    %821 = arith.addf %820, %819 : vector<8x128xf32>
    %822 = arith.divf %820, %821 : vector<8x128xf32>
    %823 = vector.extract_strided_slice %801 {offsets = [0, 256], sizes = [8, 128], strides = [1, 1]} : vector<8x384xf32> to vector<8x128xf32>
    %824 = vector.extract_strided_slice %805 {offsets = [0, 256], sizes = [8, 128], strides = [1, 1]} : vector<8x384xf32> to vector<8x128xf32>
    %825 = arith.mulf %814, %824 : vector<8x128xf32>
    %826 = arith.addf %823, %825 : vector<8x128xf32>
    %827 = math.tanh %826 : vector<8x128xf32>
    %cst_151 = arith.constant 1.000000e+00 : f32
    %828 = vector.broadcast %cst_151 : f32 to vector<8x128xf32>
    %829 = arith.subf %828, %822 : vector<8x128xf32>
    %830 = arith.mulf %829, %827 : vector<8x128xf32>
    %831 = arith.mulf %822, %806 : vector<8x128xf32>
    %832 = arith.addf %830, %831 : vector<8x128xf32>
    %833 = vector.extract_strided_slice %798 {offsets = [8, 384], sizes = [8, 384], strides = [1, 1]} : vector<16x768xf32> to vector<8x384xf32>
    %834 = vector.extract_strided_slice %790 {offsets = [8, 0], sizes = [8, 128], strides = [1, 1]} : vector<16x128xf32> to vector<8x128xf32>
    %835 = vector.extract_strided_slice %804 {offsets = [0, 0], sizes = [8, 128], strides = [1, 1]} : vector<8x384xf32> to vector<8x128xf32>
    %836 = vector.extract_strided_slice %833 {offsets = [0, 0], sizes = [8, 128], strides = [1, 1]} : vector<8x384xf32> to vector<8x128xf32>
    %837 = arith.addf %835, %836 : vector<8x128xf32>
    %838 = arith.negf %837 : vector<8x128xf32>
    %839 = math.exp %838 : vector<8x128xf32>
    %cst_152 = arith.constant 1.000000e+00 : f32
    %840 = vector.broadcast %cst_152 : f32 to vector<8x128xf32>
    %841 = arith.addf %840, %839 : vector<8x128xf32>
    %842 = arith.divf %840, %841 : vector<8x128xf32>
    %843 = vector.extract_strided_slice %804 {offsets = [0, 128], sizes = [8, 128], strides = [1, 1]} : vector<8x384xf32> to vector<8x128xf32>
    %844 = vector.extract_strided_slice %833 {offsets = [0, 128], sizes = [8, 128], strides = [1, 1]} : vector<8x384xf32> to vector<8x128xf32>
    %845 = arith.addf %843, %844 : vector<8x128xf32>
    %846 = arith.negf %845 : vector<8x128xf32>
    %847 = math.exp %846 : vector<8x128xf32>
    %cst_153 = arith.constant 1.000000e+00 : f32
    %848 = vector.broadcast %cst_153 : f32 to vector<8x128xf32>
    %849 = arith.addf %848, %847 : vector<8x128xf32>
    %850 = arith.divf %848, %849 : vector<8x128xf32>
    %851 = vector.extract_strided_slice %804 {offsets = [0, 256], sizes = [8, 128], strides = [1, 1]} : vector<8x384xf32> to vector<8x128xf32>
    %852 = vector.extract_strided_slice %833 {offsets = [0, 256], sizes = [8, 128], strides = [1, 1]} : vector<8x384xf32> to vector<8x128xf32>
    %853 = arith.mulf %842, %852 : vector<8x128xf32>
    %854 = arith.addf %851, %853 : vector<8x128xf32>
    %855 = math.tanh %854 : vector<8x128xf32>
    %cst_154 = arith.constant 1.000000e+00 : f32
    %856 = vector.broadcast %cst_154 : f32 to vector<8x128xf32>
    %857 = arith.subf %856, %850 : vector<8x128xf32>
    %858 = arith.mulf %857, %855 : vector<8x128xf32>
    %859 = arith.mulf %850, %834 : vector<8x128xf32>
    %860 = arith.addf %858, %859 : vector<8x128xf32>
    %861 = tpu.concatenate %832, %860 in 0 : vector<8x128xf32>, vector<8x128xf32> -> vector<16x128xf32>
    %c12_i32 = arith.constant 12 : i32
    %c8_i32_155 = arith.constant 8 : i32
    %862 = arith.muli %c12_i32, %c8_i32_155 : i32
    %863 = tpu.assume_multiple %862, 8 : i32
    %c15_i32_156 = arith.constant 15 : i32
    %864 = arith.subi %c15_i32_156, %c12_i32 : i32
    %c8_i32_157 = arith.constant 8 : i32
    %865 = arith.muli %864, %c8_i32_157 : i32
    %866 = tpu.assume_multiple %865, 8 : i32
    %cst_158 = arith.constant dense<0.000000e+00> : vector<16x768xf32>
    %867 = tpu.matmul %861, %7, %cst_158 {dimension_numbers = #tpu.dot_dimension_numbers<[1], [0], [0], [1], [0, 0, 1, 1], [], []>} : vector<16x128xf32>, vector<128x768xf32>, vector<16x768xf32> -> vector<16x768xf32>
    %868 = vector.broadcast %8 : vector<1x768xf32> to vector<16x768xf32>
    %869 = arith.addf %867, %868 : vector<16x768xf32>
    %870 = arith.index_cast %863 : i32 to index
    %c0_159 = arith.constant 0 : index
    %871 = vector.load %arg13[%870, %c0_159] : memref<128x768xf32, #tpu.memory_space<vmem>>, vector<8x768xf32>
    %872 = vector.extract_strided_slice %871 {offsets = [0, 0], sizes = [8, 384], strides = [1, 1]} : vector<8x768xf32> to vector<8x384xf32>
    %873 = arith.index_cast %866 : i32 to index
    %c0_160 = arith.constant 0 : index
    %874 = vector.load %arg13[%873, %c0_160] : memref<128x768xf32, #tpu.memory_space<vmem>>, vector<8x768xf32>
    %875 = vector.extract_strided_slice %874 {offsets = [0, 384], sizes = [8, 384], strides = [1, 1]} : vector<8x768xf32> to vector<8x384xf32>
    %876 = vector.extract_strided_slice %869 {offsets = [0, 0], sizes = [8, 384], strides = [1, 1]} : vector<16x768xf32> to vector<8x384xf32>
    %877 = vector.extract_strided_slice %861 {offsets = [0, 0], sizes = [8, 128], strides = [1, 1]} : vector<16x128xf32> to vector<8x128xf32>
    %878 = vector.extract_strided_slice %872 {offsets = [0, 0], sizes = [8, 128], strides = [1, 1]} : vector<8x384xf32> to vector<8x128xf32>
    %879 = vector.extract_strided_slice %876 {offsets = [0, 0], sizes = [8, 128], strides = [1, 1]} : vector<8x384xf32> to vector<8x128xf32>
    %880 = arith.addf %878, %879 : vector<8x128xf32>
    %881 = arith.negf %880 : vector<8x128xf32>
    %882 = math.exp %881 : vector<8x128xf32>
    %cst_161 = arith.constant 1.000000e+00 : f32
    %883 = vector.broadcast %cst_161 : f32 to vector<8x128xf32>
    %884 = arith.addf %883, %882 : vector<8x128xf32>
    %885 = arith.divf %883, %884 : vector<8x128xf32>
    %886 = vector.extract_strided_slice %872 {offsets = [0, 128], sizes = [8, 128], strides = [1, 1]} : vector<8x384xf32> to vector<8x128xf32>
    %887 = vector.extract_strided_slice %876 {offsets = [0, 128], sizes = [8, 128], strides = [1, 1]} : vector<8x384xf32> to vector<8x128xf32>
    %888 = arith.addf %886, %887 : vector<8x128xf32>
    %889 = arith.negf %888 : vector<8x128xf32>
    %890 = math.exp %889 : vector<8x128xf32>
    %cst_162 = arith.constant 1.000000e+00 : f32
    %891 = vector.broadcast %cst_162 : f32 to vector<8x128xf32>
    %892 = arith.addf %891, %890 : vector<8x128xf32>
    %893 = arith.divf %891, %892 : vector<8x128xf32>
    %894 = vector.extract_strided_slice %872 {offsets = [0, 256], sizes = [8, 128], strides = [1, 1]} : vector<8x384xf32> to vector<8x128xf32>
    %895 = vector.extract_strided_slice %876 {offsets = [0, 256], sizes = [8, 128], strides = [1, 1]} : vector<8x384xf32> to vector<8x128xf32>
    %896 = arith.mulf %885, %895 : vector<8x128xf32>
    %897 = arith.addf %894, %896 : vector<8x128xf32>
    %898 = math.tanh %897 : vector<8x128xf32>
    %cst_163 = arith.constant 1.000000e+00 : f32
    %899 = vector.broadcast %cst_163 : f32 to vector<8x128xf32>
    %900 = arith.subf %899, %893 : vector<8x128xf32>
    %901 = arith.mulf %900, %898 : vector<8x128xf32>
    %902 = arith.mulf %893, %877 : vector<8x128xf32>
    %903 = arith.addf %901, %902 : vector<8x128xf32>
    %904 = vector.extract_strided_slice %869 {offsets = [8, 384], sizes = [8, 384], strides = [1, 1]} : vector<16x768xf32> to vector<8x384xf32>
    %905 = vector.extract_strided_slice %861 {offsets = [8, 0], sizes = [8, 128], strides = [1, 1]} : vector<16x128xf32> to vector<8x128xf32>
    %906 = vector.extract_strided_slice %875 {offsets = [0, 0], sizes = [8, 128], strides = [1, 1]} : vector<8x384xf32> to vector<8x128xf32>
    %907 = vector.extract_strided_slice %904 {offsets = [0, 0], sizes = [8, 128], strides = [1, 1]} : vector<8x384xf32> to vector<8x128xf32>
    %908 = arith.addf %906, %907 : vector<8x128xf32>
    %909 = arith.negf %908 : vector<8x128xf32>
    %910 = math.exp %909 : vector<8x128xf32>
    %cst_164 = arith.constant 1.000000e+00 : f32
    %911 = vector.broadcast %cst_164 : f32 to vector<8x128xf32>
    %912 = arith.addf %911, %910 : vector<8x128xf32>
    %913 = arith.divf %911, %912 : vector<8x128xf32>
    %914 = vector.extract_strided_slice %875 {offsets = [0, 128], sizes = [8, 128], strides = [1, 1]} : vector<8x384xf32> to vector<8x128xf32>
    %915 = vector.extract_strided_slice %904 {offsets = [0, 128], sizes = [8, 128], strides = [1, 1]} : vector<8x384xf32> to vector<8x128xf32>
    %916 = arith.addf %914, %915 : vector<8x128xf32>
    %917 = arith.negf %916 : vector<8x128xf32>
    %918 = math.exp %917 : vector<8x128xf32>
    %cst_165 = arith.constant 1.000000e+00 : f32
    %919 = vector.broadcast %cst_165 : f32 to vector<8x128xf32>
    %920 = arith.addf %919, %918 : vector<8x128xf32>
    %921 = arith.divf %919, %920 : vector<8x128xf32>
    %922 = vector.extract_strided_slice %875 {offsets = [0, 256], sizes = [8, 128], strides = [1, 1]} : vector<8x384xf32> to vector<8x128xf32>
    %923 = vector.extract_strided_slice %904 {offsets = [0, 256], sizes = [8, 128], strides = [1, 1]} : vector<8x384xf32> to vector<8x128xf32>
    %924 = arith.mulf %913, %923 : vector<8x128xf32>
    %925 = arith.addf %922, %924 : vector<8x128xf32>
    %926 = math.tanh %925 : vector<8x128xf32>
    %cst_166 = arith.constant 1.000000e+00 : f32
    %927 = vector.broadcast %cst_166 : f32 to vector<8x128xf32>
    %928 = arith.subf %927, %921 : vector<8x128xf32>
    %929 = arith.mulf %928, %926 : vector<8x128xf32>
    %930 = arith.mulf %921, %905 : vector<8x128xf32>
    %931 = arith.addf %929, %930 : vector<8x128xf32>
    %932 = tpu.concatenate %903, %931 in 0 : vector<8x128xf32>, vector<8x128xf32> -> vector<16x128xf32>
    %c13_i32 = arith.constant 13 : i32
    %c8_i32_167 = arith.constant 8 : i32
    %933 = arith.muli %c13_i32, %c8_i32_167 : i32
    %934 = tpu.assume_multiple %933, 8 : i32
    %c15_i32_168 = arith.constant 15 : i32
    %935 = arith.subi %c15_i32_168, %c13_i32 : i32
    %c8_i32_169 = arith.constant 8 : i32
    %936 = arith.muli %935, %c8_i32_169 : i32
    %937 = tpu.assume_multiple %936, 8 : i32
    %cst_170 = arith.constant dense<0.000000e+00> : vector<16x768xf32>
    %938 = tpu.matmul %932, %7, %cst_170 {dimension_numbers = #tpu.dot_dimension_numbers<[1], [0], [0], [1], [0, 0, 1, 1], [], []>} : vector<16x128xf32>, vector<128x768xf32>, vector<16x768xf32> -> vector<16x768xf32>
    %939 = vector.broadcast %8 : vector<1x768xf32> to vector<16x768xf32>
    %940 = arith.addf %938, %939 : vector<16x768xf32>
    %941 = arith.index_cast %934 : i32 to index
    %c0_171 = arith.constant 0 : index
    %942 = vector.load %arg13[%941, %c0_171] : memref<128x768xf32, #tpu.memory_space<vmem>>, vector<8x768xf32>
    %943 = vector.extract_strided_slice %942 {offsets = [0, 0], sizes = [8, 384], strides = [1, 1]} : vector<8x768xf32> to vector<8x384xf32>
    %944 = arith.index_cast %937 : i32 to index
    %c0_172 = arith.constant 0 : index
    %945 = vector.load %arg13[%944, %c0_172] : memref<128x768xf32, #tpu.memory_space<vmem>>, vector<8x768xf32>
    %946 = vector.extract_strided_slice %945 {offsets = [0, 384], sizes = [8, 384], strides = [1, 1]} : vector<8x768xf32> to vector<8x384xf32>
    %947 = vector.extract_strided_slice %940 {offsets = [0, 0], sizes = [8, 384], strides = [1, 1]} : vector<16x768xf32> to vector<8x384xf32>
    %948 = vector.extract_strided_slice %932 {offsets = [0, 0], sizes = [8, 128], strides = [1, 1]} : vector<16x128xf32> to vector<8x128xf32>
    %949 = vector.extract_strided_slice %943 {offsets = [0, 0], sizes = [8, 128], strides = [1, 1]} : vector<8x384xf32> to vector<8x128xf32>
    %950 = vector.extract_strided_slice %947 {offsets = [0, 0], sizes = [8, 128], strides = [1, 1]} : vector<8x384xf32> to vector<8x128xf32>
    %951 = arith.addf %949, %950 : vector<8x128xf32>
    %952 = arith.negf %951 : vector<8x128xf32>
    %953 = math.exp %952 : vector<8x128xf32>
    %cst_173 = arith.constant 1.000000e+00 : f32
    %954 = vector.broadcast %cst_173 : f32 to vector<8x128xf32>
    %955 = arith.addf %954, %953 : vector<8x128xf32>
    %956 = arith.divf %954, %955 : vector<8x128xf32>
    %957 = vector.extract_strided_slice %943 {offsets = [0, 128], sizes = [8, 128], strides = [1, 1]} : vector<8x384xf32> to vector<8x128xf32>
    %958 = vector.extract_strided_slice %947 {offsets = [0, 128], sizes = [8, 128], strides = [1, 1]} : vector<8x384xf32> to vector<8x128xf32>
    %959 = arith.addf %957, %958 : vector<8x128xf32>
    %960 = arith.negf %959 : vector<8x128xf32>
    %961 = math.exp %960 : vector<8x128xf32>
    %cst_174 = arith.constant 1.000000e+00 : f32
    %962 = vector.broadcast %cst_174 : f32 to vector<8x128xf32>
    %963 = arith.addf %962, %961 : vector<8x128xf32>
    %964 = arith.divf %962, %963 : vector<8x128xf32>
    %965 = vector.extract_strided_slice %943 {offsets = [0, 256], sizes = [8, 128], strides = [1, 1]} : vector<8x384xf32> to vector<8x128xf32>
    %966 = vector.extract_strided_slice %947 {offsets = [0, 256], sizes = [8, 128], strides = [1, 1]} : vector<8x384xf32> to vector<8x128xf32>
    %967 = arith.mulf %956, %966 : vector<8x128xf32>
    %968 = arith.addf %965, %967 : vector<8x128xf32>
    %969 = math.tanh %968 : vector<8x128xf32>
    %cst_175 = arith.constant 1.000000e+00 : f32
    %970 = vector.broadcast %cst_175 : f32 to vector<8x128xf32>
    %971 = arith.subf %970, %964 : vector<8x128xf32>
    %972 = arith.mulf %971, %969 : vector<8x128xf32>
    %973 = arith.mulf %964, %948 : vector<8x128xf32>
    %974 = arith.addf %972, %973 : vector<8x128xf32>
    %975 = vector.extract_strided_slice %940 {offsets = [8, 384], sizes = [8, 384], strides = [1, 1]} : vector<16x768xf32> to vector<8x384xf32>
    %976 = vector.extract_strided_slice %932 {offsets = [8, 0], sizes = [8, 128], strides = [1, 1]} : vector<16x128xf32> to vector<8x128xf32>
    %977 = vector.extract_strided_slice %946 {offsets = [0, 0], sizes = [8, 128], strides = [1, 1]} : vector<8x384xf32> to vector<8x128xf32>
    %978 = vector.extract_strided_slice %975 {offsets = [0, 0], sizes = [8, 128], strides = [1, 1]} : vector<8x384xf32> to vector<8x128xf32>
    %979 = arith.addf %977, %978 : vector<8x128xf32>
    %980 = arith.negf %979 : vector<8x128xf32>
    %981 = math.exp %980 : vector<8x128xf32>
    %cst_176 = arith.constant 1.000000e+00 : f32
    %982 = vector.broadcast %cst_176 : f32 to vector<8x128xf32>
    %983 = arith.addf %982, %981 : vector<8x128xf32>
    %984 = arith.divf %982, %983 : vector<8x128xf32>
    %985 = vector.extract_strided_slice %946 {offsets = [0, 128], sizes = [8, 128], strides = [1, 1]} : vector<8x384xf32> to vector<8x128xf32>
    %986 = vector.extract_strided_slice %975 {offsets = [0, 128], sizes = [8, 128], strides = [1, 1]} : vector<8x384xf32> to vector<8x128xf32>
    %987 = arith.addf %985, %986 : vector<8x128xf32>
    %988 = arith.negf %987 : vector<8x128xf32>
    %989 = math.exp %988 : vector<8x128xf32>
    %cst_177 = arith.constant 1.000000e+00 : f32
    %990 = vector.broadcast %cst_177 : f32 to vector<8x128xf32>
    %991 = arith.addf %990, %989 : vector<8x128xf32>
    %992 = arith.divf %990, %991 : vector<8x128xf32>
    %993 = vector.extract_strided_slice %946 {offsets = [0, 256], sizes = [8, 128], strides = [1, 1]} : vector<8x384xf32> to vector<8x128xf32>
    %994 = vector.extract_strided_slice %975 {offsets = [0, 256], sizes = [8, 128], strides = [1, 1]} : vector<8x384xf32> to vector<8x128xf32>
    %995 = arith.mulf %984, %994 : vector<8x128xf32>
    %996 = arith.addf %993, %995 : vector<8x128xf32>
    %997 = math.tanh %996 : vector<8x128xf32>
    %cst_178 = arith.constant 1.000000e+00 : f32
    %998 = vector.broadcast %cst_178 : f32 to vector<8x128xf32>
    %999 = arith.subf %998, %992 : vector<8x128xf32>
    %1000 = arith.mulf %999, %997 : vector<8x128xf32>
    %1001 = arith.mulf %992, %976 : vector<8x128xf32>
    %1002 = arith.addf %1000, %1001 : vector<8x128xf32>
    %1003 = tpu.concatenate %974, %1002 in 0 : vector<8x128xf32>, vector<8x128xf32> -> vector<16x128xf32>
    %c14_i32 = arith.constant 14 : i32
    %c8_i32_179 = arith.constant 8 : i32
    %1004 = arith.muli %c14_i32, %c8_i32_179 : i32
    %1005 = tpu.assume_multiple %1004, 8 : i32
    %c15_i32_180 = arith.constant 15 : i32
    %1006 = arith.subi %c15_i32_180, %c14_i32 : i32
    %c8_i32_181 = arith.constant 8 : i32
    %1007 = arith.muli %1006, %c8_i32_181 : i32
    %1008 = tpu.assume_multiple %1007, 8 : i32
    %cst_182 = arith.constant dense<0.000000e+00> : vector<16x768xf32>
    %1009 = tpu.matmul %1003, %7, %cst_182 {dimension_numbers = #tpu.dot_dimension_numbers<[1], [0], [0], [1], [0, 0, 1, 1], [], []>} : vector<16x128xf32>, vector<128x768xf32>, vector<16x768xf32> -> vector<16x768xf32>
    %1010 = vector.broadcast %8 : vector<1x768xf32> to vector<16x768xf32>
    %1011 = arith.addf %1009, %1010 : vector<16x768xf32>
    %1012 = arith.index_cast %1005 : i32 to index
    %c0_183 = arith.constant 0 : index
    %1013 = vector.load %arg13[%1012, %c0_183] : memref<128x768xf32, #tpu.memory_space<vmem>>, vector<8x768xf32>
    %1014 = vector.extract_strided_slice %1013 {offsets = [0, 0], sizes = [8, 384], strides = [1, 1]} : vector<8x768xf32> to vector<8x384xf32>
    %1015 = arith.index_cast %1008 : i32 to index
    %c0_184 = arith.constant 0 : index
    %1016 = vector.load %arg13[%1015, %c0_184] : memref<128x768xf32, #tpu.memory_space<vmem>>, vector<8x768xf32>
    %1017 = vector.extract_strided_slice %1016 {offsets = [0, 384], sizes = [8, 384], strides = [1, 1]} : vector<8x768xf32> to vector<8x384xf32>
    %1018 = vector.extract_strided_slice %1011 {offsets = [0, 0], sizes = [8, 384], strides = [1, 1]} : vector<16x768xf32> to vector<8x384xf32>
    %1019 = vector.extract_strided_slice %1003 {offsets = [0, 0], sizes = [8, 128], strides = [1, 1]} : vector<16x128xf32> to vector<8x128xf32>
    %1020 = vector.extract_strided_slice %1014 {offsets = [0, 0], sizes = [8, 128], strides = [1, 1]} : vector<8x384xf32> to vector<8x128xf32>
    %1021 = vector.extract_strided_slice %1018 {offsets = [0, 0], sizes = [8, 128], strides = [1, 1]} : vector<8x384xf32> to vector<8x128xf32>
    %1022 = arith.addf %1020, %1021 : vector<8x128xf32>
    %1023 = arith.negf %1022 : vector<8x128xf32>
    %1024 = math.exp %1023 : vector<8x128xf32>
    %cst_185 = arith.constant 1.000000e+00 : f32
    %1025 = vector.broadcast %cst_185 : f32 to vector<8x128xf32>
    %1026 = arith.addf %1025, %1024 : vector<8x128xf32>
    %1027 = arith.divf %1025, %1026 : vector<8x128xf32>
    %1028 = vector.extract_strided_slice %1014 {offsets = [0, 128], sizes = [8, 128], strides = [1, 1]} : vector<8x384xf32> to vector<8x128xf32>
    %1029 = vector.extract_strided_slice %1018 {offsets = [0, 128], sizes = [8, 128], strides = [1, 1]} : vector<8x384xf32> to vector<8x128xf32>
    %1030 = arith.addf %1028, %1029 : vector<8x128xf32>
    %1031 = arith.negf %1030 : vector<8x128xf32>
    %1032 = math.exp %1031 : vector<8x128xf32>
    %cst_186 = arith.constant 1.000000e+00 : f32
    %1033 = vector.broadcast %cst_186 : f32 to vector<8x128xf32>
    %1034 = arith.addf %1033, %1032 : vector<8x128xf32>
    %1035 = arith.divf %1033, %1034 : vector<8x128xf32>
    %1036 = vector.extract_strided_slice %1014 {offsets = [0, 256], sizes = [8, 128], strides = [1, 1]} : vector<8x384xf32> to vector<8x128xf32>
    %1037 = vector.extract_strided_slice %1018 {offsets = [0, 256], sizes = [8, 128], strides = [1, 1]} : vector<8x384xf32> to vector<8x128xf32>
    %1038 = arith.mulf %1027, %1037 : vector<8x128xf32>
    %1039 = arith.addf %1036, %1038 : vector<8x128xf32>
    %1040 = math.tanh %1039 : vector<8x128xf32>
    %cst_187 = arith.constant 1.000000e+00 : f32
    %1041 = vector.broadcast %cst_187 : f32 to vector<8x128xf32>
    %1042 = arith.subf %1041, %1035 : vector<8x128xf32>
    %1043 = arith.mulf %1042, %1040 : vector<8x128xf32>
    %1044 = arith.mulf %1035, %1019 : vector<8x128xf32>
    %1045 = arith.addf %1043, %1044 : vector<8x128xf32>
    %1046 = vector.extract_strided_slice %1011 {offsets = [8, 384], sizes = [8, 384], strides = [1, 1]} : vector<16x768xf32> to vector<8x384xf32>
    %1047 = vector.extract_strided_slice %1003 {offsets = [8, 0], sizes = [8, 128], strides = [1, 1]} : vector<16x128xf32> to vector<8x128xf32>
    %1048 = vector.extract_strided_slice %1017 {offsets = [0, 0], sizes = [8, 128], strides = [1, 1]} : vector<8x384xf32> to vector<8x128xf32>
    %1049 = vector.extract_strided_slice %1046 {offsets = [0, 0], sizes = [8, 128], strides = [1, 1]} : vector<8x384xf32> to vector<8x128xf32>
    %1050 = arith.addf %1048, %1049 : vector<8x128xf32>
    %1051 = arith.negf %1050 : vector<8x128xf32>
    %1052 = math.exp %1051 : vector<8x128xf32>
    %cst_188 = arith.constant 1.000000e+00 : f32
    %1053 = vector.broadcast %cst_188 : f32 to vector<8x128xf32>
    %1054 = arith.addf %1053, %1052 : vector<8x128xf32>
    %1055 = arith.divf %1053, %1054 : vector<8x128xf32>
    %1056 = vector.extract_strided_slice %1017 {offsets = [0, 128], sizes = [8, 128], strides = [1, 1]} : vector<8x384xf32> to vector<8x128xf32>
    %1057 = vector.extract_strided_slice %1046 {offsets = [0, 128], sizes = [8, 128], strides = [1, 1]} : vector<8x384xf32> to vector<8x128xf32>
    %1058 = arith.addf %1056, %1057 : vector<8x128xf32>
    %1059 = arith.negf %1058 : vector<8x128xf32>
    %1060 = math.exp %1059 : vector<8x128xf32>
    %cst_189 = arith.constant 1.000000e+00 : f32
    %1061 = vector.broadcast %cst_189 : f32 to vector<8x128xf32>
    %1062 = arith.addf %1061, %1060 : vector<8x128xf32>
    %1063 = arith.divf %1061, %1062 : vector<8x128xf32>
    %1064 = vector.extract_strided_slice %1017 {offsets = [0, 256], sizes = [8, 128], strides = [1, 1]} : vector<8x384xf32> to vector<8x128xf32>
    %1065 = vector.extract_strided_slice %1046 {offsets = [0, 256], sizes = [8, 128], strides = [1, 1]} : vector<8x384xf32> to vector<8x128xf32>
    %1066 = arith.mulf %1055, %1065 : vector<8x128xf32>
    %1067 = arith.addf %1064, %1066 : vector<8x128xf32>
    %1068 = math.tanh %1067 : vector<8x128xf32>
    %cst_190 = arith.constant 1.000000e+00 : f32
    %1069 = vector.broadcast %cst_190 : f32 to vector<8x128xf32>
    %1070 = arith.subf %1069, %1063 : vector<8x128xf32>
    %1071 = arith.mulf %1070, %1068 : vector<8x128xf32>
    %1072 = arith.mulf %1063, %1047 : vector<8x128xf32>
    %1073 = arith.addf %1071, %1072 : vector<8x128xf32>
    %1074 = tpu.concatenate %1045, %1073 in 0 : vector<8x128xf32>, vector<8x128xf32> -> vector<16x128xf32>
    %c15_i32_191 = arith.constant 15 : i32
    %c8_i32_192 = arith.constant 8 : i32
    %1075 = arith.muli %c15_i32_191, %c8_i32_192 : i32
    %1076 = tpu.assume_multiple %1075, 8 : i32
    %c15_i32_193 = arith.constant 15 : i32
    %1077 = arith.subi %c15_i32_193, %c15_i32_191 : i32
    %c8_i32_194 = arith.constant 8 : i32
    %1078 = arith.muli %1077, %c8_i32_194 : i32
    %1079 = tpu.assume_multiple %1078, 8 : i32
    %cst_195 = arith.constant dense<0.000000e+00> : vector<16x768xf32>
    %1080 = tpu.matmul %1074, %7, %cst_195 {dimension_numbers = #tpu.dot_dimension_numbers<[1], [0], [0], [1], [0, 0, 1, 1], [], []>} : vector<16x128xf32>, vector<128x768xf32>, vector<16x768xf32> -> vector<16x768xf32>
    %1081 = vector.broadcast %8 : vector<1x768xf32> to vector<16x768xf32>
    %1082 = arith.addf %1080, %1081 : vector<16x768xf32>
    %1083 = arith.index_cast %1076 : i32 to index
    %c0_196 = arith.constant 0 : index
    %1084 = vector.load %arg13[%1083, %c0_196] : memref<128x768xf32, #tpu.memory_space<vmem>>, vector<8x768xf32>
    %1085 = vector.extract_strided_slice %1084 {offsets = [0, 0], sizes = [8, 384], strides = [1, 1]} : vector<8x768xf32> to vector<8x384xf32>
    %1086 = arith.index_cast %1079 : i32 to index
    %c0_197 = arith.constant 0 : index
    %1087 = vector.load %arg13[%1086, %c0_197] : memref<128x768xf32, #tpu.memory_space<vmem>>, vector<8x768xf32>
    %1088 = vector.extract_strided_slice %1087 {offsets = [0, 384], sizes = [8, 384], strides = [1, 1]} : vector<8x768xf32> to vector<8x384xf32>
    %1089 = vector.extract_strided_slice %1082 {offsets = [0, 0], sizes = [8, 384], strides = [1, 1]} : vector<16x768xf32> to vector<8x384xf32>
    %1090 = vector.extract_strided_slice %1074 {offsets = [0, 0], sizes = [8, 128], strides = [1, 1]} : vector<16x128xf32> to vector<8x128xf32>
    %1091 = vector.extract_strided_slice %1085 {offsets = [0, 0], sizes = [8, 128], strides = [1, 1]} : vector<8x384xf32> to vector<8x128xf32>
    %1092 = vector.extract_strided_slice %1089 {offsets = [0, 0], sizes = [8, 128], strides = [1, 1]} : vector<8x384xf32> to vector<8x128xf32>
    %1093 = arith.addf %1091, %1092 : vector<8x128xf32>
    %1094 = arith.negf %1093 : vector<8x128xf32>
    %1095 = math.exp %1094 : vector<8x128xf32>
    %cst_198 = arith.constant 1.000000e+00 : f32
    %1096 = vector.broadcast %cst_198 : f32 to vector<8x128xf32>
    %1097 = arith.addf %1096, %1095 : vector<8x128xf32>
    %1098 = arith.divf %1096, %1097 : vector<8x128xf32>
    %1099 = vector.extract_strided_slice %1085 {offsets = [0, 128], sizes = [8, 128], strides = [1, 1]} : vector<8x384xf32> to vector<8x128xf32>
    %1100 = vector.extract_strided_slice %1089 {offsets = [0, 128], sizes = [8, 128], strides = [1, 1]} : vector<8x384xf32> to vector<8x128xf32>
    %1101 = arith.addf %1099, %1100 : vector<8x128xf32>
    %1102 = arith.negf %1101 : vector<8x128xf32>
    %1103 = math.exp %1102 : vector<8x128xf32>
    %cst_199 = arith.constant 1.000000e+00 : f32
    %1104 = vector.broadcast %cst_199 : f32 to vector<8x128xf32>
    %1105 = arith.addf %1104, %1103 : vector<8x128xf32>
    %1106 = arith.divf %1104, %1105 : vector<8x128xf32>
    %1107 = vector.extract_strided_slice %1085 {offsets = [0, 256], sizes = [8, 128], strides = [1, 1]} : vector<8x384xf32> to vector<8x128xf32>
    %1108 = vector.extract_strided_slice %1089 {offsets = [0, 256], sizes = [8, 128], strides = [1, 1]} : vector<8x384xf32> to vector<8x128xf32>
    %1109 = arith.mulf %1098, %1108 : vector<8x128xf32>
    %1110 = arith.addf %1107, %1109 : vector<8x128xf32>
    %1111 = math.tanh %1110 : vector<8x128xf32>
    %cst_200 = arith.constant 1.000000e+00 : f32
    %1112 = vector.broadcast %cst_200 : f32 to vector<8x128xf32>
    %1113 = arith.subf %1112, %1106 : vector<8x128xf32>
    %1114 = arith.mulf %1113, %1111 : vector<8x128xf32>
    %1115 = arith.mulf %1106, %1090 : vector<8x128xf32>
    %1116 = arith.addf %1114, %1115 : vector<8x128xf32>
    %1117 = vector.extract_strided_slice %1082 {offsets = [8, 384], sizes = [8, 384], strides = [1, 1]} : vector<16x768xf32> to vector<8x384xf32>
    %1118 = vector.extract_strided_slice %1074 {offsets = [8, 0], sizes = [8, 128], strides = [1, 1]} : vector<16x128xf32> to vector<8x128xf32>
    %1119 = vector.extract_strided_slice %1088 {offsets = [0, 0], sizes = [8, 128], strides = [1, 1]} : vector<8x384xf32> to vector<8x128xf32>
    %1120 = vector.extract_strided_slice %1117 {offsets = [0, 0], sizes = [8, 128], strides = [1, 1]} : vector<8x384xf32> to vector<8x128xf32>
    %1121 = arith.addf %1119, %1120 : vector<8x128xf32>
    %1122 = arith.negf %1121 : vector<8x128xf32>
    %1123 = math.exp %1122 : vector<8x128xf32>
    %cst_201 = arith.constant 1.000000e+00 : f32
    %1124 = vector.broadcast %cst_201 : f32 to vector<8x128xf32>
    %1125 = arith.addf %1124, %1123 : vector<8x128xf32>
    %1126 = arith.divf %1124, %1125 : vector<8x128xf32>
    %1127 = vector.extract_strided_slice %1088 {offsets = [0, 128], sizes = [8, 128], strides = [1, 1]} : vector<8x384xf32> to vector<8x128xf32>
    %1128 = vector.extract_strided_slice %1117 {offsets = [0, 128], sizes = [8, 128], strides = [1, 1]} : vector<8x384xf32> to vector<8x128xf32>
    %1129 = arith.addf %1127, %1128 : vector<8x128xf32>
    %1130 = arith.negf %1129 : vector<8x128xf32>
    %1131 = math.exp %1130 : vector<8x128xf32>
    %cst_202 = arith.constant 1.000000e+00 : f32
    %1132 = vector.broadcast %cst_202 : f32 to vector<8x128xf32>
    %1133 = arith.addf %1132, %1131 : vector<8x128xf32>
    %1134 = arith.divf %1132, %1133 : vector<8x128xf32>
    %1135 = vector.extract_strided_slice %1088 {offsets = [0, 256], sizes = [8, 128], strides = [1, 1]} : vector<8x384xf32> to vector<8x128xf32>
    %1136 = vector.extract_strided_slice %1117 {offsets = [0, 256], sizes = [8, 128], strides = [1, 1]} : vector<8x384xf32> to vector<8x128xf32>
    %1137 = arith.mulf %1126, %1136 : vector<8x128xf32>
    %1138 = arith.addf %1135, %1137 : vector<8x128xf32>
    %1139 = math.tanh %1138 : vector<8x128xf32>
    %cst_203 = arith.constant 1.000000e+00 : f32
    %1140 = vector.broadcast %cst_203 : f32 to vector<8x128xf32>
    %1141 = arith.subf %1140, %1134 : vector<8x128xf32>
    %1142 = arith.mulf %1141, %1139 : vector<8x128xf32>
    %1143 = arith.mulf %1134, %1118 : vector<8x128xf32>
    %1144 = arith.addf %1142, %1143 : vector<8x128xf32>
    %1145 = tpu.concatenate %1116, %1144 in 0 : vector<8x128xf32>, vector<8x128xf32> -> vector<16x128xf32>
    %c16_i32 = arith.constant 16 : i32
    %1146 = vector.extract_strided_slice %1145 {offsets = [0, 0], sizes = [8, 128], strides = [1, 1]} : vector<16x128xf32> to vector<8x128xf32>
    %1147 = vector.extract_strided_slice %1145 {offsets = [8, 0], sizes = [8, 128], strides = [1, 1]} : vector<16x128xf32> to vector<8x128xf32>
    %1148 = vector.extract_strided_slice %1146 {offsets = [0, 0], sizes = [8, 32], strides = [1, 1]} : vector<8x128xf32> to vector<8x32xf32>
    %c0_204 = arith.constant 0 : index
    %c0_205 = arith.constant 0 : index
    %1149 = vector.load %arg10[%c0_204, %c0_205] : memref<8x64xf32, #tpu.memory_space<vmem>>, vector<8x32xf32>
    tpu.vector_store %arg10[%c0_204, %c0_205], %1148 {strides = array<i32>} : memref<8x64xf32, #tpu.memory_space<vmem>>, vector<8x32xf32>,
    %1150 = vector.extract_strided_slice %1147 {offsets = [0, 0], sizes = [8, 32], strides = [1, 1]} : vector<8x128xf32> to vector<8x32xf32>
    %c0_206 = arith.constant 0 : index
    %c32 = arith.constant 32 : index
    %1151 = vector.load %arg10[%c0_206, %c32] : memref<8x64xf32, #tpu.memory_space<vmem>>, vector<8x32xf32>
    tpu.vector_store %arg10[%c0_206, %c32], %1150 {strides = array<i32>} : memref<8x64xf32, #tpu.memory_space<vmem>>, vector<8x32xf32>,
    %c0_207 = arith.constant 0 : index
    %c0_208 = arith.constant 0 : index
    %1152 = vector.load %arg5[%c0_207, %c0_208] : memref<128x8xf32, #tpu.memory_space<vmem>>, vector<128x8xf32>
    %cst_209 = arith.constant dense<0.000000e+00> : vector<8x8xf32>
    %1153 = tpu.matmul %1146, %1152, %cst_209 {dimension_numbers = #tpu.dot_dimension_numbers<[1], [0], [0], [1], [0, 0, 1, 1], [], []>} : vector<8x128xf32>, vector<128x8xf32>, vector<8x8xf32> -> vector<8x8xf32>
    %c0_210 = arith.constant 0 : index
    %c0_211 = arith.constant 0 : index
    %1154 = vector.load %arg6[%c0_210, %c0_211] : memref<128x8xf32, #tpu.memory_space<vmem>>, vector<128x8xf32>
    %cst_212 = arith.constant dense<0.000000e+00> : vector<8x8xf32>
    %1155 = tpu.matmul %1147, %1154, %cst_212 {dimension_numbers = #tpu.dot_dimension_numbers<[1], [0], [0], [1], [0, 0, 1, 1], [], []>} : vector<8x128xf32>, vector<128x8xf32>, vector<8x8xf32> -> vector<8x8xf32>
    %1156 = arith.addf %1153, %1155 : vector<8x8xf32>
    %c0_213 = arith.constant 0 : index
    %c0_214 = arith.constant 0 : index
    %1157 = vector.load %arg7[%c0_213, %c0_214] : memref<1x8xf32, #tpu.memory_space<vmem>>, vector<1x8xf32>
    %1158 = vector.broadcast %1157 : vector<1x8xf32> to vector<8x8xf32>
    %1159 = arith.addf %1156, %1158 : vector<8x8xf32>
    %c0_215 = arith.constant 0 : index
    %c0_216 = arith.constant 0 : index
    %1160 = vector.load %arg11[%c0_215, %c0_216] : memref<8x8xf32, #tpu.memory_space<vmem>>, vector<8x8xf32>
    tpu.vector_store %arg11[%c0_215, %c0_216], %1159 {strides = array<i32>} : memref<8x8xf32, #tpu.memory_space<vmem>>, vector<8x8xf32>,
    %cst_217 = arith.constant dense<0xFF800000> : vector<8xf32>
    %1161 = vector.multi_reduction <maximumf>, %1159, %cst_217 [1] : vector<8x8xf32> to vector<8xf32>
    %1162 = vector.shape_cast %1161 : vector<8xf32> to vector<8x1xf32>
    %1163 = vector.broadcast %1162 : vector<8x1xf32> to vector<8x8xf32>
    %1164 = arith.subf %1159, %1163 : vector<8x8xf32>
    %1165 = math.exp %1164 : vector<8x8xf32>
    %cst_218 = arith.constant dense<0.000000e+00> : vector<8xf32>
    %1166 = vector.multi_reduction <add>, %1165, %cst_218 [1] : vector<8x8xf32> to vector<8xf32>
    %1167 = vector.shape_cast %1166 : vector<8xf32> to vector<8x1xf32>
    %1168 = tpu.reciprocal %1167 {approx = true} : vector<8x1xf32> -> vector<8x1xf32>
    %1169 = vector.broadcast %1168 : vector<8x1xf32> to vector<8x8xf32>
    %1170 = arith.mulf %1165, %1169 : vector<8x8xf32>
    %c0_219 = arith.constant 0 : index
    %c0_220 = arith.constant 0 : index
    %1171 = vector.load %arg9[%c0_219, %c0_220] : memref<8x8xf32, #tpu.memory_space<vmem>>, vector<8x8xf32>
    tpu.vector_store %arg9[%c0_219, %c0_220], %1170 {strides = array<i32>} : memref<8x8xf32, #tpu.memory_space<vmem>>, vector<8x8xf32>,
    %1172 = math.log %1167 : vector<8x1xf32>
    %1173 = arith.addf %1162, %1172 : vector<8x1xf32>
    %c0_221 = arith.constant 0 : index
    %c0_222 = arith.constant 0 : index
    %1174 = vector.load %arg8[%c0_221, %c0_222] : memref<8x8xf32, #tpu.memory_space<vmem>>, vector<8x8xf32>
    %1175 = vector.broadcast %1173 : vector<8x1xf32> to vector<8x8xf32>
    %1176 = arith.subf %1175, %1159 : vector<8x8xf32>
    %1177 = arith.mulf %1174, %1176 : vector<8x8xf32>
    %1178 = vector.shape_cast %1177 : vector<8x8xf32> to vector<1x8x8xf32>
    %cst_223 = arith.constant dense<0.000000e+00> : vector<1xf32>
    %1179 = vector.multi_reduction <add>, %1178, %cst_223 [1, 2] : vector<1x8x8xf32> to vector<1xf32>
    %1180 = vector.shape_cast %1179 : vector<1xf32> to vector<1x1x1xf32>
    %1181 = vector.extract %1180[0, 0, 0] : f32 from vector<1x1x1xf32>
    %c0_224 = arith.constant 0 : index
    %c0_225 = arith.constant 0 : index
    %1182 = memref.load %arg12[%c0_224, %c0_225] : memref<1x1xf32, #tpu.memory_space<smem>>
    memref.store %1181, %arg12[%c0_224, %c0_225] : memref<1x1xf32, #tpu.memory_space<smem>>
    return
  }
}

</mosaic_0001>

<bundles_post_ra>
// kernel: tpu_custom_call.1
= control target key start
LH: loop header
LB: loop body
LE: loop exit
PB: predicated region body
PF: predicated region fallthrough
CT: control target
= control target key end

     0   :  { %18 = vsyncpa [#allocation4], 0  ;;  %s10075_s0 = inlined_call_operand.vmem [shape: f32[128,32], index: 0, kind: input, shape index: {}]   ;;  %s10076_s1 = inlined_call_operand.vmem [shape: f32[32,768], index: 1, kind: input, shape index: {}]   ;;  %s10077_s2 = inlined_call_operand.vmem [shape: f32[1,768], index: 2, kind: input, shape index: {}]   ;;  %s10078_s3 = inlined_call_operand.hbm [shape: f32[128,768], index: 3, kind: input, shape index: {}]   ;;  %s10079_s4 = inlined_call_operand.vmem [shape: f32[1,768], index: 4, kind: input, shape index: {}]   ;;  %s10080_s5 = inlined_call_operand.vmem [shape: f32[128,8], index: 5, kind: input, shape index: {}]   ;;  %s10081_s6 = inlined_call_operand.vmem [shape: f32[128,8], index: 6, kind: input, shape index: {}]   ;;  %s10082_s7 = inlined_call_operand.vmem [shape: f32[1,8], index: 7, kind: input, shape index: {}]   ;;  %s10083_s8 = inlined_call_operand.vmem [shape: f32[8,8], index: 8, kind: input, shape index: {}]   ;;  %s10084_s9 = inlined_call_operand.hbm [shape: f32[8,8], index: 9, kind: output, shape index: {0}]   ;;  %s10085_s10 = inlined_call_operand.hbm [shape: f32[8,64], index: 10, kind: output, shape index: {1}]   ;;  %s10086_s11 = inlined_call_operand.hbm [shape: f32[8,8], index: 11, kind: output, shape index: {2}]   ;;  %s10087_s12 = inlined_call_operand.hbm [shape: f32[1,1], index: 12, kind: output, shape index: {3}]  }
   0x1   :  { %19 = vsyncpa [#allocation5], 0 }
   0x2   :  { %20 = vsyncpa [#allocation9], 0 }
   0x3   :  { %21 = vsyncpa [#allocation6], 0  ;;  %s7952_s21 = smov [#allocation3]   ;;  %s7846_s25 = scalar_lea.hbm %s10078_s3, 12288 }
   0x4   :  { %s33_s22 = sshll.u32 %s7952_s21, 4  ;;  %p7847_p0 = scmp.ne.s32.totalorder %s10078_s3, %s7846_s25  ;;  %s34_s22 = int_to_ptr.vmem [resolvable:$true] %s33_s22 }
   0x5   :  { %p7850_p1 = scmp.lt.u32.totalorder %s7846_s25, %s10078_s3 }
   0x7   :  { %p7852_p2 = pnand %p7850_p1, %p7847_p0 }
   0x9   :  { %7855 = shalt.err (!%p7852_p2)
}
   0xa   :  { %s7856_s30 = scalar_lea.vmem %s34_s22, 12288  ;;  %p7861_p4 = scmp.lt.s32.totalorder %s34_s22, %s34_s22 }
   0xb   :  { %p7857_p3 = scmp.ne.s32.totalorder %s34_s22, %s7856_s30  ;;  %p7862_p5 = scmp.lt.s32.totalorder %s7856_s30, %s7856_s30 }
   0xd   :  { %p7863_p6 = por %p7862_p5, %p7861_p4 }
   0xf   :  { %p7864_p7 = pnand %p7863_p6, %p7857_p3 }
  0x11   :  { %7867 = shalt.err (!%p7864_p7)
}
  0x12   :  { %s7953_s13 = smov 768   ;;  %s7954_s14 = smov 48  }
  0x13   :  { %39 = dma.hbm_to_vmem [thread:$0]  %s10078_s3, 12288, %s34_s22, [#allocation4], %s7953_s13, %s7953_s13, %s7954_s14  }
  0x14   :  { %7944 = dma.done.wait [#allocation4], 12288  }
  0x15   :  { %7945 = vsyncadd [#allocation4], 4294955008  ;;  %v10090_v0 = vmov 0.0   ;;  %v70_v1 = vld [vmem:[%s10076_s1 + $0x8] sm:$0xff]  ;;  %v76_v2 = vld [vmem:[%s10076_s1 + $0x38] sm:$0xff]  ;;  %vm125_vm0 = vcmask 261120  }
  0x16   :  { %238 = vmatprep.mubr.f32.mxu0 %v10090_v0  ;;  %399 = vmatprep.mubr.f32.mxu1 %v10090_v0  ;;  %v69_v3 = vld [vmem:[%s10076_s1] sm:$0xff]  ;;  %v5803_v4 = vpack.c.bf16 %v76_v2, %v70_v1  ;;  %v75_v5 = vld [vmem:[%s10076_s1 + $0x30] sm:$0xff]  ;;  %v82_v6 = vld [vmem:[%s10076_s1 + $0x68] sm:$0xff]  ;;  %vm7957_vm1 = vmmov 0   ;;  %vm5484_vm2 = vcmask 64512   ;;  %s7958_s18 = smov 32  }
  0x17   :  { %v88_v7 = vld [vmem:[%s10076_s1 + $0x98] sm:$0xff]  ;;  %v5805_v8 = vpack.c.bf16 %v75_v5, %v69_v3  ;;  %v81_v10 = vld [vmem:[%s10076_s1 + $0x60] sm:$0xff]  ;;  %v87_v11 = vld [vmem:[%s10076_s1 + $0x90] sm:$0xff] }
  0x18   :  { %v5807_v9 = vpack.c.bf16 %v88_v7, %v82_v6  ;;  %5804 = vmatprep.subr.bf16.mxu0 %v5803_v4  ;;  %v74_v12 = vld [vmem:[%s10076_s1 + $0x28] sm:$0xff]  ;;  %v80_v13 = vld [vmem:[%s10076_s1 + $0x58] sm:$0xff]  ;;  %v5809_v14 = vpack.c.bf16 %v87_v11, %v81_v10  ;;  %v73_v15 = vld [vmem:[%s10076_s1 + $0x20] sm:$0xff] }
  0x19   :  { %5806 = vmatpush1.bf16.msra.mxu0 %v5805_v8  ;;  %v5819_v16 = vpack.c.bf16 %v80_v13, %v74_v12  ;;  %v79_v17 = vld [vmem:[%s10076_s1 + $0x50] sm:$0xff]  ;;  %v72_v18 = vld [vmem:[%s10076_s1 + $0x18] sm:$0xff]  ;;  %v78_v19 = vld [vmem:[%s10076_s1 + $0x48] sm:$0xff] }
  0x1a   :  { %5808 = vmatprep.subr.bf16.mxu0 %v5807_v9  ;;  %v5811_v20 = vpack.c.bf16 %v78_v19, %v72_v18  ;;  %v71_v21 = vld [vmem:[%s10076_s1 + $0x10] sm:$0xff]  ;;  %v77_v22 = vld [vmem:[%s10076_s1 + $0x40] sm:$0xff]  ;;  %v84_v24 = vld [vmem:[%s10076_s1 + $0x78] sm:$0xff]  ;;  %v5821_v27 = vpack.c.bf16 %v79_v17, %v73_v15 }
  0x1b   :  { %v5813_v23 = vpack.c.bf16 %v77_v22, %v71_v21  ;;  %v90_v25 = vld [vmem:[%s10076_s1 + $0xa8] sm:$0xff]  ;;  %v8099_v26 = vld [vmem:[%s10075_s0] sm:$0xff]  ;;  %v83_v29 = vld [vmem:[%s10076_s1 + $0x70] sm:$0xff] }
  0x1c   :  { %5812 = vmatprep.subr.bf16.mxu1 %v5811_v20  ;;  %v5815_v28 = vpack.c.bf16 %v90_v25, %v84_v24  ;;  %v89_v30 = vld [vmem:[%s10076_s1 + $0xa0] sm:$0xff]  ;;  %v86_v32 = vld [vmem:[%s10076_s1 + $0x88] sm:$0xff]  ;;  %v92_v33 = vld [vmem:[%s10076_s1 + $0xb8] sm:$0xff] }
  0x1d   :  { %5810 = vmatpush1.bf16.msra.mxu0 %v5809_v14  ;;  %5814 = vmatpush1.bf16.msra.mxu1 %v5813_v23  ;;  %v5817_v31 = vpack.c.bf16 %v89_v30, %v83_v29  ;;  %v85_v34 = vld [vmem:[%s10076_s1 + $0x80] sm:$0xff]  ;;  %v91_v35 = vld [vmem:[%s10076_s1 + $0xb0] sm:$0xff]  ;;  %v5823_v36 = vpack.c.bf16 %v92_v33, %v86_v32  ;;  %v8125_v37 = vld [vmem:[%s10075_s0 + $0x8] sm:$0xff] }
  0x1e   :  { %5820 = vmatprep.subr.bf16.mxu0 %v5819_v16  ;;  %5816 = vmatprep.subr.bf16.mxu1 %v5815_v28  ;;  %v756_v38 = vld [vmem:[#allocation3 + $0x18] sm:$0xff]  ;;  %v5825_v39 = vpack.c.bf16 %v91_v35, %v85_v34  ;;  %v762_v40 = vld [vmem:[#allocation3 + $0x48] sm:$0xff]  ;;  %v755_v41 = vld [vmem:[#allocation3 + $0x10] sm:$0xff] }
  0x1f   :  { %v761_v42 = vld [vmem:[#allocation3 + $0x40] sm:$0xff]  ;;  %v8127_v43 = vpack.c.bf16 %v762_v40, %v756_v38  ;;  %v768_v44 = vld [vmem:[#allocation3 + $0x78] sm:$0xff]  ;;  %v774_v45 = vld [vmem:[#allocation3 + $0xa8] sm:$0xff] }
  0x20   :  { %5586 = vmatmul.mubr.msk.f32.vlgmr.msra.gmra.mrb[0].mxu0 %vm125_vm0, %v8099_v26  ;;  %v8131_v46 = vpack.c.bf16 %v761_v42, %v755_v41  ;;  %v8137_v47 = vld [vmem:[%s10075_s0 + $0x10] sm:$0xff]  ;;  %v773_v49 = vld [vmem:[#allocation3 + $0xa0] sm:$0xff]  ;;  %v8142_v50 = vpack.c.bf16 %v774_v45, %v768_v44  ;;  %v754_v51 = vld [vmem:[#allocation3 + $0x8] sm:$0xff] }
  0x21   :  { %5822 = vmatpush1.bf16.msra.mxu0 %v5821_v27  ;;  %244 = vmatprep.mubr.f32.mxu0 %v10090_v0  ;;  %10246 = vst [vmem:[#allocation16_spill] sm:$0xff] %v8127_v43  ;;  %v767_v48 = vld [vmem:[#allocation3 + $0x70] sm:$0xff]  ;;  %v760_v52 = vld [vmem:[#allocation3 + $0x38] sm:$0xff]  ;;  %v786_v54 = vld [vmem:[#allocation3 + $0x108] sm:$0xff] }
  0x22   :  { %5818 = vmatpush1.bf16.msra.mxu1 %v5817_v31  ;;  %5824 = vmatprep.subr.bf16.mxu0 %v5823_v36  ;;  %v780_v53 = vld [vmem:[#allocation3 + $0xd8] sm:$0xff]  ;;  %v8145_v55 = vpack.c.bf16 %v760_v52, %v754_v51  ;;  %v8150_v56 = vpack.c.bf16 %v773_v49, %v767_v48  ;;  %v779_v58 = vld [vmem:[#allocation3 + $0xd0] sm:$0xff]  ;;  %v785_v59 = vld [vmem:[#allocation3 + $0x100] sm:$0xff] }
  0x23   :  { %5860 = vmatprep.subr.bf16.mxu1 %v8127_v43  ;;  %v8156_v57 = vld [vmem:[%s10075_s0 + $0x18] sm:$0xff]  ;;  %v8162_v60 = vpack.c.bf16 %v786_v54, %v780_v53  ;;  %v798_v62 = vld [vmem:[#allocation3 + $0x168] sm:$0xff]  ;;  %v8168_v63 = vpack.c.bf16 %v785_v59, %v779_v58  ;;  %v8174_v1 = vld [vmem:[%s10075_s0 + $0x20] sm:$0xff] }
  0x24   :  { %5587 = vmatmul.mubr.msk.f32.gmra.mrb[2].mxu0 %vm125_vm0, %v8125_v37  ;;  %10247 = vst [vmem:[#allocation17_spill] sm:$0xff] %v8145_v55  ;;  %v792_v61 = vld [vmem:[#allocation3 + $0x138] sm:$0xff]  ;;  %v791_v2 = vld [vmem:[#allocation3 + $0x130] sm:$0xff]  ;;  %v797_v3 = vld [vmem:[#allocation3 + $0x160] sm:$0xff] }
  0x25   :  { %250 = vmatprep.mubr.f32.mxu0 %v10090_v0  ;;  %5602 = vmatmul.mubr.msk.f32.vlgmr.msra.gmra.mrb[0].mxu1 %vm125_vm0, %v8099_v26  ;;  %v8180_v4 = vpack.c.bf16 %v798_v62, %v792_v61  ;;  %v804_v5 = vld [vmem:[#allocation3 + $0x198] sm:$0xff]  ;;  %v810_v6 = vld [vmem:[#allocation3 + $0x1c8] sm:$0xff]  ;;  %v8185_v7 = vpack.c.bf16 %v797_v3, %v791_v2  ;;  %v803_v9 = vld [vmem:[#allocation3 + $0x190] sm:$0xff] }
  0x26   :  { %405 = vmatprep.mubr.f32.mxu1 %v10090_v0  ;;  %5826 = vmatpush1.bf16.msra.mxu0 %v5825_v39  ;;  %v8191_v8 = vld [vmem:[%s10075_s0 + $0x28] sm:$0xff]  ;;  %v809_v10 = vld [vmem:[#allocation3 + $0x1c0] sm:$0xff]  ;;  %v8197_v11 = vpack.c.bf16 %v810_v6, %v804_v5  ;;  %v816_v12 = vld [vmem:[#allocation3 + $0x1f8] sm:$0xff] }
  0x27   :  { %5862 = vmatpush1.bf16.msra.mxu1 %v8131_v46  ;;  %5828 = vmatprep.subr.bf16.mxu0 %v8145_v55  ;;  %10248 = vst [vmem:[#allocation18_spill] sm:$0xff] %v8180_v4  ;;  %10249 = vst [vmem:[#allocation19_spill] sm:$0xff] %v8185_v7  ;;  %v822_v13 = vld [vmem:[#allocation3 + $0x228] sm:$0xff]  ;;  %v8202_v14 = vpack.c.bf16 %v809_v10, %v803_v9  ;;  %v8208_v15 = vld [vmem:[%s10075_s0 + $0x30] sm:$0xff] }
  0x28   :  { %5588 = vmatmul.mubr.msk.f32.gmra.mrb[4].mxu0 %vm125_vm0, %v8137_v47  ;;  %5864 = vmatprep.subr.bf16.mxu1 %v8142_v50  ;;  %10250 = vst [vmem:[#allocation20_spill] sm:$0xff] %v8197_v11  ;;  %v815_v16 = vld [vmem:[#allocation3 + $0x1f0] sm:$0xff]  ;;  %v821_v17 = vld [vmem:[#allocation3 + $0x220] sm:$0xff]  ;;  %v8214_v18 = vpack.c.bf16 %v822_v13, %v816_v12  ;;  %v828_v19 = vld [vmem:[#allocation3 + $0x258] sm:$0xff] }
  0x29   :  { %256 = vmatprep.mubr.f32.mxu0 %v10090_v0  ;;  %5603 = vmatmul.mubr.msk.f32.gmra.mrb[2].mxu1 %vm125_vm0, %v8125_v37  ;;  %10251 = vst [vmem:[#allocation21_spill] sm:$0xff] %v8202_v14  ;;  %v834_v20 = vld [vmem:[#allocation3 + $0x288] sm:$0xff]  ;;  %v8219_v21 = vpack.c.bf16 %v821_v17, %v815_v16  ;;  %v8225_v22 = vld [vmem:[%s10075_s0 + $0x38] sm:$0xff]  ;;  %v827_v23 = vld [vmem:[#allocation3 + $0x250] sm:$0xff] }
  0x2a   :  { %411 = vmatprep.mubr.f32.mxu1 %v10090_v0  ;;  %10252 = vst [vmem:[#allocation22_spill] sm:$0xff] %v8214_v18  ;;  %v833_v24 = vld [vmem:[#allocation3 + $0x280] sm:$0xff]  ;;  %v8231_v25 = vpack.c.bf16 %v834_v20, %v828_v19  ;;  %v840_v27 = vld [vmem:[#allocation3 + $0x2b8] sm:$0xff]  ;;  %v846_v28 = vld [vmem:[#allocation3 + $0x2e8] sm:$0xff] }
  0x2b   :  { %5866 = vmatpush1.bf16.msra.mxu1 %v8150_v56  ;;  %10253 = vst [vmem:[#allocation23_spill] sm:$0xff] %v8219_v21  ;;  %v8236_v29 = vpack.c.bf16 %v833_v24, %v827_v23  ;;  %v8242_v30 = vld [vmem:[%s10075_s0 + $0x40] sm:$0xff]  ;;  %v839_v31 = vld [vmem:[#allocation3 + $0x2b0] sm:$0xff]  ;;  %v8248_v33 = vpack.c.bf16 %v846_v28, %v840_v27  ;;  %v758_v34 = vld [vmem:[#allocation3 + $0x28] sm:$0xff] }
  0x2c   :  { %5589 = vmatmul.mubr.msk.f32.gmra.mrb[6].mxu0 %vm125_vm0, %v8156_v57  ;;  %5868 = vmatprep.subr.bf16.mxu1 %v8162_v60  ;;  %10254 = vst [vmem:[#allocation24_spill] sm:$0xff] %v8231_v25  ;;  %v845_v32 = vld [vmem:[#allocation3 + $0x2e0] sm:$0xff]  ;;  %v764_v35 = vld [vmem:[#allocation3 + $0x58] sm:$0xff]  ;;  %v8259_v38 = vld [vmem:[%s10075_s0 + $0x48] sm:$0xff] }
  0x2d   :  { %262 = vmatprep.mubr.f32.mxu0 %v10090_v0  ;;  %5604 = vmatmul.mubr.msk.f32.gmra.mrb[4].mxu1 %vm125_vm0, %v8137_v47  ;;  %10255 = vst [vmem:[#allocation25_spill] sm:$0xff] %v8236_v29  ;;  %10256 = vst [vmem:[#allocation26_spill] sm:$0xff] %v8248_v33  ;;  %v8253_v36 = vpack.c.bf16 %v845_v32, %v839_v31  ;;  %v8265_v39 = vpack.c.bf16 %v764_v35, %v758_v34  ;;  %v8274_v40 = vld [vmem:[%s10075_s0 + $0x50] sm:$0xff]  ;;  %v8286_v41 = vld [vmem:[%s10075_s0 + $0x58] sm:$0xff] }
  0x2e   :  { %417 = vmatprep.mubr.f32.mxu1 %v10090_v0  ;;  %v8297_v42 = vld [vmem:[%s10075_s0 + $0x60] sm:$0xff]  ;;  %v8308_v44 = vld [vmem:[%s10075_s0 + $0x68] sm:$0xff]  ;;  %v8319_v45 = vld [vmem:[%s10075_s0 + $0x70] sm:$0xff] }
  0x2f   :  { %5870 = vmatpush1.bf16.msra.mxu1 %v8168_v63  ;;  %10257 = vst [vmem:[#allocation27_spill] sm:$0xff] %v8253_v36  ;;  %v8330_v48 = vld [vmem:[%s10075_s0 + $0x78] sm:$0xff]  ;;  %v753_v49 = vld [vmem:[#allocation3] sm:$0xff]  ;;  %v759_v51 = vld [vmem:[#allocation3 + $0x30] sm:$0xff]  ;;  %s7959_s0 = smov [#allocation7]  }
  0x30   :  { %5590 = vmatmul.mubr.msk.f32.gmra.mrb[8].mxu0 %vm125_vm0, %v8174_v1  ;;  %5872 = vmatprep.subr.bf16.mxu1 %v8180_v4  ;;  %v766_v52 = vld [vmem:[#allocation3 + $0x68] sm:$0xff]  ;;  %v772_v53 = vld [vmem:[#allocation3 + $0x98] sm:$0xff]  ;;  %v8338_v54 = vpack.c.bf16 %v759_v51, %v753_v49  ;;  %v765_v59 = vld [vmem:[#allocation3 + $0x60] sm:$0xff]  ;;  %s5522_s19 = sshll.u32 %s7959_s0, 4  ;;  %s5523_s19 = int_to_ptr.vmem [resolvable:$true] %s5522_s19 }
  0x31   :  { %268 = vmatprep.mubr.f32.mxu0 %v10090_v0  ;;  %5605 = vmatmul.mubr.msk.f32.gmra.mrb[6].mxu1 %vm125_vm0, %v8156_v57  ;;  %v8342_v58 = vpack.c.bf16 %v772_v53, %v766_v52  ;;  %v771_v61 = vld [vmem:[#allocation3 + $0x90] sm:$0xff]  ;;  %v778_v62 = vld [vmem:[#allocation3 + $0xc8] sm:$0xff]  ;;  %v784_v2 = vld [vmem:[#allocation3 + $0xf8] sm:$0xff]  ;;  %p7873_p9 = scmp.lt.s32.totalorder %s5523_s19, %s5523_s19 }
  0x32   :  { %423 = vmatprep.mubr.f32.mxu1 %v10090_v0  ;;  %v757_v3 = vld [vmem:[#allocation3 + $0x20] sm:$0xff]  ;;  %v763_v5 = vld [vmem:[#allocation3 + $0x50] sm:$0xff]  ;;  %v8349_v6 = vpack.c.bf16 %v771_v61, %v765_v59  ;;  %v770_v9 = vld [vmem:[#allocation3 + $0x88] sm:$0xff]  ;;  %v8352_v12 = vpack.c.bf16 %v784_v2, %v778_v62 }
  0x33   :  { %5874 = vmatpush1.bf16.msra.mxu1 %v8185_v7  ;;  %v776_v10 = vld [vmem:[#allocation3 + $0xb8] sm:$0xff]  ;;  %v777_v13 = vld [vmem:[#allocation3 + $0xc0] sm:$0xff]  ;;  %v783_v16 = vld [vmem:[#allocation3 + $0xf0] sm:$0xff] }
  0x34   :  { %5591 = vmatmul.mubr.msk.f32.gmra.mrb[10].mxu0 %vm125_vm0, %v8191_v8  ;;  %5876 = vmatprep.subr.bf16.mxu1 %v8197_v11  ;;  %v790_v17 = vld [vmem:[#allocation3 + $0x128] sm:$0xff]  ;;  %v796_v19 = vld [vmem:[#allocation3 + $0x158] sm:$0xff]  ;;  %v8361_v20 = vpack.c.bf16 %v776_v10, %v770_v9  ;;  %v769_v23 = vld [vmem:[#allocation3 + $0x80] sm:$0xff]  ;;  %v8365_v27 = vpack.c.bf16 %v783_v16, %v777_v13 }
  0x35   :  { %274 = vmatprep.mubr.f32.mxu0 %v10090_v0  ;;  %5606 = vmatmul.mubr.msk.f32.gmra.mrb[8].mxu1 %vm125_vm0, %v8174_v1  ;;  %v775_v24 = vld [vmem:[#allocation3 + $0xb0] sm:$0xff]  ;;  %v782_v28 = vld [vmem:[#allocation3 + $0xe8] sm:$0xff]  ;;  %v788_v31 = vld [vmem:[#allocation3 + $0x118] sm:$0xff]  ;;  %v8369_v32 = vpack.c.bf16 %v796_v19, %v790_v17 }
  0x36   :  { %429 = vmatprep.mubr.f32.mxu1 %v10090_v0  ;;  %v789_v34 = vld [vmem:[#allocation3 + $0x120] sm:$0xff]  ;;  %v8372_v35 = vpack.c.bf16 %v775_v24, %v769_v23  ;;  %v802_v49 = vld [vmem:[#allocation3 + $0x188] sm:$0xff]  ;;  %v808_v51 = vld [vmem:[#allocation3 + $0x1b8] sm:$0xff]  ;;  %v8378_v52 = vpack.c.bf16 %v788_v31, %v782_v28 }
  0x37   :  { %5878 = vmatpush1.bf16.msra.mxu1 %v8202_v14  ;;  %v781_v53 = vld [vmem:[#allocation3 + $0xe0] sm:$0xff]  ;;  %v787_v59 = vld [vmem:[#allocation3 + $0x110] sm:$0xff]  ;;  %v794_v62 = vld [vmem:[#allocation3 + $0x148] sm:$0xff] }
  0x38   :  { %5592 = vmatmul.mubr.msk.f32.gmra.mrb[12].mxu0 %vm125_vm0, %v8208_v15  ;;  %5880 = vmatprep.subr.bf16.mxu1 %v8214_v18  ;;  %v800_v2 = vld [vmem:[#allocation3 + $0x178] sm:$0xff]  ;;  %v8389_v9 = vpack.c.bf16 %v787_v59, %v781_v53  ;;  %v814_v10 = vld [vmem:[#allocation3 + $0x1e8] sm:$0xff]  ;;  %v793_v17 = vld [vmem:[#allocation3 + $0x140] sm:$0xff] }
  0x39   :  { %280 = vmatprep.mubr.f32.mxu0 %v10090_v0  ;;  %5607 = vmatmul.mubr.msk.f32.gmra.mrb[10].mxu1 %vm125_vm0, %v8191_v8  ;;  %v820_v13 = vld [vmem:[#allocation3 + $0x218] sm:$0xff]  ;;  %v8395_v16 = vpack.c.bf16 %v800_v2, %v794_v62  ;;  %v799_v19 = vld [vmem:[#allocation3 + $0x170] sm:$0xff]  ;;  %v806_v24 = vld [vmem:[#allocation3 + $0x1a8] sm:$0xff] }
  0x3a   :  { %435 = vmatprep.mubr.f32.mxu1 %v10090_v0  ;;  %v812_v28 = vld [vmem:[#allocation3 + $0x1d8] sm:$0xff]  ;;  %v8402_v31 = vpack.c.bf16 %v820_v13, %v814_v10  ;;  %v805_v59 = vld [vmem:[#allocation3 + $0x1a0] sm:$0xff]  ;;  %v811_v62 = vld [vmem:[#allocation3 + $0x1d0] sm:$0xff] }
  0x3b   :  { %5882 = vmatpush1.bf16.msra.mxu1 %v8219_v21  ;;  %v8410_v53 = vpack.c.bf16 %v812_v28, %v806_v24  ;;  %v825_v13 = vld [vmem:[#allocation3 + $0x240] sm:$0xff]  ;;  %v844_v24 = vld [vmem:[#allocation3 + $0x2d8] sm:$0xff] }
  0x3c   :  { %5593 = vmatmul.mubr.msk.f32.gmra.mrb[14].mxu0 %vm125_vm0, %v8225_v22  ;;  %5884 = vmatprep.subr.bf16.mxu1 %v8231_v25  ;;  %10260 = vst [vmem:[#allocation30_spill] sm:$0xff] %v8402_v31 }
  0x3d   :  { %286 = vmatprep.mubr.f32.mxu0 %v10090_v0  ;;  %5608 = vmatmul.mubr.msk.f32.gmra.mrb[12].mxu1 %vm125_vm0, %v8208_v15  ;;  %10262 = vst [vmem:[#allocation32_spill] sm:$0xff] %v8410_v53 }
  0x3e   :  { %441 = vmatprep.mubr.f32.mxu1 %v10090_v0 }
  0x3f   :  { %5886 = vmatpush1.bf16.msra.mxu1 %v8236_v29 }
  0x40   :  { %5594 = vmatmul.mubr.msk.f32.gmra.mrb[16].mxu0 %vm125_vm0, %v8242_v30  ;;  %5888 = vmatprep.subr.bf16.mxu1 %v8248_v33 }
  0x41   :  { %292 = vmatprep.mubr.f32.mxu0 %v10090_v0  ;;  %5609 = vmatmul.mubr.msk.f32.gmra.mrb[14].mxu1 %vm125_vm0, %v8225_v22 }
  0x42   :  { %447 = vmatprep.mubr.f32.mxu1 %v10090_v0 }
  0x43   :  { %5890 = vmatpush1.bf16.msra.mxu1 %v8253_v36 }
  0x44   :  { %5595 = vmatmul.mubr.msk.f32.gmra.mrb[18].mxu0 %vm125_vm0, %v8259_v38  ;;  %5892 = vmatprep.subr.bf16.mxu1 %v8265_v39 }
  0x45   :  { %298 = vmatprep.mubr.f32.mxu0 %v10090_v0  ;;  %5610 = vmatmul.mubr.msk.f32.gmra.mrb[16].mxu1 %vm125_vm0, %v8242_v30 }
  0x46   :  { %453 = vmatprep.mubr.f32.mxu1 %v10090_v0 }
  0x48   :  { %5596 = vmatmul.mubr.msk.f32.gmra.mrb[20].mxu0 %vm125_vm0, %v8274_v40 }
  0x49   :  { %304 = vmatprep.mubr.f32.mxu0 %v10090_v0  ;;  %5611 = vmatmul.mubr.msk.f32.gmra.mrb[18].mxu1 %vm125_vm0, %v8259_v38 }
  0x4a   :  { %459 = vmatprep.mubr.f32.mxu1 %v10090_v0 }
  0x4c   :  { %5597 = vmatmul.mubr.msk.f32.gmra.mrb[22].mxu0 %vm125_vm0, %v8286_v41 }
  0x4d   :  { %310 = vmatprep.mubr.f32.mxu0 %v10090_v0  ;;  %5612 = vmatmul.mubr.msk.f32.gmra.mrb[20].mxu1 %vm125_vm0, %v8274_v40 }
  0x4e   :  { %465 = vmatprep.mubr.f32.mxu1 %v10090_v0 }
  0x50   :  { %5598 = vmatmul.mubr.msk.f32.gmra.mrb[24].mxu0 %vm125_vm0, %v8297_v42 }
  0x51   :  { %316 = vmatprep.mubr.f32.mxu0 %v10090_v0  ;;  %5613 = vmatmul.mubr.msk.f32.gmra.mrb[22].mxu1 %vm125_vm0, %v8286_v41 }
  0x52   :  { %471 = vmatprep.mubr.f32.mxu1 %v10090_v0 }
  0x54   :  { %5599 = vmatmul.mubr.msk.f32.gmra.mrb[26].mxu0 %vm125_vm0, %v8308_v44 }
  0x55   :  { %322 = vmatprep.mubr.f32.mxu0 %v10090_v0  ;;  %5614 = vmatmul.mubr.msk.f32.gmra.mrb[24].mxu1 %vm125_vm0, %v8297_v42 }
  0x56   :  { %477 = vmatprep.mubr.f32.mxu1 %v10090_v0 }
  0x58   :  { %5600 = vmatmul.mubr.msk.f32.gmra.mrb[28].mxu0 %vm125_vm0, %v8319_v45 }
  0x59   :  { %328 = vmatprep.mubr.f32.mxu0 %v10090_v0  ;;  %5615 = vmatmul.mubr.msk.f32.gmra.mrb[26].mxu1 %vm125_vm0, %v8308_v44 }
  0x5a   :  { %483 = vmatprep.mubr.f32.mxu1 %v10090_v0 }
  0x5c   :  { %5601 = vmatmul.mubr.msk.f32.gmra.mrb[30].mxu0 %vm125_vm0, %v8330_v48 }
  0x5d   :  { %560 = vmatprep.mubr.f32.mxu0 %v10090_v0  ;;  %5616 = vmatmul.mubr.msk.f32.gmra.mrb[28].mxu1 %vm125_vm0, %v8319_v45 }
  0x5e   :  { %489 = vmatprep.mubr.f32.mxu1 %v10090_v0 }
  0x60   :  { %5618 = vmatmul.mubr.msk.f32.vlgmr.msra.gmra.mrb[32].mxu0 %vm125_vm0, %v8099_v26  ;;  %v8357_v26 = vpack.c.bf16 %v763_v5, %v757_v3  ;;  %v8386_v3 = vpack.c.bf16 %v808_v51, %v802_v49  ;;  %v807_v5 = vld [vmem:[#allocation3 + $0x1b0] sm:$0xff]  ;;  %v826_v49 = vld [vmem:[#allocation3 + $0x248] sm:$0xff]  ;;  %v832_v51 = vld [vmem:[#allocation3 + $0x278] sm:$0xff] }
  0x61   :  { %5830 = vmatpush1.bf16.msra.mxu0 %v8338_v54  ;;  %566 = vmatprep.mubr.f32.mxu0 %v10090_v0  ;;  %v8417_v10 = vpack.c.bf16 %v832_v51, %v826_v49  ;;  %v830_v49 = vld [vmem:[#allocation3 + $0x268] sm:$0xff]  ;;  %v836_v51 = vld [vmem:[#allocation3 + $0x298] sm:$0xff] }
  0x62   :  { %5832 = vmatprep.subr.bf16.mxu0 %v8342_v58  ;;  %5617 = vmatmul.mubr.msk.f32.gmra.mrb[30].mxu1 %vm125_vm0, %v8330_v48  ;;  %10258 = vst [vmem:[#allocation28_spill] sm:$0xff] %v8386_v3 }
  0x63   :  { %1020 = vmatprep.mubr.f32.mxu1 %v10090_v0  ;;  %10264 = vst [vmem:[#allocation34_spill] sm:$0xff] %v8417_v10 }
  0x64   :  { %5619 = vmatmul.mubr.msk.f32.gmra.mrb[34].mxu0 %vm125_vm0, %v8125_v37  ;;  %v795_v37 = vld [vmem:[#allocation3 + $0x150] sm:$0xff] }
  0x65   :  { %572 = vmatprep.mubr.f32.mxu0 %v10090_v0  ;;  %5834 = vmatpush1.bf16.msra.mxu0 %v8349_v6  ;;  %v8382_v61 = vpack.c.bf16 %v795_v37, %v789_v34  ;;  %v813_v34 = vld [vmem:[#allocation3 + $0x1e0] sm:$0xff]  ;;  %v8405_v37 = vpack.c.bf16 %v799_v19, %v793_v17  ;;  %v8420_v17 = vpack.c.bf16 %v811_v62, %v805_v59  ;;  %v838_v19 = vld [vmem:[#allocation3 + $0x2a8] sm:$0xff] }
  0x66   :  { %5836 = vmatprep.subr.bf16.mxu0 %v8352_v12  ;;  %1021 = vmatmul.mubr.f32.vlgmr.msra.gmra.mrb[32].mxu1 %v10090_v0  ;;  %v8432_v59 = vpack.c.bf16 %v844_v24, %v838_v19  ;;  %v837_v62 = vld [vmem:[#allocation3 + $0x2a0] sm:$0xff]  ;;  %v842_v19 = vld [vmem:[#allocation3 + $0x2c8] sm:$0xff]  ;;  %v848_v24 = vld [vmem:[#allocation3 + $0x2f8] sm:$0xff] }
  0x67   :  { %5894 = vmatpush1.bf16.msra.mxu1 %v8357_v26  ;;  %1025 = vmatprep.mubr.f32.mxu1 %v10090_v0  ;;  %10261 = vst [vmem:[#allocation31_spill] sm:$0xff] %v8405_v37 }
  0x68   :  { %5620 = vmatmul.mubr.msk.f32.gmra.mrb[36].mxu0 %vm125_vm0, %v8137_v47  ;;  %5896 = vmatprep.subr.bf16.mxu1 %v8361_v20  ;;  %v801_v47 = vld [vmem:[#allocation3 + $0x180] sm:$0xff]  ;;  %10266 = vst [vmem:[#allocation36_spill] sm:$0xff] %v8432_v59 }
  0x69   :  { %578 = vmatprep.mubr.f32.mxu0 %v10090_v0  ;;  %5838 = vmatpush1.bf16.msra.mxu0 %v8365_v27  ;;  %v8399_v23 = vpack.c.bf16 %v807_v5, %v801_v47  ;;  %v818_v47 = vld [vmem:[#allocation3 + $0x208] sm:$0xff]  ;;  %v824_v5 = vld [vmem:[#allocation3 + $0x238] sm:$0xff] }
  0x6a   :  { %5840 = vmatprep.subr.bf16.mxu0 %v8369_v32  ;;  %1026 = vmatmul.mubr.f32.gmra.mrb[34].mxu1 %v10090_v0  ;;  %v8425_v28 = vpack.c.bf16 %v824_v5, %v818_v47  ;;  %v8440_v5 = vpack.c.bf16 %v836_v51, %v830_v49  ;;  %v847_v49 = vld [vmem:[#allocation3 + $0x2f0] sm:$0xff] }
  0x6b   :  { %5898 = vmatpush1.bf16.msra.mxu1 %v8372_v35  ;;  %1095 = vmatprep.mubr.f32.mxu1 %v10090_v0  ;;  %10259 = vst [vmem:[#allocation29_spill] sm:$0xff] %v8399_v23 }
  0x6c   :  { %5621 = vmatmul.mubr.msk.f32.gmra.mrb[38].mxu0 %vm125_vm0, %v8156_v57  ;;  %5900 = vmatprep.subr.bf16.mxu1 %v8378_v52  ;;  %v819_v57 = vld [vmem:[#allocation3 + $0x210] sm:$0xff] }
  0x6d   :  { %584 = vmatprep.mubr.f32.mxu0 %v10090_v0  ;;  %5842 = vmatpush1.bf16.msra.mxu0 %v8382_v61  ;;  %v8414_v2 = vpack.c.bf16 %v819_v57, %v813_v34  ;;  %v817_v34 = vld [vmem:[#allocation3 + $0x200] sm:$0xff]  ;;  %v823_v57 = vld [vmem:[#allocation3 + $0x230] sm:$0xff] }
  0x6e   :  { %5844 = vmatprep.subr.bf16.mxu0 %v8386_v3  ;;  %v8435_v47 = vpack.c.bf16 %v823_v57, %v817_v34  ;;  %v841_v57 = vld [vmem:[#allocation3 + $0x2c0] sm:$0xff] }
  0x6f   :  { %5902 = vmatpush1.bf16.msra.mxu1 %v8389_v9  ;;  %10263 = vst [vmem:[#allocation33_spill] sm:$0xff] %v8414_v2  ;;  %v8459_v51 = vpack.c.bf16 %v847_v49, %v841_v57 }
  0x70   :  { %5622 = vmatmul.mubr.msk.f32.gmra.mrb[40].mxu0 %vm125_vm0, %v8174_v1  ;;  %5904 = vmatprep.subr.bf16.mxu1 %v8395_v16  ;;  %v831_v1 = vld [vmem:[#allocation3 + $0x270] sm:$0xff] }
  0x71   :  { %590 = vmatprep.mubr.f32.mxu0 %v10090_v0  ;;  %5846 = vmatpush1.bf16.msra.mxu0 %v8399_v23 }
  0x72   :  { %5848 = vmatprep.subr.bf16.mxu0 %v8402_v31 }
  0x73   :  { %5906 = vmatpush1.bf16.msra.mxu1 %v8405_v37  ;;  %v8429_v37 = vpack.c.bf16 %v831_v1, %v825_v13  ;;  %v835_v13 = vld [vmem:[#allocation3 + $0x290] sm:$0xff]  ;;  %v10267_v1 = vmov 0.0  }
  0x74   :  { %5623 = vmatmul.mubr.msk.f32.gmra.mrb[42].mxu0 %vm125_vm0, %v8191_v8  ;;  %5908 = vmatprep.subr.bf16.mxu1 %v8410_v53  ;;  %v843_v8 = vld [vmem:[#allocation3 + $0x2d0] sm:$0xff] }
  0x75   :  { %596 = vmatprep.mubr.f32.mxu0 %v10090_v0  ;;  %5850 = vmatpush1.bf16.msra.mxu0 %v8414_v2  ;;  %10265 = vst [vmem:[#allocation35_spill] sm:$0xff] %v8429_v37  ;;  %v829_v0 = vld [vmem:[#allocation3 + $0x260] sm:$0xff]  ;;  %v8444_v53 = vpack.c.bf16 %v843_v8, %v837_v62 }
  0x76   :  { %5852 = vmatprep.subr.bf16.mxu0 %v8417_v10  ;;  %v8448_v34 = vpack.c.bf16 %v835_v13, %v829_v0  ;;  %v95_v0 = vlaneseq }
  0x77   :  { %5910 = vmatpush1.bf16.msra.mxu1 %v8420_v17  ;;  %10268 = vst [vmem:[#allocation37_spill] sm:$0xff] %v8444_v53 }
  0x78   :  { %5624 = vmatmul.mubr.msk.f32.gmra.mrb[44].mxu0 %vm125_vm0, %v8208_v15  ;;  %5912 = vmatprep.subr.bf16.mxu1 %v8425_v28  ;;  %v8453_v15 = vpack.c.bf16 %v848_v24, %v842_v19 }
  0x79   :  { %602 = vmatprep.mubr.f32.mxu0 %v10267_v1  ;;  %5854 = vmatpush1.bf16.msra.mxu0 %v8429_v37 }
  0x7a   :  { %5856 = vmatprep.subr.bf16.mxu0 %v8432_v59 }
  0x7b   :  { %5914 = vmatpush1.bf16.msra.mxu1 %v8435_v47 }
  0x7c   :  { %5625 = vmatmul.mubr.msk.f32.gmra.mrb[46].mxu0 %vm125_vm0, %v8225_v22  ;;  %5916 = vmatprep.subr.bf16.mxu1 %v8440_v5  ;;  %v8528_v22 = vshrl.u32 %v95_v0, 7 }
  0x7d   :  { %608 = vmatprep.mubr.f32.mxu0 %v10267_v1  ;;  %5858 = vmatpush1.bf16.msra.mxu0 %v8444_v53 }
  0x7e   :  { %5924 = vmatprep.subr.bf16.mxu0 %v8145_v55 }
  0x7f   :  { %5918 = vmatpush1.bf16.msra.mxu1 %v8448_v34 }
  0x80   :  { %5626 = vmatmul.mubr.msk.f32.gmra.mrb[48].mxu0 %vm125_vm0, %v8242_v30  ;;  %5920 = vmatprep.subr.bf16.mxu1 %v8453_v15  ;;  %v10095_v30 = vsub.s32 3, %v8528_v22 }
  0x81   :  { %614 = vmatprep.mubr.f32.mxu0 %v10267_v1 }
  0x83   :  { %5922 = vmatpush1.bf16.msra.mxu1 %v8459_v51 }
  0x84   :  { %5627 = vmatmul.mubr.msk.f32.gmra.mrb[50].mxu0 %vm125_vm0, %v8259_v38  ;;  %5956 = vmatprep.subr.bf16.mxu1 %v8127_v43  ;;  %v8534_v38 = vld [vmem:[%s10077_s2] sm:$0x3f]  ;;  %s7868_s2 = scalar_lea.vmem %s5523_s19, 128 }
  0x85   :  { %620 = vmatprep.mubr.f32.mxu0 %v10267_v1  ;;  %p7869_p8 = scmp.ne.s32.totalorder %s5523_s19, %s7868_s2  ;;  %p7874_p10 = scmp.lt.s32.totalorder %s7868_s2, %s7868_s2 }
  0x86   :  { %1096 = vmatmul.mubr.f32.vlgmr.msra.gmra.mrb[36].mxu1 %v10267_v1 }
  0x87   :  { %1099 = vmatprep.mubr.f32.mxu1 %v10267_v1  ;;  %5958 = vmatpush1.bf16.msra.mxu1 %v8131_v46  ;;  %p7875_p11 = por %p7874_p10, %p7873_p9 }
  0x88   :  { %5628 = vmatmul.mubr.msk.f32.gmra.mrb[52].mxu0 %vm125_vm0, %v8274_v40  ;;  %5960 = vmatprep.subr.bf16.mxu1 %v8142_v50  ;;  %v8539_v40 = vrot.slane %v8534_v38, %v10095_v30 }
  0x89   :  { %626 = vmatprep.mubr.f32.mxu0 %v10267_v1  ;;  %p7876_p12 = pnand %p7875_p11, %p7869_p8 }
  0x8a   :  { %1100 = vmatmul.mubr.f32.gmra.mrb[38].mxu1 %v10267_v1 }
  0x8b   :  { %5962 = vmatpush1.bf16.msra.mxu1 %v8150_v56  ;;  %1305 = vmatprep.mubr.f32.mxu1 %v10267_v1 }
  0x8c   :  { %5629 = vmatmul.mubr.msk.f32.gmra.mrb[54].mxu0 %vm125_vm0, %v8286_v41  ;;  %5964 = vmatprep.subr.bf16.mxu1 %v8162_v60  ;;  %v10094_v41 = vsub.s32 2, %v8528_v22 }
  0x8d   :  { %632 = vmatprep.mubr.f32.mxu0 %v10267_v1 }
  0x8f   :  { %5966 = vmatpush1.bf16.msra.mxu1 %v8168_v63 }
  0x90   :  { %5630 = vmatmul.mubr.msk.f32.gmra.mrb[56].mxu0 %vm125_vm0, %v8297_v42  ;;  %5968 = vmatprep.subr.bf16.mxu1 %v8180_v4 }
  0x91   :  { %638 = vmatprep.mubr.f32.mxu0 %v10267_v1 }
  0x93   :  { %5970 = vmatpush1.bf16.msra.mxu1 %v8185_v7 }
  0x94   :  { %5631 = vmatmul.mubr.msk.f32.gmra.mrb[58].mxu0 %vm125_vm0, %v8308_v44  ;;  %5972 = vmatprep.subr.bf16.mxu1 %v8197_v11 }
  0x95   :  { %644 = vmatprep.mubr.f32.mxu0 %v10267_v1 }
  0x97   :  { %5974 = vmatpush1.bf16.msra.mxu1 %v8202_v14 }
  0x98   :  { %5632 = vmatmul.mubr.msk.f32.gmra.mrb[60].mxu0 %vm125_vm0, %v8319_v45  ;;  %5976 = vmatprep.subr.bf16.mxu1 %v8214_v18 }
  0x99   :  { %650 = vmatprep.mubr.f32.mxu0 %v10267_v1 }
  0x9b   :  { %5978 = vmatpush1.bf16.msra.mxu1 %v8219_v21 }
  0x9c   :  { %5633 = vmatmul.mubr.msk.f32.gmra.mrb[62].mxu0 %vm125_vm0, %v8330_v48  ;;  %5980 = vmatprep.subr.bf16.mxu1 %v8231_v25  ;;  %v8550_v48 = vrot.slane %v8534_v38, %v10094_v41 }
  0x9d   :  { %945 = vmatprep.mubr.f32.mxu0 %v10267_v1 }
  0x9f   :  { %5982 = vmatpush1.bf16.msra.mxu1 %v8236_v29 }
  0xa0   :  { %946 = vmatmul.mubr.f32.vlgmr.msra.gmra.mrb[0].mxu0 %v10267_v1  ;;  %5984 = vmatprep.subr.bf16.mxu1 %v8248_v33 }
  0xa1   :  { %5926 = vmatpush1.bf16.msra.mxu0 %v8338_v54  ;;  %951 = vmatprep.mubr.f32.mxu0 %v10267_v1 }
  0xa2   :  { %5928 = vmatprep.subr.bf16.mxu0 %v8342_v58 }
  0xa3   :  { %5986 = vmatpush1.bf16.msra.mxu1 %v8253_v36 }
  0xa4   :  { %952 = vmatmul.mubr.f32.gmra.mrb[64].mxu0 %v10267_v1  ;;  %5988 = vmatprep.subr.bf16.mxu1 %v8265_v39 }
  0xa5   :  { %5930 = vmatpush1.bf16.msra.mxu0 %v8349_v6  ;;  %1230 = vmatprep.mubr.f32.mxu0 %v10267_v1 }
  0xa6   :  { %5932 = vmatprep.subr.bf16.mxu0 %v8352_v12 }
  0xa9   :  { %5934 = vmatpush1.bf16.msra.mxu0 %v8365_v27 }
  0xaa   :  { %5936 = vmatprep.subr.bf16.mxu0 %v8369_v32 }
  0xad   :  { %5938 = vmatpush1.bf16.msra.mxu0 %v8382_v61 }
  0xae   :  { %5940 = vmatprep.subr.bf16.mxu0 %v8386_v3 }
  0xb1   :  { %5942 = vmatpush1.bf16.msra.mxu0 %v8399_v23 }
  0xb2   :  { %5944 = vmatprep.subr.bf16.mxu0 %v8402_v31 }
  0xb5   :  { %5946 = vmatpush1.bf16.msra.mxu0 %v8414_v2 }
  0xb6   :  { %5948 = vmatprep.subr.bf16.mxu0 %v8417_v10 }
  0xb9   :  { %5950 = vmatpush1.bf16.msra.mxu0 %v8429_v37 }
  0xba   :  { %5952 = vmatprep.subr.bf16.mxu0 %v8432_v59 }
  0xbd   :  { %5954 = vmatpush1.bf16.msra.mxu0 %v8444_v53 }
  0xbe   :  { %6020 = vmatprep.subr.bf16.mxu0 %v8145_v55 }
  0xf8   :  { %v8542_v42 = vpop.f32.mrb[0].mxu1 }
  0xf9   :  { %v403_v44 = vpop.f32.mrb[1].mxu1 }
  0xfa   :  { %v8545_v45 = vadd.f32 %v403_v44, %v8539_v40 }
  0xfc   :  { %10269 = vst [vmem:[#allocation38_spill] sm:$0xff] %v8545_v45  ;;  %v407_v62 = vpop.f32.mrb[2].mxu1 }
  0xfd   :  { %v8553_v8 = vadd.f32 %v407_v62, %v8550_v48  ;;  %v409_v13 = vpop.f32.mrb[3].mxu1 }
  0xfe   :  { %v8556_v19 = vadd.f32 %v409_v13, %v8539_v40 }
  0xff   :  { %10270 = vst [vmem:[#allocation39_spill] sm:$0xff] %v8553_v8 }
 0x100   :  { %10271 = vst [vmem:[#allocation40_spill] sm:$0xff] %v8556_v19  ;;  %v413_v24 = vpop.f32.mrb[4].mxu1 }
 0x101   :  { %v8559_v57 = vadd.f32 %v413_v24, %v8550_v48  ;;  %v415_v49 = vpop.f32.mrb[5].mxu1 }
 0x102   :  { %v8562_v0 = vadd.f32 %v415_v49, %v8539_v40 }
 0x103   :  { %10272 = vst [vmem:[#allocation41_spill] sm:$0xff] %v8559_v57 }
 0x104   :  { %10273 = vst [vmem:[#allocation42_spill] sm:$0xff] %v8562_v0  ;;  %v419_v44 = vpop.f32.mrb[6].mxu1 }
 0x105   :  { %v8565_v41 = vadd.f32 %v419_v44, %v8550_v48  ;;  %v421_v30 = vpop.f32.mrb[7].mxu1 }
 0x106   :  { %v8568_v62 = vadd.f32 %v421_v30, %v8539_v40 }
 0x107   :  { %10274 = vst [vmem:[#allocation43_spill] sm:$0xff] %v8565_v41 }
 0x108   :  { %10275 = vst [vmem:[#allocation44_spill] sm:$0xff] %v8568_v62  ;;  %v425_v45 = vpop.f32.mrb[8].mxu1 }
 0x109   :  { %v8571_v13 = vadd.f32 %v425_v45, %v8550_v48  ;;  %v427_v19 = vpop.f32.mrb[9].mxu1 }
 0x10a   :  { %v8574_v24 = vadd.f32 %v427_v19, %v8539_v40 }
 0x10b   :  { %10276 = vst [vmem:[#allocation45_spill] sm:$0xff] %v8571_v13 }
 0x10c   :  { %10277 = vst [vmem:[#allocation46_spill] sm:$0xff] %v8574_v24  ;;  %v431_v57 = vpop.f32.mrb[10].mxu1 }
 0x10d   :  { %v8577_v49 = vadd.f32 %v431_v57, %v8550_v48  ;;  %v433_v0 = vpop.f32.mrb[11].mxu1 }
 0x10e   :  { %v8580_v44 = vadd.f32 %v433_v0, %v8539_v40 }
 0x10f   :  { %10278 = vst [vmem:[#allocation47_spill] sm:$0xff] %v8577_v49 }
 0x110   :  { %10279 = vst [vmem:[#allocation48_spill] sm:$0xff] %v8580_v44  ;;  %v437_v41 = vpop.f32.mrb[12].mxu1 }
 0x111   :  { %v8583_v30 = vadd.f32 %v437_v41, %v8550_v48  ;;  %v439_v62 = vpop.f32.mrb[13].mxu1 }
 0x112   :  { %v8586_v45 = vadd.f32 %v439_v62, %v8539_v40 }
 0x113   :  { %10280 = vst [vmem:[#allocation49_spill] sm:$0xff] %v8583_v30 }
 0x114   :  { %10281 = vst [vmem:[#allocation50_spill] sm:$0xff] %v8586_v45  ;;  %v443_v13 = vpop.f32.mrb[14].mxu1 }
 0x115   :  { %v8589_v19 = vadd.f32 %v443_v13, %v8550_v48  ;;  %v445_v24 = vpop.f32.mrb[15].mxu1 }
 0x116   :  { %v8592_v57 = vadd.f32 %v445_v24, %v8539_v40 }
 0x117   :  { %10282 = vst [vmem:[#allocation51_spill] sm:$0xff] %v8589_v19 }
 0x118   :  { %10283 = vst [vmem:[#allocation52_spill] sm:$0xff] %v8592_v57  ;;  %v449_v49 = vpop.f32.mrb[16].mxu1 }
 0x119   :  { %v8595_v0 = vadd.f32 %v449_v49, %v8550_v48  ;;  %v451_v44 = vpop.f32.mrb[17].mxu1 }
 0x11a   :  { %v8598_v41 = vadd.f32 %v451_v44, %v8539_v40 }
 0x11b   :  { %10284 = vst [vmem:[#allocation53_spill] sm:$0xff] %v8595_v0 }
 0x11c   :  { %10285 = vst [vmem:[#allocation54_spill] sm:$0xff] %v8598_v41  ;;  %v455_v30 = vpop.f32.mrb[18].mxu1 }
 0x11d   :  { %v8601_v62 = vadd.f32 %v455_v30, %v8550_v48  ;;  %v457_v45 = vpop.f32.mrb[19].mxu1 }
 0x11e   :  { %v8604_v13 = vadd.f32 %v457_v45, %v8539_v40 }
 0x11f   :  { %10286 = vst [vmem:[#allocation55_spill] sm:$0xff] %v8601_v62 }
 0x120   :  { %10287 = vst [vmem:[#allocation56_spill] sm:$0xff] %v8604_v13  ;;  %v461_v19 = vpop.f32.mrb[20].mxu1 }
 0x121   :  { %v8607_v24 = vadd.f32 %v461_v19, %v8550_v48  ;;  %v463_v57 = vpop.f32.mrb[21].mxu1 }
 0x122   :  { %v8610_v49 = vadd.f32 %v463_v57, %v8539_v40 }
 0x123   :  { %10288 = vst [vmem:[#allocation57_spill] sm:$0xff] %v8607_v24  ;;  %v10096_v24 = vsub.s32 4, %v8528_v22 }
 0x124   :  { %10289 = vst [vmem:[#allocation58_spill] sm:$0xff] %v8610_v49  ;;  %v467_v0 = vpop.f32.mrb[22].mxu1  ;;  %v10099_v49 = vsub.s32 5, %v8528_v22 }
 0x125   :  { %v8613_v44 = vadd.f32 %v467_v0, %v8550_v48  ;;  %v469_v41 = vpop.f32.mrb[23].mxu1 }
 0x126   :  { %v8616_v30 = vadd.f32 %v469_v41, %v8539_v40 }
 0x127   :  { %10290 = vst [vmem:[#allocation59_spill] sm:$0xff] %v8613_v44 }
 0x128   :  { %10291 = vst [vmem:[#allocation60_spill] sm:$0xff] %v8616_v30  ;;  %v473_v62 = vpop.f32.mrb[24].mxu1 }
 0x129   :  { %v8619_v45 = vadd.f32 %v473_v62, %v8550_v48  ;;  %v475_v13 = vpop.f32.mrb[25].mxu1  ;;  %v8635_v62 = vrot.slane %v8534_v38, %v10096_v24 }
 0x12a   :  { %v8622_v19 = vadd.f32 %v475_v13, %v8539_v40  ;;  %v8640_v13 = vrot.slane %v8534_v38, %v10099_v49 }
 0x12b   :  { %10292 = vst [vmem:[#allocation61_spill] sm:$0xff] %v8619_v45 }
 0x12c   :  { %10293 = vst [vmem:[#allocation62_spill] sm:$0xff] %v8622_v19  ;;  %v479_v57 = vpop.f32.mrb[26].mxu1 }
 0x12d   :  { %v8627_v0 = vadd.f32 %v479_v57, %v8550_v48  ;;  %v481_v44 = vpop.f32.mrb[27].mxu1 }
 0x12e   :  { %v8630_v41 = vadd.f32 %v481_v44, %v8539_v40 }
 0x12f   :  { %10294 = vst [vmem:[#allocation63_spill] sm:$0xff] %v8627_v0 }
 0x130   :  { %10295 = vst [vmem:[#allocation64_spill] sm:$0xff] %v8630_v41  ;;  %v485_v45 = vpop.f32.mrb[28].mxu1 }
 0x131   :  { %v8643_v30 = vadd.f32 %v485_v45, %v8550_v48  ;;  %v487_v57 = vpop.f32.mrb[29].mxu1 }
 0x132   :  { %v8646_v0 = vadd.f32 %v487_v57, %v8539_v40  ;;  %v8663_v57 = vld [vmem:[%s10079_s4] sm:$0x3f] }
 0x133   :  { %10296 = vst [vmem:[#allocation65_spill] sm:$0xff] %v8643_v30  ;;  %v562_v44 = vpop.f32.mrb[32].mxu0 }
 0x134   :  { %10297 = vst [vmem:[#allocation66_spill] sm:$0xff] %v8646_v0  ;;  %v8649_v19 = vadd.f32 %v562_v44, %v8635_v62  ;;  %v564_v41 = vpop.f32.mrb[33].mxu0 }
 0x135   :  { %v8652_v24 = vadd.f32 %v564_v41, %v8640_v13  ;;  %v491_v55 = vpop.f32.mrb[30].mxu1 }
 0x136   :  { %10298 = vst [vmem:[#allocation67_spill] sm:$0xff] %v8649_v19  ;;  %v8655_v8 = vadd.f32 %v491_v55, %v8550_v48  ;;  %v493_v49 = vpop.f32.mrb[31].mxu1  ;;  %v10303_v55 = vsub.s32 3, %v8528_v22 }
 0x137   :  { %10299 = vst [vmem:[#allocation68_spill] sm:$0xff] %v8652_v24  ;;  %v568_v36 = vpop.f32.mrb[34].mxu0  ;;  %v494_v33 = vadd.f32 %v493_v49, %v8539_v40 }
 0x138   :  { %10300 = vst [vmem:[#allocation69_spill] sm:$0xff] %v8655_v8  ;;  %v8658_v45 = vadd.f32 %v568_v36, %v8635_v62  ;;  %v570_v30 = vpop.f32.mrb[35].mxu0  ;;  %v8673_v8 = vrot.slane %v8663_v57, %v10303_v55 }
 0x139   :  { %v8666_v44 = vadd.f32 %v570_v30, %v8640_v13  ;;  %v8668_v41 = vpop.f32.mrb[32].mxu1 }
 0x13a   :  { %10301 = vst [vmem:[#allocation70_spill] sm:$0xff] %v8658_v45  ;;  %v1024_v24 = vpop.f32.mrb[33].mxu1  ;;  %10304 = vst [vmem:[#allocation72_spill] sm:$0xff] %v8673_v8 }
 0x13b   :  { %10302 = vst [vmem:[#allocation71_spill] sm:$0xff] %v8666_v44  ;;  %v574_v19 = vpop.f32.mrb[36].mxu0 }
 0x13c   :  { %v8676_v36 = vadd.f32 %v574_v19, %v8635_v62  ;;  %v576_v45 = vpop.f32.mrb[37].mxu0 }
 0x13d   :  { %v8679_v0 = vadd.f32 %v576_v45, %v8640_v13  ;;  %v1027_v30 = vpop.f32.mrb[34].mxu1 }
 0x13e   :  { %10305 = vst [vmem:[#allocation73_spill] sm:$0xff] %v8676_v36  ;;  %v1028_v44 = vpop.f32.mrb[35].mxu1 }
 0x13f   :  { %10306 = vst [vmem:[#allocation74_spill] sm:$0xff] %v8679_v0  ;;  %v580_v29 = vpop.f32.mrb[38].mxu0  ;;  %v1029_v24 = vadd.f32 %v1028_v44, %v8673_v8 }
 0x140   :  { %v8684_v25 = vadd.f32 %v580_v29, %v8635_v62  ;;  %v582_v21 = vpop.f32.mrb[39].mxu0 }
 0x141   :  { %v8687_v55 = vadd.f32 %v582_v21, %v8640_v13  ;;  %v1145_v19 = vadd.f32 %v1029_v24, %v494_v33 }
 0x142   :  { %10307 = vst [vmem:[#allocation75_spill] sm:$0xff] %v8684_v25 }
 0x143   :  { %10308 = vst [vmem:[#allocation76_spill] sm:$0xff] %v8687_v55  ;;  %v586_v36 = vpop.f32.mrb[40].mxu0  ;;  %v5636_v18 = vmul.f32 -1.442695, %v1145_v19 }
 0x144   :  { %v8690_v45 = vadd.f32 %v586_v36, %v8635_v62  ;;  %v588_v0 = vpop.f32.mrb[41].mxu0 }
 0x145   :  { %v8693_v40 = vadd.f32 %v588_v0, %v8640_v13  ;;  %7520 = vpow2.f32 %v5636_v18 }
 0x146   :  { %10309 = vst [vmem:[#allocation77_spill] sm:$0xff] %v8690_v45 }
 0x147   :  { %10310 = vst [vmem:[#allocation78_spill] sm:$0xff] %v8693_v40  ;;  %v592_v49 = vpop.f32.mrb[42].mxu0 }
 0x148   :  { %v8696_v44 = vadd.f32 %v592_v49, %v8635_v62  ;;  %v594_v29 = vpop.f32.mrb[43].mxu0 }
 0x149   :  { %v8699_v30 = vadd.f32 %v594_v29, %v8640_v13 }
 0x14a   :  { %10311 = vst [vmem:[#allocation79_spill] sm:$0xff] %v8696_v44 }
 0x14b   :  { %10312 = vst [vmem:[#allocation80_spill] sm:$0xff] %v8699_v30  ;;  %v598_v21 = vpop.f32.mrb[44].mxu0 }
 0x14c   :  { %v8702_v33 = vadd.f32 %v598_v21, %v8635_v62  ;;  %v600_v24 = vpop.f32.mrb[45].mxu0 }
 0x14d   :  { %v8705_v36 = vadd.f32 %v600_v24, %v8640_v13 }
 0x14e   :  { %10313 = vst [vmem:[#allocation81_spill] sm:$0xff] %v8702_v33 }
 0x14f   :  { %10314 = vst [vmem:[#allocation82_spill] sm:$0xff] %v8705_v36  ;;  %v7521_v19 = vpop.eup %7520  ;;  %v604_v0 = vpop.f32.mrb[46].mxu0 }
 0x150   :  { %v8708_v18 = vadd.f32 %v604_v0, %v8635_v62  ;;  %v606_v55 = vpop.f32.mrb[47].mxu0  ;;  %v1149_v49 = vadd.f32 1.0, %v7521_v19 }
 0x151   :  { %v8711_v25 = vadd.f32 %v606_v55, %v8640_v13 }
 0x152   :  { %10315 = vst [vmem:[#allocation83_spill] sm:$0xff] %v8708_v18  ;;  %7522 = vrcp.f32 %v1149_v49  ;;  %v10321_v49 = vsub.s32 5, %v8528_v22 }
 0x153   :  { %10316 = vst [vmem:[#allocation84_spill] sm:$0xff] %v8711_v25  ;;  %v610_v29 = vpop.f32.mrb[48].mxu0 }
 0x154   :  { %v8714_v40 = vadd.f32 %v610_v29, %v8635_v62  ;;  %v612_v21 = vpop.f32.mrb[49].mxu0  ;;  %v8728_v29 = vrot.slane %v8663_v57, %v10321_v49 }
 0x155   :  { %v8717_v45 = vadd.f32 %v612_v21, %v8640_v13 }
 0x156   :  { %10317 = vst [vmem:[#allocation85_spill] sm:$0xff] %v8714_v40  ;;  %10322 = vst [vmem:[#allocation89_spill] sm:$0xff] %v8728_v29 }
 0x157   :  { %10318 = vst [vmem:[#allocation86_spill] sm:$0xff] %v8717_v45  ;;  %v616_v24 = vpop.f32.mrb[50].mxu0 }
 0x158   :  { %v8720_v30 = vadd.f32 %v616_v24, %v8635_v62  ;;  %v618_v0 = vpop.f32.mrb[51].mxu0 }
 0x159   :  { %v8723_v44 = vadd.f32 %v618_v0, %v8640_v13  ;;  %v1097_v19 = vpop.f32.mrb[36].mxu1 }
 0x15a   :  { %10319 = vst [vmem:[#allocation87_spill] sm:$0xff] %v8720_v30  ;;  %v1098_v55 = vpop.f32.mrb[37].mxu1 }
 0x15b   :  { %10320 = vst [vmem:[#allocation88_spill] sm:$0xff] %v8723_v44  ;;  %v622_v36 = vpop.f32.mrb[52].mxu0 }
 0x15c   :  { %v8731_v33 = vadd.f32 %v622_v36, %v8635_v62  ;;  %v624_v21 = vpop.f32.mrb[53].mxu0  ;;  %v7523_v18 = vpop.eup %7522 }
 0x15d   :  { %v8734_v25 = vadd.f32 %v624_v21, %v8640_v13  ;;  %v1101_v24 = vpop.f32.mrb[38].mxu1 }
 0x15e   :  { %10323 = vst [vmem:[#allocation90_spill] sm:$0xff] %v8731_v33  ;;  %v1103_v45 = vpop.f32.mrb[39].mxu1 }
 0x15f   :  { %10324 = vst [vmem:[#allocation91_spill] sm:$0xff] %v8734_v25  ;;  %v628_v0 = vpop.f32.mrb[54].mxu0  ;;  %v1104_v19 = vadd.f32 %v1103_v45, %v8728_v29 }
 0x160   :  { %v8738_v55 = vadd.f32 %v628_v0, %v8635_v62  ;;  %v630_v40 = vpop.f32.mrb[55].mxu0  ;;  %v97_v0 = vsub.s32 0, %v8528_v22 }
 0x161   :  { %v8741_v49 = vadd.f32 %v630_v40, %v8640_v13  ;;  %v1159_v44 = vmul.f32 %v7523_v18, %v1104_v19  ;;  %v10331_v40 = vsub.s32 4, %v8528_v22 }
 0x162   :  { %10325 = vst [vmem:[#allocation92_spill] sm:$0xff] %v8738_v55 }
 0x163   :  { %10326 = vst [vmem:[#allocation93_spill] sm:$0xff] %v8741_v49  ;;  %v634_v36 = vpop.f32.mrb[56].mxu0  ;;  %v8759_v18 = vrot.slane %v8663_v57, %v10331_v40 }
 0x164   :  { %v8744_v30 = vadd.f32 %v634_v36, %v8635_v62  ;;  %v636_v21 = vpop.f32.mrb[57].mxu0  ;;  %v101_v36 = vsub.s32 1, %v8528_v22 }
 0x165   :  { %v8747_v25 = vadd.f32 %v636_v21, %v8640_v13  ;;  %10332 = vst [vmem:[#allocation98_spill] sm:$0xff] %v8759_v18 }
 0x166   :  { %10327 = vst [vmem:[#allocation94_spill] sm:$0xff] %v8744_v30  ;;  %v102_v40 = vrot.slane %v8534_v38, %v101_v36 }
 0x167   :  { %10328 = vst [vmem:[#allocation95_spill] sm:$0xff] %v8747_v25  ;;  %v640_v33 = vpop.f32.mrb[58].mxu0  ;;  %v854_v25 = vrot.slane %v8663_v57, %v97_v0 }
 0x168   :  { %v8750_v8 = vadd.f32 %v640_v33, %v8635_v62  ;;  %v642_v45 = vpop.f32.mrb[59].mxu0  ;;  %v98_v33 = vrot.slane %v8534_v38, %v97_v0 }
 0x169   :  { %v8754_v55 = vadd.f32 %v642_v45, %v8640_v13  ;;  %v1102_v45 = vadd.f32 %v1101_v24, %v8759_v18 }
 0x16a   :  { %10329 = vst [vmem:[#allocation96_spill] sm:$0xff] %v8750_v8  ;;  %v858_v8 = vrot.slane %v8663_v57, %v101_v36 }
 0x16b   :  { %10330 = vst [vmem:[#allocation97_spill] sm:$0xff] %v8754_v55  ;;  %v646_v19 = vpop.f32.mrb[60].mxu0 }
 0x16c   :  { %v8763_v21 = vadd.f32 %v646_v19, %v8635_v62  ;;  %v648_v49 = vpop.f32.mrb[61].mxu0  ;;  %v8774_v19 = vadd.f32 %v854_v25, %v98_v33  ;;  %v8777_v4 = vadd.f32 %v858_v8, %v102_v40  ;;  %v10337_v8 = vsub.s32 2, %v8528_v22 }
 0x16d   :  { %v8768_v30 = vadd.f32 %v648_v49, %v8640_v13 }
 0x16e   :  { %10333 = vst [vmem:[#allocation99_spill] sm:$0xff] %v8763_v21  ;;  %10335 = vst [vmem:[#allocation101_spill] sm:$0xff] %v8774_v19 }
 0x16f   :  { %10334 = vst [vmem:[#allocation100_spill] sm:$0xff] %v8768_v30  ;;  %v652_v55 = vpop.f32.mrb[62].mxu0  ;;  %10336 = vst [vmem:[#allocation102_spill] sm:$0xff] %v8777_v4 }
 0x170   :  { %v653_v29 = vadd.f32 %v652_v55, %v8635_v62  ;;  %v654_v14 = vpop.f32.mrb[63].mxu0 }
 0x171   :  { %v655_v21 = vadd.f32 %v654_v14, %v8640_v13 }
 0x172   :  { %v1152_v11 = vadd.f32 %v1102_v45, %v653_v29  ;;  %v8784_v29 = vrot.slane %v8663_v57, %v10337_v8  ;;  %v10345_v8 = vld [vmem:[#allocation22_spill] sm:$0xff] }
 0x173   :  { %v1160_v7 = vadd.f32 %v1159_v44, %v655_v21  ;;  %v947_v0 = vpop.f32.mrb[0].mxu0 }
 0x174   :  { %v5637_v49 = vmul.f32 -1.442695, %v1152_v11  ;;  %v7412_v24 = vadd.f32 %v8774_v19, %v947_v0  ;;  %v949_v30 = vpop.f32.mrb[1].mxu0  ;;  %10338 = vst [vmem:[#allocation103_spill] sm:$0xff] %v8784_v29  ;;  %v1023_v33 = vadd.f32 %v8668_v41, %v8784_v29  ;;  %v402_v0 = vadd.f32 %v8542_v42, %v8550_v48  ;;  %v10339_v42 = vld [vmem:[#allocation31_spill] sm:$0xff]  ;;  %v10340_v48 = vld [vmem:[#allocation32_spill] sm:$0xff] }
 0x175   :  { %v7414_v36 = vadd.f32 %v8777_v4, %v949_v30  ;;  %v10341_v41 = vld [vmem:[#allocation18_spill] sm:$0xff] }
 0x176   :  { %7524 = vpow2.f32 %v5637_v49  ;;  %v5634_v38 = vmul.f32 -1.442695, %v7412_v24 }
 0x177   :  { %v953_v18 = vpop.f32.mrb[64].mxu0  ;;  %v5635_v25 = vmul.f32 -1.442695, %v7414_v36 }
 0x178   :  { %7526 = vpow2.f32 %v5634_v38  ;;  %v954_v62 = vpop.f32.mrb[65].mxu0 }
 0x179   :  { %7528 = vpow2.f32 %v5635_v25 }
 0x180   :  { %v7525_v55 = vpop.eup %7524 }
 0x181   :  { %v1156_v14 = vadd.f32 1.0, %v7525_v55 }
 0x182   :  { %v7527_v13 = vpop.eup %7526 }
 0x183   :  { %7530 = vrcp.f32 %v1156_v14  ;;  %v1128_v44 = vadd.f32 1.0, %v7527_v13  ;;  %v7529_v11 = vpop.eup %7528  ;;  %v10342_v13 = vld [vmem:[#allocation19_spill] sm:$0xff] }
 0x184   :  { %7532 = vtanh.f32 %v1160_v7  ;;  %v1135_v21 = vadd.f32 1.0, %v7529_v11  ;;  %v10344_v11 = vld [vmem:[#allocation21_spill] sm:$0xff] }
 0x185   :  { %7534 = vrcp.f32 %v1128_v44  ;;  %v10343_v44 = vld [vmem:[#allocation20_spill] sm:$0xff] }
 0x186   :  { %7536 = vrcp.f32 %v1135_v21  ;;  %v10346_v21 = vld [vmem:[#allocation23_spill] sm:$0xff] }
 0x18d   :  { %v7531_v30 = vpop.eup %7530 }
 0x18e   :  { %v7533_v18 = vpop.eup %7532  ;;  %v1162_v45 = vsub.f32 1.0, %v7531_v30  ;;  %v1164_v24 = vmul.f32 0.0, %v7531_v30  ;;  %v10347_v30 = vld [vmem:[#allocation24_spill] sm:$0xff] }
 0x18f   :  { %v7535_v40 = vpop.eup %7534 }
 0x190   :  { %v1138_v49 = vmul.f32 %v7535_v40, %v1023_v33  ;;  %v1163_v7 = vmul.f32 %v7533_v18, %v1162_v45  ;;  %v7537_v57 = vpop.eup %7536  ;;  %v10348_v18 = vld [vmem:[#allocation25_spill] sm:$0xff]  ;;  %v10349_v33 = vld [vmem:[#allocation26_spill] sm:$0xff]  ;;  %v10350_v45 = vld [vmem:[#allocation27_spill] sm:$0xff] }
 0x191   :  { %v1141_v36 = vsub.f32 1.0, %v7537_v57  ;;  %v1143_v55 = vmul.f32 0.0, %v7537_v57 }
 0x192   :  { %v1139_v38 = vadd.f32 %v1138_v49, %v402_v0  ;;  %v8790_v22 = vadd.f32 %v1164_v24, %v1163_v7 }
 0x194   :  { %7538 = vtanh.f32 %v1139_v38 }
 0x19e   :  { %v7539_v62 = vpop.eup %7538 }
 0x19f   :  { %v1142_v25 = vmul.f32 %v7539_v62, %v1141_v36 }
 0x1a1   :  { %v8792_v14 = vadd.f32 %v1143_v55, %v1142_v25 }
 0x1a3   :  { %1231 = vmatmul.mubr.f32.vlgmr.msra.gmra.mrb[2].mxu0 %v8792_v14  ;;  %1306 = vmatmul.mubr.f32.vlgmr.msra.gmra.mrb[40].mxu1 %v8792_v14 }
 0x1a4   :  { %5990 = vmatpush1.bf16.msra.mxu1 %v8357_v26  ;;  %1236 = vmatprep.mubr.f32.mxu0 %v10267_v1 }
 0x1a5   :  { %1310 = vmatprep.mubr.f32.mxu1 %v10267_v1  ;;  %5992 = vmatprep.subr.bf16.mxu1 %v8361_v20 }
 0x1a6   :  { %6022 = vmatpush1.bf16.msra.mxu0 %v8338_v54 }
 0x1a7   :  { %1237 = vmatmul.mubr.f32.gmra.mrb[66].mxu0 %v8790_v22  ;;  %1311 = vmatmul.mubr.f32.gmra.mrb[42].mxu1 %v8790_v22 }
 0x1a8   :  { %5994 = vmatpush1.bf16.msra.mxu1 %v8372_v35  ;;  %1380 = vmatprep.mubr.f32.mxu1 %v10267_v1 }
 0x1a9   :  { %5996 = vmatprep.subr.bf16.mxu1 %v8378_v52  ;;  %6024 = vmatprep.subr.bf16.mxu0 %v8342_v58 }
 0x1aa   :  { %6026 = vmatpush1.bf16.msra.mxu0 %v8349_v6  ;;  %1515 = vmatprep.mubr.f32.mxu0 %v10267_v1 }
 0x1ab   :  { %6028 = vmatprep.subr.bf16.mxu0 %v8352_v12 }
 0x1ac   :  { %5998 = vmatpush1.bf16.msra.mxu1 %v8389_v9 }
 0x1ad   :  { %6000 = vmatprep.subr.bf16.mxu1 %v8395_v16 }
 0x1ae   :  { %6030 = vmatpush1.bf16.msra.mxu0 %v8365_v27 }
 0x1af   :  { %6032 = vmatprep.subr.bf16.mxu0 %v8369_v32 }
 0x1b0   :  { %6002 = vmatpush1.bf16.msra.mxu1 %v10339_v42 }
 0x1b1   :  { %6004 = vmatprep.subr.bf16.mxu1 %v10340_v48 }
 0x1b2   :  { %6034 = vmatpush1.bf16.msra.mxu0 %v8382_v61 }
 0x1b3   :  { %6036 = vmatprep.subr.bf16.mxu0 %v8386_v3 }
 0x1b4   :  { %6006 = vmatpush1.bf16.msra.mxu1 %v8420_v17 }
 0x1b5   :  { %6008 = vmatprep.subr.bf16.mxu1 %v8425_v28 }
 0x1b6   :  { %6038 = vmatpush1.bf16.msra.mxu0 %v8399_v23 }
 0x1b7   :  { %6040 = vmatprep.subr.bf16.mxu0 %v8402_v31 }
 0x1b8   :  { %6010 = vmatpush1.bf16.msra.mxu1 %v8435_v47 }
 0x1b9   :  { %6012 = vmatprep.subr.bf16.mxu1 %v8440_v5 }
 0x1ba   :  { %6042 = vmatpush1.bf16.msra.mxu0 %v8414_v2 }
 0x1bb   :  { %6044 = vmatprep.subr.bf16.mxu0 %v8417_v10  ;;  %v10352_v10 = vld [vmem:[#allocation66_spill] sm:$0xff] }
 0x1bc   :  { %6014 = vmatpush1.bf16.msra.mxu1 %v8448_v34 }
 0x1bd   :  { %6016 = vmatprep.subr.bf16.mxu1 %v8453_v15 }
 0x1be   :  { %6046 = vmatpush1.bf16.msra.mxu0 %v8429_v37 }
 0x1bf   :  { %6048 = vmatprep.subr.bf16.mxu0 %v8432_v59 }
 0x1c0   :  { %6018 = vmatpush1.bf16.msra.mxu1 %v8459_v51 }
 0x1c1   :  { %6052 = vmatprep.subr.bf16.mxu1 %v8127_v43 }
 0x1c2   :  { %6050 = vmatpush1.bf16.msra.mxu0 %v8444_v53  ;;  %v10351_v53 = vld [vmem:[#allocation72_spill] sm:$0xff] }
 0x1c3   :  { %1381 = vmatmul.mubr.f32.vlgmr.msra.gmra.mrb[44].mxu1 %v8792_v14  ;;  %6084 = vmatprep.subr.bf16.mxu0 %v8265_v39 }
 0x1c4   :  { %1384 = vmatprep.mubr.f32.mxu1 %v10267_v1  ;;  %6054 = vmatpush1.bf16.msra.mxu1 %v8131_v46 }
 0x1c5   :  { %6056 = vmatprep.subr.bf16.mxu1 %v8142_v50 }
 0x1c7   :  { %1385 = vmatmul.mubr.f32.gmra.mrb[46].mxu1 %v8790_v22 }
 0x1c8   :  { %6058 = vmatpush1.bf16.msra.mxu1 %v8150_v56  ;;  %1590 = vmatprep.mubr.f32.mxu1 %v10267_v1 }
 0x1c9   :  { %6060 = vmatprep.subr.bf16.mxu1 %v8162_v60 }
 0x1cc   :  { %6062 = vmatpush1.bf16.msra.mxu1 %v8168_v63 }
 0x1cd   :  { %6064 = vmatprep.subr.bf16.mxu1 %v10341_v41 }
 0x1d0   :  { %6066 = vmatpush1.bf16.msra.mxu1 %v10342_v13 }
 0x1d1   :  { %6068 = vmatprep.subr.bf16.mxu1 %v10343_v44 }
 0x1d4   :  { %6070 = vmatpush1.bf16.msra.mxu1 %v10344_v11 }
 0x1d5   :  { %6072 = vmatprep.subr.bf16.mxu1 %v10345_v8 }
 0x1d8   :  { %6074 = vmatpush1.bf16.msra.mxu1 %v10346_v21 }
 0x1d9   :  { %6076 = vmatprep.subr.bf16.mxu1 %v10347_v30 }
 0x1dc   :  { %6078 = vmatpush1.bf16.msra.mxu1 %v10348_v18 }
 0x1dd   :  { %6080 = vmatprep.subr.bf16.mxu1 %v10349_v33 }
 0x1e0   :  { %6082 = vmatpush1.bf16.msra.mxu1 %v10350_v45 }
 0x1e1   :  { %6148 = vmatprep.subr.bf16.mxu1 %v8127_v43 }
 0x276   :  { %v1232_v40 = vpop.f32.mrb[2].mxu0  ;;  %v1307_v0 = vpop.f32.mrb[40].mxu1 }
 0x277   :  { %v7416_v49 = vadd.f32 %v8774_v19, %v1232_v40  ;;  %v1234_v7 = vpop.f32.mrb[3].mxu0  ;;  %v1309_v24 = vpop.f32.mrb[41].mxu1 }
 0x278   :  { %v7418_v57 = vadd.f32 %v8777_v4, %v1234_v7 }
 0x279   :  { %v5638_v38 = vmul.f32 -1.442695, %v7416_v49 }
 0x27a   :  { %v1238_v36 = vpop.f32.mrb[66].mxu0  ;;  %v1312_v62 = vpop.f32.mrb[42].mxu1  ;;  %v5639_v37 = vmul.f32 -1.442695, %v7418_v57 }
 0x27b   :  { %7540 = vpow2.f32 %v5638_v38  ;;  %v1239_v25 = vpop.f32.mrb[67].mxu0  ;;  %v1313_v55 = vpop.f32.mrb[43].mxu1  ;;  %v1308_v36 = vadd.f32 %v1307_v0, %v8784_v29 }
 0x27c   :  { %v1314_v59 = vadd.f32 %v1313_v55, %v10351_v53  ;;  %7542 = vpow2.f32 %v5639_v37  ;;  %v10353_v25 = vld [vmem:[#allocation39_spill] sm:$0xff] }
 0x27e   :  { %v1430_v2 = vadd.f32 %v1314_v59, %v10352_v10 }
 0x280   :  { %v5640_v43 = vmul.f32 -1.442695, %v1430_v2 }
 0x282   :  { %7544 = vpow2.f32 %v5640_v43  ;;  %v10354_v43 = vld [vmem:[#allocation98_spill] sm:$0xff] }
 0x285   :  { %v7541_v31 = vpop.eup %7540 }
 0x286   :  { %v1413_v40 = vadd.f32 1.0, %v7541_v31  ;;  %v7543_v24 = vpop.eup %7542 }
 0x287   :  { %v1420_v19 = vadd.f32 1.0, %v7543_v24 }
 0x288   :  { %7546 = vrcp.f32 %v1413_v40  ;;  %v10355_v40 = vld [vmem:[#allocation89_spill] sm:$0xff] }
 0x289   :  { %7548 = vrcp.f32 %v1420_v19 }
 0x28c   :  { %v7545_v49 = vpop.eup %7544 }
 0x28d   :  { %v1434_v7 = vadd.f32 1.0, %v7545_v49  ;;  %v10356_v49 = vld [vmem:[#allocation99_spill] sm:$0xff] }
 0x28f   :  { %7550 = vrcp.f32 %v1434_v7 }
 0x292   :  { %v7547_v38 = vpop.eup %7546 }
 0x293   :  { %v1423_v62 = vmul.f32 %v7547_v38, %v1308_v36  ;;  %v7549_v59 = vpop.eup %7548  ;;  %v10357_v36 = vld [vmem:[#allocation100_spill] sm:$0xff] }
 0x294   :  { %v1426_v19 = vsub.f32 1.0, %v7549_v59 }
 0x295   :  { %v1424_v57 = vadd.f32 %v1423_v62, %v10353_v25  ;;  %v1428_v25 = vmul.f32 %v7549_v59, %v8792_v14  ;;  %v10360_v59 = vld [vmem:[#allocation33_spill] sm:$0xff] }
 0x296   :  { %v1382_v55 = vpop.f32.mrb[44].mxu1 }
 0x297   :  { %7552 = vtanh.f32 %v1424_v57  ;;  %v1383_v2 = vpop.f32.mrb[45].mxu1 }
 0x299   :  { %v7551_v24 = vpop.eup %7550 }
 0x29a   :  { %v1386_v37 = vpop.f32.mrb[46].mxu1 }
 0x29b   :  { %v1387_v10 = vadd.f32 %v1386_v37, %v10354_v43  ;;  %v1388_v31 = vpop.f32.mrb[47].mxu1 }
 0x29c   :  { %v1389_v53 = vadd.f32 %v1388_v31, %v10355_v40  ;;  %v10359_v31 = vld [vmem:[#allocation30_spill] sm:$0xff] }
 0x29d   :  { %v1437_v4 = vadd.f32 %v1387_v10, %v10356_v49  ;;  %v10362_v49 = vld [vmem:[#allocation35_spill] sm:$0xff] }
 0x29e   :  { %v1444_v0 = vmul.f32 %v7551_v24, %v1389_v53  ;;  %v10361_v24 = vld [vmem:[#allocation34_spill] sm:$0xff] }
 0x29f   :  { %v5641_v29 = vmul.f32 -1.442695, %v1437_v4 }
 0x2a0   :  { %v1445_v7 = vadd.f32 %v1444_v0, %v10357_v36  ;;  %v10363_v0 = vld [vmem:[#allocation36_spill] sm:$0xff] }
 0x2a1   :  { %v7553_v38 = vpop.eup %7552  ;;  %7554 = vpow2.f32 %v5641_v29 }
 0x2a2   :  { %v1427_v62 = vmul.f32 %v7553_v38, %v1426_v19  ;;  %v10364_v19 = vld [vmem:[#allocation37_spill] sm:$0xff] }
 0x2a3   :  { %v10365_v38 = vld [vmem:[#allocation101_spill] sm:$0xff] }
 0x2a4   :  { %v8865_v57 = vadd.f32 %v1428_v25, %v1427_v62 }
 0x2a6   :  { %1516 = vmatmul.mubr.f32.vlgmr.msra.gmra.mrb[4].mxu0 %v8865_v57  ;;  %1591 = vmatmul.mubr.f32.vlgmr.msra.gmra.mrb[48].mxu1 %v8865_v57 }
 0x2a7   :  { %6086 = vmatpush1.bf16.msra.mxu0 %v8357_v26  ;;  %1521 = vmatprep.mubr.f32.mxu0 %v10267_v1 }
 0x2a8   :  { %6088 = vmatprep.subr.bf16.mxu0 %v8361_v20  ;;  %1595 = vmatprep.mubr.f32.mxu1 %v10267_v1 }
 0x2a9   :  { %6150 = vmatpush1.bf16.msra.mxu1 %v8131_v46 }
 0x2aa   :  { %6152 = vmatprep.subr.bf16.mxu1 %v8142_v50 }
 0x2ab   :  { %v7555_v4 = vpop.eup %7554  ;;  %6090 = vmatpush1.bf16.msra.mxu0 %v8372_v35 }
 0x2ac   :  { %v1441_v53 = vadd.f32 1.0, %v7555_v4  ;;  %6092 = vmatprep.subr.bf16.mxu0 %v8378_v52 }
 0x2ad   :  { %6154 = vmatpush1.bf16.msra.mxu1 %v8150_v56 }
 0x2ae   :  { %7556 = vrcp.f32 %v1441_v53  ;;  %6156 = vmatprep.subr.bf16.mxu1 %v8162_v60 }
 0x2af   :  { %6094 = vmatpush1.bf16.msra.mxu0 %v8389_v9  ;;  %7558 = vtanh.f32 %v1445_v7 }
 0x2b0   :  { %6096 = vmatprep.subr.bf16.mxu0 %v8395_v16 }
 0x2b1   :  { %6158 = vmatpush1.bf16.msra.mxu1 %v8168_v63 }
 0x2b2   :  { %6160 = vmatprep.subr.bf16.mxu1 %v10341_v41 }
 0x2b3   :  { %6098 = vmatpush1.bf16.msra.mxu0 %v10339_v42 }
 0x2b4   :  { %6100 = vmatprep.subr.bf16.mxu0 %v10340_v48 }
 0x2b5   :  { %6162 = vmatpush1.bf16.msra.mxu1 %v10342_v13 }
 0x2b6   :  { %6164 = vmatprep.subr.bf16.mxu1 %v10343_v44 }
 0x2b7   :  { %6102 = vmatpush1.bf16.msra.mxu0 %v8420_v17 }
 0x2b8   :  { %v7557_v29 = vpop.eup %7556  ;;  %6104 = vmatprep.subr.bf16.mxu0 %v8425_v28 }
 0x2b9   :  { %v1447_v14 = vsub.f32 1.0, %v7557_v29  ;;  %6166 = vmatpush1.bf16.msra.mxu1 %v10344_v11  ;;  %v7559_v55 = vpop.eup %7558  ;;  %v1449_v37 = vmul.f32 %v7557_v29, %v8790_v22  ;;  %v10358_v22 = vld [vmem:[#allocation17_spill] sm:$0xff]  ;;  %v10366_v29 = vld [vmem:[#allocation102_spill] sm:$0xff] }
 0x2ba   :  { %6168 = vmatprep.subr.bf16.mxu1 %v10345_v8  ;;  %v10367_v8 = vld [vmem:[#allocation103_spill] sm:$0xff] }
 0x2bb   :  { %6106 = vmatpush1.bf16.msra.mxu0 %v8435_v47  ;;  %v1448_v2 = vmul.f32 %v7559_v55, %v1447_v14 }
 0x2bc   :  { %6108 = vmatprep.subr.bf16.mxu0 %v8440_v5 }
 0x2bd   :  { %v8894_v10 = vadd.f32 %v1449_v37, %v1448_v2  ;;  %6170 = vmatpush1.bf16.msra.mxu1 %v10346_v21 }
 0x2be   :  { %6172 = vmatprep.subr.bf16.mxu1 %v10347_v30 }
 0x2bf   :  { %1522 = vmatmul.mubr.f32.gmra.mrb[68].mxu0 %v8894_v10  ;;  %1596 = vmatmul.mubr.f32.gmra.mrb[50].mxu1 %v8894_v10 }
 0x2c0   :  { %6110 = vmatpush1.bf16.msra.mxu0 %v8448_v34  ;;  %1665 = vmatprep.mubr.f32.mxu0 %v10267_v1 }
 0x2c1   :  { %6112 = vmatprep.subr.bf16.mxu0 %v8453_v15  ;;  %6174 = vmatpush1.bf16.msra.mxu1 %v10348_v18 }
 0x2c2   :  { %6176 = vmatprep.subr.bf16.mxu1 %v10349_v33  ;;  %1875 = vmatprep.mubr.f32.mxu1 %v10267_v1 }
 0x2c4   :  { %6114 = vmatpush1.bf16.msra.mxu0 %v8459_v51 }
 0x2c5   :  { %6116 = vmatprep.subr.bf16.mxu0 %v10358_v22  ;;  %6178 = vmatpush1.bf16.msra.mxu1 %v10350_v45 }
 0x2c6   :  { %6180 = vmatprep.subr.bf16.mxu1 %v8265_v39 }
 0x2c7   :  { %1666 = vmatmul.mubr.f32.vlgmr.msra.gmra.mrb[70].mxu0 %v8865_v57 }
 0x2c8   :  { %1669 = vmatprep.mubr.f32.mxu0 %v10267_v1  ;;  %6118 = vmatpush1.bf16.msra.mxu0 %v8338_v54 }
 0x2c9   :  { %6120 = vmatprep.subr.bf16.mxu0 %v8342_v58 }
 0x2cb   :  { %1670 = vmatmul.mubr.f32.gmra.mrb[72].mxu0 %v8894_v10 }
 0x2cc   :  { %6122 = vmatpush1.bf16.msra.mxu0 %v8349_v6  ;;  %1800 = vmatprep.mubr.f32.mxu0 %v10267_v1 }
 0x2cd   :  { %6124 = vmatprep.subr.bf16.mxu0 %v8352_v12 }
 0x2d0   :  { %6126 = vmatpush1.bf16.msra.mxu0 %v8365_v27 }
 0x2d1   :  { %6128 = vmatprep.subr.bf16.mxu0 %v8369_v32 }
 0x2d4   :  { %6130 = vmatpush1.bf16.msra.mxu0 %v8382_v61 }
 0x2d5   :  { %6132 = vmatprep.subr.bf16.mxu0 %v8386_v3 }
 0x2d8   :  { %6134 = vmatpush1.bf16.msra.mxu0 %v8399_v23 }
 0x2d9   :  { %6136 = vmatprep.subr.bf16.mxu0 %v10359_v31 }
 0x2dc   :  { %6138 = vmatpush1.bf16.msra.mxu0 %v10360_v59 }
 0x2dd   :  { %6140 = vmatprep.subr.bf16.mxu0 %v10361_v24 }
 0x2e0   :  { %6142 = vmatpush1.bf16.msra.mxu0 %v10362_v49 }
 0x2e1   :  { %6144 = vmatprep.subr.bf16.mxu0 %v10363_v0 }
 0x2e4   :  { %6146 = vmatpush1.bf16.msra.mxu0 %v10364_v19 }
 0x2e5   :  { %6212 = vmatprep.subr.bf16.mxu0 %v10358_v22 }
 0x379   :  { %v1517_v36 = vpop.f32.mrb[4].mxu0  ;;  %v1592_v7 = vpop.f32.mrb[48].mxu1 }
 0x37a   :  { %v7420_v62 = vadd.f32 %v10365_v38, %v1517_v36  ;;  %v1519_v25 = vpop.f32.mrb[5].mxu0  ;;  %v1594_v4 = vpop.f32.mrb[49].mxu1  ;;  %v1593_v11 = vadd.f32 %v1592_v7, %v10367_v8  ;;  %v10368_v36 = vld [vmem:[#allocation72_spill] sm:$0xff] }
 0x37b   :  { %v7422_v14 = vadd.f32 %v10366_v29, %v1519_v25  ;;  %v10369_v25 = vld [vmem:[#allocation64_spill] sm:$0xff] }
 0x37c   :  { %v5642_v53 = vmul.f32 -1.442695, %v7420_v62  ;;  %v10371_v7 = vld [vmem:[#allocation96_spill] sm:$0xff] }
 0x37d   :  { %v5643_v55 = vmul.f32 -1.442695, %v7422_v14  ;;  %v10370_v14 = vld [vmem:[#allocation41_spill] sm:$0xff] }
 0x37e   :  { %7560 = vpow2.f32 %v5642_v53 }
 0x37f   :  { %7562 = vpow2.f32 %v5643_v55 }
 0x388   :  { %v7561_v2 = vpop.eup %7560 }
 0x389   :  { %v1698_v37 = vadd.f32 1.0, %v7561_v2  ;;  %v7563_v45 = vpop.eup %7562 }
 0x38a   :  { %v1705_v33 = vadd.f32 1.0, %v7563_v45 }
 0x38b   :  { %7564 = vrcp.f32 %v1698_v37 }
 0x38c   :  { %7566 = vrcp.f32 %v1705_v33 }
 0x392   :  { %v1523_v18 = vpop.f32.mrb[68].mxu0  ;;  %v1597_v30 = vpop.f32.mrb[50].mxu1 }
 0x393   :  { %v1524_v22 = vpop.f32.mrb[69].mxu0  ;;  %v1598_v21 = vpop.f32.mrb[51].mxu1 }
 0x394   :  { %v1599_v38 = vadd.f32 %v1598_v21, %v10368_v36 }
 0x395   :  { %v7565_v4 = vpop.eup %7564 }
 0x396   :  { %v1708_v62 = vmul.f32 %v7565_v4, %v1593_v11  ;;  %v1715_v53 = vadd.f32 %v1599_v38, %v10369_v25  ;;  %v7567_v37 = vpop.eup %7566 }
 0x397   :  { %v1711_v21 = vsub.f32 1.0, %v7567_v37  ;;  %v1713_v4 = vmul.f32 %v7567_v37, %v8865_v57 }
 0x398   :  { %v1709_v55 = vadd.f32 %v1708_v62, %v10370_v14  ;;  %v5644_v29 = vmul.f32 -1.442695, %v1715_v53  ;;  %v10372_v14 = vld [vmem:[#allocation97_spill] sm:$0xff] }
 0x39a   :  { %7568 = vtanh.f32 %v1709_v55  ;;  %v1667_v2 = vpop.f32.mrb[70].mxu0 }
 0x39b   :  { %7570 = vpow2.f32 %v5644_v29  ;;  %v1668_v45 = vpop.f32.mrb[71].mxu0 }
 0x39e   :  { %v1671_v18 = vpop.f32.mrb[72].mxu0 }
 0x39f   :  { %v1672_v30 = vadd.f32 %v1671_v18, %v10354_v43  ;;  %v1673_v22 = vpop.f32.mrb[73].mxu0 }
 0x3a0   :  { %v1674_v29 = vadd.f32 %v1673_v22, %v10355_v40 }
 0x3a1   :  { %v1722_v8 = vadd.f32 %v1672_v30, %v10371_v7  ;;  %v10373_v7 = vld [vmem:[#allocation16_spill] sm:$0xff] }
 0x3a3   :  { %v5645_v36 = vmul.f32 -1.442695, %v1722_v8 }
 0x3a4   :  { %v7569_v11 = vpop.eup %7568 }
 0x3a5   :  { %v7571_v33 = vpop.eup %7570  ;;  %7572 = vpow2.f32 %v5645_v36  ;;  %v1712_v38 = vmul.f32 %v7569_v11, %v1711_v21  ;;  %v10375_v21 = vld [vmem:[#allocation22_spill] sm:$0xff]  ;;  %v10376_v11 = vld [vmem:[#allocation23_spill] sm:$0xff] }
 0x3a6   :  { %v1719_v62 = vadd.f32 1.0, %v7571_v33  ;;  %v10377_v33 = vld [vmem:[#allocation24_spill] sm:$0xff] }
 0x3a7   :  { %v8939_v25 = vadd.f32 %v1713_v4, %v1712_v38  ;;  %v10378_v38 = vld [vmem:[#allocation25_spill] sm:$0xff]  ;;  %v10379_v4 = vld [vmem:[#allocation26_spill] sm:$0xff] }
 0x3a8   :  { %7574 = vrcp.f32 %v1719_v62  ;;  %v10380_v62 = vld [vmem:[#allocation27_spill] sm:$0xff] }
 0x3a9   :  { %1801 = vmatmul.mubr.f32.vlgmr.msra.gmra.mrb[6].mxu0 %v8939_v25  ;;  %1876 = vmatmul.mubr.f32.vlgmr.msra.gmra.mrb[52].mxu1 %v8939_v25 }
 0x3aa   :  { %6182 = vmatpush1.bf16.msra.mxu1 %v8357_v26  ;;  %1806 = vmatprep.mubr.f32.mxu0 %v10267_v1 }
 0x3ab   :  { %6184 = vmatprep.subr.bf16.mxu1 %v8361_v20  ;;  %1880 = vmatprep.mubr.f32.mxu1 %v10267_v1 }
 0x3ac   :  { %6214 = vmatpush1.bf16.msra.mxu0 %v8338_v54 }
 0x3ad   :  { %6216 = vmatprep.subr.bf16.mxu0 %v8342_v58 }
 0x3ae   :  { %6186 = vmatpush1.bf16.msra.mxu1 %v8372_v35 }
 0x3af   :  { %v7573_v8 = vpop.eup %7572  ;;  %6188 = vmatprep.subr.bf16.mxu1 %v8378_v52 }
 0x3b0   :  { %v1726_v57 = vadd.f32 1.0, %v7573_v8  ;;  %6218 = vmatpush1.bf16.msra.mxu0 %v8349_v6 }
 0x3b1   :  { %6220 = vmatprep.subr.bf16.mxu0 %v8352_v12 }
 0x3b2   :  { %v7575_v36 = vpop.eup %7574  ;;  %6190 = vmatpush1.bf16.msra.mxu1 %v8389_v9  ;;  %7576 = vrcp.f32 %v1726_v57 }
 0x3b3   :  { %v1729_v53 = vmul.f32 %v7575_v36, %v1674_v29  ;;  %6192 = vmatprep.subr.bf16.mxu1 %v8395_v16  ;;  %v10381_v29 = vld [vmem:[#allocation101_spill] sm:$0xff] }
 0x3b4   :  { %6222 = vmatpush1.bf16.msra.mxu0 %v8365_v27 }
 0x3b5   :  { %v1730_v55 = vadd.f32 %v1729_v53, %v10372_v14  ;;  %6224 = vmatprep.subr.bf16.mxu0 %v8369_v32 }
 0x3b6   :  { %6194 = vmatpush1.bf16.msra.mxu1 %v10339_v42 }
 0x3b7   :  { %7578 = vtanh.f32 %v1730_v55  ;;  %6196 = vmatprep.subr.bf16.mxu1 %v10340_v48 }
 0x3b8   :  { %6226 = vmatpush1.bf16.msra.mxu0 %v8382_v61 }
 0x3b9   :  { %6228 = vmatprep.subr.bf16.mxu0 %v8386_v3 }
 0x3ba   :  { %6198 = vmatpush1.bf16.msra.mxu1 %v8420_v17 }
 0x3bb   :  { %6200 = vmatprep.subr.bf16.mxu1 %v8425_v28 }
 0x3bc   :  { %6230 = vmatpush1.bf16.msra.mxu0 %v8399_v23  ;;  %v7577_v2 = vpop.eup %7576 }
 0x3bd   :  { %6232 = vmatprep.subr.bf16.mxu0 %v10359_v31  ;;  %v1732_v45 = vsub.f32 1.0, %v7577_v2  ;;  %v1734_v22 = vmul.f32 %v7577_v2, %v8894_v10  ;;  %v10374_v10 = vld [vmem:[#allocation21_spill] sm:$0xff]  ;;  %v10382_v2 = vld [vmem:[#allocation102_spill] sm:$0xff] }
 0x3be   :  { %6202 = vmatpush1.bf16.msra.mxu1 %v8435_v47 }
 0x3bf   :  { %6204 = vmatprep.subr.bf16.mxu1 %v8440_v5 }
 0x3c0   :  { %6234 = vmatpush1.bf16.msra.mxu0 %v10360_v59 }
 0x3c1   :  { %v7579_v18 = vpop.eup %7578  ;;  %6236 = vmatprep.subr.bf16.mxu0 %v10361_v24 }
 0x3c2   :  { %6206 = vmatpush1.bf16.msra.mxu1 %v8448_v34  ;;  %v1733_v30 = vmul.f32 %v7579_v18, %v1732_v45 }
 0x3c3   :  { %6208 = vmatprep.subr.bf16.mxu1 %v8453_v15 }
 0x3c4   :  { %v8974_v37 = vadd.f32 %v1734_v22, %v1733_v30  ;;  %6238 = vmatpush1.bf16.msra.mxu0 %v10362_v49  ;;  %v10383_v49 = vld [vmem:[#allocation103_spill] sm:$0xff] }
 0x3c5   :  { %6240 = vmatprep.subr.bf16.mxu0 %v10363_v0 }
 0x3c6   :  { %1807 = vmatmul.mubr.f32.gmra.mrb[74].mxu0 %v8974_v37  ;;  %1881 = vmatmul.mubr.f32.gmra.mrb[54].mxu1 %v8974_v37 }
 0x3c7   :  { %6210 = vmatpush1.bf16.msra.mxu1 %v8459_v51  ;;  %1950 = vmatprep.mubr.f32.mxu1 %v10267_v1 }
 0x3c8   :  { %6244 = vmatprep.subr.bf16.mxu1 %v10373_v7  ;;  %6242 = vmatpush1.bf16.msra.mxu0 %v10364_v19 }
 0x3c9   :  { %2085 = vmatprep.mubr.f32.mxu0 %v10267_v1  ;;  %6276 = vmatprep.subr.bf16.mxu0 %v8265_v39 }
 0x3ca   :  { %1951 = vmatmul.mubr.f32.vlgmr.msra.gmra.mrb[56].mxu1 %v8939_v25 }
 0x3cb   :  { %1954 = vmatprep.mubr.f32.mxu1 %v10267_v1  ;;  %6246 = vmatpush1.bf16.msra.mxu1 %v8131_v46 }
 0x3cc   :  { %6248 = vmatprep.subr.bf16.mxu1 %v8142_v50 }
 0x3ce   :  { %1955 = vmatmul.mubr.f32.gmra.mrb[58].mxu1 %v8974_v37 }
 0x3cf   :  { %6250 = vmatpush1.bf16.msra.mxu1 %v8150_v56  ;;  %2160 = vmatprep.mubr.f32.mxu1 %v10267_v1 }
 0x3d0   :  { %6252 = vmatprep.subr.bf16.mxu1 %v8162_v60 }
 0x3d3   :  { %6254 = vmatpush1.bf16.msra.mxu1 %v8168_v63 }
 0x3d4   :  { %6256 = vmatprep.subr.bf16.mxu1 %v10341_v41 }
 0x3d7   :  { %6258 = vmatpush1.bf16.msra.mxu1 %v10342_v13 }
 0x3d8   :  { %6260 = vmatprep.subr.bf16.mxu1 %v10343_v44 }
 0x3db   :  { %6262 = vmatpush1.bf16.msra.mxu1 %v10374_v10 }
 0x3dc   :  { %6264 = vmatprep.subr.bf16.mxu1 %v10375_v21 }
 0x3df   :  { %6266 = vmatpush1.bf16.msra.mxu1 %v10376_v11 }
 0x3e0   :  { %6268 = vmatprep.subr.bf16.mxu1 %v10377_v33 }
 0x3e3   :  { %6270 = vmatpush1.bf16.msra.mxu1 %v10378_v38 }
 0x3e4   :  { %6272 = vmatprep.subr.bf16.mxu1 %v10379_v4 }
 0x3e7   :  { %6274 = vmatpush1.bf16.msra.mxu1 %v10380_v62 }
 0x3e8   :  { %6340 = vmatprep.subr.bf16.mxu1 %v10373_v7 }
 0x47c   :  { %v1802_v8 = vpop.f32.mrb[6].mxu0  ;;  %v1877_v57 = vpop.f32.mrb[52].mxu1 }
 0x47d   :  { %v7424_v36 = vadd.f32 %v10381_v29, %v1802_v8  ;;  %v1804_v53 = vpop.f32.mrb[7].mxu0  ;;  %v1879_v14 = vpop.f32.mrb[53].mxu1  ;;  %v1878_v24 = vadd.f32 %v1877_v57, %v10383_v49 }
 0x47e   :  { %v7426_v45 = vadd.f32 %v10382_v2, %v1804_v53  ;;  %v10385_v53 = vld [vmem:[#allocation72_spill] sm:$0xff] }
 0x47f   :  { %v5646_v55 = vmul.f32 -1.442695, %v7424_v36  ;;  %v10384_v36 = vld [vmem:[#allocation43_spill] sm:$0xff] }
 0x480   :  { %v5647_v18 = vmul.f32 -1.442695, %v7426_v45  ;;  %v10386_v45 = vld [vmem:[#allocation62_spill] sm:$0xff] }
 0x481   :  { %7580 = vpow2.f32 %v5646_v55 }
 0x482   :  { %7582 = vpow2.f32 %v5647_v18 }
 0x48b   :  { %v7581_v30 = vpop.eup %7580 }
 0x48c   :  { %v1983_v22 = vadd.f32 1.0, %v7581_v30  ;;  %v7583_v19 = vpop.eup %7582 }
 0x48d   :  { %v1990_v0 = vadd.f32 1.0, %v7583_v19 }
 0x48e   :  { %7584 = vrcp.f32 %v1983_v22 }
 0x48f   :  { %7586 = vrcp.f32 %v1990_v0 }
 0x498   :  { %v7585_v7 = vpop.eup %7584 }
 0x499   :  { %v1993_v59 = vmul.f32 %v7585_v7, %v1878_v24  ;;  %v1808_v31 = vpop.f32.mrb[74].mxu0  ;;  %v1882_v8 = vpop.f32.mrb[54].mxu1 }
 0x49a   :  { %v1809_v29 = vpop.f32.mrb[75].mxu0  ;;  %v1883_v14 = vpop.f32.mrb[55].mxu1  ;;  %v10387_v31 = vld [vmem:[#allocation94_spill] sm:$0xff] }
 0x49b   :  { %v1994_v23 = vadd.f32 %v1993_v59, %v10384_v36  ;;  %v1884_v55 = vadd.f32 %v1883_v14, %v10385_v53  ;;  %v7587_v0 = vpop.eup %7586 }
 0x49c   :  { %v1996_v29 = vsub.f32 1.0, %v7587_v0 }
 0x49d   :  { %7588 = vtanh.f32 %v1994_v23  ;;  %v2000_v18 = vadd.f32 %v1884_v55, %v10386_v45  ;;  %v1952_v30 = vpop.f32.mrb[56].mxu1  ;;  %v1998_v23 = vmul.f32 %v7587_v0, %v8939_v25 }
 0x49e   :  { %v1953_v22 = vpop.f32.mrb[57].mxu1  ;;  %v10388_v30 = vld [vmem:[#allocation95_spill] sm:$0xff] }
 0x49f   :  { %v5648_v2 = vmul.f32 -1.442695, %v2000_v18 }
 0x4a1   :  { %7590 = vpow2.f32 %v5648_v2  ;;  %v1956_v19 = vpop.f32.mrb[58].mxu1 }
 0x4a2   :  { %v1957_v57 = vadd.f32 %v1956_v19, %v10354_v43  ;;  %v1958_v24 = vpop.f32.mrb[59].mxu1 }
 0x4a3   :  { %v1959_v2 = vadd.f32 %v1958_v24, %v10355_v40 }
 0x4a4   :  { %v2007_v7 = vadd.f32 %v1957_v57, %v10387_v31 }
 0x4a6   :  { %v5649_v8 = vmul.f32 -1.442695, %v2007_v7 }
 0x4a7   :  { %v7589_v49 = vpop.eup %7588 }
 0x4a8   :  { %7592 = vpow2.f32 %v5649_v8  ;;  %v1997_v59 = vmul.f32 %v7589_v49, %v1996_v29  ;;  %v10389_v29 = vld [vmem:[#allocation17_spill] sm:$0xff]  ;;  %v10391_v8 = vld [vmem:[#allocation30_spill] sm:$0xff] }
 0x4aa   :  { %v9015_v14 = vadd.f32 %v1998_v23, %v1997_v59  ;;  %v10392_v59 = vld [vmem:[#allocation33_spill] sm:$0xff]  ;;  %v10393_v23 = vld [vmem:[#allocation34_spill] sm:$0xff] }
 0x4ab   :  { %v7591_v36 = vpop.eup %7590 }
 0x4ac   :  { %v2004_v55 = vadd.f32 1.0, %v7591_v36  ;;  %2086 = vmatmul.mubr.f32.vlgmr.msra.gmra.mrb[8].mxu0 %v9015_v14  ;;  %2161 = vmatmul.mubr.f32.vlgmr.msra.gmra.mrb[60].mxu1 %v9015_v14  ;;  %v10394_v36 = vld [vmem:[#allocation35_spill] sm:$0xff] }
 0x4ad   :  { %6278 = vmatpush1.bf16.msra.mxu0 %v8357_v26  ;;  %2091 = vmatprep.mubr.f32.mxu0 %v10267_v1 }
 0x4ae   :  { %7594 = vrcp.f32 %v2004_v55  ;;  %6280 = vmatprep.subr.bf16.mxu0 %v8361_v20  ;;  %2165 = vmatprep.mubr.f32.mxu1 %v10267_v1  ;;  %v10395_v55 = vld [vmem:[#allocation36_spill] sm:$0xff] }
 0x4af   :  { %6342 = vmatpush1.bf16.msra.mxu1 %v8131_v46 }
 0x4b0   :  { %6344 = vmatprep.subr.bf16.mxu1 %v8142_v50 }
 0x4b1   :  { %6282 = vmatpush1.bf16.msra.mxu0 %v8372_v35 }
 0x4b2   :  { %v7593_v49 = vpop.eup %7592  ;;  %6284 = vmatprep.subr.bf16.mxu0 %v8378_v52 }
 0x4b3   :  { %6346 = vmatpush1.bf16.msra.mxu1 %v8150_v56  ;;  %v2011_v25 = vadd.f32 1.0, %v7593_v49  ;;  %v10396_v49 = vld [vmem:[#allocation37_spill] sm:$0xff] }
 0x4b4   :  { %6348 = vmatprep.subr.bf16.mxu1 %v8162_v60 }
 0x4b5   :  { %6286 = vmatpush1.bf16.msra.mxu0 %v8389_v9  ;;  %7596 = vrcp.f32 %v2011_v25 }
 0x4b6   :  { %6288 = vmatprep.subr.bf16.mxu0 %v8395_v16 }
 0x4b7   :  { %6350 = vmatpush1.bf16.msra.mxu1 %v8168_v63 }
 0x4b8   :  { %v7595_v45 = vpop.eup %7594  ;;  %6352 = vmatprep.subr.bf16.mxu1 %v10341_v41 }
 0x4b9   :  { %v2014_v18 = vmul.f32 %v7595_v45, %v1959_v2  ;;  %6290 = vmatpush1.bf16.msra.mxu0 %v10339_v42  ;;  %v10397_v45 = vld [vmem:[#allocation101_spill] sm:$0xff] }
 0x4ba   :  { %6292 = vmatprep.subr.bf16.mxu0 %v10340_v48 }
 0x4bb   :  { %v2015_v22 = vadd.f32 %v2014_v18, %v10388_v30  ;;  %6354 = vmatpush1.bf16.msra.mxu1 %v10342_v13 }
 0x4bc   :  { %6356 = vmatprep.subr.bf16.mxu1 %v10343_v44 }
 0x4bd   :  { %7598 = vtanh.f32 %v2015_v22  ;;  %6294 = vmatpush1.bf16.msra.mxu0 %v8420_v17 }
 0x4be   :  { %6296 = vmatprep.subr.bf16.mxu0 %v8425_v28 }
 0x4bf   :  { %6358 = vmatpush1.bf16.msra.mxu1 %v10374_v10  ;;  %v7597_v19 = vpop.eup %7596  ;;  %v10400_v10 = vld [vmem:[#allocation45_spill] sm:$0xff] }
 0x4c0   :  { %6360 = vmatprep.subr.bf16.mxu1 %v10375_v21  ;;  %v2017_v57 = vsub.f32 1.0, %v7597_v19  ;;  %v2019_v31 = vmul.f32 %v7597_v19, %v8974_v37  ;;  %v10390_v37 = vld [vmem:[#allocation29_spill] sm:$0xff] }
 0x4c1   :  { %6298 = vmatpush1.bf16.msra.mxu0 %v8435_v47 }
 0x4c2   :  { %6300 = vmatprep.subr.bf16.mxu0 %v8440_v5 }
 0x4c3   :  { %6362 = vmatpush1.bf16.msra.mxu1 %v10376_v11 }
 0x4c4   :  { %6364 = vmatprep.subr.bf16.mxu1 %v10377_v33  ;;  %v10399_v33 = vld [vmem:[#allocation103_spill] sm:$0xff] }
 0x4c5   :  { %6302 = vmatpush1.bf16.msra.mxu0 %v8448_v34 }
 0x4c6   :  { %6304 = vmatprep.subr.bf16.mxu0 %v8453_v15 }
 0x4c7   :  { %v7599_v24 = vpop.eup %7598  ;;  %6366 = vmatpush1.bf16.msra.mxu1 %v10378_v38 }
 0x4c8   :  { %v2018_v0 = vmul.f32 %v7599_v24, %v2017_v57  ;;  %6368 = vmatprep.subr.bf16.mxu1 %v10379_v4  ;;  %v10398_v57 = vld [vmem:[#allocation102_spill] sm:$0xff] }
 0x4c9   :  { %6306 = vmatpush1.bf16.msra.mxu0 %v8459_v51 }
 0x4ca   :  { %v9053_v7 = vadd.f32 %v2019_v31, %v2018_v0  ;;  %6308 = vmatprep.subr.bf16.mxu0 %v10389_v29 }
 0x4cb   :  { %6370 = vmatpush1.bf16.msra.mxu1 %v10380_v62 }
 0x4cc   :  { %2092 = vmatmul.mubr.f32.gmra.mrb[76].mxu0 %v9053_v7  ;;  %2166 = vmatmul.mubr.f32.gmra.mrb[62].mxu1 %v9053_v7 }
 0x4cd   :  { %2235 = vmatprep.mubr.f32.mxu0 %v10267_v1  ;;  %2445 = vmatprep.mubr.f32.mxu1 %v10267_v1 }
 0x4ce   :  { %6372 = vmatprep.subr.bf16.mxu1 %v8265_v39 }
 0x4d0   :  { %2236 = vmatmul.mubr.f32.vlgmr.msra.gmra.mrb[78].mxu0 %v9015_v14 }
 0x4d1   :  { %2239 = vmatprep.mubr.f32.mxu0 %v10267_v1  ;;  %6310 = vmatpush1.bf16.msra.mxu0 %v8338_v54 }
 0x4d2   :  { %6312 = vmatprep.subr.bf16.mxu0 %v8342_v58 }
 0x4d4   :  { %2240 = vmatmul.mubr.f32.gmra.mrb[80].mxu0 %v9053_v7 }
 0x4d5   :  { %6314 = vmatpush1.bf16.msra.mxu0 %v8349_v6  ;;  %2370 = vmatprep.mubr.f32.mxu0 %v10267_v1 }
 0x4d6   :  { %6316 = vmatprep.subr.bf16.mxu0 %v8352_v12 }
 0x4d9   :  { %6318 = vmatpush1.bf16.msra.mxu0 %v8365_v27 }
 0x4da   :  { %6320 = vmatprep.subr.bf16.mxu0 %v8369_v32 }
 0x4dd   :  { %6322 = vmatpush1.bf16.msra.mxu0 %v8382_v61 }
 0x4de   :  { %6324 = vmatprep.subr.bf16.mxu0 %v8386_v3 }
 0x4e1   :  { %6326 = vmatpush1.bf16.msra.mxu0 %v10390_v37 }
 0x4e2   :  { %6328 = vmatprep.subr.bf16.mxu0 %v10391_v8 }
 0x4e5   :  { %6330 = vmatpush1.bf16.msra.mxu0 %v10392_v59 }
 0x4e6   :  { %6332 = vmatprep.subr.bf16.mxu0 %v10393_v23 }
 0x4e9   :  { %6334 = vmatpush1.bf16.msra.mxu0 %v10394_v36 }
 0x4ea   :  { %6336 = vmatprep.subr.bf16.mxu0 %v10395_v55 }
 0x4ed   :  { %6338 = vmatpush1.bf16.msra.mxu0 %v10396_v49 }
 0x4ee   :  { %6404 = vmatprep.subr.bf16.mxu0 %v10389_v29 }
 0x57f   :  { %v2087_v25 = vpop.f32.mrb[8].mxu0  ;;  %v2162_v2 = vpop.f32.mrb[60].mxu1 }
 0x580   :  { %v7428_v18 = vadd.f32 %v10397_v45, %v2087_v25  ;;  %v2089_v30 = vpop.f32.mrb[9].mxu0  ;;  %v2164_v22 = vpop.f32.mrb[61].mxu1  ;;  %v2163_v11 = vadd.f32 %v2162_v2, %v10399_v33 }
 0x581   :  { %v7430_v24 = vadd.f32 %v10398_v57, %v2089_v30 }
 0x582   :  { %v5650_v19 = vmul.f32 -1.442695, %v7428_v18 }
 0x583   :  { %v5651_v0 = vmul.f32 -1.442695, %v7430_v24  ;;  %v10401_v24 = vld [vmem:[#allocation60_spill] sm:$0xff] }
 0x584   :  { %7600 = vpow2.f32 %v5650_v19 }
 0x585   :  { %7602 = vpow2.f32 %v5651_v0 }
 0x58e   :  { %v7601_v31 = vpop.eup %7600 }
 0x58f   :  { %v2268_v62 = vadd.f32 1.0, %v7601_v31  ;;  %v7603_v4 = vpop.eup %7602 }
 0x590   :  { %v2275_v38 = vadd.f32 1.0, %v7603_v4 }
 0x591   :  { %7604 = vrcp.f32 %v2268_v62 }
 0x592   :  { %7606 = vrcp.f32 %v2275_v38 }
 0x59b   :  { %v7605_v29 = vpop.eup %7604 }
 0x59c   :  { %v2278_v21 = vmul.f32 %v7605_v29, %v2163_v11  ;;  %v7607_v4 = vpop.eup %7606 }
 0x59d   :  { %v2281_v29 = vsub.f32 1.0, %v7607_v4 }
 0x59e   :  { %v2279_v25 = vadd.f32 %v2278_v21, %v10400_v10  ;;  %v10402_v21 = vld [vmem:[#allocation92_spill] sm:$0xff] }
 0x59f   :  { %v2093_v45 = vpop.f32.mrb[76].mxu0  ;;  %v2167_v22 = vpop.f32.mrb[62].mxu1 }
 0x5a0   :  { %7608 = vtanh.f32 %v2279_v25  ;;  %v2094_v18 = vpop.f32.mrb[77].mxu0  ;;  %v2168_v30 = vpop.f32.mrb[63].mxu1  ;;  %v2283_v22 = vmul.f32 %v7607_v4, %v9015_v14  ;;  %v10403_v4 = vld [vmem:[#allocation93_spill] sm:$0xff] }
 0x5a1   :  { %v2169_v19 = vadd.f32 %v2168_v30, %v10385_v53 }
 0x5a3   :  { %v2285_v0 = vadd.f32 %v2169_v19, %v10401_v24  ;;  %v2237_v31 = vpop.f32.mrb[78].mxu0 }
 0x5a4   :  { %v2238_v62 = vpop.f32.mrb[79].mxu0 }
 0x5a5   :  { %v5652_v57 = vmul.f32 -1.442695, %v2285_v0 }
 0x5a7   :  { %7610 = vpow2.f32 %v5652_v57  ;;  %v2241_v2 = vpop.f32.mrb[80].mxu0 }
 0x5a8   :  { %v2242_v11 = vadd.f32 %v2241_v2, %v10354_v43  ;;  %v2243_v38 = vpop.f32.mrb[81].mxu0 }
 0x5a9   :  { %v2244_v0 = vadd.f32 %v2243_v38, %v10355_v40 }
 0x5aa   :  { %v7609_v10 = vpop.eup %7608  ;;  %v2292_v45 = vadd.f32 %v2242_v11, %v10402_v21 }
 0x5ab   :  { %v2282_v25 = vmul.f32 %v7609_v10, %v2281_v29  ;;  %v10404_v10 = vld [vmem:[#allocation16_spill] sm:$0xff] }
 0x5ac   :  { %v5653_v18 = vmul.f32 -1.442695, %v2292_v45 }
 0x5ad   :  { %v9091_v30 = vadd.f32 %v2283_v22, %v2282_v25  ;;  %v10406_v22 = vld [vmem:[#allocation22_spill] sm:$0xff] }
 0x5ae   :  { %7612 = vpow2.f32 %v5653_v18  ;;  %v10407_v18 = vld [vmem:[#allocation23_spill] sm:$0xff] }
 0x5af   :  { %2371 = vmatmul.mubr.f32.vlgmr.msra.gmra.mrb[10].mxu0 %v9091_v30  ;;  %2446 = vmatmul.mubr.f32.vlgmr.msra.gmra.mrb[64].mxu1 %v9091_v30 }
 0x5b0   :  { %6374 = vmatpush1.bf16.msra.mxu1 %v8357_v26  ;;  %2376 = vmatprep.mubr.f32.mxu0 %v10267_v1 }
 0x5b1   :  { %v7611_v57 = vpop.eup %7610  ;;  %6376 = vmatprep.subr.bf16.mxu1 %v8361_v20  ;;  %2450 = vmatprep.mubr.f32.mxu1 %v10267_v1 }
 0x5b2   :  { %v2289_v19 = vadd.f32 1.0, %v7611_v57  ;;  %6406 = vmatpush1.bf16.msra.mxu0 %v8338_v54  ;;  %v10408_v57 = vld [vmem:[#allocation24_spill] sm:$0xff] }
 0x5b3   :  { %6408 = vmatprep.subr.bf16.mxu0 %v8342_v58 }
 0x5b4   :  { %7614 = vrcp.f32 %v2289_v19  ;;  %6378 = vmatpush1.bf16.msra.mxu1 %v8372_v35  ;;  %v10409_v19 = vld [vmem:[#allocation25_spill] sm:$0xff] }
 0x5b5   :  { %6380 = vmatprep.subr.bf16.mxu1 %v8378_v52 }
 0x5b6   :  { %6410 = vmatpush1.bf16.msra.mxu0 %v8349_v6 }
 0x5b7   :  { %6412 = vmatprep.subr.bf16.mxu0 %v8352_v12 }
 0x5b8   :  { %v7613_v14 = vpop.eup %7612  ;;  %6382 = vmatpush1.bf16.msra.mxu1 %v8389_v9 }
 0x5b9   :  { %6384 = vmatprep.subr.bf16.mxu1 %v8395_v16  ;;  %v2296_v24 = vadd.f32 1.0, %v7613_v14  ;;  %v10410_v14 = vld [vmem:[#allocation26_spill] sm:$0xff] }
 0x5ba   :  { %6414 = vmatpush1.bf16.msra.mxu0 %v8365_v27 }
 0x5bb   :  { %6416 = vmatprep.subr.bf16.mxu0 %v8369_v32  ;;  %7616 = vrcp.f32 %v2296_v24  ;;  %v10411_v24 = vld [vmem:[#allocation27_spill] sm:$0xff] }
 0x5bc   :  { %6386 = vmatpush1.bf16.msra.mxu1 %v10339_v42 }
 0x5bd   :  { %6388 = vmatprep.subr.bf16.mxu1 %v10340_v48 }
 0x5be   :  { %v7615_v31 = vpop.eup %7614  ;;  %6418 = vmatpush1.bf16.msra.mxu0 %v8382_v61 }
 0x5bf   :  { %v2299_v62 = vmul.f32 %v7615_v31, %v2244_v0  ;;  %6420 = vmatprep.subr.bf16.mxu0 %v8386_v3 }
 0x5c0   :  { %6390 = vmatpush1.bf16.msra.mxu1 %v8420_v17 }
 0x5c1   :  { %v2300_v2 = vadd.f32 %v2299_v62, %v10403_v4  ;;  %6392 = vmatprep.subr.bf16.mxu1 %v8425_v28  ;;  %v10412_v62 = vld [vmem:[#allocation101_spill] sm:$0xff] }
 0x5c2   :  { %6422 = vmatpush1.bf16.msra.mxu0 %v10390_v37  ;;  %v10414_v37 = vld [vmem:[#allocation47_spill] sm:$0xff] }
 0x5c3   :  { %7618 = vtanh.f32 %v2300_v2  ;;  %6424 = vmatprep.subr.bf16.mxu0 %v10391_v8 }
 0x5c4   :  { %6394 = vmatpush1.bf16.msra.mxu1 %v8435_v47 }
 0x5c5   :  { %6396 = vmatprep.subr.bf16.mxu1 %v8440_v5  ;;  %v7617_v11 = vpop.eup %7616 }
 0x5c6   :  { %6426 = vmatpush1.bf16.msra.mxu0 %v10392_v59  ;;  %v2302_v38 = vsub.f32 1.0, %v7617_v11  ;;  %v2304_v45 = vmul.f32 %v7617_v11, %v9053_v7  ;;  %v10405_v7 = vld [vmem:[#allocation21_spill] sm:$0xff] }
 0x5c7   :  { %6428 = vmatprep.subr.bf16.mxu0 %v10393_v23 }
 0x5c8   :  { %6398 = vmatpush1.bf16.msra.mxu1 %v8448_v34 }
 0x5c9   :  { %6400 = vmatprep.subr.bf16.mxu1 %v8453_v15 }
 0x5ca   :  { %6430 = vmatpush1.bf16.msra.mxu0 %v10394_v36 }
 0x5cb   :  { %6432 = vmatprep.subr.bf16.mxu0 %v10395_v55 }
 0x5cc   :  { %6402 = vmatpush1.bf16.msra.mxu1 %v8459_v51 }
 0x5cd   :  { %v7619_v29 = vpop.eup %7618  ;;  %6436 = vmatprep.subr.bf16.mxu1 %v10404_v10 }
 0x5ce   :  { %v2303_v21 = vmul.f32 %v7619_v29, %v2302_v38  ;;  %6434 = vmatpush1.bf16.msra.mxu0 %v10396_v49  ;;  %v10413_v29 = vld [vmem:[#allocation102_spill] sm:$0xff] }
 0x5cf   :  { %6468 = vmatprep.subr.bf16.mxu0 %v8265_v39 }
 0x5d0   :  { %v9132_v25 = vadd.f32 %v2304_v45, %v2303_v21 }
 0x5d2   :  { %2377 = vmatmul.mubr.f32.gmra.mrb[82].mxu0 %v9132_v25  ;;  %2451 = vmatmul.mubr.f32.gmra.mrb[66].mxu1 %v9132_v25 }
 0x5d3   :  { %2520 = vmatprep.mubr.f32.mxu1 %v10267_v1  ;;  %2655 = vmatprep.mubr.f32.mxu0 %v10267_v1 }
 0x5d6   :  { %2521 = vmatmul.mubr.f32.vlgmr.msra.gmra.mrb[68].mxu1 %v9091_v30 }
 0x5d7   :  { %2524 = vmatprep.mubr.f32.mxu1 %v10267_v1  ;;  %6438 = vmatpush1.bf16.msra.mxu1 %v8131_v46 }
 0x5d8   :  { %6440 = vmatprep.subr.bf16.mxu1 %v8142_v50 }
 0x5da   :  { %2525 = vmatmul.mubr.f32.gmra.mrb[70].mxu1 %v9132_v25 }
 0x5db   :  { %6442 = vmatpush1.bf16.msra.mxu1 %v8150_v56  ;;  %2730 = vmatprep.mubr.f32.mxu1 %v10267_v1 }
 0x5dc   :  { %6444 = vmatprep.subr.bf16.mxu1 %v8162_v60 }
 0x5df   :  { %6446 = vmatpush1.bf16.msra.mxu1 %v8168_v63 }
 0x5e0   :  { %6448 = vmatprep.subr.bf16.mxu1 %v10341_v41 }
 0x5e3   :  { %6450 = vmatpush1.bf16.msra.mxu1 %v10342_v13 }
 0x5e4   :  { %6452 = vmatprep.subr.bf16.mxu1 %v10343_v44 }
 0x5e7   :  { %6454 = vmatpush1.bf16.msra.mxu1 %v10405_v7 }
 0x5e8   :  { %6456 = vmatprep.subr.bf16.mxu1 %v10406_v22 }
 0x5eb   :  { %6458 = vmatpush1.bf16.msra.mxu1 %v10407_v18 }
 0x5ec   :  { %6460 = vmatprep.subr.bf16.mxu1 %v10408_v57 }
 0x5ef   :  { %6462 = vmatpush1.bf16.msra.mxu1 %v10409_v19 }
 0x5f0   :  { %6464 = vmatprep.subr.bf16.mxu1 %v10410_v14 }
 0x5f3   :  { %6466 = vmatpush1.bf16.msra.mxu1 %v10411_v24 }
 0x5f4   :  { %6532 = vmatprep.subr.bf16.mxu1 %v10404_v10 }
 0x682   :  { %v2372_v0 = vpop.f32.mrb[10].mxu0  ;;  %v2447_v31 = vpop.f32.mrb[64].mxu1 }
 0x683   :  { %v7432_v4 = vadd.f32 %v10412_v62, %v2372_v0  ;;  %v2374_v2 = vpop.f32.mrb[11].mxu0  ;;  %v2449_v11 = vpop.f32.mrb[65].mxu1  ;;  %v2448_v59 = vadd.f32 %v2447_v31, %v10399_v33 }
 0x684   :  { %v7434_v21 = vadd.f32 %v10413_v29, %v2374_v2 }
 0x685   :  { %v5654_v38 = vmul.f32 -1.442695, %v7432_v4 }
 0x686   :  { %v5655_v45 = vmul.f32 -1.442695, %v7434_v21 }
 0x687   :  { %7620 = vpow2.f32 %v5654_v38 }
 0x688   :  { %7622 = vpow2.f32 %v5655_v45  ;;  %v10415_v45 = vld [vmem:[#allocation58_spill] sm:$0xff] }
 0x691   :  { %v7621_v49 = vpop.eup %7620 }
 0x692   :  { %v2553_v55 = vadd.f32 1.0, %v7621_v49  ;;  %v7623_v36 = vpop.eup %7622 }
 0x693   :  { %v2560_v23 = vadd.f32 1.0, %v7623_v36 }
 0x694   :  { %7624 = vrcp.f32 %v2553_v55 }
 0x695   :  { %7626 = vrcp.f32 %v2560_v23 }
 0x69e   :  { %v7625_v10 = vpop.eup %7624 }
 0x69f   :  { %v2563_v8 = vmul.f32 %v7625_v10, %v2448_v59  ;;  %v7627_v21 = vpop.eup %7626 }
 0x6a0   :  { %v2566_v3 = vsub.f32 1.0, %v7627_v21  ;;  %v2568_v10 = vmul.f32 %v7627_v21, %v9091_v30 }
 0x6a1   :  { %v2564_v0 = vadd.f32 %v2563_v8, %v10414_v37 }
 0x6a3   :  { %7628 = vtanh.f32 %v2564_v0 }
 0x6a5   :  { %v2378_v11 = vpop.f32.mrb[82].mxu0  ;;  %v2452_v4 = vpop.f32.mrb[66].mxu1 }
 0x6a6   :  { %v2379_v62 = vpop.f32.mrb[83].mxu0  ;;  %v2453_v2 = vpop.f32.mrb[67].mxu1 }
 0x6a7   :  { %v2454_v38 = vadd.f32 %v2453_v2, %v10385_v53  ;;  %v10416_v62 = vld [vmem:[#allocation90_spill] sm:$0xff] }
 0x6a9   :  { %v2570_v49 = vadd.f32 %v2454_v38, %v10415_v45  ;;  %v2522_v55 = vpop.f32.mrb[68].mxu1 }
 0x6aa   :  { %v2523_v29 = vpop.f32.mrb[69].mxu1 }
 0x6ab   :  { %v5656_v36 = vmul.f32 -1.442695, %v2570_v49  ;;  %v10417_v49 = vld [vmem:[#allocation91_spill] sm:$0xff] }
 0x6ad   :  { %v7629_v31 = vpop.eup %7628  ;;  %7630 = vpow2.f32 %v5656_v36  ;;  %v2526_v59 = vpop.f32.mrb[70].mxu1 }
 0x6ae   :  { %v2527_v23 = vadd.f32 %v2526_v59, %v10354_v43  ;;  %v2528_v37 = vpop.f32.mrb[71].mxu1  ;;  %v2567_v8 = vmul.f32 %v7629_v31, %v2566_v3  ;;  %v10418_v31 = vld [vmem:[#allocation17_spill] sm:$0xff] }
 0x6af   :  { %v2529_v38 = vadd.f32 %v2528_v37, %v10355_v40 }
 0x6b0   :  { %v2577_v0 = vadd.f32 %v2527_v23, %v10416_v62  ;;  %v9167_v11 = vadd.f32 %v2568_v10, %v2567_v8  ;;  %v10420_v62 = vld [vmem:[#allocation29_spill] sm:$0xff] }
 0x6b2   :  { %v5657_v4 = vmul.f32 -1.442695, %v2577_v0  ;;  %2656 = vmatmul.mubr.f32.vlgmr.msra.gmra.mrb[12].mxu0 %v9167_v11  ;;  %2731 = vmatmul.mubr.f32.vlgmr.msra.gmra.mrb[72].mxu1 %v9167_v11  ;;  %v10421_v0 = vld [vmem:[#allocation30_spill] sm:$0xff] }
 0x6b3   :  { %6470 = vmatpush1.bf16.msra.mxu0 %v8357_v26  ;;  %2661 = vmatprep.mubr.f32.mxu0 %v10267_v1 }
 0x6b4   :  { %7632 = vpow2.f32 %v5657_v4  ;;  %6472 = vmatprep.subr.bf16.mxu0 %v8361_v20  ;;  %2735 = vmatprep.mubr.f32.mxu1 %v10267_v1  ;;  %v10422_v4 = vld [vmem:[#allocation33_spill] sm:$0xff] }
 0x6b5   :  { %6534 = vmatpush1.bf16.msra.mxu1 %v8131_v46 }
 0x6b6   :  { %6536 = vmatprep.subr.bf16.mxu1 %v8142_v50 }
 0x6b7   :  { %v7631_v3 = vpop.eup %7630  ;;  %6474 = vmatpush1.bf16.msra.mxu0 %v8372_v35 }
 0x6b8   :  { %v2574_v30 = vadd.f32 1.0, %v7631_v3  ;;  %6476 = vmatprep.subr.bf16.mxu0 %v8378_v52  ;;  %v10423_v3 = vld [vmem:[#allocation34_spill] sm:$0xff] }
 0x6b9   :  { %6538 = vmatpush1.bf16.msra.mxu1 %v8150_v56 }
 0x6ba   :  { %7634 = vrcp.f32 %v2574_v30  ;;  %6540 = vmatprep.subr.bf16.mxu1 %v8162_v60  ;;  %v10424_v30 = vld [vmem:[#allocation35_spill] sm:$0xff] }
 0x6bb   :  { %6478 = vmatpush1.bf16.msra.mxu0 %v8389_v9 }
 0x6bc   :  { %6480 = vmatprep.subr.bf16.mxu0 %v8395_v16 }
 0x6bd   :  { %6542 = vmatpush1.bf16.msra.mxu1 %v8168_v63 }
 0x6be   :  { %v7633_v29 = vpop.eup %7632  ;;  %6544 = vmatprep.subr.bf16.mxu1 %v10341_v41 }
 0x6bf   :  { %6482 = vmatpush1.bf16.msra.mxu0 %v10339_v42  ;;  %v2581_v2 = vadd.f32 1.0, %v7633_v29  ;;  %v10425_v29 = vld [vmem:[#allocation36_spill] sm:$0xff] }
 0x6c0   :  { %6484 = vmatprep.subr.bf16.mxu0 %v10340_v48 }
 0x6c1   :  { %6546 = vmatpush1.bf16.msra.mxu1 %v10342_v13  ;;  %7636 = vrcp.f32 %v2581_v2  ;;  %v10426_v2 = vld [vmem:[#allocation37_spill] sm:$0xff] }
 0x6c2   :  { %6548 = vmatprep.subr.bf16.mxu1 %v10343_v44 }
 0x6c3   :  { %6486 = vmatpush1.bf16.msra.mxu0 %v8420_v17 }
 0x6c4   :  { %v7635_v21 = vpop.eup %7634  ;;  %6488 = vmatprep.subr.bf16.mxu0 %v8425_v28 }
 0x6c5   :  { %v2584_v45 = vmul.f32 %v7635_v21, %v2529_v38  ;;  %6550 = vmatpush1.bf16.msra.mxu1 %v10405_v7  ;;  %v10429_v7 = vld [vmem:[#allocation49_spill] sm:$0xff] }
 0x6c6   :  { %6552 = vmatprep.subr.bf16.mxu1 %v10406_v22 }
 0x6c7   :  { %v2585_v55 = vadd.f32 %v2584_v45, %v10417_v49  ;;  %6490 = vmatpush1.bf16.msra.mxu0 %v8435_v47  ;;  %v10427_v45 = vld [vmem:[#allocation101_spill] sm:$0xff] }
 0x6c8   :  { %6492 = vmatprep.subr.bf16.mxu0 %v8440_v5 }
 0x6c9   :  { %7638 = vtanh.f32 %v2585_v55  ;;  %6554 = vmatpush1.bf16.msra.mxu1 %v10407_v18 }
 0x6ca   :  { %6556 = vmatprep.subr.bf16.mxu1 %v10408_v57 }
 0x6cb   :  { %6494 = vmatpush1.bf16.msra.mxu0 %v8448_v34  ;;  %v7637_v36 = vpop.eup %7636 }
 0x6cc   :  { %6496 = vmatprep.subr.bf16.mxu0 %v8453_v15  ;;  %v2587_v59 = vsub.f32 1.0, %v7637_v36  ;;  %v2589_v8 = vmul.f32 %v7637_v36, %v9132_v25  ;;  %v10419_v25 = vld [vmem:[#allocation28_spill] sm:$0xff] }
 0x6cd   :  { %6558 = vmatpush1.bf16.msra.mxu1 %v10409_v19 }
 0x6ce   :  { %6560 = vmatprep.subr.bf16.mxu1 %v10410_v14 }
 0x6cf   :  { %6498 = vmatpush1.bf16.msra.mxu0 %v8459_v51 }
 0x6d0   :  { %6500 = vmatprep.subr.bf16.mxu0 %v10418_v31 }
 0x6d1   :  { %6562 = vmatpush1.bf16.msra.mxu1 %v10411_v24 }
 0x6d2   :  { %6564 = vmatprep.subr.bf16.mxu1 %v8265_v39 }
 0x6d3   :  { %v7639_v23 = vpop.eup %7638 }
 0x6d4   :  { %v2588_v37 = vmul.f32 %v7639_v23, %v2587_v59  ;;  %v10428_v23 = vld [vmem:[#allocation102_spill] sm:$0xff] }
 0x6d6   :  { %v9208_v10 = vadd.f32 %v2589_v8, %v2588_v37 }
 0x6d8   :  { %2662 = vmatmul.mubr.f32.gmra.mrb[84].mxu0 %v9208_v10  ;;  %2736 = vmatmul.mubr.f32.gmra.mrb[74].mxu1 %v9208_v10 }
 0x6d9   :  { %2805 = vmatprep.mubr.f32.mxu0 %v10267_v1  ;;  %3015 = vmatprep.mubr.f32.mxu1 %v10267_v1 }
 0x6dc   :  { %2806 = vmatmul.mubr.f32.vlgmr.msra.gmra.mrb[86].mxu0 %v9167_v11 }
 0x6dd   :  { %2809 = vmatprep.mubr.f32.mxu0 %v10267_v1  ;;  %6502 = vmatpush1.bf16.msra.mxu0 %v8338_v54 }
 0x6de   :  { %6504 = vmatprep.subr.bf16.mxu0 %v8342_v58 }
 0x6e0   :  { %2810 = vmatmul.mubr.f32.gmra.mrb[88].mxu0 %v9208_v10 }
 0x6e1   :  { %6506 = vmatpush1.bf16.msra.mxu0 %v8349_v6  ;;  %2940 = vmatprep.mubr.f32.mxu0 %v10267_v1 }
 0x6e2   :  { %6508 = vmatprep.subr.bf16.mxu0 %v8352_v12 }
 0x6e5   :  { %6510 = vmatpush1.bf16.msra.mxu0 %v8365_v27 }
 0x6e6   :  { %6512 = vmatprep.subr.bf16.mxu0 %v8369_v32 }
 0x6e9   :  { %6514 = vmatpush1.bf16.msra.mxu0 %v8382_v61 }
 0x6ea   :  { %6516 = vmatprep.subr.bf16.mxu0 %v10419_v25 }
 0x6ed   :  { %6518 = vmatpush1.bf16.msra.mxu0 %v10420_v62 }
 0x6ee   :  { %6520 = vmatprep.subr.bf16.mxu0 %v10421_v0 }
 0x6f1   :  { %6522 = vmatpush1.bf16.msra.mxu0 %v10422_v4 }
 0x6f2   :  { %6524 = vmatprep.subr.bf16.mxu0 %v10423_v3 }
 0x6f5   :  { %6526 = vmatpush1.bf16.msra.mxu0 %v10424_v30 }
 0x6f6   :  { %6528 = vmatprep.subr.bf16.mxu0 %v10425_v29 }
 0x6f9   :  { %6530 = vmatpush1.bf16.msra.mxu0 %v10426_v2 }
 0x6fa   :  { %6596 = vmatprep.subr.bf16.mxu0 %v10418_v31 }
 0x785   :  { %v2657_v38 = vpop.f32.mrb[12].mxu0  ;;  %v2732_v21 = vpop.f32.mrb[72].mxu1 }
 0x786   :  { %v7436_v49 = vadd.f32 %v10427_v45, %v2657_v38  ;;  %v2659_v55 = vpop.f32.mrb[13].mxu0  ;;  %v2734_v36 = vpop.f32.mrb[73].mxu1  ;;  %v2733_v18 = vadd.f32 %v2732_v21, %v10399_v33 }
 0x787   :  { %v7438_v37 = vadd.f32 %v10428_v23, %v2659_v55 }
 0x788   :  { %v5658_v59 = vmul.f32 -1.442695, %v7436_v49 }
 0x789   :  { %v5659_v8 = vmul.f32 -1.442695, %v7438_v37 }
 0x78a   :  { %7640 = vpow2.f32 %v5658_v59 }
 0x78b   :  { %7642 = vpow2.f32 %v5659_v8 }
 0x794   :  { %v7641_v24 = vpop.eup %7640 }
 0x795   :  { %v2838_v14 = vadd.f32 1.0, %v7641_v24  ;;  %v7643_v19 = vpop.eup %7642  ;;  %v10430_v24 = vld [vmem:[#allocation56_spill] sm:$0xff] }
 0x796   :  { %v2845_v57 = vadd.f32 1.0, %v7643_v19 }
 0x797   :  { %7644 = vrcp.f32 %v2838_v14 }
 0x798   :  { %7646 = vrcp.f32 %v2845_v57 }
 0x7a1   :  { %v7645_v31 = vpop.eup %7644 }
 0x7a2   :  { %v2848_v22 = vmul.f32 %v7645_v31, %v2733_v18  ;;  %v7647_v45 = vpop.eup %7646 }
 0x7a3   :  { %v2851_v8 = vsub.f32 1.0, %v7647_v45  ;;  %v2853_v18 = vmul.f32 %v7647_v45, %v9167_v11 }
 0x7a4   :  { %v2849_v38 = vadd.f32 %v2848_v22, %v10429_v7 }
 0x7a6   :  { %7648 = vtanh.f32 %v2849_v38  ;;  %v10431_v38 = vld [vmem:[#allocation87_spill] sm:$0xff] }
 0x7ab   :  { %v2663_v36 = vpop.f32.mrb[84].mxu0  ;;  %v2737_v49 = vpop.f32.mrb[74].mxu1 }
 0x7ac   :  { %v2664_v55 = vpop.f32.mrb[85].mxu0  ;;  %v2738_v59 = vpop.f32.mrb[75].mxu1 }
 0x7ad   :  { %v2739_v37 = vadd.f32 %v2738_v59, %v10385_v53 }
 0x7af   :  { %v2855_v14 = vadd.f32 %v2739_v37, %v10430_v24  ;;  %v2807_v23 = vpop.f32.mrb[86].mxu0  ;;  %v10432_v37 = vld [vmem:[#allocation88_spill] sm:$0xff] }
 0x7b0   :  { %v7649_v19 = vpop.eup %7648  ;;  %v2808_v44 = vpop.f32.mrb[87].mxu0  ;;  %v10433_v24 = vld [vmem:[#allocation16_spill] sm:$0xff] }
 0x7b1   :  { %v5660_v21 = vmul.f32 -1.442695, %v2855_v14  ;;  %v2852_v33 = vmul.f32 %v7649_v19, %v2851_v8 }
 0x7b3   :  { %7650 = vpow2.f32 %v5660_v21  ;;  %v2811_v7 = vpop.f32.mrb[88].mxu0  ;;  %v9241_v22 = vadd.f32 %v2853_v18, %v2852_v33 }
 0x7b4   :  { %v2812_v57 = vadd.f32 %v2811_v7, %v10354_v43  ;;  %v2813_v31 = vpop.f32.mrb[89].mxu0 }
 0x7b5   :  { %2941 = vmatmul.mubr.f32.vlgmr.msra.gmra.mrb[14].mxu0 %v9241_v22  ;;  %3016 = vmatmul.mubr.f32.vlgmr.msra.gmra.mrb[76].mxu1 %v9241_v22  ;;  %v2814_v49 = vadd.f32 %v2813_v31, %v10355_v40  ;;  %v10435_v31 = vld [vmem:[#allocation21_spill] sm:$0xff] }
 0x7b6   :  { %v2862_v36 = vadd.f32 %v2812_v57, %v10431_v38  ;;  %6566 = vmatpush1.bf16.msra.mxu1 %v8357_v26  ;;  %2946 = vmatprep.mubr.f32.mxu0 %v10267_v1  ;;  %v10436_v38 = vld [vmem:[#allocation22_spill] sm:$0xff] }
 0x7b7   :  { %6568 = vmatprep.subr.bf16.mxu1 %v8361_v20  ;;  %3020 = vmatprep.mubr.f32.mxu1 %v10267_v1 }
 0x7b8   :  { %v5661_v44 = vmul.f32 -1.442695, %v2862_v36  ;;  %6598 = vmatpush1.bf16.msra.mxu0 %v8338_v54  ;;  %v10437_v36 = vld [vmem:[#allocation23_spill] sm:$0xff] }
 0x7b9   :  { %6600 = vmatprep.subr.bf16.mxu0 %v8342_v58 }
 0x7ba   :  { %7652 = vpow2.f32 %v5661_v44  ;;  %6570 = vmatpush1.bf16.msra.mxu1 %v8372_v35  ;;  %v10438_v44 = vld [vmem:[#allocation24_spill] sm:$0xff] }
 0x7bb   :  { %6572 = vmatprep.subr.bf16.mxu1 %v8378_v52 }
 0x7bc   :  { %6602 = vmatpush1.bf16.msra.mxu0 %v8349_v6 }
 0x7bd   :  { %v7651_v33 = vpop.eup %7650  ;;  %6604 = vmatprep.subr.bf16.mxu0 %v8352_v12 }
 0x7be   :  { %v2859_v11 = vadd.f32 1.0, %v7651_v33  ;;  %6574 = vmatpush1.bf16.msra.mxu1 %v8389_v9  ;;  %v10439_v33 = vld [vmem:[#allocation25_spill] sm:$0xff] }
 0x7bf   :  { %6576 = vmatprep.subr.bf16.mxu1 %v8395_v16 }
 0x7c0   :  { %7654 = vrcp.f32 %v2859_v11  ;;  %6606 = vmatpush1.bf16.msra.mxu0 %v8365_v27  ;;  %v10440_v11 = vld [vmem:[#allocation26_spill] sm:$0xff] }
 0x7c1   :  { %6608 = vmatprep.subr.bf16.mxu0 %v8369_v32 }
 0x7c2   :  { %6578 = vmatpush1.bf16.msra.mxu1 %v10339_v42 }
 0x7c3   :  { %6580 = vmatprep.subr.bf16.mxu1 %v10340_v48 }
 0x7c4   :  { %v7653_v45 = vpop.eup %7652  ;;  %6610 = vmatpush1.bf16.msra.mxu0 %v8382_v61 }
 0x7c5   :  { %6612 = vmatprep.subr.bf16.mxu0 %v10419_v25  ;;  %v2866_v23 = vadd.f32 1.0, %v7653_v45  ;;  %v10441_v45 = vld [vmem:[#allocation27_spill] sm:$0xff] }
 0x7c6   :  { %6582 = vmatpush1.bf16.msra.mxu1 %v8420_v17 }
 0x7c7   :  { %6584 = vmatprep.subr.bf16.mxu1 %v8425_v28  ;;  %7656 = vrcp.f32 %v2866_v23 }
 0x7c8   :  { %6614 = vmatpush1.bf16.msra.mxu0 %v10420_v62  ;;  %v10445_v62 = vld [vmem:[#allocation51_spill] sm:$0xff] }
 0x7c9   :  { %6616 = vmatprep.subr.bf16.mxu0 %v10421_v0 }
 0x7ca   :  { %v7655_v55 = vpop.eup %7654  ;;  %6586 = vmatpush1.bf16.msra.mxu1 %v8435_v47 }
 0x7cb   :  { %v2869_v59 = vmul.f32 %v7655_v55, %v2814_v49  ;;  %6588 = vmatprep.subr.bf16.mxu1 %v8440_v5  ;;  %v10442_v55 = vld [vmem:[#allocation101_spill] sm:$0xff] }
 0x7cc   :  { %6618 = vmatpush1.bf16.msra.mxu0 %v10422_v4 }
 0x7cd   :  { %v2870_v8 = vadd.f32 %v2869_v59, %v10432_v37  ;;  %6620 = vmatprep.subr.bf16.mxu0 %v10423_v3  ;;  %v10444_v3 = vld [vmem:[#allocation103_spill] sm:$0xff] }
 0x7ce   :  { %6590 = vmatpush1.bf16.msra.mxu1 %v8448_v34 }
 0x7cf   :  { %7658 = vtanh.f32 %v2870_v8  ;;  %6592 = vmatprep.subr.bf16.mxu1 %v8453_v15 }
 0x7d0   :  { %6622 = vmatpush1.bf16.msra.mxu0 %v10424_v30 }
 0x7d1   :  { %6624 = vmatprep.subr.bf16.mxu0 %v10425_v29  ;;  %v7657_v14 = vpop.eup %7656 }
 0x7d2   :  { %6594 = vmatpush1.bf16.msra.mxu1 %v8459_v51  ;;  %v2872_v19 = vsub.f32 1.0, %v7657_v14  ;;  %v2874_v7 = vmul.f32 %v7657_v14, %v9208_v10  ;;  %v10434_v10 = vld [vmem:[#allocation20_spill] sm:$0xff] }
 0x7d3   :  { %6628 = vmatprep.subr.bf16.mxu1 %v10433_v24 }
 0x7d4   :  { %6626 = vmatpush1.bf16.msra.mxu0 %v10426_v2 }
 0x7d5   :  { %6660 = vmatprep.subr.bf16.mxu0 %v8265_v39 }
 0x7d9   :  { %v7659_v21 = vpop.eup %7658 }
 0x7da   :  { %v2873_v18 = vmul.f32 %v7659_v21, %v2872_v19  ;;  %v10443_v19 = vld [vmem:[#allocation102_spill] sm:$0xff] }
 0x7dc   :  { %v9284_v57 = vadd.f32 %v2874_v7, %v2873_v18 }
 0x7de   :  { %2947 = vmatmul.mubr.f32.gmra.mrb[90].mxu0 %v9284_v57  ;;  %3021 = vmatmul.mubr.f32.gmra.mrb[78].mxu1 %v9284_v57 }
 0x7df   :  { %3090 = vmatprep.mubr.f32.mxu1 %v10267_v1  ;;  %3225 = vmatprep.mubr.f32.mxu0 %v10267_v1 }
 0x7e2   :  { %3091 = vmatmul.mubr.f32.vlgmr.msra.gmra.mrb[80].mxu1 %v9241_v22 }
 0x7e3   :  { %3094 = vmatprep.mubr.f32.mxu1 %v10267_v1  ;;  %6630 = vmatpush1.bf16.msra.mxu1 %v8131_v46 }
 0x7e4   :  { %6632 = vmatprep.subr.bf16.mxu1 %v8142_v50 }
 0x7e6   :  { %3095 = vmatmul.mubr.f32.gmra.mrb[82].mxu1 %v9284_v57 }
 0x7e7   :  { %6634 = vmatpush1.bf16.msra.mxu1 %v8150_v56  ;;  %3300 = vmatprep.mubr.f32.mxu1 %v10267_v1 }
 0x7e8   :  { %6636 = vmatprep.subr.bf16.mxu1 %v8162_v60 }
 0x7eb   :  { %6638 = vmatpush1.bf16.msra.mxu1 %v8168_v63 }
 0x7ec   :  { %6640 = vmatprep.subr.bf16.mxu1 %v10341_v41 }
 0x7ef   :  { %6642 = vmatpush1.bf16.msra.mxu1 %v10342_v13 }
 0x7f0   :  { %6644 = vmatprep.subr.bf16.mxu1 %v10434_v10 }
 0x7f3   :  { %6646 = vmatpush1.bf16.msra.mxu1 %v10435_v31 }
 0x7f4   :  { %6648 = vmatprep.subr.bf16.mxu1 %v10436_v38 }
 0x7f7   :  { %6650 = vmatpush1.bf16.msra.mxu1 %v10437_v36 }
 0x7f8   :  { %6652 = vmatprep.subr.bf16.mxu1 %v10438_v44 }
 0x7fb   :  { %6654 = vmatpush1.bf16.msra.mxu1 %v10439_v33 }
 0x7fc   :  { %6656 = vmatprep.subr.bf16.mxu1 %v10440_v11 }
 0x7ff   :  { %6658 = vmatpush1.bf16.msra.mxu1 %v10441_v45 }
 0x800   :  { %6724 = vmatprep.subr.bf16.mxu1 %v10433_v24 }
 0x888   :  { %v2942_v23 = vpop.f32.mrb[14].mxu0  ;;  %v3017_v49 = vpop.f32.mrb[76].mxu1 }
 0x889   :  { %v7440_v59 = vadd.f32 %v10442_v55, %v2942_v23  ;;  %v2944_v37 = vpop.f32.mrb[15].mxu0  ;;  %v3019_v8 = vpop.f32.mrb[77].mxu1  ;;  %v3018_v4 = vadd.f32 %v3017_v49, %v10444_v3 }
 0x88a   :  { %v7442_v21 = vadd.f32 %v10443_v19, %v2944_v37  ;;  %v10446_v19 = vld [vmem:[#allocation54_spill] sm:$0xff] }
 0x88b   :  { %v5662_v14 = vmul.f32 -1.442695, %v7440_v59 }
 0x88c   :  { %v5663_v18 = vmul.f32 -1.442695, %v7442_v21 }
 0x88d   :  { %7660 = vpow2.f32 %v5662_v14 }
 0x88e   :  { %7662 = vpow2.f32 %v5663_v18 }
 0x897   :  { %v7661_v7 = vpop.eup %7660 }
 0x898   :  { %v3123_v2 = vadd.f32 1.0, %v7661_v7  ;;  %v7663_v29 = vpop.eup %7662 }
 0x899   :  { %v3130_v30 = vadd.f32 1.0, %v7663_v29 }
 0x89a   :  { %7664 = vrcp.f32 %v3123_v2 }
 0x89b   :  { %7666 = vrcp.f32 %v3130_v30 }
 0x8a4   :  { %v7665_v24 = vpop.eup %7664 }
 0x8a5   :  { %v3133_v0 = vmul.f32 %v7665_v24, %v3018_v4  ;;  %v7667_v8 = vpop.eup %7666 }
 0x8a6   :  { %v3136_v37 = vsub.f32 1.0, %v7667_v8  ;;  %v3138_v29 = vmul.f32 %v7667_v8, %v9241_v22 }
 0x8a7   :  { %v3134_v23 = vadd.f32 %v3133_v0, %v10445_v62 }
 0x8a9   :  { %7668 = vtanh.f32 %v3134_v23 }
 0x8b1   :  { %v2948_v59 = vpop.f32.mrb[90].mxu0  ;;  %v3022_v55 = vpop.f32.mrb[78].mxu1 }
 0x8b2   :  { %v2949_v14 = vpop.f32.mrb[91].mxu0  ;;  %v3023_v21 = vpop.f32.mrb[79].mxu1 }
 0x8b3   :  { %v7669_v18 = vpop.eup %7668  ;;  %v3024_v7 = vadd.f32 %v3023_v21, %v10385_v53 }
 0x8b4   :  { %v3137_v2 = vmul.f32 %v7669_v18, %v3136_v37 }
 0x8b5   :  { %v3140_v49 = vadd.f32 %v3024_v7, %v10446_v19  ;;  %v3092_v3 = vpop.f32.mrb[80].mxu1  ;;  %v10448_v7 = vld [vmem:[#allocation86_spill] sm:$0xff] }
 0x8b6   :  { %v3093_v4 = vpop.f32.mrb[81].mxu1  ;;  %v9317_v30 = vadd.f32 %v3138_v29, %v3137_v2  ;;  %v10447_v3 = vld [vmem:[#allocation85_spill] sm:$0xff] }
 0x8b7   :  { %v5664_v62 = vmul.f32 -1.442695, %v3140_v49  ;;  %v10449_v29 = vld [vmem:[#allocation17_spill] sm:$0xff] }
 0x8b8   :  { %3226 = vmatmul.mubr.f32.vlgmr.msra.gmra.mrb[16].mxu0 %v9317_v30  ;;  %3301 = vmatmul.mubr.f32.vlgmr.msra.gmra.mrb[84].mxu1 %v9317_v30 }
 0x8b9   :  { %7670 = vpow2.f32 %v5664_v62  ;;  %v3096_v0 = vpop.f32.mrb[82].mxu1  ;;  %6662 = vmatpush1.bf16.msra.mxu0 %v8357_v26  ;;  %3231 = vmatprep.mubr.f32.mxu0 %v10267_v1 }
 0x8ba   :  { %v3097_v24 = vadd.f32 %v3096_v0, %v10354_v43  ;;  %v3098_v22 = vpop.f32.mrb[83].mxu1  ;;  %6664 = vmatprep.subr.bf16.mxu0 %v8361_v20  ;;  %3305 = vmatprep.mubr.f32.mxu1 %v10267_v1 }
 0x8bb   :  { %6726 = vmatpush1.bf16.msra.mxu1 %v8131_v46  ;;  %v3099_v14 = vadd.f32 %v3098_v22, %v10355_v40 }
 0x8bc   :  { %v3147_v55 = vadd.f32 %v3097_v24, %v10447_v3  ;;  %6728 = vmatprep.subr.bf16.mxu1 %v8142_v50  ;;  %v10451_v3 = vld [vmem:[#allocation30_spill] sm:$0xff] }
 0x8bd   :  { %6666 = vmatpush1.bf16.msra.mxu0 %v8372_v35 }
 0x8be   :  { %v5665_v19 = vmul.f32 -1.442695, %v3147_v55  ;;  %6668 = vmatprep.subr.bf16.mxu0 %v8378_v52  ;;  %v10452_v55 = vld [vmem:[#allocation33_spill] sm:$0xff] }
 0x8bf   :  { %6730 = vmatpush1.bf16.msra.mxu1 %v8150_v56 }
 0x8c0   :  { %7672 = vpow2.f32 %v5665_v19  ;;  %6732 = vmatprep.subr.bf16.mxu1 %v8162_v60  ;;  %v10453_v19 = vld [vmem:[#allocation34_spill] sm:$0xff] }
 0x8c1   :  { %6670 = vmatpush1.bf16.msra.mxu0 %v8389_v9 }
 0x8c2   :  { %6672 = vmatprep.subr.bf16.mxu0 %v8395_v16 }
 0x8c3   :  { %v7671_v23 = vpop.eup %7670  ;;  %6734 = vmatpush1.bf16.msra.mxu1 %v8168_v63 }
 0x8c4   :  { %v3144_v8 = vadd.f32 1.0, %v7671_v23  ;;  %6736 = vmatprep.subr.bf16.mxu1 %v10341_v41  ;;  %v10454_v23 = vld [vmem:[#allocation35_spill] sm:$0xff] }
 0x8c5   :  { %6674 = vmatpush1.bf16.msra.mxu0 %v10339_v42 }
 0x8c6   :  { %7674 = vrcp.f32 %v3144_v8  ;;  %6676 = vmatprep.subr.bf16.mxu0 %v10340_v48  ;;  %v10455_v8 = vld [vmem:[#allocation36_spill] sm:$0xff] }
 0x8c7   :  { %6738 = vmatpush1.bf16.msra.mxu1 %v10342_v13 }
 0x8c8   :  { %6740 = vmatprep.subr.bf16.mxu1 %v10434_v10 }
 0x8c9   :  { %6678 = vmatpush1.bf16.msra.mxu0 %v8420_v17 }
 0x8ca   :  { %v7673_v59 = vpop.eup %7672  ;;  %6680 = vmatprep.subr.bf16.mxu0 %v8425_v28 }
 0x8cb   :  { %6742 = vmatpush1.bf16.msra.mxu1 %v10435_v31  ;;  %v3151_v37 = vadd.f32 1.0, %v7673_v59  ;;  %v10456_v59 = vld [vmem:[#allocation37_spill] sm:$0xff] }
 0x8cc   :  { %6744 = vmatprep.subr.bf16.mxu1 %v10436_v38  ;;  %v10460_v31 = vld [vmem:[#allocation53_spill] sm:$0xff] }
 0x8cd   :  { %6682 = vmatpush1.bf16.msra.mxu0 %v8435_v47  ;;  %7676 = vrcp.f32 %v3151_v37 }
 0x8ce   :  { %6684 = vmatprep.subr.bf16.mxu0 %v8440_v5 }
 0x8cf   :  { %6746 = vmatpush1.bf16.msra.mxu1 %v10437_v36 }
 0x8d0   :  { %v7675_v21 = vpop.eup %7674  ;;  %6748 = vmatprep.subr.bf16.mxu1 %v10438_v44  ;;  %v10459_v44 = vld [vmem:[#allocation103_spill] sm:$0xff] }
 0x8d1   :  { %v3154_v18 = vmul.f32 %v7675_v21, %v3099_v14  ;;  %6686 = vmatpush1.bf16.msra.mxu0 %v8448_v34  ;;  %v10457_v21 = vld [vmem:[#allocation101_spill] sm:$0xff] }
 0x8d2   :  { %6688 = vmatprep.subr.bf16.mxu0 %v8453_v15 }
 0x8d3   :  { %v3155_v2 = vadd.f32 %v3154_v18, %v10448_v7  ;;  %6750 = vmatpush1.bf16.msra.mxu1 %v10439_v33 }
 0x8d4   :  { %6752 = vmatprep.subr.bf16.mxu1 %v10440_v11 }
 0x8d5   :  { %7678 = vtanh.f32 %v3155_v2  ;;  %6690 = vmatpush1.bf16.msra.mxu0 %v8459_v51 }
 0x8d6   :  { %6692 = vmatprep.subr.bf16.mxu0 %v10449_v29 }
 0x8d7   :  { %6754 = vmatpush1.bf16.msra.mxu1 %v10441_v45  ;;  %v7677_v49 = vpop.eup %7676 }
 0x8d8   :  { %6756 = vmatprep.subr.bf16.mxu1 %v8265_v39  ;;  %v3157_v4 = vsub.f32 1.0, %v7677_v49  ;;  %v3159_v24 = vmul.f32 %v7677_v49, %v9284_v57  ;;  %v10450_v57 = vld [vmem:[#allocation29_spill] sm:$0xff] }
 0x8df   :  { %v7679_v62 = vpop.eup %7678 }
 0x8e0   :  { %v3158_v0 = vmul.f32 %v7679_v62, %v3157_v4  ;;  %v10458_v4 = vld [vmem:[#allocation102_spill] sm:$0xff] }
 0x8e2   :  { %v9360_v22 = vadd.f32 %v3159_v24, %v3158_v0 }
 0x8e4   :  { %3232 = vmatmul.mubr.f32.gmra.mrb[92].mxu0 %v9360_v22  ;;  %3306 = vmatmul.mubr.f32.gmra.mrb[86].mxu1 %v9360_v22 }
 0x8e5   :  { %3375 = vmatprep.mubr.f32.mxu0 %v10267_v1  ;;  %3567 = vmatprep.mubr.f32.mxu1 %v10267_v1 }
 0x8e8   :  { %3376 = vmatmul.mubr.f32.vlgmr.msra.gmra.mrb[94].mxu0 %v9317_v30 }
 0x8e9   :  { %3379 = vmatprep.mubr.f32.mxu0 %v10267_v1  ;;  %6694 = vmatpush1.bf16.msra.mxu0 %v8338_v54 }
 0x8ea   :  { %6696 = vmatprep.subr.bf16.mxu0 %v8342_v58 }
 0x8ec   :  { %3380 = vmatmul.mubr.f32.gmra.mrb[96].mxu0 %v9360_v22 }
 0x8ed   :  { %6698 = vmatpush1.bf16.msra.mxu0 %v8349_v6  ;;  %3492 = vmatprep.mubr.f32.mxu0 %v10267_v1 }
 0x8ee   :  { %6700 = vmatprep.subr.bf16.mxu0 %v8352_v12 }
 0x8f1   :  { %6702 = vmatpush1.bf16.msra.mxu0 %v8365_v27 }
 0x8f2   :  { %6704 = vmatprep.subr.bf16.mxu0 %v8369_v32 }
 0x8f5   :  { %6706 = vmatpush1.bf16.msra.mxu0 %v8382_v61 }
 0x8f6   :  { %6708 = vmatprep.subr.bf16.mxu0 %v10419_v25 }
 0x8f9   :  { %6710 = vmatpush1.bf16.msra.mxu0 %v10450_v57 }
 0x8fa   :  { %6712 = vmatprep.subr.bf16.mxu0 %v10451_v3 }
 0x8fd   :  { %6714 = vmatpush1.bf16.msra.mxu0 %v10452_v55 }
 0x8fe   :  { %6716 = vmatprep.subr.bf16.mxu0 %v10453_v19 }
 0x901   :  { %6718 = vmatpush1.bf16.msra.mxu0 %v10454_v23 }
 0x902   :  { %6720 = vmatprep.subr.bf16.mxu0 %v10455_v8 }
 0x905   :  { %6722 = vmatpush1.bf16.msra.mxu0 %v10456_v59 }
 0x906   :  { %6788 = vmatprep.subr.bf16.mxu0 %v10449_v29 }
 0x98b   :  { %v3227_v37 = vpop.f32.mrb[16].mxu0  ;;  %v3302_v14 = vpop.f32.mrb[84].mxu1 }
 0x98c   :  { %v7444_v18 = vadd.f32 %v10457_v21, %v3227_v37  ;;  %v3229_v7 = vpop.f32.mrb[17].mxu0  ;;  %v3304_v2 = vpop.f32.mrb[85].mxu1  ;;  %v3303_v36 = vadd.f32 %v3302_v14, %v10459_v44  ;;  %v10461_v14 = vld [vmem:[#allocation52_spill] sm:$0xff] }
 0x98d   :  { %v7446_v62 = vadd.f32 %v10458_v4, %v3229_v7 }
 0x98e   :  { %v5666_v49 = vmul.f32 -1.442695, %v7444_v18 }
 0x98f   :  { %v5667_v0 = vmul.f32 -1.442695, %v7446_v62 }
 0x990   :  { %7680 = vpow2.f32 %v5666_v49 }
 0x991   :  { %7682 = vpow2.f32 %v5667_v0 }
 0x99a   :  { %v7681_v24 = vpop.eup %7680 }
 0x99b   :  { %v3390_v45 = vadd.f32 1.0, %v7681_v24  ;;  %v7683_v11 = vpop.eup %7682 }
 0x99c   :  { %v3397_v33 = vadd.f32 1.0, %v7683_v11 }
 0x99d   :  { %7684 = vrcp.f32 %v3390_v45 }
 0x99e   :  { %7686 = vrcp.f32 %v3397_v33 }
 0x9a7   :  { %v7685_v29 = vpop.eup %7684 }
 0x9a8   :  { %v3400_v38 = vmul.f32 %v7685_v29, %v3303_v36  ;;  %v7687_v2 = vpop.eup %7686 }
 0x9a9   :  { %v3403_v18 = vsub.f32 1.0, %v7687_v2  ;;  %v3405_v0 = vmul.f32 %v7687_v2, %v9317_v30 }
 0x9aa   :  { %v3401_v37 = vadd.f32 %v3400_v38, %v10460_v31 }
 0x9ac   :  { %7688 = vtanh.f32 %v3401_v37  ;;  %v10462_v37 = vld [vmem:[#allocation83_spill] sm:$0xff] }
 0x9b6   :  { %v7689_v21 = vpop.eup %7688 }
 0x9b7   :  { %v3233_v7 = vpop.f32.mrb[92].mxu0  ;;  %v3307_v49 = vpop.f32.mrb[86].mxu1  ;;  %v3404_v62 = vmul.f32 %v7689_v21, %v3403_v18 }
 0x9b8   :  { %v3234_v24 = vpop.f32.mrb[93].mxu0  ;;  %v3308_v45 = vpop.f32.mrb[87].mxu1 }
 0x9b9   :  { %v3309_v11 = vadd.f32 %v3308_v45, %v10385_v53  ;;  %v9392_v4 = vadd.f32 %v3405_v0, %v3404_v62 }
 0x9bb   :  { %v3407_v36 = vadd.f32 %v3309_v11, %v10461_v14  ;;  %v3377_v33 = vpop.f32.mrb[94].mxu0  ;;  %3493 = vmatmul.mubr.f32.vlgmr.msra.gmra.mrb[18].mxu0 %v9392_v4  ;;  %3568 = vmatmul.mubr.f32.vlgmr.msra.gmra.mrb[88].mxu1 %v9392_v4  ;;  %v10463_v14 = vld [vmem:[#allocation84_spill] sm:$0xff] }
 0x9bc   :  { %v3378_v31 = vpop.f32.mrb[95].mxu0  ;;  %6758 = vmatpush1.bf16.msra.mxu1 %v8357_v26  ;;  %3498 = vmatprep.mubr.f32.mxu0 %v10267_v1  ;;  %v10464_v33 = vld [vmem:[#allocation16_spill] sm:$0xff] }
 0x9bd   :  { %v5668_v38 = vmul.f32 -1.442695, %v3407_v36  ;;  %6760 = vmatprep.subr.bf16.mxu1 %v8361_v20  ;;  %3572 = vmatprep.mubr.f32.mxu1 %v10267_v1 }
 0x9be   :  { %6790 = vmatpush1.bf16.msra.mxu0 %v8338_v54 }
 0x9bf   :  { %7690 = vpow2.f32 %v5668_v38  ;;  %v3381_v30 = vpop.f32.mrb[96].mxu0  ;;  %6792 = vmatprep.subr.bf16.mxu0 %v8342_v58 }
 0x9c0   :  { %v3382_v29 = vadd.f32 %v3381_v30, %v10354_v43  ;;  %v3383_v21 = vpop.f32.mrb[97].mxu0  ;;  %6762 = vmatpush1.bf16.msra.mxu1 %v8372_v35 }
 0x9c1   :  { %6764 = vmatprep.subr.bf16.mxu1 %v8378_v52  ;;  %v3384_v24 = vadd.f32 %v3383_v21, %v10355_v40 }
 0x9c2   :  { %v3414_v2 = vadd.f32 %v3382_v29, %v10462_v37  ;;  %6794 = vmatpush1.bf16.msra.mxu0 %v8349_v6 }
 0x9c3   :  { %6796 = vmatprep.subr.bf16.mxu0 %v8352_v12 }
 0x9c4   :  { %v5669_v18 = vmul.f32 -1.442695, %v3414_v2  ;;  %6766 = vmatpush1.bf16.msra.mxu1 %v8389_v9  ;;  %v10466_v2 = vld [vmem:[#allocation22_spill] sm:$0xff] }
 0x9c5   :  { %6768 = vmatprep.subr.bf16.mxu1 %v8395_v16 }
 0x9c6   :  { %7692 = vpow2.f32 %v5669_v18  ;;  %6798 = vmatpush1.bf16.msra.mxu0 %v8365_v27  ;;  %v10467_v18 = vld [vmem:[#allocation23_spill] sm:$0xff] }
 0x9c7   :  { %6800 = vmatprep.subr.bf16.mxu0 %v8369_v32 }
 0x9c8   :  { %6770 = vmatpush1.bf16.msra.mxu1 %v10339_v42 }
 0x9c9   :  { %v7691_v7 = vpop.eup %7690  ;;  %6772 = vmatprep.subr.bf16.mxu1 %v10340_v48 }
 0x9ca   :  { %v3411_v49 = vadd.f32 1.0, %v7691_v7  ;;  %6802 = vmatpush1.bf16.msra.mxu0 %v8382_v61  ;;  %v10468_v7 = vld [vmem:[#allocation24_spill] sm:$0xff] }
 0x9cb   :  { %6804 = vmatprep.subr.bf16.mxu0 %v10419_v25 }
 0x9cc   :  { %7694 = vrcp.f32 %v3411_v49  ;;  %6774 = vmatpush1.bf16.msra.mxu1 %v8420_v17  ;;  %v10469_v49 = vld [vmem:[#allocation25_spill] sm:$0xff] }
 0x9cd   :  { %6776 = vmatprep.subr.bf16.mxu1 %v8425_v28 }
 0x9ce   :  { %6806 = vmatpush1.bf16.msra.mxu0 %v10450_v57  ;;  %v10474_v57 = vld [vmem:[#allocation55_spill] sm:$0xff] }
 0x9cf   :  { %6808 = vmatprep.subr.bf16.mxu0 %v10451_v3 }
 0x9d0   :  { %v7693_v62 = vpop.eup %7692  ;;  %6778 = vmatpush1.bf16.msra.mxu1 %v8435_v47 }
 0x9d1   :  { %6780 = vmatprep.subr.bf16.mxu1 %v8440_v5  ;;  %v3418_v0 = vadd.f32 1.0, %v7693_v62  ;;  %v10470_v62 = vld [vmem:[#allocation26_spill] sm:$0xff] }
 0x9d2   :  { %6810 = vmatpush1.bf16.msra.mxu0 %v10452_v55 }
 0x9d3   :  { %6812 = vmatprep.subr.bf16.mxu0 %v10453_v19  ;;  %7696 = vrcp.f32 %v3418_v0  ;;  %v10471_v0 = vld [vmem:[#allocation27_spill] sm:$0xff] }
 0x9d4   :  { %6782 = vmatpush1.bf16.msra.mxu1 %v8448_v34 }
 0x9d5   :  { %6784 = vmatprep.subr.bf16.mxu1 %v8453_v15 }
 0x9d6   :  { %v7695_v45 = vpop.eup %7694  ;;  %6814 = vmatpush1.bf16.msra.mxu0 %v10454_v23 }
 0x9d7   :  { %v3421_v11 = vmul.f32 %v7695_v45, %v3384_v24  ;;  %6816 = vmatprep.subr.bf16.mxu0 %v10455_v8 }
 0x9d8   :  { %6786 = vmatpush1.bf16.msra.mxu1 %v8459_v51 }
 0x9d9   :  { %v3422_v36 = vadd.f32 %v3421_v11, %v10463_v14  ;;  %6820 = vmatprep.subr.bf16.mxu1 %v10464_v33  ;;  %v10472_v11 = vld [vmem:[#allocation101_spill] sm:$0xff] }
 0x9da   :  { %6818 = vmatpush1.bf16.msra.mxu0 %v10456_v59 }
 0x9db   :  { %7698 = vtanh.f32 %v3422_v36  ;;  %6852 = vmatprep.subr.bf16.mxu0 %v8265_v39 }
 0x9dd   :  { %v7697_v31 = vpop.eup %7696 }
 0x9de   :  { %v3424_v38 = vsub.f32 1.0, %v7697_v31  ;;  %v3426_v21 = vmul.f32 %v7697_v31, %v9360_v22  ;;  %v10465_v22 = vld [vmem:[#allocation21_spill] sm:$0xff] }
 0x9e5   :  { %v7699_v30 = vpop.eup %7698 }
 0x9e6   :  { %v3425_v29 = vmul.f32 %v7699_v30, %v3424_v38  ;;  %v10473_v30 = vld [vmem:[#allocation102_spill] sm:$0xff] }
 0x9e8   :  { %v9436_v37 = vadd.f32 %v3426_v21, %v3425_v29 }
 0x9ea   :  { %3499 = vmatmul.mubr.f32.gmra.mrb[98].mxu0 %v9436_v37  ;;  %3573 = vmatmul.mubr.f32.gmra.mrb[90].mxu1 %v9436_v37 }
 0x9eb   :  { %3642 = vmatprep.mubr.f32.mxu1 %v10267_v1  ;;  %3759 = vmatprep.mubr.f32.mxu0 %v10267_v1 }
 0x9ee   :  { %3643 = vmatmul.mubr.f32.vlgmr.msra.gmra.mrb[92].mxu1 %v9392_v4 }
 0x9ef   :  { %3646 = vmatprep.mubr.f32.mxu1 %v10267_v1  ;;  %6822 = vmatpush1.bf16.msra.mxu1 %v8131_v46 }
 0x9f0   :  { %6824 = vmatprep.subr.bf16.mxu1 %v8142_v50 }
 0x9f2   :  { %3647 = vmatmul.mubr.f32.gmra.mrb[94].mxu1 %v9436_v37 }
 0x9f3   :  { %6826 = vmatpush1.bf16.msra.mxu1 %v8150_v56  ;;  %3834 = vmatprep.mubr.f32.mxu1 %v10267_v1 }
 0x9f4   :  { %6828 = vmatprep.subr.bf16.mxu1 %v8162_v60 }
 0x9f7   :  { %6830 = vmatpush1.bf16.msra.mxu1 %v8168_v63 }
 0x9f8   :  { %6832 = vmatprep.subr.bf16.mxu1 %v10341_v41 }
 0x9fb   :  { %6834 = vmatpush1.bf16.msra.mxu1 %v10342_v13 }
 0x9fc   :  { %6836 = vmatprep.subr.bf16.mxu1 %v10434_v10 }
 0x9ff   :  { %6838 = vmatpush1.bf16.msra.mxu1 %v10465_v22 }
 0xa00   :  { %6840 = vmatprep.subr.bf16.mxu1 %v10466_v2 }
 0xa03   :  { %6842 = vmatpush1.bf16.msra.mxu1 %v10467_v18 }
 0xa04   :  { %6844 = vmatprep.subr.bf16.mxu1 %v10468_v7 }
 0xa07   :  { %6846 = vmatpush1.bf16.msra.mxu1 %v10469_v49 }
 0xa08   :  { %6848 = vmatprep.subr.bf16.mxu1 %v10470_v62 }
 0xa0b   :  { %6850 = vmatpush1.bf16.msra.mxu1 %v10471_v0 }
 0xa0c   :  { %6916 = vmatprep.subr.bf16.mxu1 %v10464_v33 }
 0xa8e   :  { %v3494_v24 = vpop.f32.mrb[18].mxu0  ;;  %v3569_v45 = vpop.f32.mrb[88].mxu1 }
 0xa8f   :  { %v7448_v14 = vadd.f32 %v10472_v11, %v3494_v24  ;;  %v3496_v36 = vpop.f32.mrb[19].mxu0  ;;  %v3571_v31 = vpop.f32.mrb[89].mxu1  ;;  %v3570_v55 = vadd.f32 %v3569_v45, %v10459_v44 }
 0xa90   :  { %v7450_v29 = vadd.f32 %v10473_v30, %v3496_v36 }
 0xa91   :  { %v5670_v38 = vmul.f32 -1.442695, %v7448_v14 }
 0xa92   :  { %v5671_v21 = vmul.f32 -1.442695, %v7450_v29 }
 0xa93   :  { %7700 = vpow2.f32 %v5670_v38 }
 0xa94   :  { %7702 = vpow2.f32 %v5671_v21 }
 0xa9d   :  { %v7701_v59 = vpop.eup %7700 }
 0xa9e   :  { %v3657_v8 = vadd.f32 1.0, %v7701_v59  ;;  %v7703_v23 = vpop.eup %7702 }
 0xa9f   :  { %v3664_v19 = vadd.f32 1.0, %v7703_v23 }
 0xaa0   :  { %7704 = vrcp.f32 %v3657_v8 }
 0xaa1   :  { %7706 = vrcp.f32 %v3664_v19 }
 0xaaa   :  { %v7705_v33 = vpop.eup %7704 }
 0xaab   :  { %v3667_v3 = vmul.f32 %v7705_v33, %v3570_v55  ;;  %v7707_v31 = vpop.eup %7706 }
 0xaac   :  { %v3670_v14 = vsub.f32 1.0, %v7707_v31  ;;  %v3672_v38 = vmul.f32 %v7707_v31, %v9392_v4  ;;  %v10476_v31 = vld [vmem:[#allocation81_spill] sm:$0xff] }
 0xaad   :  { %v3668_v24 = vadd.f32 %v3667_v3, %v10474_v57  ;;  %v10475_v57 = vld [vmem:[#allocation50_spill] sm:$0xff] }
 0xaaf   :  { %7708 = vtanh.f32 %v3668_v24 }
 0xab9   :  { %v7709_v11 = vpop.eup %7708 }
 0xaba   :  { %v3671_v36 = vmul.f32 %v7709_v11, %v3670_v14 }
 0xabc   :  { %v9467_v29 = vadd.f32 %v3672_v38, %v3671_v36 }
 0xabd   :  { %v3500_v59 = vpop.f32.mrb[98].mxu0  ;;  %v3574_v8 = vpop.f32.mrb[90].mxu1 }
 0xabe   :  { %v3501_v21 = vpop.f32.mrb[99].mxu0  ;;  %v3575_v23 = vpop.f32.mrb[91].mxu1  ;;  %3760 = vmatmul.mubr.f32.vlgmr.msra.gmra.mrb[20].mxu0 %v9467_v29  ;;  %3835 = vmatmul.mubr.f32.vlgmr.msra.gmra.mrb[96].mxu1 %v9467_v29 }
 0xabf   :  { %v3576_v55 = vadd.f32 %v3575_v23, %v10385_v53  ;;  %6854 = vmatpush1.bf16.msra.mxu0 %v8357_v26  ;;  %3765 = vmatprep.mubr.f32.mxu0 %v10267_v1 }
 0xac0   :  { %6856 = vmatprep.subr.bf16.mxu0 %v8361_v20  ;;  %3839 = vmatprep.mubr.f32.mxu1 %v10267_v1 }
 0xac1   :  { %v3674_v3 = vadd.f32 %v3576_v55, %v10475_v57  ;;  %v3644_v19 = vpop.f32.mrb[92].mxu1  ;;  %6918 = vmatpush1.bf16.msra.mxu1 %v8131_v46  ;;  %v10477_v57 = vld [vmem:[#allocation17_spill] sm:$0xff] }
 0xac2   :  { %v3645_v4 = vpop.f32.mrb[93].mxu1  ;;  %6920 = vmatprep.subr.bf16.mxu1 %v8142_v50  ;;  %v10478_v19 = vld [vmem:[#allocation82_spill] sm:$0xff] }
 0xac3   :  { %v5672_v33 = vmul.f32 -1.442695, %v3674_v3  ;;  %6858 = vmatpush1.bf16.msra.mxu0 %v8372_v35 }
 0xac4   :  { %6860 = vmatprep.subr.bf16.mxu0 %v8378_v52 }
 0xac5   :  { %7710 = vpow2.f32 %v5672_v33  ;;  %v3648_v45 = vpop.f32.mrb[94].mxu1  ;;  %6922 = vmatpush1.bf16.msra.mxu1 %v8150_v56 }
 0xac6   :  { %v3649_v11 = vadd.f32 %v3648_v45, %v10354_v43  ;;  %v3650_v24 = vpop.f32.mrb[95].mxu1  ;;  %6924 = vmatprep.subr.bf16.mxu1 %v8162_v60 }
 0xac7   :  { %6862 = vmatpush1.bf16.msra.mxu0 %v8389_v9  ;;  %v3651_v23 = vadd.f32 %v3650_v24, %v10355_v40 }
 0xac8   :  { %v3681_v14 = vadd.f32 %v3649_v11, %v10476_v31  ;;  %6864 = vmatprep.subr.bf16.mxu0 %v8395_v16 }
 0xac9   :  { %6926 = vmatpush1.bf16.msra.mxu1 %v8168_v63 }
 0xaca   :  { %v5673_v36 = vmul.f32 -1.442695, %v3681_v14  ;;  %6928 = vmatprep.subr.bf16.mxu1 %v10341_v41 }
 0xacb   :  { %6866 = vmatpush1.bf16.msra.mxu0 %v10339_v42 }
 0xacc   :  { %7712 = vpow2.f32 %v5673_v36  ;;  %6868 = vmatprep.subr.bf16.mxu0 %v10340_v48  ;;  %v10480_v36 = vld [vmem:[#allocation30_spill] sm:$0xff] }
 0xacd   :  { %6930 = vmatpush1.bf16.msra.mxu1 %v10342_v13 }
 0xace   :  { %6932 = vmatprep.subr.bf16.mxu1 %v10434_v10 }
 0xacf   :  { %v7711_v38 = vpop.eup %7710  ;;  %6870 = vmatpush1.bf16.msra.mxu0 %v8420_v17 }
 0xad0   :  { %v3678_v59 = vadd.f32 1.0, %v7711_v38  ;;  %6872 = vmatprep.subr.bf16.mxu0 %v8425_v28  ;;  %v10481_v38 = vld [vmem:[#allocation33_spill] sm:$0xff] }
 0xad1   :  { %6934 = vmatpush1.bf16.msra.mxu1 %v10465_v22  ;;  %v10487_v22 = vld [vmem:[#allocation57_spill] sm:$0xff] }
 0xad2   :  { %7714 = vrcp.f32 %v3678_v59  ;;  %6936 = vmatprep.subr.bf16.mxu1 %v10466_v2  ;;  %v10482_v59 = vld [vmem:[#allocation34_spill] sm:$0xff] }
 0xad3   :  { %6874 = vmatpush1.bf16.msra.mxu0 %v8435_v47 }
 0xad4   :  { %6876 = vmatprep.subr.bf16.mxu0 %v8440_v5 }
 0xad5   :  { %6938 = vmatpush1.bf16.msra.mxu1 %v10467_v18 }
 0xad6   :  { %v7713_v8 = vpop.eup %7712  ;;  %6940 = vmatprep.subr.bf16.mxu1 %v10468_v7 }
 0xad7   :  { %6878 = vmatpush1.bf16.msra.mxu0 %v8448_v34  ;;  %v3685_v21 = vadd.f32 1.0, %v7713_v8  ;;  %v10483_v8 = vld [vmem:[#allocation35_spill] sm:$0xff] }
 0xad8   :  { %6880 = vmatprep.subr.bf16.mxu0 %v8453_v15 }
 0xad9   :  { %6942 = vmatpush1.bf16.msra.mxu1 %v10469_v49  ;;  %7716 = vrcp.f32 %v3685_v21  ;;  %v10484_v21 = vld [vmem:[#allocation36_spill] sm:$0xff] }
 0xada   :  { %6944 = vmatprep.subr.bf16.mxu1 %v10470_v62 }
 0xadb   :  { %6882 = vmatpush1.bf16.msra.mxu0 %v8459_v51 }
 0xadc   :  { %v7715_v55 = vpop.eup %7714  ;;  %6884 = vmatprep.subr.bf16.mxu0 %v10477_v57 }
 0xadd   :  { %v3688_v3 = vmul.f32 %v7715_v55, %v3651_v23  ;;  %6946 = vmatpush1.bf16.msra.mxu1 %v10471_v0  ;;  %v10485_v23 = vld [vmem:[#allocation37_spill] sm:$0xff] }
 0xade   :  { %6948 = vmatprep.subr.bf16.mxu1 %v8265_v39 }
 0xadf   :  { %v3689_v4 = vadd.f32 %v3688_v3, %v10478_v19  ;;  %v10486_v19 = vld [vmem:[#allocation101_spill] sm:$0xff] }
 0xae1   :  { %7718 = vtanh.f32 %v3689_v4 }
 0xae3   :  { %v7717_v33 = vpop.eup %7716 }
 0xae4   :  { %v3691_v45 = vsub.f32 1.0, %v7717_v33  ;;  %v3693_v24 = vmul.f32 %v7717_v33, %v9436_v37  ;;  %v10479_v37 = vld [vmem:[#allocation29_spill] sm:$0xff] }
 0xaeb   :  { %v7719_v11 = vpop.eup %7718 }
 0xaec   :  { %v3692_v31 = vmul.f32 %v7719_v11, %v3691_v45 }
 0xaee   :  { %v9512_v14 = vadd.f32 %v3693_v24, %v3692_v31 }
 0xaf0   :  { %3766 = vmatmul.mubr.f32.gmra.mrb[100].mxu0 %v9512_v14  ;;  %3840 = vmatmul.mubr.f32.gmra.mrb[98].mxu1 %v9512_v14 }
 0xaf1   :  { %3909 = vmatprep.mubr.f32.mxu0 %v10267_v1  ;;  %4101 = vmatprep.mubr.f32.mxu1 %v10267_v1 }
 0xaf4   :  { %3910 = vmatmul.mubr.f32.vlgmr.msra.gmra.mrb[102].mxu0 %v9467_v29 }
 0xaf5   :  { %3913 = vmatprep.mubr.f32.mxu0 %v10267_v1  ;;  %6886 = vmatpush1.bf16.msra.mxu0 %v8338_v54 }
 0xaf6   :  { %6888 = vmatprep.subr.bf16.mxu0 %v8342_v58 }
 0xaf8   :  { %3914 = vmatmul.mubr.f32.gmra.mrb[104].mxu0 %v9512_v14 }
 0xaf9   :  { %6890 = vmatpush1.bf16.msra.mxu0 %v8349_v6  ;;  %4026 = vmatprep.mubr.f32.mxu0 %v10267_v1 }
 0xafa   :  { %6892 = vmatprep.subr.bf16.mxu0 %v8352_v12 }
 0xafd   :  { %6894 = vmatpush1.bf16.msra.mxu0 %v8365_v27 }
 0xafe   :  { %6896 = vmatprep.subr.bf16.mxu0 %v8369_v32 }
 0xb01   :  { %6898 = vmatpush1.bf16.msra.mxu0 %v8382_v61 }
 0xb02   :  { %6900 = vmatprep.subr.bf16.mxu0 %v10419_v25 }
 0xb05   :  { %6902 = vmatpush1.bf16.msra.mxu0 %v10479_v37 }
 0xb06   :  { %6904 = vmatprep.subr.bf16.mxu0 %v10480_v36 }
 0xb09   :  { %6906 = vmatpush1.bf16.msra.mxu0 %v10481_v38 }
 0xb0a   :  { %6908 = vmatprep.subr.bf16.mxu0 %v10482_v59 }
 0xb0d   :  { %6910 = vmatpush1.bf16.msra.mxu0 %v10483_v8 }
 0xb0e   :  { %6912 = vmatprep.subr.bf16.mxu0 %v10484_v21 }
 0xb11   :  { %6914 = vmatpush1.bf16.msra.mxu0 %v10485_v23 }
 0xb12   :  { %6980 = vmatprep.subr.bf16.mxu0 %v10477_v57 }
 0xb91   :  { %v3761_v55 = vpop.f32.mrb[20].mxu0  ;;  %v3836_v3 = vpop.f32.mrb[96].mxu1 }
 0xb92   :  { %v7452_v4 = vadd.f32 %v10486_v19, %v3761_v55  ;;  %v3763_v33 = vpop.f32.mrb[21].mxu0  ;;  %v3838_v45 = vpop.f32.mrb[97].mxu1  ;;  %v3837_v18 = vadd.f32 %v3836_v3, %v10459_v44 }
 0xb93   :  { %v7454_v31 = vadd.f32 %v10473_v30, %v3763_v33 }
 0xb94   :  { %v5674_v11 = vmul.f32 -1.442695, %v7452_v4 }
 0xb95   :  { %v5675_v24 = vmul.f32 -1.442695, %v7454_v31 }
 0xb96   :  { %7720 = vpow2.f32 %v5674_v11 }
 0xb97   :  { %7722 = vpow2.f32 %v5675_v24 }
 0xba0   :  { %v7721_v0 = vpop.eup %7720 }
 0xba1   :  { %v3924_v62 = vadd.f32 1.0, %v7721_v0  ;;  %v7723_v49 = vpop.eup %7722 }
 0xba2   :  { %v3931_v7 = vadd.f32 1.0, %v7723_v49 }
 0xba3   :  { %7724 = vrcp.f32 %v3924_v62  ;;  %v10488_v62 = vld [vmem:[#allocation48_spill] sm:$0xff] }
 0xba4   :  { %7726 = vrcp.f32 %v3931_v7 }
 0xbad   :  { %v7725_v57 = vpop.eup %7724 }
 0xbae   :  { %v3934_v2 = vmul.f32 %v7725_v57, %v3837_v18  ;;  %v7727_v45 = vpop.eup %7726 }
 0xbaf   :  { %v3937_v4 = vsub.f32 1.0, %v7727_v45  ;;  %v3939_v11 = vmul.f32 %v7727_v45, %v9467_v29  ;;  %v10489_v45 = vld [vmem:[#allocation79_spill] sm:$0xff] }
 0xbb0   :  { %v3935_v55 = vadd.f32 %v3934_v2, %v10487_v22 }
 0xbb2   :  { %7728 = vtanh.f32 %v3935_v55 }
 0xbbc   :  { %v7729_v19 = vpop.eup %7728 }
 0xbbd   :  { %v3938_v33 = vmul.f32 %v7729_v19, %v3937_v4 }
 0xbbf   :  { %v9543_v31 = vadd.f32 %v3939_v11, %v3938_v33 }
 0xbc1   :  { %4027 = vmatmul.mubr.f32.vlgmr.msra.gmra.mrb[22].mxu0 %v9543_v31  ;;  %4102 = vmatmul.mubr.f32.vlgmr.msra.gmra.mrb[100].mxu1 %v9543_v31 }
 0xbc2   :  { %6950 = vmatpush1.bf16.msra.mxu1 %v8357_v26  ;;  %4032 = vmatprep.mubr.f32.mxu0 %v10267_v1 }
 0xbc3   :  { %v3767_v18 = vpop.f32.mrb[100].mxu0  ;;  %v3841_v7 = vpop.f32.mrb[98].mxu1  ;;  %6952 = vmatprep.subr.bf16.mxu1 %v8361_v20  ;;  %4106 = vmatprep.mubr.f32.mxu1 %v10267_v1 }
 0xbc4   :  { %v3768_v22 = vpop.f32.mrb[101].mxu0  ;;  %v3842_v2 = vpop.f32.mrb[99].mxu1  ;;  %6982 = vmatpush1.bf16.msra.mxu0 %v8338_v54 }
 0xbc5   :  { %v3843_v49 = vadd.f32 %v3842_v2, %v10385_v53  ;;  %6984 = vmatprep.subr.bf16.mxu0 %v8342_v58  ;;  %v10490_v2 = vld [vmem:[#allocation16_spill] sm:$0xff] }
 0xbc6   :  { %6954 = vmatpush1.bf16.msra.mxu1 %v8372_v35 }
 0xbc7   :  { %v3941_v0 = vadd.f32 %v3843_v49, %v10488_v62  ;;  %v3911_v29 = vpop.f32.mrb[102].mxu0  ;;  %6956 = vmatprep.subr.bf16.mxu1 %v8378_v52 }
 0xbc8   :  { %v3912_v57 = vpop.f32.mrb[103].mxu0  ;;  %6986 = vmatpush1.bf16.msra.mxu0 %v8349_v6  ;;  %v10491_v29 = vld [vmem:[#allocation80_spill] sm:$0xff] }
 0xbc9   :  { %v5676_v3 = vmul.f32 -1.442695, %v3941_v0  ;;  %6988 = vmatprep.subr.bf16.mxu0 %v8352_v12 }
 0xbca   :  { %6958 = vmatpush1.bf16.msra.mxu1 %v8389_v9 }
 0xbcb   :  { %7730 = vpow2.f32 %v5676_v3  ;;  %v3915_v19 = vpop.f32.mrb[104].mxu0  ;;  %6960 = vmatprep.subr.bf16.mxu1 %v8395_v16 }
 0xbcc   :  { %v3916_v24 = vadd.f32 %v3915_v19, %v10354_v43  ;;  %v3917_v55 = vpop.f32.mrb[105].mxu0  ;;  %6990 = vmatpush1.bf16.msra.mxu0 %v8365_v27 }
 0xbcd   :  { %6992 = vmatprep.subr.bf16.mxu0 %v8369_v32  ;;  %v3918_v49 = vadd.f32 %v3917_v55, %v10355_v40  ;;  %v10493_v55 = vld [vmem:[#allocation22_spill] sm:$0xff] }
 0xbce   :  { %v3948_v4 = vadd.f32 %v3916_v24, %v10489_v45  ;;  %6962 = vmatpush1.bf16.msra.mxu1 %v10339_v42 }
 0xbcf   :  { %6964 = vmatprep.subr.bf16.mxu1 %v10340_v48 }
 0xbd0   :  { %v5677_v33 = vmul.f32 -1.442695, %v3948_v4  ;;  %6994 = vmatpush1.bf16.msra.mxu0 %v8382_v61 }
 0xbd1   :  { %6996 = vmatprep.subr.bf16.mxu0 %v10419_v25 }
 0xbd2   :  { %7732 = vpow2.f32 %v5677_v33  ;;  %6966 = vmatpush1.bf16.msra.mxu1 %v8420_v17 }
 0xbd3   :  { %6968 = vmatprep.subr.bf16.mxu1 %v8425_v28 }
 0xbd4   :  { %6998 = vmatpush1.bf16.msra.mxu0 %v10479_v37  ;;  %v10500_v37 = vld [vmem:[#allocation59_spill] sm:$0xff] }
 0xbd5   :  { %v7731_v11 = vpop.eup %7730  ;;  %7000 = vmatprep.subr.bf16.mxu0 %v10480_v36 }
 0xbd6   :  { %v3945_v18 = vadd.f32 1.0, %v7731_v11  ;;  %6970 = vmatpush1.bf16.msra.mxu1 %v8435_v47  ;;  %v10494_v11 = vld [vmem:[#allocation23_spill] sm:$0xff] }
 0xbd7   :  { %6972 = vmatprep.subr.bf16.mxu1 %v8440_v5 }
 0xbd8   :  { %7734 = vrcp.f32 %v3945_v18  ;;  %7002 = vmatpush1.bf16.msra.mxu0 %v10481_v38  ;;  %v10495_v18 = vld [vmem:[#allocation24_spill] sm:$0xff] }
 0xbd9   :  { %7004 = vmatprep.subr.bf16.mxu0 %v10482_v59 }
 0xbda   :  { %6974 = vmatpush1.bf16.msra.mxu1 %v8448_v34 }
 0xbdb   :  { %6976 = vmatprep.subr.bf16.mxu1 %v8453_v15 }
 0xbdc   :  { %v7733_v7 = vpop.eup %7732  ;;  %7006 = vmatpush1.bf16.msra.mxu0 %v10483_v8 }
 0xbdd   :  { %7008 = vmatprep.subr.bf16.mxu0 %v10484_v21  ;;  %v3952_v22 = vadd.f32 1.0, %v7733_v7  ;;  %v10496_v7 = vld [vmem:[#allocation25_spill] sm:$0xff] }
 0xbde   :  { %6978 = vmatpush1.bf16.msra.mxu1 %v8459_v51 }
 0xbdf   :  { %7012 = vmatprep.subr.bf16.mxu1 %v10490_v2  ;;  %7736 = vrcp.f32 %v3952_v22  ;;  %v10497_v22 = vld [vmem:[#allocation26_spill] sm:$0xff] }
 0xbe0   :  { %7010 = vmatpush1.bf16.msra.mxu0 %v10485_v23 }
 0xbe1   :  { %7044 = vmatprep.subr.bf16.mxu0 %v8265_v39 }
 0xbe2   :  { %v7735_v62 = vpop.eup %7734 }
 0xbe3   :  { %v3955_v0 = vmul.f32 %v7735_v62, %v3918_v49  ;;  %v10498_v49 = vld [vmem:[#allocation27_spill] sm:$0xff] }
 0xbe5   :  { %v3956_v57 = vadd.f32 %v3955_v0, %v10491_v29  ;;  %v10499_v29 = vld [vmem:[#allocation101_spill] sm:$0xff] }
 0xbe7   :  { %7738 = vtanh.f32 %v3956_v57 }
 0xbe9   :  { %v7737_v3 = vpop.eup %7736 }
 0xbea   :  { %v3958_v19 = vsub.f32 1.0, %v7737_v3  ;;  %v3960_v4 = vmul.f32 %v7737_v3, %v9512_v14  ;;  %v10492_v14 = vld [vmem:[#allocation21_spill] sm:$0xff] }
 0xbf1   :  { %v7739_v24 = vpop.eup %7738 }
 0xbf2   :  { %v3959_v45 = vmul.f32 %v7739_v24, %v3958_v19 }
 0xbf4   :  { %v9588_v33 = vadd.f32 %v3960_v4, %v3959_v45 }
 0xbf6   :  { %4033 = vmatmul.mubr.f32.gmra.mrb[106].mxu0 %v9588_v33  ;;  %4107 = vmatmul.mubr.f32.gmra.mrb[102].mxu1 %v9588_v33 }
 0xbf7   :  { %4176 = vmatprep.mubr.f32.mxu1 %v10267_v1  ;;  %4293 = vmatprep.mubr.f32.mxu0 %v10267_v1 }
 0xbfa   :  { %4177 = vmatmul.mubr.f32.vlgmr.msra.gmra.mrb[104].mxu1 %v9543_v31 }
 0xbfb   :  { %4180 = vmatprep.mubr.f32.mxu1 %v10267_v1  ;;  %7014 = vmatpush1.bf16.msra.mxu1 %v8131_v46 }
 0xbfc   :  { %7016 = vmatprep.subr.bf16.mxu1 %v8142_v50 }
 0xbfe   :  { %4181 = vmatmul.mubr.f32.gmra.mrb[106].mxu1 %v9588_v33 }
 0xbff   :  { %7018 = vmatpush1.bf16.msra.mxu1 %v8150_v56  ;;  %4368 = vmatprep.mubr.f32.mxu1 %v10267_v1 }
 0xc00   :  { %7020 = vmatprep.subr.bf16.mxu1 %v8162_v60 }
 0xc03   :  { %7022 = vmatpush1.bf16.msra.mxu1 %v8168_v63 }
 0xc04   :  { %7024 = vmatprep.subr.bf16.mxu1 %v10341_v41 }
 0xc07   :  { %7026 = vmatpush1.bf16.msra.mxu1 %v10342_v13 }
 0xc08   :  { %7028 = vmatprep.subr.bf16.mxu1 %v10434_v10 }
 0xc0b   :  { %7030 = vmatpush1.bf16.msra.mxu1 %v10492_v14 }
 0xc0c   :  { %7032 = vmatprep.subr.bf16.mxu1 %v10493_v55 }
 0xc0f   :  { %7034 = vmatpush1.bf16.msra.mxu1 %v10494_v11 }
 0xc10   :  { %7036 = vmatprep.subr.bf16.mxu1 %v10495_v18 }
 0xc13   :  { %7038 = vmatpush1.bf16.msra.mxu1 %v10496_v7 }
 0xc14   :  { %7040 = vmatprep.subr.bf16.mxu1 %v10497_v22 }
 0xc17   :  { %7042 = vmatpush1.bf16.msra.mxu1 %v10498_v49 }
 0xc18   :  { %7108 = vmatprep.subr.bf16.mxu1 %v10490_v2 }
 0xc94   :  { %v4028_v62 = vpop.f32.mrb[22].mxu0  ;;  %v4103_v0 = vpop.f32.mrb[100].mxu1 }
 0xc95   :  { %v7456_v57 = vadd.f32 %v10499_v29, %v4028_v62  ;;  %v4030_v3 = vpop.f32.mrb[23].mxu0  ;;  %v4105_v19 = vpop.f32.mrb[101].mxu1  ;;  %v4104_v38 = vadd.f32 %v4103_v0, %v10459_v44 }
 0xc96   :  { %v7458_v45 = vadd.f32 %v10473_v30, %v4030_v3 }
 0xc97   :  { %v5678_v24 = vmul.f32 -1.442695, %v7456_v57 }
 0xc98   :  { %v5679_v4 = vmul.f32 -1.442695, %v7458_v45 }
 0xc99   :  { %7740 = vpow2.f32 %v5678_v24 }
 0xc9a   :  { %7742 = vpow2.f32 %v5679_v4 }
 0xca3   :  { %v7741_v23 = vpop.eup %7740 }
 0xca4   :  { %v4191_v21 = vadd.f32 1.0, %v7741_v23  ;;  %v7743_v8 = vpop.eup %7742 }
 0xca5   :  { %v4198_v59 = vadd.f32 1.0, %v7743_v8 }
 0xca6   :  { %7744 = vrcp.f32 %v4191_v21  ;;  %v10501_v21 = vld [vmem:[#allocation46_spill] sm:$0xff] }
 0xca7   :  { %7746 = vrcp.f32 %v4198_v59 }
 0xcb0   :  { %v7745_v2 = vpop.eup %7744 }
 0xcb1   :  { %v4201_v36 = vmul.f32 %v7745_v2, %v4104_v38  ;;  %v7747_v19 = vpop.eup %7746 }
 0xcb2   :  { %v4204_v57 = vsub.f32 1.0, %v7747_v19  ;;  %v4206_v24 = vmul.f32 %v7747_v19, %v9543_v31  ;;  %v10502_v19 = vld [vmem:[#allocation77_spill] sm:$0xff] }
 0xcb3   :  { %v4202_v62 = vadd.f32 %v4201_v36, %v10500_v37 }
 0xcb5   :  { %7748 = vtanh.f32 %v4202_v62 }
 0xcbf   :  { %v7749_v29 = vpop.eup %7748 }
 0xcc0   :  { %v4205_v3 = vmul.f32 %v7749_v29, %v4204_v57 }
 0xcc2   :  { %v9619_v45 = vadd.f32 %v4206_v24, %v4205_v3 }
 0xcc4   :  { %4294 = vmatmul.mubr.f32.vlgmr.msra.gmra.mrb[24].mxu0 %v9619_v45  ;;  %4369 = vmatmul.mubr.f32.vlgmr.msra.gmra.mrb[108].mxu1 %v9619_v45 }
 0xcc5   :  { %7046 = vmatpush1.bf16.msra.mxu0 %v8357_v26  ;;  %4299 = vmatprep.mubr.f32.mxu0 %v10267_v1 }
 0xcc6   :  { %7048 = vmatprep.subr.bf16.mxu0 %v8361_v20  ;;  %4373 = vmatprep.mubr.f32.mxu1 %v10267_v1 }
 0xcc7   :  { %7110 = vmatpush1.bf16.msra.mxu1 %v8131_v46 }
 0xcc8   :  { %7112 = vmatprep.subr.bf16.mxu1 %v8142_v50 }
 0xcc9   :  { %v4034_v37 = vpop.f32.mrb[106].mxu0  ;;  %v4108_v36 = vpop.f32.mrb[102].mxu1  ;;  %7050 = vmatpush1.bf16.msra.mxu0 %v8372_v35 }
 0xcca   :  { %v4035_v38 = vpop.f32.mrb[107].mxu0  ;;  %v4109_v59 = vpop.f32.mrb[103].mxu1  ;;  %7052 = vmatprep.subr.bf16.mxu0 %v8378_v52 }
 0xccb   :  { %v4110_v8 = vadd.f32 %v4109_v59, %v10385_v53  ;;  %7114 = vmatpush1.bf16.msra.mxu1 %v8150_v56  ;;  %v10503_v38 = vld [vmem:[#allocation17_spill] sm:$0xff] }
 0xccc   :  { %7116 = vmatprep.subr.bf16.mxu1 %v8162_v60 }
 0xccd   :  { %v4208_v23 = vadd.f32 %v4110_v8, %v10501_v21  ;;  %v4178_v31 = vpop.f32.mrb[104].mxu1  ;;  %7054 = vmatpush1.bf16.msra.mxu0 %v8389_v9 }
 0xcce   :  { %v4179_v2 = vpop.f32.mrb[105].mxu1  ;;  %7056 = vmatprep.subr.bf16.mxu0 %v8395_v16  ;;  %v10504_v31 = vld [vmem:[#allocation78_spill] sm:$0xff] }
 0xccf   :  { %v5680_v0 = vmul.f32 -1.442695, %v4208_v23  ;;  %7118 = vmatpush1.bf16.msra.mxu1 %v8168_v63 }
 0xcd0   :  { %7120 = vmatprep.subr.bf16.mxu1 %v10341_v41 }
 0xcd1   :  { %7750 = vpow2.f32 %v5680_v0  ;;  %v4182_v29 = vpop.f32.mrb[106].mxu1  ;;  %7058 = vmatpush1.bf16.msra.mxu0 %v10339_v42 }
 0xcd2   :  { %v4183_v4 = vadd.f32 %v4182_v29, %v10354_v43  ;;  %v4184_v62 = vpop.f32.mrb[107].mxu1  ;;  %7060 = vmatprep.subr.bf16.mxu0 %v10340_v48 }
 0xcd3   :  { %7122 = vmatpush1.bf16.msra.mxu1 %v10342_v13  ;;  %v4185_v8 = vadd.f32 %v4184_v62, %v10355_v40  ;;  %v10506_v62 = vld [vmem:[#allocation30_spill] sm:$0xff] }
 0xcd4   :  { %v4215_v57 = vadd.f32 %v4183_v4, %v10502_v19  ;;  %7124 = vmatprep.subr.bf16.mxu1 %v10434_v10 }
 0xcd5   :  { %7062 = vmatpush1.bf16.msra.mxu0 %v8420_v17 }
 0xcd6   :  { %v5681_v3 = vmul.f32 -1.442695, %v4215_v57  ;;  %7064 = vmatprep.subr.bf16.mxu0 %v8425_v28 }
 0xcd7   :  { %7126 = vmatpush1.bf16.msra.mxu1 %v10492_v14  ;;  %v10513_v14 = vld [vmem:[#allocation61_spill] sm:$0xff] }
 0xcd8   :  { %7752 = vpow2.f32 %v5681_v3  ;;  %7128 = vmatprep.subr.bf16.mxu1 %v10493_v55 }
 0xcd9   :  { %7066 = vmatpush1.bf16.msra.mxu0 %v8435_v47 }
 0xcda   :  { %7068 = vmatprep.subr.bf16.mxu0 %v8440_v5 }
 0xcdb   :  { %v7751_v24 = vpop.eup %7750  ;;  %7130 = vmatpush1.bf16.msra.mxu1 %v10494_v11 }
 0xcdc   :  { %v4212_v37 = vadd.f32 1.0, %v7751_v24  ;;  %7132 = vmatprep.subr.bf16.mxu1 %v10495_v18  ;;  %v10507_v24 = vld [vmem:[#allocation33_spill] sm:$0xff] }
 0xcdd   :  { %7070 = vmatpush1.bf16.msra.mxu0 %v8448_v34 }
 0xcde   :  { %7754 = vrcp.f32 %v4212_v37  ;;  %7072 = vmatprep.subr.bf16.mxu0 %v8453_v15  ;;  %v10508_v37 = vld [vmem:[#allocation34_spill] sm:$0xff] }
 0xcdf   :  { %7134 = vmatpush1.bf16.msra.mxu1 %v10496_v7 }
 0xce0   :  { %7136 = vmatprep.subr.bf16.mxu1 %v10497_v22 }
 0xce1   :  { %7074 = vmatpush1.bf16.msra.mxu0 %v8459_v51 }
 0xce2   :  { %v7753_v36 = vpop.eup %7752  ;;  %7076 = vmatprep.subr.bf16.mxu0 %v10503_v38 }
 0xce3   :  { %7138 = vmatpush1.bf16.msra.mxu1 %v10498_v49  ;;  %v4219_v59 = vadd.f32 1.0, %v7753_v36  ;;  %v10509_v36 = vld [vmem:[#allocation35_spill] sm:$0xff] }
 0xce4   :  { %7140 = vmatprep.subr.bf16.mxu1 %v8265_v39 }
 0xce5   :  { %7756 = vrcp.f32 %v4219_v59  ;;  %v10510_v59 = vld [vmem:[#allocation36_spill] sm:$0xff] }
 0xce8   :  { %v7755_v21 = vpop.eup %7754 }
 0xce9   :  { %v4222_v23 = vmul.f32 %v7755_v21, %v4185_v8  ;;  %v10511_v8 = vld [vmem:[#allocation37_spill] sm:$0xff] }
 0xceb   :  { %v4223_v2 = vadd.f32 %v4222_v23, %v10504_v31  ;;  %v10512_v31 = vld [vmem:[#allocation101_spill] sm:$0xff] }
 0xced   :  { %7758 = vtanh.f32 %v4223_v2 }
 0xcef   :  { %v7757_v0 = vpop.eup %7756 }
 0xcf0   :  { %v4225_v29 = vsub.f32 1.0, %v7757_v0  ;;  %v4227_v57 = vmul.f32 %v7757_v0, %v9588_v33  ;;  %v10505_v33 = vld [vmem:[#allocation29_spill] sm:$0xff] }
 0xcf7   :  { %v7759_v4 = vpop.eup %7758 }
 0xcf8   :  { %v4226_v19 = vmul.f32 %v7759_v4, %v4225_v29 }
 0xcfa   :  { %v9664_v3 = vadd.f32 %v4227_v57, %v4226_v19 }
 0xcfc   :  { %4300 = vmatmul.mubr.f32.gmra.mrb[108].mxu0 %v9664_v3  ;;  %4374 = vmatmul.mubr.f32.gmra.mrb[110].mxu1 %v9664_v3 }
 0xcfd   :  { %4443 = vmatprep.mubr.f32.mxu0 %v10267_v1  ;;  %4635 = vmatprep.mubr.f32.mxu1 %v10267_v1 }
 0xd00   :  { %4444 = vmatmul.mubr.f32.vlgmr.msra.gmra.mrb[110].mxu0 %v9619_v45 }
 0xd01   :  { %4447 = vmatprep.mubr.f32.mxu0 %v10267_v1  ;;  %7078 = vmatpush1.bf16.msra.mxu0 %v8338_v54 }
 0xd02   :  { %7080 = vmatprep.subr.bf16.mxu0 %v8342_v58 }
 0xd04   :  { %4448 = vmatmul.mubr.f32.gmra.mrb[112].mxu0 %v9664_v3 }
 0xd05   :  { %7082 = vmatpush1.bf16.msra.mxu0 %v8349_v6  ;;  %4560 = vmatprep.mubr.f32.mxu0 %v10267_v1 }
 0xd06   :  { %7084 = vmatprep.subr.bf16.mxu0 %v8352_v12 }
 0xd09   :  { %7086 = vmatpush1.bf16.msra.mxu0 %v8365_v27 }
 0xd0a   :  { %7088 = vmatprep.subr.bf16.mxu0 %v8369_v32 }
 0xd0d   :  { %7090 = vmatpush1.bf16.msra.mxu0 %v8382_v61 }
 0xd0e   :  { %7092 = vmatprep.subr.bf16.mxu0 %v10419_v25 }
 0xd11   :  { %7094 = vmatpush1.bf16.msra.mxu0 %v10505_v33 }
 0xd12   :  { %7096 = vmatprep.subr.bf16.mxu0 %v10506_v62 }
 0xd15   :  { %7098 = vmatpush1.bf16.msra.mxu0 %v10507_v24 }
 0xd16   :  { %7100 = vmatprep.subr.bf16.mxu0 %v10508_v37 }
 0xd19   :  { %7102 = vmatpush1.bf16.msra.mxu0 %v10509_v36 }
 0xd1a   :  { %7104 = vmatprep.subr.bf16.mxu0 %v10510_v59 }
 0xd1d   :  { %7106 = vmatpush1.bf16.msra.mxu0 %v10511_v8 }
 0xd1e   :  { %7172 = vmatprep.subr.bf16.mxu0 %v10503_v38 }
 0xd97   :  { %v4295_v21 = vpop.f32.mrb[24].mxu0  ;;  %v4370_v23 = vpop.f32.mrb[108].mxu1 }
 0xd98   :  { %v7460_v2 = vadd.f32 %v10512_v31, %v4295_v21  ;;  %v4297_v0 = vpop.f32.mrb[25].mxu0  ;;  %v4372_v29 = vpop.f32.mrb[109].mxu1  ;;  %v4371_v11 = vadd.f32 %v4370_v23, %v10459_v44 }
 0xd99   :  { %v7462_v19 = vadd.f32 %v10473_v30, %v4297_v0 }
 0xd9a   :  { %v5682_v4 = vmul.f32 -1.442695, %v7460_v2 }
 0xd9b   :  { %v5683_v57 = vmul.f32 -1.442695, %v7462_v19 }
 0xd9c   :  { %7760 = vpow2.f32 %v5682_v4 }
 0xd9d   :  { %7762 = vpow2.f32 %v5683_v57 }
 0xda6   :  { %v7761_v49 = vpop.eup %7760 }
 0xda7   :  { %v4458_v22 = vadd.f32 1.0, %v7761_v49  ;;  %v7763_v7 = vpop.eup %7762 }
 0xda8   :  { %v4465_v18 = vadd.f32 1.0, %v7763_v7 }
 0xda9   :  { %7764 = vrcp.f32 %v4458_v22  ;;  %v10514_v22 = vld [vmem:[#allocation44_spill] sm:$0xff] }
 0xdaa   :  { %7766 = vrcp.f32 %v4465_v18 }
 0xdb3   :  { %v7765_v38 = vpop.eup %7764 }
 0xdb4   :  { %v4468_v55 = vmul.f32 %v7765_v38, %v4371_v11  ;;  %v7767_v29 = vpop.eup %7766 }
 0xdb5   :  { %v4471_v2 = vsub.f32 1.0, %v7767_v29  ;;  %v4473_v4 = vmul.f32 %v7767_v29, %v9619_v45  ;;  %v10515_v29 = vld [vmem:[#allocation75_spill] sm:$0xff] }
 0xdb6   :  { %v4469_v21 = vadd.f32 %v4468_v55, %v10513_v14 }
 0xdb8   :  { %7768 = vtanh.f32 %v4469_v21 }
 0xdc2   :  { %v7769_v31 = vpop.eup %7768 }
 0xdc3   :  { %v4472_v0 = vmul.f32 %v7769_v31, %v4471_v2 }
 0xdc5   :  { %v9695_v19 = vadd.f32 %v4473_v4, %v4472_v0 }
 0xdc7   :  { %4561 = vmatmul.mubr.f32.vlgmr.msra.gmra.mrb[26].mxu0 %v9695_v19  ;;  %4636 = vmatmul.mubr.f32.vlgmr.msra.gmra.mrb[112].mxu1 %v9695_v19 }
 0xdc8   :  { %7142 = vmatpush1.bf16.msra.mxu1 %v8357_v26  ;;  %4566 = vmatprep.mubr.f32.mxu0 %v10267_v1 }
 0xdc9   :  { %7144 = vmatprep.subr.bf16.mxu1 %v8361_v20  ;;  %4640 = vmatprep.mubr.f32.mxu1 %v10267_v1 }
 0xdca   :  { %7174 = vmatpush1.bf16.msra.mxu0 %v8338_v54 }
 0xdcb   :  { %7176 = vmatprep.subr.bf16.mxu0 %v8342_v58 }
 0xdcc   :  { %7146 = vmatpush1.bf16.msra.mxu1 %v8372_v35 }
 0xdcd   :  { %7148 = vmatprep.subr.bf16.mxu1 %v8378_v52 }
 0xdce   :  { %7178 = vmatpush1.bf16.msra.mxu0 %v8349_v6 }
 0xdcf   :  { %v4301_v14 = vpop.f32.mrb[108].mxu0  ;;  %v4375_v55 = vpop.f32.mrb[110].mxu1  ;;  %7180 = vmatprep.subr.bf16.mxu0 %v8352_v12 }
 0xdd0   :  { %v4302_v11 = vpop.f32.mrb[109].mxu0  ;;  %v4376_v18 = vpop.f32.mrb[111].mxu1  ;;  %7150 = vmatpush1.bf16.msra.mxu1 %v8389_v9  ;;  %v10516_v55 = vld [vmem:[#allocation16_spill] sm:$0xff] }
 0xdd1   :  { %v4377_v7 = vadd.f32 %v4376_v18, %v10385_v53  ;;  %7152 = vmatprep.subr.bf16.mxu1 %v8395_v16 }
 0xdd2   :  { %7182 = vmatpush1.bf16.msra.mxu0 %v8365_v27 }
 0xdd3   :  { %v4475_v49 = vadd.f32 %v4377_v7, %v10514_v22  ;;  %v4445_v45 = vpop.f32.mrb[110].mxu0  ;;  %7184 = vmatprep.subr.bf16.mxu0 %v8369_v32 }
 0xdd4   :  { %v4446_v38 = vpop.f32.mrb[111].mxu0  ;;  %7154 = vmatpush1.bf16.msra.mxu1 %v10339_v42  ;;  %v10517_v45 = vld [vmem:[#allocation76_spill] sm:$0xff] }
 0xdd5   :  { %v5684_v23 = vmul.f32 -1.442695, %v4475_v49  ;;  %7156 = vmatprep.subr.bf16.mxu1 %v10340_v48 }
 0xdd6   :  { %7186 = vmatpush1.bf16.msra.mxu0 %v8382_v61 }
 0xdd7   :  { %7770 = vpow2.f32 %v5684_v23  ;;  %v4449_v31 = vpop.f32.mrb[112].mxu0  ;;  %7188 = vmatprep.subr.bf16.mxu0 %v10419_v25 }
 0xdd8   :  { %v4450_v57 = vadd.f32 %v4449_v31, %v10354_v43  ;;  %v4451_v21 = vpop.f32.mrb[113].mxu0  ;;  %7158 = vmatpush1.bf16.msra.mxu1 %v8420_v17 }
 0xdd9   :  { %7160 = vmatprep.subr.bf16.mxu1 %v8425_v28  ;;  %v4452_v7 = vadd.f32 %v4451_v21, %v10355_v40  ;;  %v10519_v21 = vld [vmem:[#allocation22_spill] sm:$0xff] }
 0xdda   :  { %v4482_v2 = vadd.f32 %v4450_v57, %v10515_v29  ;;  %7190 = vmatpush1.bf16.msra.mxu0 %v10505_v33  ;;  %v10526_v33 = vld [vmem:[#allocation63_spill] sm:$0xff] }
 0xddb   :  { %7192 = vmatprep.subr.bf16.mxu0 %v10506_v62 }
 0xddc   :  { %v5685_v0 = vmul.f32 -1.442695, %v4482_v2  ;;  %7162 = vmatpush1.bf16.msra.mxu1 %v8435_v47 }
 0xddd   :  { %7164 = vmatprep.subr.bf16.mxu1 %v8440_v5 }
 0xdde   :  { %7772 = vpow2.f32 %v5685_v0  ;;  %7194 = vmatpush1.bf16.msra.mxu0 %v10507_v24 }
 0xddf   :  { %7196 = vmatprep.subr.bf16.mxu0 %v10508_v37 }
 0xde0   :  { %7166 = vmatpush1.bf16.msra.mxu1 %v8448_v34 }
 0xde1   :  { %v7771_v4 = vpop.eup %7770  ;;  %7168 = vmatprep.subr.bf16.mxu1 %v8453_v15 }
 0xde2   :  { %v4479_v14 = vadd.f32 1.0, %v7771_v4  ;;  %7198 = vmatpush1.bf16.msra.mxu0 %v10509_v36  ;;  %v10520_v4 = vld [vmem:[#allocation23_spill] sm:$0xff] }
 0xde3   :  { %7200 = vmatprep.subr.bf16.mxu0 %v10510_v59 }
 0xde4   :  { %7774 = vrcp.f32 %v4479_v14  ;;  %7170 = vmatpush1.bf16.msra.mxu1 %v8459_v51  ;;  %v10521_v14 = vld [vmem:[#allocation24_spill] sm:$0xff] }
 0xde5   :  { %7204 = vmatprep.subr.bf16.mxu1 %v10516_v55 }
 0xde6   :  { %7202 = vmatpush1.bf16.msra.mxu0 %v10511_v8 }
 0xde7   :  { %7236 = vmatprep.subr.bf16.mxu0 %v8265_v39 }
 0xde8   :  { %v7773_v11 = vpop.eup %7772 }
 0xde9   :  { %v4486_v18 = vadd.f32 1.0, %v7773_v11  ;;  %v10522_v11 = vld [vmem:[#allocation25_spill] sm:$0xff] }
 0xdeb   :  { %7776 = vrcp.f32 %v4486_v18  ;;  %v10523_v18 = vld [vmem:[#allocation26_spill] sm:$0xff] }
 0xdee   :  { %v7775_v22 = vpop.eup %7774 }
 0xdef   :  { %v4489_v49 = vmul.f32 %v7775_v22, %v4452_v7  ;;  %v10524_v7 = vld [vmem:[#allocation27_spill] sm:$0xff] }
 0xdf1   :  { %v4490_v38 = vadd.f32 %v4489_v49, %v10517_v45  ;;  %v10525_v45 = vld [vmem:[#allocation101_spill] sm:$0xff] }
 0xdf3   :  { %7778 = vtanh.f32 %v4490_v38 }
 0xdf5   :  { %v7777_v23 = vpop.eup %7776 }
 0xdf6   :  { %v4492_v31 = vsub.f32 1.0, %v7777_v23  ;;  %v4494_v2 = vmul.f32 %v7777_v23, %v9664_v3  ;;  %v10518_v3 = vld [vmem:[#allocation21_spill] sm:$0xff] }
 0xdfd   :  { %v7779_v57 = vpop.eup %7778 }
 0xdfe   :  { %v4493_v29 = vmul.f32 %v7779_v57, %v4492_v31 }
 0xe00   :  { %v9740_v0 = vadd.f32 %v4494_v2, %v4493_v29 }
 0xe02   :  { %4567 = vmatmul.mubr.f32.gmra.mrb[114].mxu0 %v9740_v0  ;;  %4641 = vmatmul.mubr.f32.gmra.mrb[114].mxu1 %v9740_v0 }
 0xe03   :  { %4710 = vmatprep.mubr.f32.mxu1 %v10267_v1  ;;  %4827 = vmatprep.mubr.f32.mxu0 %v10267_v1 }
 0xe06   :  { %4711 = vmatmul.mubr.f32.vlgmr.msra.gmra.mrb[116].mxu1 %v9695_v19 }
 0xe07   :  { %4714 = vmatprep.mubr.f32.mxu1 %v10267_v1  ;;  %7206 = vmatpush1.bf16.msra.mxu1 %v8131_v46 }
 0xe08   :  { %7208 = vmatprep.subr.bf16.mxu1 %v8142_v50 }
 0xe0a   :  { %4715 = vmatmul.mubr.f32.gmra.mrb[118].mxu1 %v9740_v0 }
 0xe0b   :  { %7210 = vmatpush1.bf16.msra.mxu1 %v8150_v56  ;;  %4902 = vmatprep.mubr.f32.mxu1 %v10267_v1 }
 0xe0c   :  { %7212 = vmatprep.subr.bf16.mxu1 %v8162_v60 }
 0xe0f   :  { %7214 = vmatpush1.bf16.msra.mxu1 %v8168_v63 }
 0xe10   :  { %7216 = vmatprep.subr.bf16.mxu1 %v10341_v41 }
 0xe13   :  { %7218 = vmatpush1.bf16.msra.mxu1 %v10342_v13 }
 0xe14   :  { %7220 = vmatprep.subr.bf16.mxu1 %v10434_v10 }
 0xe17   :  { %7222 = vmatpush1.bf16.msra.mxu1 %v10518_v3 }
 0xe18   :  { %7224 = vmatprep.subr.bf16.mxu1 %v10519_v21 }
 0xe1b   :  { %7226 = vmatpush1.bf16.msra.mxu1 %v10520_v4 }
 0xe1c   :  { %7228 = vmatprep.subr.bf16.mxu1 %v10521_v14 }
 0xe1f   :  { %7230 = vmatpush1.bf16.msra.mxu1 %v10522_v11 }
 0xe20   :  { %7232 = vmatprep.subr.bf16.mxu1 %v10523_v18 }
 0xe23   :  { %7234 = vmatpush1.bf16.msra.mxu1 %v10524_v7 }
 0xe24   :  { %7300 = vmatprep.subr.bf16.mxu1 %v10516_v55 }
 0xe9a   :  { %v4562_v22 = vpop.f32.mrb[26].mxu0  ;;  %v4637_v49 = vpop.f32.mrb[112].mxu1 }
 0xe9b   :  { %v7464_v38 = vadd.f32 %v10525_v45, %v4562_v22  ;;  %v4564_v23 = vpop.f32.mrb[27].mxu0  ;;  %v4639_v31 = vpop.f32.mrb[113].mxu1  ;;  %v4638_v24 = vadd.f32 %v4637_v49, %v10459_v44  ;;  %v10529_v49 = vld [vmem:[#allocation17_spill] sm:$0xff] }
 0xe9c   :  { %v7466_v29 = vadd.f32 %v10473_v30, %v4564_v23 }
 0xe9d   :  { %v5686_v57 = vmul.f32 -1.442695, %v7464_v38 }
 0xe9e   :  { %v5687_v2 = vmul.f32 -1.442695, %v7466_v29 }
 0xe9f   :  { %7780 = vpow2.f32 %v5686_v57 }
 0xea0   :  { %7782 = vpow2.f32 %v5687_v2 }
 0xea9   :  { %v7781_v8 = vpop.eup %7780 }
 0xeaa   :  { %v4725_v59 = vadd.f32 1.0, %v7781_v8  ;;  %v7783_v36 = vpop.eup %7782 }
 0xeab   :  { %v4732_v37 = vadd.f32 1.0, %v7783_v36 }
 0xeac   :  { %7784 = vrcp.f32 %v4725_v59 }
 0xead   :  { %7786 = vrcp.f32 %v4732_v37 }
 0xeb6   :  { %v7785_v55 = vpop.eup %7784 }
 0xeb7   :  { %v4735_v62 = vmul.f32 %v7785_v55, %v4638_v24  ;;  %v7787_v31 = vpop.eup %7786  ;;  %v10530_v55 = vld [vmem:[#allocation74_spill] sm:$0xff] }
 0xeb8   :  { %v4738_v38 = vsub.f32 1.0, %v7787_v31  ;;  %v4740_v57 = vmul.f32 %v7787_v31, %v9695_v19 }
 0xeb9   :  { %v4736_v22 = vadd.f32 %v4735_v62, %v10526_v33 }
 0xebb   :  { %7788 = vtanh.f32 %v4736_v22 }
 0xec5   :  { %v7789_v45 = vpop.eup %7788 }
 0xec6   :  { %v4739_v23 = vmul.f32 %v7789_v45, %v4738_v38 }
 0xec8   :  { %v9771_v29 = vadd.f32 %v4740_v57, %v4739_v23 }
 0xeca   :  { %4828 = vmatmul.mubr.f32.vlgmr.msra.gmra.mrb[28].mxu0 %v9771_v29  ;;  %4903 = vmatmul.mubr.f32.vlgmr.msra.gmra.mrb[120].mxu1 %v9771_v29 }
 0xecb   :  { %7238 = vmatpush1.bf16.msra.mxu0 %v8357_v26  ;;  %4833 = vmatprep.mubr.f32.mxu0 %v10267_v1 }
 0xecc   :  { %7240 = vmatprep.subr.bf16.mxu0 %v8361_v20  ;;  %4907 = vmatprep.mubr.f32.mxu1 %v10267_v1 }
 0xecd   :  { %7302 = vmatpush1.bf16.msra.mxu1 %v8131_v46 }
 0xece   :  { %7304 = vmatprep.subr.bf16.mxu1 %v8142_v50 }
 0xecf   :  { %7242 = vmatpush1.bf16.msra.mxu0 %v8372_v35 }
 0xed0   :  { %7244 = vmatprep.subr.bf16.mxu0 %v8378_v52 }
 0xed1   :  { %7306 = vmatpush1.bf16.msra.mxu1 %v8150_v56  ;;  %v10527_v56 = vld [vmem:[#allocation42_spill] sm:$0xff] }
 0xed2   :  { %7308 = vmatprep.subr.bf16.mxu1 %v8162_v60 }
 0xed3   :  { %7246 = vmatpush1.bf16.msra.mxu0 %v8389_v9 }
 0xed4   :  { %7248 = vmatprep.subr.bf16.mxu0 %v8395_v16 }
 0xed5   :  { %v4568_v33 = vpop.f32.mrb[114].mxu0  ;;  %v4642_v62 = vpop.f32.mrb[114].mxu1  ;;  %7310 = vmatpush1.bf16.msra.mxu1 %v8168_v63 }
 0xed6   :  { %v4569_v24 = vpop.f32.mrb[115].mxu0  ;;  %v4643_v46 = vpop.f32.mrb[115].mxu1  ;;  %7312 = vmatprep.subr.bf16.mxu1 %v10341_v41  ;;  %v10536_v33 = vld [vmem:[#allocation36_spill] sm:$0xff]  ;;  %v10538_v62 = vld [vmem:[#allocation101_spill] sm:$0xff] }
 0xed7   :  { %v4644_v50 = vadd.f32 %v4643_v46, %v10385_v53  ;;  %7250 = vmatpush1.bf16.msra.mxu0 %v10339_v42 }
 0xed8   :  { %7252 = vmatprep.subr.bf16.mxu0 %v10340_v48 }
 0xed9   :  { %v4742_v60 = vadd.f32 %v4644_v50, %v10527_v56  ;;  %v4712_v37 = vpop.f32.mrb[116].mxu1  ;;  %7314 = vmatpush1.bf16.msra.mxu1 %v10342_v13  ;;  %v10528_v13 = vld [vmem:[#allocation73_spill] sm:$0xff] }
 0xeda   :  { %v4713_v36 = vpop.f32.mrb[117].mxu1  ;;  %7316 = vmatprep.subr.bf16.mxu1 %v10434_v10 }
 0xedb   :  { %v5688_v59 = vmul.f32 -1.442695, %v4742_v60  ;;  %7254 = vmatpush1.bf16.msra.mxu0 %v8420_v17 }
 0xedc   :  { %7256 = vmatprep.subr.bf16.mxu0 %v8425_v28 }
 0xedd   :  { %7790 = vpow2.f32 %v5688_v59  ;;  %v4716_v63 = vpop.f32.mrb[118].mxu1  ;;  %7318 = vmatpush1.bf16.msra.mxu1 %v10518_v3 }
 0xede   :  { %v4717_v41 = vadd.f32 %v4716_v63, %v10354_v43  ;;  %v4718_v8 = vpop.f32.mrb[119].mxu1  ;;  %7320 = vmatprep.subr.bf16.mxu1 %v10519_v21 }
 0xedf   :  { %7258 = vmatpush1.bf16.msra.mxu0 %v8435_v47  ;;  %v4719_v45 = vadd.f32 %v4718_v8, %v10355_v40 }
 0xee0   :  { %v4749_v19 = vadd.f32 %v4717_v41, %v10528_v13  ;;  %7260 = vmatprep.subr.bf16.mxu0 %v8440_v5  ;;  %v10539_v13 = vld [vmem:[#allocation65_spill] sm:$0xff] }
 0xee1   :  { %7322 = vmatpush1.bf16.msra.mxu1 %v10520_v4 }
 0xee2   :  { %v5689_v10 = vmul.f32 -1.442695, %v4749_v19  ;;  %7324 = vmatprep.subr.bf16.mxu1 %v10521_v14 }
 0xee3   :  { %7262 = vmatpush1.bf16.msra.mxu0 %v8448_v34 }
 0xee4   :  { %7792 = vpow2.f32 %v5689_v10  ;;  %7264 = vmatprep.subr.bf16.mxu0 %v8453_v15 }
 0xee5   :  { %7326 = vmatpush1.bf16.msra.mxu1 %v10522_v11 }
 0xee6   :  { %7328 = vmatprep.subr.bf16.mxu1 %v10523_v18 }
 0xee7   :  { %v7791_v3 = vpop.eup %7790  ;;  %7266 = vmatpush1.bf16.msra.mxu0 %v8459_v51 }
 0xee8   :  { %v4746_v21 = vadd.f32 1.0, %v7791_v3  ;;  %7268 = vmatprep.subr.bf16.mxu0 %v10529_v49 }
 0xee9   :  { %7330 = vmatpush1.bf16.msra.mxu1 %v10524_v7 }
 0xeea   :  { %7794 = vrcp.f32 %v4746_v21  ;;  %7332 = vmatprep.subr.bf16.mxu1 %v8265_v39  ;;  %v10531_v39 = vld [vmem:[#allocation29_spill] sm:$0xff] }
 0xeee   :  { %v7793_v4 = vpop.eup %7792 }
 0xeef   :  { %v4753_v14 = vadd.f32 1.0, %v7793_v4 }
 0xef1   :  { %7796 = vrcp.f32 %v4753_v14 }
 0xef4   :  { %v7795_v2 = vpop.eup %7794 }
 0xef5   :  { %v4756_v11 = vmul.f32 %v7795_v2, %v4719_v45 }
 0xef7   :  { %v4757_v18 = vadd.f32 %v4756_v11, %v10530_v55  ;;  %v10540_v11 = vld [vmem:[#allocation40_spill] sm:$0xff] }
 0xef9   :  { %7798 = vtanh.f32 %v4757_v18  ;;  %v10541_v18 = vld [vmem:[#allocation70_spill] sm:$0xff] }
 0xefb   :  { %v7797_v22 = vpop.eup %7796 }
 0xefc   :  { %v4759_v31 = vsub.f32 1.0, %v7797_v22  ;;  %v4761_v57 = vmul.f32 %v7797_v22, %v9740_v0  ;;  %v10534_v0 = vld [vmem:[#allocation34_spill] sm:$0xff] }
 0xf03   :  { %v7799_v38 = vpop.eup %7798 }
 0xf04   :  { %v4760_v23 = vmul.f32 %v7799_v38, %v4759_v31 }
 0xf06   :  { %v9816_v7 = vadd.f32 %v4761_v57, %v4760_v23 }
 0xf08   :  { %4834 = vmatmul.mubr.f32.gmra.mrb[116].mxu0 %v9816_v7  ;;  %4908 = vmatmul.mubr.f32.gmra.mrb[122].mxu1 %v9816_v7 }
 0xf09   :  { %4977 = vmatprep.mubr.f32.mxu0 %v10267_v1  ;;  %5169 = vmatprep.mubr.f32.mxu1 %v10267_v1 }
 0xf0c   :  { %4978 = vmatmul.mubr.f32.vlgmr.msra.gmra.mrb[118].mxu0 %v9771_v29 }
 0xf0d   :  { %4981 = vmatprep.mubr.f32.mxu0 %v10267_v1  ;;  %7270 = vmatpush1.bf16.msra.mxu0 %v8338_v54  ;;  %v10532_v54 = vld [vmem:[#allocation30_spill] sm:$0xff] }
 0xf0e   :  { %7272 = vmatprep.subr.bf16.mxu0 %v8342_v58  ;;  %v10533_v58 = vld [vmem:[#allocation33_spill] sm:$0xff] }
 0xf10   :  { %4982 = vmatmul.mubr.f32.gmra.mrb[120].mxu0 %v9816_v7 }
 0xf11   :  { %7274 = vmatpush1.bf16.msra.mxu0 %v8349_v6  ;;  %5094 = vmatprep.mubr.f32.mxu0 %v10267_v1  ;;  %v10535_v6 = vld [vmem:[#allocation35_spill] sm:$0xff] }
 0xf12   :  { %7276 = vmatprep.subr.bf16.mxu0 %v8352_v12  ;;  %v10537_v12 = vld [vmem:[#allocation37_spill] sm:$0xff] }
 0xf15   :  { %7278 = vmatpush1.bf16.msra.mxu0 %v8365_v27 }
 0xf16   :  { %7280 = vmatprep.subr.bf16.mxu0 %v8369_v32 }
 0xf19   :  { %7282 = vmatpush1.bf16.msra.mxu0 %v8382_v61 }
 0xf1a   :  { %7284 = vmatprep.subr.bf16.mxu0 %v10419_v25 }
 0xf1d   :  { %7286 = vmatpush1.bf16.msra.mxu0 %v10531_v39  ;;  %v10542_v39 = vld [vmem:[#allocation71_spill] sm:$0xff] }
 0xf1e   :  { %7288 = vmatprep.subr.bf16.mxu0 %v10532_v54 }
 0xf21   :  { %7290 = vmatpush1.bf16.msra.mxu0 %v10533_v58 }
 0xf22   :  { %7292 = vmatprep.subr.bf16.mxu0 %v10534_v0 }
 0xf25   :  { %7294 = vmatpush1.bf16.msra.mxu0 %v10535_v6 }
 0xf26   :  { %7296 = vmatprep.subr.bf16.mxu0 %v10536_v33  ;;  %v5304_v33 = vld [vmem:[%s10080_s5] sm:$0xff] }
 0xf29   :  { %7298 = vmatpush1.bf16.msra.mxu0 %v10537_v12 }
 0xf9d   :  { %v4829_v27 = vpop.f32.mrb[28].mxu0  ;;  %v4904_v32 = vpop.f32.mrb[120].mxu1 }
 0xf9e   :  { %v7468_v61 = vadd.f32 %v10538_v62, %v4829_v27  ;;  %v4831_v24 = vpop.f32.mrb[29].mxu0  ;;  %v4906_v25 = vpop.f32.mrb[121].mxu1  ;;  %v4905_v63 = vadd.f32 %v4904_v32, %v10459_v44  ;;  %v7956_v27 = vmov 0.0|0.0   ;;  %v5306_v32 = vld [vmem:[%s10080_s5 + $0x10] sm:$0xff] }
 0xf9f   :  { %v7470_v50 = vadd.f32 %v10473_v30, %v4831_v24  ;;  %7363 = vmatprep.subr.bf16.mxu0 %v7956_v27  ;;  %v5308_v25 = vld [vmem:[%s10080_s5 + $0x20] sm:$0xff] }
 0xfa0   :  { %v5690_v46 = vmul.f32 -1.442695, %v7468_v61  ;;  %v5307_v61 = vld [vmem:[%s10080_s5 + $0x18] sm:$0xff] }
 0xfa1   :  { %v5691_v56 = vmul.f32 -1.442695, %v7470_v50  ;;  %v7391_v24 = vpack.c.bf16 %v5307_v61, %v5306_v32 }
 0xfa2   :  { %7800 = vpow2.f32 %v5690_v46  ;;  %v5309_v46 = vld [vmem:[%s10080_s5 + $0x28] sm:$0xff] }
 0xfa3   :  { %7802 = vpow2.f32 %v5691_v56  ;;  %v7394_v50 = vpack.c.bf16 %v5309_v46, %v5308_v25  ;;  %v5310_v56 = vld [vmem:[%s10080_s5 + $0x30] sm:$0xff]  ;;  %v10543_v46 = vld [vmem:[#allocation69_spill] sm:$0xff] }
 0xfac   :  { %v7801_v60 = vpop.eup %7800 }
 0xfad   :  { %v4992_v37 = vadd.f32 1.0, %v7801_v60  ;;  %v7803_v36 = vpop.eup %7802  ;;  %v5311_v60 = vld [vmem:[%s10080_s5 + $0x38] sm:$0xff] }
 0xfae   :  { %v4999_v59 = vadd.f32 1.0, %v7803_v36  ;;  %v5312_v36 = vld [vmem:[%s10080_s5 + $0x40] sm:$0xff] }
 0xfaf   :  { %7804 = vrcp.f32 %v4992_v37  ;;  %v7397_v37 = vpack.c.bf16 %v5311_v60, %v5310_v56 }
 0xfb0   :  { %7806 = vrcp.f32 %v4999_v59  ;;  %v5313_v59 = vld [vmem:[%s10080_s5 + $0x48] sm:$0xff] }
 0xfb9   :  { %v7805_v41 = vpop.eup %7804 }
 0xfba   :  { %v5002_v8 = vmul.f32 %v7805_v41, %v4905_v63  ;;  %v7807_v10 = vpop.eup %7806  ;;  %v7400_v63 = vpack.c.bf16 %v5313_v59, %v5312_v36  ;;  %v5314_v41 = vld [vmem:[%s10080_s5 + $0x50] sm:$0xff] }
 0xfbb   :  { %v5005_v3 = vsub.f32 1.0, %v7807_v10  ;;  %v5007_v4 = vmul.f32 %v7807_v10, %v9771_v29  ;;  %v5317_v10 = vld [vmem:[%s10080_s5 + $0x68] sm:$0xff] }
 0xfbc   :  { %v5003_v19 = vadd.f32 %v5002_v8, %v10539_v13  ;;  %v5315_v8 = vld [vmem:[%s10080_s5 + $0x58] sm:$0xff] }
 0xfbd   :  { %v7403_v13 = vpack.c.bf16 %v5315_v8, %v5314_v41 }
 0xfbe   :  { %7808 = vtanh.f32 %v5003_v19  ;;  %v5316_v19 = vld [vmem:[%s10080_s5 + $0x60] sm:$0xff] }
 0xfc8   :  { %v7809_v21 = vpop.eup %7808 }
 0xfc9   :  { %v5006_v49 = vmul.f32 %v7809_v21, %v5005_v3  ;;  %v7406_v3 = vpack.c.bf16 %v5317_v10, %v5316_v19  ;;  %v5319_v21 = vld [vmem:[%s10080_s5 + $0x78] sm:$0xff] }
 0xfcb   :  { %v9846_v14 = vadd.f32 %v5007_v4, %v5006_v49  ;;  %v5320_v4 = vld [vmem:[%s10081_s6] sm:$0xff] }
 0xfcd   :  { %5095 = vmatmul.mubr.f32.vlgmr.msra.gmra.mrb[30].mxu0 %v9846_v14  ;;  %5170 = vmatmul.mubr.f32.vlgmr.msra.gmra.mrb[124].mxu1 %v9846_v14 }
 0xfce   :  { %7334 = vmatpush1.bf16.msra.mxu1 %v8357_v26  ;;  %5100 = vmatprep.mubr.f32.mxu0 %v10267_v1 }
 0xfcf   :  { %7336 = vmatprep.subr.bf16.mxu1 %v8361_v20  ;;  %5174 = vmatprep.mubr.f32.mxu1 %v10267_v1 }
 0xfd2   :  { %7338 = vmatpush1.bf16.msra.mxu1 %v8372_v35 }
 0xfd3   :  { %7340 = vmatprep.subr.bf16.mxu1 %v8378_v52 }
 0xfd6   :  { %7342 = vmatpush1.bf16.msra.mxu1 %v8389_v9 }
 0xfd7   :  { %7344 = vmatprep.subr.bf16.mxu1 %v8395_v16 }
 0xfda   :  { %7346 = vmatpush1.bf16.msra.mxu1 %v10339_v42 }
 0xfdb   :  { %v4835_v29 = vpop.f32.mrb[116].mxu0  ;;  %v4909_v45 = vpop.f32.mrb[122].mxu1  ;;  %7348 = vmatprep.subr.bf16.mxu1 %v10340_v48 }
 0xfdc   :  { %v4836_v26 = vpop.f32.mrb[117].mxu0  ;;  %v4910_v2 = vpop.f32.mrb[123].mxu1  ;;  %v5321_v29 = vld [vmem:[%s10081_s6 + $0x8] sm:$0xff] }
 0xfdd   :  { %v4911_v20 = vadd.f32 %v4910_v2, %v10385_v53  ;;  %v7364_v45 = vpack.c.bf16 %v5321_v29, %v5320_v4  ;;  %v5322_v26 = vld [vmem:[%s10081_s6 + $0x10] sm:$0xff]  ;;  %v5323_v2 = vld [vmem:[%s10081_s6 + $0x18] sm:$0xff] }
 0xfde   :  { %7350 = vmatpush1.bf16.msra.mxu1 %v8420_v17  ;;  %v10545_v4 = vld [vmem:[#allocation67_spill] sm:$0xff] }
 0xfdf   :  { %v5009_v35 = vadd.f32 %v4911_v20, %v10540_v11  ;;  %v4979_v55 = vpop.f32.mrb[118].mxu0  ;;  %7352 = vmatprep.subr.bf16.mxu1 %v8425_v28  ;;  %7365 = vmatpush3.bf16.msra.mxu0 %v7364_v45  ;;  %v7367_v20 = vpack.c.bf16 %v5323_v2, %v5322_v26  ;;  %v5324_v11 = vld [vmem:[%s10081_s6 + $0x20] sm:$0xff] }
 0xfe0   :  { %v4980_v52 = vpop.f32.mrb[119].mxu0  ;;  %7366 = vmatprep.subr.bf16.mxu0 %v7956_v27 }
 0xfe1   :  { %v5692_v9 = vmul.f32 -1.442695, %v5009_v35  ;;  %v5325_v35 = vld [vmem:[%s10081_s6 + $0x28] sm:$0xff]  ;;  %v5326_v52 = vld [vmem:[%s10081_s6 + $0x30] sm:$0xff] }
 0xfe2   :  { %7354 = vmatpush1.bf16.msra.mxu1 %v8435_v47  ;;  %v7370_v55 = vpack.c.bf16 %v5325_v35, %v5324_v11 }
 0xfe3   :  { %7810 = vpow2.f32 %v5692_v9  ;;  %v4983_v16 = vpop.f32.mrb[120].mxu0  ;;  %7356 = vmatprep.subr.bf16.mxu1 %v8440_v5  ;;  %7368 = vmatpush3.bf16.msra.mxu0 %v7367_v20  ;;  %v5327_v9 = vld [vmem:[%s10081_s6 + $0x38] sm:$0xff] }
 0xfe4   :  { %v4984_v42 = vadd.f32 %v4983_v16, %v10354_v43  ;;  %v4985_v48 = vpop.f32.mrb[121].mxu0  ;;  %7369 = vmatprep.subr.bf16.mxu0 %v7956_v27  ;;  %v7373_v16 = vpack.c.bf16 %v5327_v9, %v5326_v52  ;;  %v10546_v52 = vld [vmem:[#allocation68_spill] sm:$0xff] }
 0xfe5   :  { %v4986_v5 = vadd.f32 %v4985_v48, %v10355_v40  ;;  %v5329_v48 = vld [vmem:[%s10081_s6 + $0x48] sm:$0xff] }
 0xfe6   :  { %v5016_v22 = vadd.f32 %v4984_v42, %v10541_v18  ;;  %7358 = vmatpush1.bf16.msra.mxu1 %v8448_v34  ;;  %v5328_v42 = vld [vmem:[%s10081_s6 + $0x40] sm:$0xff] }
 0xfe7   :  { %7360 = vmatprep.subr.bf16.mxu1 %v8453_v15  ;;  %7371 = vmatpush3.bf16.msra.mxu0 %v7370_v55  ;;  %v7376_v18 = vpack.c.bf16 %v5329_v48, %v5328_v42 }
 0xfe8   :  { %v5693_v17 = vmul.f32 -1.442695, %v5016_v22  ;;  %7372 = vmatprep.subr.bf16.mxu0 %v7956_v27  ;;  %v5330_v22 = vld [vmem:[%s10081_s6 + $0x50] sm:$0xff] }
 0xfea   :  { %7812 = vpow2.f32 %v5693_v17  ;;  %7362 = vmatpush1.bf16.msra.mxu1 %v8459_v51  ;;  %v5331_v17 = vld [vmem:[%s10081_s6 + $0x58] sm:$0xff] }
 0xfeb   :  { %7387 = vmatprep.subr.bf16.mxu1 %v7956_v27  ;;  %7374 = vmatpush3.bf16.msra.mxu0 %v7373_v16 }
 0xfec   :  { %7375 = vmatprep.subr.bf16.mxu0 %v7956_v27 }
 0xfed   :  { %v7811_v28 = vpop.eup %7810 }
 0xfee   :  { %v5013_v31 = vadd.f32 1.0, %v7811_v28  ;;  %v7379_v28 = vpack.c.bf16 %v5331_v17, %v5330_v22 }
 0xfef   :  { %7377 = vmatpush3.bf16.msra.mxu0 %v7376_v18 }
 0xff0   :  { %7814 = vrcp.f32 %v5013_v31  ;;  %7378 = vmatprep.subr.bf16.mxu0 %v7956_v27  ;;  %v5332_v31 = vld [vmem:[%s10081_s6 + $0x60] sm:$0xff] }
 0xff3   :  { %7380 = vmatpush3.bf16.msra.mxu0 %v7379_v28 }
 0xff4   :  { %v7813_v47 = vpop.eup %7812  ;;  %7381 = vmatprep.subr.bf16.mxu0 %v7956_v27 }
 0xff5   :  { %v5020_v38 = vadd.f32 1.0, %v7813_v47  ;;  %v5333_v47 = vld [vmem:[%s10081_s6 + $0x68] sm:$0xff] }
 0xff7   :  { %7816 = vrcp.f32 %v5020_v38  ;;  %v7382_v38 = vpack.c.bf16 %v5333_v47, %v5332_v31 }
 0xff9   :  { %7383 = vmatpush3.bf16.msra.mxu0 %v7382_v38 }
 0xffa   :  { %v7815_v23 = vpop.eup %7814  ;;  %7384 = vmatprep.subr.bf16.mxu0 %v7956_v27 }
 0xffb   :  { %v5023_v57 = vmul.f32 %v7815_v23, %v4986_v5  ;;  %v5334_v5 = vld [vmem:[%s10081_s6 + $0x70] sm:$0xff]  ;;  %v5335_v23 = vld [vmem:[%s10081_s6 + $0x78] sm:$0xff] }
 0xffd   :  { %v5024_v54 = vadd.f32 %v5023_v57, %v10542_v39  ;;  %v7385_v57 = vpack.c.bf16 %v5335_v23, %v5334_v5 }
 0xfff   :  { %7818 = vtanh.f32 %v5024_v54  ;;  %7386 = vmatpush3.bf16.msra.mxu0 %v7385_v57 }
0x1001   :  { %v7817_v34 = vpop.eup %7816 }
0x1002   :  { %v5026_v58 = vsub.f32 1.0, %v7817_v34  ;;  %v5028_v6 = vmul.f32 %v7817_v34, %v9816_v7  ;;  %v5305_v7 = vld [vmem:[%s10080_s5 + $0x8] sm:$0xff] }
0x1003   :  { %v7388_v12 = vpack.c.bf16 %v5305_v7, %v5304_v33 }
0x1009   :  { %v7819_v15 = vpop.eup %7818 }
0x100a   :  { %v5027_v0 = vmul.f32 %v7819_v15, %v5026_v58 }
0x100c   :  { %v9874_v51 = vadd.f32 %v5028_v6, %v5027_v0 }
0x100e   :  { %5101 = vmatmul.mubr.f32.gmra.mrb[122].mxu0 %v9874_v51  ;;  %5175 = vmatmul.mubr.f32.gmra.mrb[126].mxu1 %v9874_v51 }
0x100f   :  { %5244 = vmatprep.mubr.f32.mxu1 %v10267_v1  ;;  %5765 = vmatprep.mubr.msk.f32.mxu0 %vm7957_vm1, %v10267_v1 }
0x1012   :  { %5245 = vmatmul.mubr.f32.vlgmr.msra.gmra.mrb[128].mxu1 %v9846_v14 }
0x1013   :  { %5248 = vmatprep.mubr.f32.mxu1 %v10267_v1  ;;  %7389 = vmatpush3.bf16.msra.mxu1 %v7388_v12 }
0x1014   :  { %7390 = vmatprep.subr.bf16.mxu1 %v7956_v27 }
0x1016   :  { %5249 = vmatmul.mubr.f32.gmra.mrb[130].mxu1 %v9874_v51 }
0x1017   :  { %7392 = vmatpush3.bf16.msra.mxu1 %v7391_v24  ;;  %5800 = vmatprep.mubr.msk.f32.mxu1 %vm7957_vm1, %v10267_v1  ;;  %v5318_v1 = vld [vmem:[%s10080_s5 + $0x70] sm:$0xff] }
0x1018   :  { %7393 = vmatprep.subr.bf16.mxu1 %v7956_v27  ;;  %v7409_v49 = vpack.c.bf16 %v5319_v21, %v5318_v1 }
0x101b   :  { %7395 = vmatpush3.bf16.msra.mxu1 %v7394_v50 }
0x101c   :  { %7396 = vmatprep.subr.bf16.mxu1 %v7956_v27 }
0x101f   :  { %7398 = vmatpush3.bf16.msra.mxu1 %v7397_v37 }
0x1020   :  { %7399 = vmatprep.subr.bf16.mxu1 %v7956_v27 }
0x1023   :  { %7401 = vmatpush3.bf16.msra.mxu1 %v7400_v63 }
0x1024   :  { %7402 = vmatprep.subr.bf16.mxu1 %v7956_v27 }
0x1027   :  { %7404 = vmatpush3.bf16.msra.mxu1 %v7403_v13  ;;  %v10544_v13 = vld [vmem:[#allocation38_spill] sm:$0xff] }
0x1028   :  { %7405 = vmatprep.subr.bf16.mxu1 %v7956_v27 }
0x102b   :  { %7407 = vmatpush3.bf16.msra.mxu1 %v7406_v3 }
0x102c   :  { %7408 = vmatprep.subr.bf16.mxu1 %v7956_v27 }
0x102f   :  { %7410 = vmatpush3.bf16.msra.mxu1 %v7409_v49 }
0x10a0   :  { %v5096_v39 = vpop.f32.mrb[30].mxu0  ;;  %v5171_v54 = vpop.f32.mrb[124].mxu1 }
0x10a1   :  { %v7472_v34 = vadd.f32 %v10538_v62, %v5096_v39  ;;  %v5098_v58 = vpop.f32.mrb[31].mxu0  ;;  %v5173_v15 = vpop.f32.mrb[125].mxu1  ;;  %v5172_v27 = vadd.f32 %v5171_v54, %v10459_v44 }
0x10a2   :  { %v7474_v6 = vadd.f32 %v10473_v30, %v5098_v58 }
0x10a3   :  { %v5694_v0 = vmul.f32 -1.442695, %v7472_v34 }
0x10a4   :  { %v5695_v33 = vmul.f32 -1.442695, %v7474_v6 }
0x10a5   :  { %7820 = vpow2.f32 %v5694_v0 }
0x10a6   :  { %7822 = vpow2.f32 %v5695_v33 }
0x10af   :  { %v7821_v7 = vpop.eup %7820 }
0x10b0   :  { %v5259_v12 = vadd.f32 1.0, %v7821_v7  ;;  %v7823_v32 = vpop.eup %7822 }
0x10b1   :  { %v5266_v61 = vadd.f32 1.0, %v7823_v32 }
0x10b2   :  { %7824 = vrcp.f32 %v5259_v12  ;;  %v5501_v12 = vld [vmem:[%s10083_s8] sm:$0xff] }
0x10b3   :  { %7826 = vrcp.f32 %v5266_v61 }
0x10bc   :  { %v7825_v24 = vpop.eup %7824 }
0x10bd   :  { %v5269_v25 = vmul.f32 %v7825_v24, %v5172_v27  ;;  %v7827_v50 = vpop.eup %7826 }
0x10be   :  { %v5272_v56 = vsub.f32 1.0, %v7827_v50  ;;  %v5274_v37 = vmul.f32 %v7827_v50, %v9846_v14 }
0x10bf   :  { %v5270_v62 = vadd.f32 %v5269_v25, %v10543_v46 }
0x10c1   :  { %7828 = vtanh.f32 %v5270_v62 }
0x10cb   :  { %v7829_v60 = vpop.eup %7828 }
0x10cc   :  { %v5273_v30 = vmul.f32 %v7829_v60, %v5272_v56 }
0x10ce   :  { %v5275_v36 = vadd.f32 %v5274_v37, %v5273_v30 }
0x10d0   :  { %5801 = vmatmul.mubr.f32.vlgmr.msra.gmra.mrb[132].mxu1 %v5275_v36  ;;  %5297 = vst.msk [vmem:[#allocation8] sm:$0xff] %vm125_vm0, %v5275_v36 }
0x10e1   :  { %v5102_v59 = vpop.f32.mrb[122].mxu0  ;;  %v5176_v63 = vpop.f32.mrb[126].mxu1 }
0x10e2   :  { %v5103_v41 = vpop.f32.mrb[123].mxu0  ;;  %v5177_v44 = vpop.f32.mrb[127].mxu1 }
0x10e3   :  { %v5178_v8 = vadd.f32 %v5177_v44, %v10385_v53 }
0x10e5   :  { %v5276_v19 = vadd.f32 %v5178_v8, %v10544_v13  ;;  %v5246_v10 = vpop.f32.mrb[128].mxu1 }
0x10e6   :  { %v5247_v3 = vpop.f32.mrb[129].mxu1 }
0x10e7   :  { %v5696_v1 = vmul.f32 -1.442695, %v5276_v19 }
0x10e9   :  { %7830 = vpow2.f32 %v5696_v1  ;;  %v5250_v21 = vpop.f32.mrb[130].mxu1 }
0x10ea   :  { %v5251_v49 = vadd.f32 %v5250_v21, %v10354_v43  ;;  %v5252_v14 = vpop.f32.mrb[131].mxu1 }
0x10eb   :  { %v5253_v53 = vadd.f32 %v5252_v14, %v10355_v40  ;;  %v5698_v40 = vld [vmem:[%s10082_s7] ss:$0 sm:$0xff] }
0x10ec   :  { %v5283_v29 = vadd.f32 %v5251_v49, %v10545_v4 }
0x10ee   :  { %v5697_v45 = vmul.f32 -1.442695, %v5283_v29 }
0x10f0   :  { %7832 = vpow2.f32 %v5697_v45 }
0x10f3   :  { %v7831_v26 = vpop.eup %7830 }
0x10f4   :  { %v5280_v2 = vadd.f32 1.0, %v7831_v26 }
0x10f6   :  { %7834 = vrcp.f32 %v5280_v2 }
0x10fa   :  { %v7833_v20 = vpop.eup %7832 }
0x10fb   :  { %v5287_v11 = vadd.f32 1.0, %v7833_v20 }
0x10fd   :  { %7836 = vrcp.f32 %v5287_v11 }
0x1100   :  { %v7835_v35 = vpop.eup %7834 }
0x1101   :  { %v5290_v55 = vmul.f32 %v7835_v35, %v5253_v53 }
0x1103   :  { %v5291_v9 = vadd.f32 %v5290_v55, %v10546_v52 }
0x1105   :  { %7838 = vtanh.f32 %v5291_v9 }
0x1107   :  { %v7837_v16 = vpop.eup %7836 }
0x1108   :  { %v5293_v43 = vsub.f32 1.0, %v7837_v16  ;;  %v5295_v18 = vmul.f32 %v7837_v16, %v9874_v51 }
0x110f   :  { %v7839_v42 = vpop.eup %7838 }
0x1110   :  { %v5294_v48 = vmul.f32 %v7839_v42, %v5293_v43 }
0x1112   :  { %v5296_v22 = vadd.f32 %v5295_v18, %v5294_v48 }
0x1114   :  { %5766 = vmatmul.mubr.f32.vlgmr.msra.gmra.mrb[124].mxu0 %v5296_v22 }
0x11a3   :  { %v5472_v17 = vpop.f32.mrb[132].mxu1 }
0x11a4   :  { %v5802_v28 = vpop.f32.mrb[133].mxu1 }
0x11e7   :  { %v5402_v31 = vpop.f32.mrb[124].mxu0 }
0x11e8   :  { %v5473_v47 = vadd.f32 %v5472_v17, %v5402_v31  ;;  %v5767_v38 = vpop.f32.mrb[125].mxu0 }
0x11ea   :  { %v5483_v5 = vadd.f32 %v5698_v40, %v5473_v47 }
0x11ec   :  { %v5486_v23 = vsel %vm5484_vm2, %v5483_v5, -inf  ;;  %5485 = vst.msk [vmem:[#allocation10] sm:$0xff] %vm5484_vm2, %v5483_v5 }
0x11ed   :  { %5487 = vmax.xlane.f32.xlu0 %v5486_v23 }
0x127a   :  { %v5488_v57 = vpop.xlane.xlu0 %5487 }
0x127b   :  { %v5489_v51 = vsub.f32 %v5483_v5, %v5488_v57 }
0x127d   :  { %v5490_v39 = vmul.f32 1.442695, %v5489_v51 }
0x127f   :  { %7840 = vpow2.f32 %v5490_v39 }
0x1289   :  { %v7841_v54 = vpop.eup %7840 }
0x128a   :  { %v5492_v34 = vsel %vm5484_vm2, %v7841_v54, 0.0 }
0x128b   :  { %5493 = vadd.xlane.f32.xlu0 %v5492_v34 }
0x1318   :  { %v5494_v58 = vpop.xlane.xlu0 %5493 }
0x1319   :  { %7842 = vrcp.f32 %v5494_v58 }
0x131a   :  { %7844 = vlog2.f32 %v5494_v58 }
0x1323   :  { %v7843_v15 = vpop.eup %7842 }
0x1324   :  { %v7845_v0 = vpop.eup %7844  ;;  %v5496_v6 = vmul.f32 %v7843_v15, %v7841_v54 }
0x1325   :  { %v5499_v33 = vmul.f32 0.6931472, %v7845_v0 }
0x1326   :  { %5497 = vst.msk [vmem:[#allocation7] sm:$0xff] %vm5484_vm2, %v5496_v6 }
0x1327   :  { %v5500_v7 = vadd.f32 %v5499_v33, %v5488_v57 }
0x1329   :  { %v5502_v32 = vsub.f32 %v5500_v7, %v5483_v5 }
0x132b   :  { %v5503_v61 = vmul.f32 %v5502_v32, %v5501_v12 }
0x132d   :  { %v5504_v27 = vsel %vm5484_vm2, %v5503_v61, 0.0 }
0x132e   :  { %5505 = vadd.xlane.f32.xlu1 %v5504_v27 }
0x133f   :  { %5299 = vrot.lane.b32.xlu1 %v5296_v22, %s7958_s18 }
0x1340   :  { %7879 = shalt.err (!%p7876_p12)
}
0x1341   :  { %s7880_s8 = scalar_lea.hbm %s10084_s9, 128 }
0x1342   :  { %p7881_p13 = scmp.ne.s32.totalorder %s10084_s9, %s7880_s8  ;;  %p7884_p0 = scmp.lt.u32.totalorder %s7880_s8, %s10084_s9 }
0x1344   :  { %p7886_p1 = pnand %p7884_p0, %p7881_p13 }
0x1346   :  { %7889 = shalt.err (!%p7886_p1)
}
0x1347   :  { %5525 = dma.vmem_to_hbm [thread:$0]  %s5523_s19, 128, %s10084_s9, [#allocation5]   ;;  %vm5302_vm3 = vcmask 523520  }
0x1348   :  { %s7960_s26 = smov [#allocation8]   ;;  %s7961_s28 = smov [#allocation10]  }
0x1349   :  { %s5532_s27 = sshll.u32 %s7960_s26, 4  ;;  %s5542_s29 = sshll.u32 %s7961_s28, 4  ;;  %s5533_s27 = int_to_ptr.vmem [resolvable:$true] %s5532_s27  ;;  %s10032_s29 = int_to_ptr.vmem [resolvable:$true] %s5542_s29 }
0x134a   :  { %s7890_s1 = scalar_lea.vmem %s5533_s27, 128  ;;  %p7895_p3 = scmp.lt.s32.totalorder %s5533_s27, %s5533_s27 }
0x134b   :  { %p7891_p2 = scmp.ne.s32.totalorder %s5533_s27, %s7890_s1  ;;  %p7896_p4 = scmp.lt.s32.totalorder %s7890_s1, %s7890_s1 }
0x134d   :  { %p7897_p5 = por %p7896_p4, %p7895_p3 }
0x134f   :  { %p7898_p6 = pnand %p7897_p5, %p7891_p2 }
0x13bb   :  { %v5506_v24 = vpop.xlane.xlu1 %5505 }
0x13bc   :  { %v5507_v25 = vrot.slane %v5506_v24, 4 }
0x13be   :  { %v5508_v46 = vadd.f32 %v5507_v25, %v5506_v24 }
0x13bf   :  { %v5300_v62 = vpop.permute.xlu1 %5299 }
0x13c0   :  { %v5509_v50 = vrot.slane %v5508_v46, 2  ;;  %5303 = vst.msk [vmem:[#allocation8] sm:$0xff] %vm5302_vm3, %v5300_v62 }
0x13c1   :  { %7901 = shalt.err (!%p7898_p6)
}
0x13c2   :  { %s7902_s13 = scalar_lea.hbm %s10085_s10, 128 }
0x13c3   :  { %p7903_p7 = scmp.ne.s32.totalorder %s10085_s10, %s7902_s13  ;;  %p7906_p8 = scmp.lt.u32.totalorder %s7902_s13, %s10085_s10 }
0x13c5   :  { %p7908_p9 = pnand %p7906_p8, %p7903_p7 }
0x13c7   :  { %7911 = shalt.err (!%p7908_p9)
}
0x13c8   :  { %5535 = dma.vmem_to_hbm [thread:$0]  %s5533_s27, 128, %s10085_s10, [#allocation9]   ;;  %v5510_v56 = vadd.f32 %v5509_v50, %v5508_v46 }
0x13c9   :  { %s7912_s17 = scalar_lea.vmem %s10032_s29, 128  ;;  %p7917_p11 = scmp.lt.s32.totalorder %s10032_s29, %s10032_s29 }
0x13ca   :  { %p7913_p10 = scmp.ne.s32.totalorder %s10032_s29, %s7912_s17  ;;  %p7918_p12 = scmp.lt.s32.totalorder %s7912_s17, %s7912_s17 }
0x13cc   :  { %p7919_p13 = por %p7918_p12, %p7917_p11 }
0x13ce   :  { %p7920_p0 = pnand %p7919_p13, %p7913_p10 }
0x13d0   :  { %7923 = shalt.err (!%p7920_p0)
}
0x13d1   :  { %s7924_s19 = scalar_lea.hbm %s10086_s11, 128 }
0x13d2   :  { %p7925_p1 = scmp.ne.s32.totalorder %s10086_s11, %s7924_s19  ;;  %p7928_p2 = scmp.lt.u32.totalorder %s7924_s19, %s10086_s11 }
0x13d4   :  { %p7930_p3 = pnand %p7928_p2, %p7925_p1 }
0x13d6   :  { %7933 = shalt.err (!%p7930_p3)
}
0x13d7   :  { %5545 = dma.vmem_to_hbm [thread:$0]  %s10032_s29, 128, %s10086_s11, [#allocation9]   ;;  %v5511_v60 = vrot.slane %v5510_v56, 1 }
0x13d8   :  { %s7934_s24 = scalar_lea.hbm %s10087_s12, 16 }
0x13d9   :  { %v5512_v30 = vadd.f32 %v5511_v60, %v5510_v56  ;;  %p7935_p4 = scmp.ne.s32.totalorder %s10087_s12, %s7934_s24  ;;  %p7938_p5 = scmp.lt.u32.totalorder %s7934_s24, %s10087_s12 }
0x13db   :  { %7507 = vpush %v5512_v30  ;;  %p7940_p6 = pnand %p7938_p5, %p7935_p4 }
0x140c   :  { %s7508_s23 = spop %7507 }
0x140d   :  { %5515 = sst [smem:[#allocation11]] %s7508_s23 }
0x140e   :  { %7943 = shalt.err (!%p7940_p6)
}
0x140f   :  { %s7962_s11 = smov [#allocation11]  }
0x1410   :  { %5553 = dma.smem_to_hbm %s7962_s11, 16, %s10087_s12, [#allocation6]  }
0x1411   :  { %7946 = dma.done.wait [#allocation5], 128  }
0x1412   :  { %7947 = vsyncadd [#allocation5], 4294967168 }
0x1413   :  { %7948 = dma.done.wait [#allocation9], 256  }
0x1414   :  { %7949 = vsyncadd [#allocation9], 4294967040 }
0x1415   :  { %7950 = dma.done.wait [#allocation6], 16  }
0x1416   :  { %7951 = vsyncadd [#allocation6], 4294967280 }
0x1417   :  { %5566 = sfence }
0x1418   :  { %5567 = vsyncpa [#allocation4], 1 }
0x1419   :  { %5568 = vsyncpa [#allocation5], 1 }
0x141a   :  { %5569 = vsyncpa [#allocation9], 1 }
0x141b   :  { %5570 = vsyncpa [#allocation6], 1 }

</bundles_post_ra>
